<compile_context>
chip_gen: v6e
topology: v6e:2x2x1
jax: 0.10.0
libtpu: 0.0.40
codegen_flags: <defaults>
</compile_context>

<pallas_src>
import functools

import jax
import jax.numpy as jnp
from jax import lax
from jax.experimental import pallas as pl
from jax.experimental.pallas import tpu as pltpu


# ---------------------------------------------------------------------------
# helpers
# ---------------------------------------------------------------------------
def _round_up(x, m):
    return ((x + m - 1) // m) * m


def _const_spec(a):
    """Full-array BlockSpec whose block index never changes across the grid."""
    return pl.BlockSpec(a.shape, functools.partial(lambda i, nd: (0,) * nd, nd=a.ndim))


def _pad_gate_cols(w_t, H, H_pad):
    """(in_dim, 4H) -> (in_dim, 4*H_pad): each PyTorch gate block [i|f|g|o] is placed at a
    lane-aligned H_pad-wide slot; padded columns are zero."""
    in_dim = w_t.shape[0]
    out = jnp.zeros((in_dim, 4 * H_pad), w_t.dtype)
    for k in range(4):
        out = out.at[:, k * H_pad:k * H_pad + H].set(w_t[:, k * H:(k + 1) * H])
    return out


def _pad_gate_bias(b, H, H_pad):
    out = jnp.zeros((1, 4 * H_pad), b.dtype)
    for k in range(4):
        out = out.at[0, k * H_pad:k * H_pad + H].set(b[k * H:(k + 1) * H])
    return out


def _pad_rows(w, rows_pad):
    r = w.shape[0]
    if r == rows_pad:
        return w
    return jnp.pad(w, ((0, rows_pad - r), (0, 0)))


def _nbytes(a):
    return int(a.size) * a.dtype.itemsize


# ---------------------------------------------------------------------------
# recurrent kernel: multi-layer LSTM over a chunk of timesteps per grid step
# ---------------------------------------------------------------------------
def _make_lstm_kernel(L, H_pad, chunk, t_valid, t_pad, compute_dtype):
    G = 4 * H_pad
    need_mask = (t_pad != t_valid)

    def kernel(*refs):
        # inputs
        xproj_ref = refs[0]                     # (chunk, B, G)  precomputed layer-0 gates (+bias)
        whh_refs = refs[1:1 + L]                # (H_pad, G) per layer
        wih_refs = refs[1 + L:2 * L]            # (H_pad, G) for layers 1..L-1
        b_refs = refs[2 * L:3 * L - 1]          # (1, G) combined b_ih+b_hh for layers 1..L-1
        h0_ref = refs[3 * L - 1]                # (L, B, H_pad)
        c0_ref = refs[3 * L]                    # (L, B, H_pad)
        # outputs
        hseq_ref = refs[3 * L + 1]              # (chunk, B, H_pad)
        hout_ref = refs[3 * L + 2]              # (L, B, H_pad)
        cout_ref = refs[3 * L + 3]              # (L, B, H_pad)
        # scratch
        h_sc = refs[3 * L + 4]                  # (L, B, H_pad) f32
        c_sc = refs[3 * L + 5]                  # (L, B, H_pad) f32

        gi = pl.program_id(0)

        @pl.when(gi == 0)
        def _init():
            h_sc[...] = h0_ref[...]
            c_sc[...] = c0_ref[...]

        def step(s, carry):
            if need_mask:
                valid = (gi * chunk + s) < t_valid
            x_gates0 = xproj_ref[s].astype(jnp.float32)          # (B, G)
            x = None
            for l in range(L):
                h_prev = h_sc[l]                                 # (B, H_pad)
                c_prev = c_sc[l]
                hh = jnp.dot(h_prev.astype(compute_dtype), whh_refs[l][...],
                             preferred_element_type=jnp.float32)
                if l == 0:
                    gates = x_gates0 + hh
                else:
                    gates = (jnp.dot(x.astype(compute_dtype), wih_refs[l - 1][...],
                                     preferred_element_type=jnp.float32)
                             + hh + b_refs[l - 1][...])
                # lane-aligned gate slices (H_pad is a multiple of 128), PyTorch order i,f,g,o
                i_g = jax.nn.sigmoid(gates[:, 0 * H_pad:1 * H_pad])
                f_g = jax.nn.sigmoid(gates[:, 1 * H_pad:2 * H_pad])
                g_g = jnp.tanh(gates[:, 2 * H_pad:3 * H_pad])
                o_g = jax.nn.sigmoid(gates[:, 3 * H_pad:4 * H_pad])
                c_new = f_g * c_prev + i_g * g_g
                h_new = o_g * jnp.tanh(c_new)
                if need_mask:
                    c_new = jnp.where(valid, c_new, c_prev)
                    h_new = jnp.where(valid, h_new, h_prev)
                h_sc[l] = h_new
                c_sc[l] = c_new
                x = h_new
            hseq_ref[s] = x.astype(hseq_ref.dtype)
            return carry

        lax.fori_loop(0, chunk, step, 0, unroll=True)

        @pl.when(gi == pl.num_programs(0) - 1)
        def _fin():
            hout_ref[...] = h_sc[...]
            cout_ref[...] = c_sc[...]

    return kernel


# ---------------------------------------------------------------------------
# head kernel: fc1 -> fc2 -> log_softmax, batched over all (T*B) rows
# ---------------------------------------------------------------------------
def _make_head_kernel(compute_dtype):
    def kernel(h_ref, w1_ref, b1_ref, w2_ref, b2_ref, out_ref):
        h = h_ref[...]
        y1 = jnp.dot(h.astype(compute_dtype), w1_ref[...],
                     preferred_element_type=jnp.float32) + b1_ref[...]
        y2 = jnp.dot(y1.astype(compute_dtype), w2_ref[...],
                     preferred_element_type=jnp.float32) + b2_ref[...]
        m = jnp.max(y2, axis=-1, keepdims=True)
        z = y2 - m
        lse = jnp.log(jnp.sum(jnp.exp(z), axis=-1, keepdims=True))
        out_ref[...] = (z - lse).astype(out_ref.dtype)
    return kernel


# ---------------------------------------------------------------------------
# wrapper
# ---------------------------------------------------------------------------
def lstm_model_forward(x_ids, hidden_state, params, *, num_layers, hidden_dim,
                       weight_dtype=jnp.float32, time_chunk=8):
    """Pallas implementation of LSTM_model.forward (inference).

    x_ids:        (B, T) int32 token ids
    hidden_state: tuple (h, c), each (B, L, H) float32 (batch-first, as passed to the module)
    returns:      (log_probs (B, T, V), (h_out, c_out) each (B, L, H))
    """
    B, T = x_ids.shape
    L, H = num_layers, hidden_dim
    emb_w = params["emb"]                                  # (V, E)
    V, E = emb_w.shape
    F = params["fc1_w"].shape[0]                           # fc_hid = H // 5

    H_pad = _round_up(H, 128)
    F_pad = _round_up(F, 128)
    V_pad = _round_up(V, 128)
    G = 4 * H_pad

    chunk = max(1, min(time_chunk, T))
    T_pad = _round_up(T, chunk)
    n_chunks = T_pad // chunk
    wd = weight_dtype

    # ---- glue: embedding gather + layer-0 input projection (dense, outside time loop) ----
    emb_x = jnp.take(emb_w.astype(jnp.float32), x_ids, axis=0)          # (B, T, E)
    emb_tbe = jnp.transpose(emb_x, (1, 0, 2))                           # (T, B, E)

    w_ih0_t = _pad_gate_cols(params["w_ih_0"].T.astype(jnp.float32), H, H_pad)     # (E, G)
    b0 = _pad_gate_bias((params["b_ih_0"] + params["b_hh_0"]).astype(jnp.float32), H, H_pad)
    xproj = jnp.einsum("tbe,eg->tbg", emb_tbe, w_ih0_t) + b0            # (T, B, G) f32
    if T_pad != T:
        xproj = jnp.pad(xproj, ((0, T_pad - T), (0, 0), (0, 0)))

    # ---- recurrent weights: pre-transposed, gate-padded, pre-summed biases ----
    whh_list, wih_list, bias_list = [], [], []
    for l in range(L):
        whh_t = _pad_rows(_pad_gate_cols(params[f"w_hh_{l}"].T.astype(jnp.float32), H, H_pad),
                          H_pad).astype(wd)                             # (H_pad, G)
        whh_list.append(whh_t)
        if l > 0:
            wih_t = _pad_rows(_pad_gate_cols(params[f"w_ih_{l}"].T.astype(jnp.float32), H, H_pad),
                              H_pad).astype(wd)                         # (H_pad, G)
            wih_list.append(wih_t)
            bias_list.append(_pad_gate_bias(
                (params[f"b_ih_{l}"] + params[f"b_hh_{l}"]).astype(jnp.float32), H, H_pad))

    def _prep_state(s):
        s = jnp.transpose(s, (1, 0, 2)).astype(jnp.float32)             # (L, B, H)
        return jnp.pad(s, ((0, 0), (0, 0), (0, H_pad - H)))
    h0 = _prep_state(hidden_state[0])
    c0 = _prep_state(hidden_state[1])

    in_arrays = [xproj] + whh_list + wih_list + bias_list + [h0, c0]
    in_specs = ([pl.BlockSpec((chunk, B, G), lambda i: (i, 0, 0))]
                + [_const_spec(a) for a in in_arrays[1:]])
    # TODO(synk): on v7x, single-buffer the constant-index weight BlockSpecs
    # (pipeline_mode=pl.Buffered(1)) to halve their resident VMEM footprint.
    out_specs = (
        pl.BlockSpec((chunk, B, H_pad), lambda i: (i, 0, 0)),   # per-chunk h_t slab
        pl.BlockSpec((L, B, H_pad), lambda i: (0, 0, 0)),       # final h (resident accumulator)
        pl.BlockSpec((L, B, H_pad), lambda i: (0, 0, 0)),       # final c
    )
    out_shape = (
        jax.ShapeDtypeStruct((T_pad, B, H_pad), jnp.float32),
        jax.ShapeDtypeStruct((L, B, H_pad), jnp.float32),
        jax.ShapeDtypeStruct((L, B, H_pad), jnp.float32),
    )

    flops_rec = 2 * T_pad * B * G * H_pad * (2 * L - 1)
    transc_rec = 5 * T_pad * B * H_pad * L
    bytes_rec = (sum(_nbytes(a) for a in in_arrays)
                 + (T_pad * B * H_pad + 2 * L * B * H_pad) * 4)

    blk_bytes = chunk * B * (G + H_pad) * 4
    const_bytes = sum(_nbytes(a) for a in in_arrays[1:]) + 2 * L * B * H_pad * 4
    scratch_bytes = 2 * L * B * H_pad * 4
    vmem_rec = int(min(max(2 * (blk_bytes + const_bytes) + scratch_bytes + (4 << 20),
                           32 << 20), 100 << 20))

    hseq, h_out, c_out = pl.pallas_call(
        _make_lstm_kernel(L, H_pad, chunk, T, T_pad, wd),
        out_shape=out_shape,
        grid_spec=pltpu.PrefetchScalarGridSpec(
            num_scalar_prefetch=0,
            grid=(n_chunks,),
            in_specs=in_specs,
            out_specs=out_specs,
            scratch_shapes=[pltpu.VMEM((L, B, H_pad), jnp.float32),
                            pltpu.VMEM((L, B, H_pad), jnp.float32)],
        ),
        compiler_params=pltpu.CompilerParams(dimension_semantics=("arbitrary",),
                                             vmem_limit_bytes=vmem_rec),
        cost_estimate=pl.CostEstimate(flops=flops_rec, transcendentals=transc_rec,
                                      bytes_accessed=bytes_rec),
    )(*in_arrays)

    # ---- fc head: one batched, lane-dense pass over all (T*B) rows ----
    ROWS = T * B
    h_flat = hseq[:T].reshape(ROWS, H_pad)
    RT = 256 if ROWS >= 256 else _round_up(ROWS, 8)
    ROWS_pad = _round_up(ROWS, RT)
    if ROWS_pad != ROWS:
        h_flat = jnp.pad(h_flat, ((0, ROWS_pad - ROWS), (0, 0)))

    fc1w = jnp.zeros((H_pad, F_pad), jnp.float32).at[:H, :F].set(
        params["fc1_w"].T.astype(jnp.float32)).astype(wd)
    fc1b = jnp.zeros((1, F_pad), jnp.float32).at[0, :F].set(params["fc1_b"].astype(jnp.float32))
    fc2w = jnp.zeros((F_pad, V_pad), jnp.float32).at[:F, :V].set(
        params["fc2_w"].T.astype(jnp.float32)).astype(wd)
    # padded vocab columns get a huge negative bias so they vanish in log_softmax
    fc2b = jnp.full((1, V_pad), -1e30, jnp.float32).at[0, :V].set(
        params["fc2_b"].astype(jnp.float32))
    # TODO(synk): for very large vocabularies, tile the V axis of this head (two-pass /
    # online softmax over V tiles) instead of holding the full (F_pad, V_pad) weight and
    # (RT, V_pad) logits block in VMEM.

    head_in = [h_flat, fc1w, fc1b, fc2w, fc2b]
    head_specs = ([pl.BlockSpec((RT, H_pad), lambda i: (i, 0))]
                  + [_const_spec(a) for a in head_in[1:]])
    flops_head = 2 * ROWS_pad * (H_pad * F_pad + F_pad * V_pad)
    transc_head = ROWS_pad * V_pad + ROWS_pad
    bytes_head = sum(_nbytes(a) for a in head_in) + ROWS_pad * V_pad * 4

    logp_flat = pl.pallas_call(
        _make_head_kernel(wd),
        out_shape=jax.ShapeDtypeStruct((ROWS_pad, V_pad), jnp.float32),
        grid_spec=pltpu.PrefetchScalarGridSpec(
            num_scalar_prefetch=0,
            grid=(ROWS_pad // RT,),
            in_specs=head_specs,
            out_specs=pl.BlockSpec((RT, V_pad), lambda i: (i, 0)),
        ),
        compiler_params=pltpu.CompilerParams(dimension_semantics=("parallel",)),
        cost_estimate=pl.CostEstimate(flops=flops_head, transcendentals=transc_head,
                                      bytes_accessed=bytes_head),
    )(*head_in)

    log_probs = logp_flat[:ROWS, :V].reshape(T, B, V).transpose(1, 0, 2)   # (B, T, V)
    h_out = jnp.transpose(h_out[:, :, :H], (1, 0, 2))                      # (B, L, H)
    c_out = jnp.transpose(c_out[:, :, :H], (1, 0, 2))
    return log_probs, (h_out, c_out)


# ---------------------------------------------------------------------------
# pure-JAX reference (mirrors the torch module, eval mode)
# ---------------------------------------------------------------------------
def reference_forward(x_ids, hidden_state, params, *, num_layers, hidden_dim):
    L, H = num_layers, hidden_dim
    emb = params["emb"][x_ids]                            # (B, T, E)
    B, T, _ = emb.shape
    h = jnp.transpose(hidden_state[0], (1, 0, 2))         # (L, B, H)
    c = jnp.transpose(hidden_state[1], (1, 0, 2))
    h = [h[l] for l in range(L)]
    c = [c[l] for l in range(L)]
    ys = []
    for t in range(T):
        x = emb[:, t]
        for l in range(L):
            gates = (x @ params[f"w_ih_{l}"].T + params[f"b_ih_{l}"]
                     + h[l] @ params[f"w_hh_{l}"].T + params[f"b_hh_{l}"])
            i = jax.nn.sigmoid(gates[:, 0 * H:1 * H])
            f = jax.nn.sigmoid(gates[:, 1 * H:2 * H])
            g = jnp.tanh(gates[:, 2 * H:3 * H])
            o = jax.nn.sigmoid(gates[:, 3 * H:4 * H])
            c[l] = f * c[l] + i * g
            h[l] = o * jnp.tanh(c[l])
            x = h[l]
        ys.append(x)
    y = jnp.stack(ys, axis=1)                             # (B, T, H)
    y = y @ params["fc1_w"].T + params["fc1_b"]
    y = y @ params["fc2_w"].T + params["fc2_b"]
    logp = jax.nn.log_softmax(y, axis=2)
    h_out = jnp.transpose(jnp.stack(h, 0), (1, 0, 2))
    c_out = jnp.transpose(jnp.stack(c, 0), (1, 0, 2))
    return logp, (h_out, c_out)


def init_params(key, vocab_size, emb_dim, hidden_dim, num_layers):
    H = hidden_dim
    fc_hid = H // 5
    params = {}
    k = key

    def nxt():
        nonlocal k
        k, sub = jax.random.split(k)
        return sub

    u = lambda shape, s: jax.random.uniform(nxt(), shape, jnp.float32, -s, s)
    params["emb"] = jax.random.normal(nxt(), (vocab_size, emb_dim), jnp.float32)
    s = 1.0 / jnp.sqrt(H)
    for l in range(num_layers):
        in_dim = emb_dim if l == 0 else H
        params[f"w_ih_{l}"] = u((4 * H, in_dim), s)
        params[f"w_hh_{l}"] = u((4 * H, H), s)
        params[f"b_ih_{l}"] = u((4 * H,), s)
        params[f"b_hh_{l}"] = u((4 * H,), s)
    params["fc1_w"] = u((fc_hid, H), 1.0 / jnp.sqrt(H))
    params["fc1_b"] = u((fc_hid,), 1.0 / jnp.sqrt(H))
    params["fc2_w"] = u((vocab_size, fc_hid), 1.0 / jnp.sqrt(fc_hid))
    params["fc2_b"] = u((vocab_size,), 1.0 / jnp.sqrt(fc_hid))
    return params


if __name__ == "__main__":
    # small config consistent with the module (unidirectional)
    VOCAB = 16
    EMB = 32
    HIDDEN = 32
    LAYERS = 2
    B, T = 2, 8

    key = jax.random.PRNGKey(0)
    kp, kx, kh, kc = jax.random.split(key, 4)

    params = init_params(kp, VOCAB, EMB, HIDDEN, LAYERS)
    x_ids = jax.random.randint(kx, (B, T), 0, VOCAB, dtype=jnp.int32)
    h0 = jax.random.normal(kh, (B, LAYERS, HIDDEN), jnp.float32)
    c0 = jax.random.normal(kc, (B, LAYERS, HIDDEN), jnp.float32)

    ref_logp, (ref_h, ref_c) = reference_forward(
        x_ids, (h0, c0), params, num_layers=LAYERS, hidden_dim=HIDDEN)

    # --- f32 weights: exact-path check ---
    logp, (h_out, c_out) = lstm_model_forward(
        x_ids, (h0, c0), params, num_layers=LAYERS, hidden_dim=HIDDEN,
        weight_dtype=jnp.float32, time_chunk=8)
    jax.block_until_ready((logp, h_out, c_out))

    assert logp.shape == (B, T, VOCAB)
    assert h_out.shape == (B, LAYERS, HIDDEN) and c_out.shape == (B, LAYERS, HIDDEN)
    assert jnp.allclose(logp, ref_logp, atol=2e-4, rtol=2e-4)
    assert jnp.allclose(h_out, ref_h, atol=2e-4, rtol=2e-4)
    assert jnp.allclose(c_out, ref_c, atol=2e-4, rtol=2e-4)

    # --- bf16 weights (perf mode: halves weight VMEM, 2x MXU throughput) ---
    logp_bf, (h_bf, c_bf) = lstm_model_forward(
        x_ids, (h0, c0), params, num_layers=LAYERS, hidden_dim=HIDDEN,
        weight_dtype=jnp.bfloat16, time_chunk=8)
    jax.block_until_ready((logp_bf, h_bf, c_bf))
    assert logp_bf.shape == (B, T, VOCAB)
    assert jnp.allclose(logp_bf, ref_logp, atol=1e-1, rtol=1e-1)
    assert jnp.allclose(h_bf, ref_h, atol=1e-1, rtol=1e-1)
    assert jnp.allclose(c_bf, ref_c, atol=1e-1, rtol=1e-1)

    print("KERNEL_OK")
</pallas_src>

<mosaic_0001>
module attributes {stable_mosaic.version = 11 : i64} {
  func.func @kernel(%arg0: i32, %arg1: memref<8x2x512xf32, #tpu.memory_space<vmem>>, %arg2: memref<128x512xf32, #tpu.memory_space<vmem>>, %arg3: memref<128x512xf32, #tpu.memory_space<vmem>>, %arg4: memref<128x512xf32, #tpu.memory_space<vmem>>, %arg5: memref<1x512xf32, #tpu.memory_space<vmem>>, %arg6: memref<2x2x128xf32, #tpu.memory_space<vmem>>, %arg7: memref<2x2x128xf32, #tpu.memory_space<vmem>>, %arg8: memref<8x2x128xf32, #tpu.memory_space<vmem>>, %arg9: memref<2x2x128xf32, #tpu.memory_space<vmem>>, %arg10: memref<2x2x128xf32, #tpu.memory_space<vmem>>, %arg11: memref<2x2x128xf32, #tpu.memory_space<vmem>>, %arg12: memref<2x2x128xf32, #tpu.memory_space<vmem>>) attributes {dimension_semantics = [#tpu.dimension_semantics<arbitrary>], iteration_bounds = array<i64: 1>, scalar_prefetch = 0 : i64, scratch_operands = 2 : i64, tpu.core_type = #tpu.core_type<tc>, window_params = [{transform_indices = @transform_0, window_bounds = array<i64: 8, 2, 512>}, {pipeline_mode = #tpu.pipeline_mode<synchronous>, transform_indices = @transform_1, window_bounds = array<i64: 128, 512>}, {pipeline_mode = #tpu.pipeline_mode<synchronous>, transform_indices = @transform_2, window_bounds = array<i64: 128, 512>}, {pipeline_mode = #tpu.pipeline_mode<synchronous>, transform_indices = @transform_3, window_bounds = array<i64: 128, 512>}, {pipeline_mode = #tpu.pipeline_mode<synchronous>, transform_indices = @transform_4, window_bounds = array<i64: 1, 512>}, {pipeline_mode = #tpu.pipeline_mode<synchronous>, transform_indices = @transform_5, window_bounds = array<i64: 2, 2, 128>}, {pipeline_mode = #tpu.pipeline_mode<synchronous>, transform_indices = @transform_6, window_bounds = array<i64: 2, 2, 128>}, {transform_indices = @transform_7, window_bounds = array<i64: 8, 2, 128>}, {pipeline_mode = #tpu.pipeline_mode<synchronous>, transform_indices = @transform_8, window_bounds = array<i64: 2, 2, 128>}, {pipeline_mode = #tpu.pipeline_mode<synchronous>, transform_indices = @transform_9, window_bounds = array<i64: 2, 2, 128>}]} {
    %c0_i32 = arith.constant 0 : i32
    %0 = arith.cmpi eq, %arg0, %c0_i32 : i32
    %1 = arith.extui %0 : i1 to i32
    %c0_i32_0 = arith.constant 0 : i32
    %2 = arith.cmpi ne, %1, %c0_i32_0 : i32
    scf.if %2 {
      %c0_361 = arith.constant 0 : index
      %c0_362 = arith.constant 0 : index
      %c0_363 = arith.constant 0 : index
      %710 = vector.load %arg6[%c0_361, %c0_362, %c0_363] : memref<2x2x128xf32, #tpu.memory_space<vmem>>, vector<2x2x128xf32>
      %c0_364 = arith.constant 0 : index
      %c0_365 = arith.constant 0 : index
      %c0_366 = arith.constant 0 : index
      %711 = vector.load %arg11[%c0_364, %c0_365, %c0_366] : memref<2x2x128xf32, #tpu.memory_space<vmem>>, vector<2x2x128xf32>
      tpu.vector_store %arg11[%c0_364, %c0_365, %c0_366], %710 {strides = array<i32>} : memref<2x2x128xf32, #tpu.memory_space<vmem>>, vector<2x2x128xf32>,
      %c0_367 = arith.constant 0 : index
      %c0_368 = arith.constant 0 : index
      %c0_369 = arith.constant 0 : index
      %712 = vector.load %arg7[%c0_367, %c0_368, %c0_369] : memref<2x2x128xf32, #tpu.memory_space<vmem>>, vector<2x2x128xf32>
      %c0_370 = arith.constant 0 : index
      %c0_371 = arith.constant 0 : index
      %c0_372 = arith.constant 0 : index
      %713 = vector.load %arg12[%c0_370, %c0_371, %c0_372] : memref<2x2x128xf32, #tpu.memory_space<vmem>>, vector<2x2x128xf32>
      tpu.vector_store %arg12[%c0_370, %c0_371, %c0_372], %712 {strides = array<i32>} : memref<2x2x128xf32, #tpu.memory_space<vmem>>, vector<2x2x128xf32>,
    } else {
    }
    %c0_i32_1 = arith.constant 0 : i32
    %3 = arith.index_cast %c0_i32_1 : i32 to index
    %c0 = arith.constant 0 : index
    %c0_2 = arith.constant 0 : index
    %4 = vector.load %arg1[%3, %c0, %c0_2] : memref<8x2x512xf32, #tpu.memory_space<vmem>>, vector<1x2x512xf32>
    %5 = vector.shape_cast %4 : vector<1x2x512xf32> to vector<2x512xf32>
    %c0_3 = arith.constant 0 : index
    %c0_4 = arith.constant 0 : index
    %c0_5 = arith.constant 0 : index
    %6 = vector.load %arg11[%c0_3, %c0_4, %c0_5] : memref<2x2x128xf32, #tpu.memory_space<vmem>>, vector<1x2x128xf32>
    %7 = vector.shape_cast %6 : vector<1x2x128xf32> to vector<2x128xf32>
    %c0_6 = arith.constant 0 : index
    %c0_7 = arith.constant 0 : index
    %c0_8 = arith.constant 0 : index
    %8 = vector.load %arg12[%c0_6, %c0_7, %c0_8] : memref<2x2x128xf32, #tpu.memory_space<vmem>>, vector<1x2x128xf32>
    %9 = vector.shape_cast %8 : vector<1x2x128xf32> to vector<2x128xf32>
    %c0_9 = arith.constant 0 : index
    %c0_10 = arith.constant 0 : index
    %10 = vector.load %arg2[%c0_9, %c0_10] : memref<128x512xf32, #tpu.memory_space<vmem>>, vector<128x512xf32>
    %cst = arith.constant dense<0.000000e+00> : vector<2x512xf32>
    %11 = tpu.matmul %7, %10, %cst {dimension_numbers = #tpu.dot_dimension_numbers<[1], [0], [0], [1], [0, 0, 1, 1], [], []>} : vector<2x128xf32>, vector<128x512xf32>, vector<2x512xf32> -> vector<2x512xf32>
    %12 = arith.addf %5, %11 : vector<2x512xf32>
    %13 = vector.extract_strided_slice %12 {offsets = [0, 0], sizes = [2, 128], strides = [1, 1]} : vector<2x512xf32> to vector<2x128xf32>
    %14 = arith.negf %13 : vector<2x128xf32>
    %15 = math.exp %14 : vector<2x128xf32>
    %cst_11 = arith.constant 1.000000e+00 : f32
    %16 = vector.broadcast %cst_11 : f32 to vector<2x128xf32>
    %17 = arith.addf %16, %15 : vector<2x128xf32>
    %18 = arith.divf %16, %17 : vector<2x128xf32>
    %19 = vector.extract_strided_slice %12 {offsets = [0, 128], sizes = [2, 128], strides = [1, 1]} : vector<2x512xf32> to vector<2x128xf32>
    %20 = arith.negf %19 : vector<2x128xf32>
    %21 = math.exp %20 : vector<2x128xf32>
    %cst_12 = arith.constant 1.000000e+00 : f32
    %22 = vector.broadcast %cst_12 : f32 to vector<2x128xf32>
    %23 = arith.addf %22, %21 : vector<2x128xf32>
    %24 = arith.divf %22, %23 : vector<2x128xf32>
    %25 = vector.extract_strided_slice %12 {offsets = [0, 256], sizes = [2, 128], strides = [1, 1]} : vector<2x512xf32> to vector<2x128xf32>
    %26 = math.tanh %25 : vector<2x128xf32>
    %27 = vector.extract_strided_slice %12 {offsets = [0, 384], sizes = [2, 128], strides = [1, 1]} : vector<2x512xf32> to vector<2x128xf32>
    %28 = arith.negf %27 : vector<2x128xf32>
    %29 = math.exp %28 : vector<2x128xf32>
    %cst_13 = arith.constant 1.000000e+00 : f32
    %30 = vector.broadcast %cst_13 : f32 to vector<2x128xf32>
    %31 = arith.addf %30, %29 : vector<2x128xf32>
    %32 = arith.divf %30, %31 : vector<2x128xf32>
    %33 = arith.mulf %24, %9 : vector<2x128xf32>
    %34 = arith.mulf %18, %26 : vector<2x128xf32>
    %35 = arith.addf %33, %34 : vector<2x128xf32>
    %36 = math.tanh %35 : vector<2x128xf32>
    %37 = arith.mulf %32, %36 : vector<2x128xf32>
    %c0_14 = arith.constant 0 : index
    %c0_15 = arith.constant 0 : index
    %c0_16 = arith.constant 0 : index
    %38 = vector.load %arg11[%c0_14, %c0_15, %c0_16] : memref<2x2x128xf32, #tpu.memory_space<vmem>>, vector<1x2x128xf32>
    %39 = vector.shape_cast %38 : vector<1x2x128xf32> to vector<2x128xf32>
    %40 = vector.shape_cast %37 : vector<2x128xf32> to vector<1x2x128xf32>
    tpu.vector_store %arg11[%c0_14, %c0_15, %c0_16], %40 {strides = array<i32>} : memref<2x2x128xf32, #tpu.memory_space<vmem>>, vector<1x2x128xf32>,
    %c0_17 = arith.constant 0 : index
    %c0_18 = arith.constant 0 : index
    %c0_19 = arith.constant 0 : index
    %41 = vector.load %arg12[%c0_17, %c0_18, %c0_19] : memref<2x2x128xf32, #tpu.memory_space<vmem>>, vector<1x2x128xf32>
    %42 = vector.shape_cast %41 : vector<1x2x128xf32> to vector<2x128xf32>
    %43 = vector.shape_cast %35 : vector<2x128xf32> to vector<1x2x128xf32>
    tpu.vector_store %arg12[%c0_17, %c0_18, %c0_19], %43 {strides = array<i32>} : memref<2x2x128xf32, #tpu.memory_space<vmem>>, vector<1x2x128xf32>,
    %c1 = arith.constant 1 : index
    %c0_20 = arith.constant 0 : index
    %c0_21 = arith.constant 0 : index
    %44 = vector.load %arg11[%c1, %c0_20, %c0_21] : memref<2x2x128xf32, #tpu.memory_space<vmem>>, vector<1x2x128xf32>
    %45 = vector.shape_cast %44 : vector<1x2x128xf32> to vector<2x128xf32>
    %c1_22 = arith.constant 1 : index
    %c0_23 = arith.constant 0 : index
    %c0_24 = arith.constant 0 : index
    %46 = vector.load %arg12[%c1_22, %c0_23, %c0_24] : memref<2x2x128xf32, #tpu.memory_space<vmem>>, vector<1x2x128xf32>
    %47 = vector.shape_cast %46 : vector<1x2x128xf32> to vector<2x128xf32>
    %c0_25 = arith.constant 0 : index
    %c0_26 = arith.constant 0 : index
    %48 = vector.load %arg3[%c0_25, %c0_26] : memref<128x512xf32, #tpu.memory_space<vmem>>, vector<128x512xf32>
    %cst_27 = arith.constant dense<0.000000e+00> : vector<2x512xf32>
    %49 = tpu.matmul %45, %48, %cst_27 {dimension_numbers = #tpu.dot_dimension_numbers<[1], [0], [0], [1], [0, 0, 1, 1], [], []>} : vector<2x128xf32>, vector<128x512xf32>, vector<2x512xf32> -> vector<2x512xf32>
    %c0_28 = arith.constant 0 : index
    %c0_29 = arith.constant 0 : index
    %50 = vector.load %arg4[%c0_28, %c0_29] : memref<128x512xf32, #tpu.memory_space<vmem>>, vector<128x512xf32>
    %cst_30 = arith.constant dense<0.000000e+00> : vector<2x512xf32>
    %51 = tpu.matmul %37, %50, %cst_30 {dimension_numbers = #tpu.dot_dimension_numbers<[1], [0], [0], [1], [0, 0, 1, 1], [], []>} : vector<2x128xf32>, vector<128x512xf32>, vector<2x512xf32> -> vector<2x512xf32>
    %52 = arith.addf %51, %49 : vector<2x512xf32>
    %c0_31 = arith.constant 0 : index
    %c0_32 = arith.constant 0 : index
    %53 = vector.load %arg5[%c0_31, %c0_32] : memref<1x512xf32, #tpu.memory_space<vmem>>, vector<1x512xf32>
    %54 = vector.broadcast %53 : vector<1x512xf32> to vector<2x512xf32>
    %55 = arith.addf %52, %54 : vector<2x512xf32>
    %56 = vector.extract_strided_slice %55 {offsets = [0, 0], sizes = [2, 128], strides = [1, 1]} : vector<2x512xf32> to vector<2x128xf32>
    %57 = arith.negf %56 : vector<2x128xf32>
    %58 = math.exp %57 : vector<2x128xf32>
    %cst_33 = arith.constant 1.000000e+00 : f32
    %59 = vector.broadcast %cst_33 : f32 to vector<2x128xf32>
    %60 = arith.addf %59, %58 : vector<2x128xf32>
    %61 = arith.divf %59, %60 : vector<2x128xf32>
    %62 = vector.extract_strided_slice %55 {offsets = [0, 128], sizes = [2, 128], strides = [1, 1]} : vector<2x512xf32> to vector<2x128xf32>
    %63 = arith.negf %62 : vector<2x128xf32>
    %64 = math.exp %63 : vector<2x128xf32>
    %cst_34 = arith.constant 1.000000e+00 : f32
    %65 = vector.broadcast %cst_34 : f32 to vector<2x128xf32>
    %66 = arith.addf %65, %64 : vector<2x128xf32>
    %67 = arith.divf %65, %66 : vector<2x128xf32>
    %68 = vector.extract_strided_slice %55 {offsets = [0, 256], sizes = [2, 128], strides = [1, 1]} : vector<2x512xf32> to vector<2x128xf32>
    %69 = math.tanh %68 : vector<2x128xf32>
    %70 = vector.extract_strided_slice %55 {offsets = [0, 384], sizes = [2, 128], strides = [1, 1]} : vector<2x512xf32> to vector<2x128xf32>
    %71 = arith.negf %70 : vector<2x128xf32>
    %72 = math.exp %71 : vector<2x128xf32>
    %cst_35 = arith.constant 1.000000e+00 : f32
    %73 = vector.broadcast %cst_35 : f32 to vector<2x128xf32>
    %74 = arith.addf %73, %72 : vector<2x128xf32>
    %75 = arith.divf %73, %74 : vector<2x128xf32>
    %76 = arith.mulf %67, %47 : vector<2x128xf32>
    %77 = arith.mulf %61, %69 : vector<2x128xf32>
    %78 = arith.addf %76, %77 : vector<2x128xf32>
    %79 = math.tanh %78 : vector<2x128xf32>
    %80 = arith.mulf %75, %79 : vector<2x128xf32>
    %c1_36 = arith.constant 1 : index
    %c0_37 = arith.constant 0 : index
    %c0_38 = arith.constant 0 : index
    %81 = vector.load %arg11[%c1_36, %c0_37, %c0_38] : memref<2x2x128xf32, #tpu.memory_space<vmem>>, vector<1x2x128xf32>
    %82 = vector.shape_cast %81 : vector<1x2x128xf32> to vector<2x128xf32>
    %83 = vector.shape_cast %80 : vector<2x128xf32> to vector<1x2x128xf32>
    tpu.vector_store %arg11[%c1_36, %c0_37, %c0_38], %83 {strides = array<i32>} : memref<2x2x128xf32, #tpu.memory_space<vmem>>, vector<1x2x128xf32>,
    %c1_39 = arith.constant 1 : index
    %c0_40 = arith.constant 0 : index
    %c0_41 = arith.constant 0 : index
    %84 = vector.load %arg12[%c1_39, %c0_40, %c0_41] : memref<2x2x128xf32, #tpu.memory_space<vmem>>, vector<1x2x128xf32>
    %85 = vector.shape_cast %84 : vector<1x2x128xf32> to vector<2x128xf32>
    %86 = vector.shape_cast %78 : vector<2x128xf32> to vector<1x2x128xf32>
    tpu.vector_store %arg12[%c1_39, %c0_40, %c0_41], %86 {strides = array<i32>} : memref<2x2x128xf32, #tpu.memory_space<vmem>>, vector<1x2x128xf32>,
    %87 = arith.index_cast %c0_i32_1 : i32 to index
    %c0_42 = arith.constant 0 : index
    %c0_43 = arith.constant 0 : index
    %88 = vector.load %arg8[%87, %c0_42, %c0_43] : memref<8x2x128xf32, #tpu.memory_space<vmem>>, vector<1x2x128xf32>
    %89 = vector.shape_cast %88 : vector<1x2x128xf32> to vector<2x128xf32>
    %90 = vector.shape_cast %80 : vector<2x128xf32> to vector<1x2x128xf32>
    tpu.vector_store %arg8[%87, %c0_42, %c0_43], %90 {strides = array<i32>} : memref<8x2x128xf32, #tpu.memory_space<vmem>>, vector<1x2x128xf32>,
    %c1_i32 = arith.constant 1 : i32
    %91 = arith.index_cast %c1_i32 : i32 to index
    %c0_44 = arith.constant 0 : index
    %c0_45 = arith.constant 0 : index
    %92 = vector.load %arg1[%91, %c0_44, %c0_45] : memref<8x2x512xf32, #tpu.memory_space<vmem>>, vector<1x2x512xf32>
    %93 = vector.shape_cast %92 : vector<1x2x512xf32> to vector<2x512xf32>
    %c0_46 = arith.constant 0 : index
    %c0_47 = arith.constant 0 : index
    %c0_48 = arith.constant 0 : index
    %94 = vector.load %arg11[%c0_46, %c0_47, %c0_48] : memref<2x2x128xf32, #tpu.memory_space<vmem>>, vector<1x2x128xf32>
    %95 = vector.shape_cast %94 : vector<1x2x128xf32> to vector<2x128xf32>
    %c0_49 = arith.constant 0 : index
    %c0_50 = arith.constant 0 : index
    %c0_51 = arith.constant 0 : index
    %96 = vector.load %arg12[%c0_49, %c0_50, %c0_51] : memref<2x2x128xf32, #tpu.memory_space<vmem>>, vector<1x2x128xf32>
    %97 = vector.shape_cast %96 : vector<1x2x128xf32> to vector<2x128xf32>
    %c0_52 = arith.constant 0 : index
    %c0_53 = arith.constant 0 : index
    %98 = vector.load %arg2[%c0_52, %c0_53] : memref<128x512xf32, #tpu.memory_space<vmem>>, vector<128x512xf32>
    %cst_54 = arith.constant dense<0.000000e+00> : vector<2x512xf32>
    %99 = tpu.matmul %95, %98, %cst_54 {dimension_numbers = #tpu.dot_dimension_numbers<[1], [0], [0], [1], [0, 0, 1, 1], [], []>} : vector<2x128xf32>, vector<128x512xf32>, vector<2x512xf32> -> vector<2x512xf32>
    %100 = arith.addf %93, %99 : vector<2x512xf32>
    %101 = vector.extract_strided_slice %100 {offsets = [0, 0], sizes = [2, 128], strides = [1, 1]} : vector<2x512xf32> to vector<2x128xf32>
    %102 = arith.negf %101 : vector<2x128xf32>
    %103 = math.exp %102 : vector<2x128xf32>
    %cst_55 = arith.constant 1.000000e+00 : f32
    %104 = vector.broadcast %cst_55 : f32 to vector<2x128xf32>
    %105 = arith.addf %104, %103 : vector<2x128xf32>
    %106 = arith.divf %104, %105 : vector<2x128xf32>
    %107 = vector.extract_strided_slice %100 {offsets = [0, 128], sizes = [2, 128], strides = [1, 1]} : vector<2x512xf32> to vector<2x128xf32>
    %108 = arith.negf %107 : vector<2x128xf32>
    %109 = math.exp %108 : vector<2x128xf32>
    %cst_56 = arith.constant 1.000000e+00 : f32
    %110 = vector.broadcast %cst_56 : f32 to vector<2x128xf32>
    %111 = arith.addf %110, %109 : vector<2x128xf32>
    %112 = arith.divf %110, %111 : vector<2x128xf32>
    %113 = vector.extract_strided_slice %100 {offsets = [0, 256], sizes = [2, 128], strides = [1, 1]} : vector<2x512xf32> to vector<2x128xf32>
    %114 = math.tanh %113 : vector<2x128xf32>
    %115 = vector.extract_strided_slice %100 {offsets = [0, 384], sizes = [2, 128], strides = [1, 1]} : vector<2x512xf32> to vector<2x128xf32>
    %116 = arith.negf %115 : vector<2x128xf32>
    %117 = math.exp %116 : vector<2x128xf32>
    %cst_57 = arith.constant 1.000000e+00 : f32
    %118 = vector.broadcast %cst_57 : f32 to vector<2x128xf32>
    %119 = arith.addf %118, %117 : vector<2x128xf32>
    %120 = arith.divf %118, %119 : vector<2x128xf32>
    %121 = arith.mulf %112, %97 : vector<2x128xf32>
    %122 = arith.mulf %106, %114 : vector<2x128xf32>
    %123 = arith.addf %121, %122 : vector<2x128xf32>
    %124 = math.tanh %123 : vector<2x128xf32>
    %125 = arith.mulf %120, %124 : vector<2x128xf32>
    %c0_58 = arith.constant 0 : index
    %c0_59 = arith.constant 0 : index
    %c0_60 = arith.constant 0 : index
    %126 = vector.load %arg11[%c0_58, %c0_59, %c0_60] : memref<2x2x128xf32, #tpu.memory_space<vmem>>, vector<1x2x128xf32>
    %127 = vector.shape_cast %126 : vector<1x2x128xf32> to vector<2x128xf32>
    %128 = vector.shape_cast %125 : vector<2x128xf32> to vector<1x2x128xf32>
    tpu.vector_store %arg11[%c0_58, %c0_59, %c0_60], %128 {strides = array<i32>} : memref<2x2x128xf32, #tpu.memory_space<vmem>>, vector<1x2x128xf32>,
    %c0_61 = arith.constant 0 : index
    %c0_62 = arith.constant 0 : index
    %c0_63 = arith.constant 0 : index
    %129 = vector.load %arg12[%c0_61, %c0_62, %c0_63] : memref<2x2x128xf32, #tpu.memory_space<vmem>>, vector<1x2x128xf32>
    %130 = vector.shape_cast %129 : vector<1x2x128xf32> to vector<2x128xf32>
    %131 = vector.shape_cast %123 : vector<2x128xf32> to vector<1x2x128xf32>
    tpu.vector_store %arg12[%c0_61, %c0_62, %c0_63], %131 {strides = array<i32>} : memref<2x2x128xf32, #tpu.memory_space<vmem>>, vector<1x2x128xf32>,
    %c1_64 = arith.constant 1 : index
    %c0_65 = arith.constant 0 : index
    %c0_66 = arith.constant 0 : index
    %132 = vector.load %arg11[%c1_64, %c0_65, %c0_66] : memref<2x2x128xf32, #tpu.memory_space<vmem>>, vector<1x2x128xf32>
    %133 = vector.shape_cast %132 : vector<1x2x128xf32> to vector<2x128xf32>
    %c1_67 = arith.constant 1 : index
    %c0_68 = arith.constant 0 : index
    %c0_69 = arith.constant 0 : index
    %134 = vector.load %arg12[%c1_67, %c0_68, %c0_69] : memref<2x2x128xf32, #tpu.memory_space<vmem>>, vector<1x2x128xf32>
    %135 = vector.shape_cast %134 : vector<1x2x128xf32> to vector<2x128xf32>
    %c0_70 = arith.constant 0 : index
    %c0_71 = arith.constant 0 : index
    %136 = vector.load %arg3[%c0_70, %c0_71] : memref<128x512xf32, #tpu.memory_space<vmem>>, vector<128x512xf32>
    %cst_72 = arith.constant dense<0.000000e+00> : vector<2x512xf32>
    %137 = tpu.matmul %133, %136, %cst_72 {dimension_numbers = #tpu.dot_dimension_numbers<[1], [0], [0], [1], [0, 0, 1, 1], [], []>} : vector<2x128xf32>, vector<128x512xf32>, vector<2x512xf32> -> vector<2x512xf32>
    %c0_73 = arith.constant 0 : index
    %c0_74 = arith.constant 0 : index
    %138 = vector.load %arg4[%c0_73, %c0_74] : memref<128x512xf32, #tpu.memory_space<vmem>>, vector<128x512xf32>
    %cst_75 = arith.constant dense<0.000000e+00> : vector<2x512xf32>
    %139 = tpu.matmul %125, %138, %cst_75 {dimension_numbers = #tpu.dot_dimension_numbers<[1], [0], [0], [1], [0, 0, 1, 1], [], []>} : vector<2x128xf32>, vector<128x512xf32>, vector<2x512xf32> -> vector<2x512xf32>
    %140 = arith.addf %139, %137 : vector<2x512xf32>
    %c0_76 = arith.constant 0 : index
    %c0_77 = arith.constant 0 : index
    %141 = vector.load %arg5[%c0_76, %c0_77] : memref<1x512xf32, #tpu.memory_space<vmem>>, vector<1x512xf32>
    %142 = vector.broadcast %141 : vector<1x512xf32> to vector<2x512xf32>
    %143 = arith.addf %140, %142 : vector<2x512xf32>
    %144 = vector.extract_strided_slice %143 {offsets = [0, 0], sizes = [2, 128], strides = [1, 1]} : vector<2x512xf32> to vector<2x128xf32>
    %145 = arith.negf %144 : vector<2x128xf32>
    %146 = math.exp %145 : vector<2x128xf32>
    %cst_78 = arith.constant 1.000000e+00 : f32
    %147 = vector.broadcast %cst_78 : f32 to vector<2x128xf32>
    %148 = arith.addf %147, %146 : vector<2x128xf32>
    %149 = arith.divf %147, %148 : vector<2x128xf32>
    %150 = vector.extract_strided_slice %143 {offsets = [0, 128], sizes = [2, 128], strides = [1, 1]} : vector<2x512xf32> to vector<2x128xf32>
    %151 = arith.negf %150 : vector<2x128xf32>
    %152 = math.exp %151 : vector<2x128xf32>
    %cst_79 = arith.constant 1.000000e+00 : f32
    %153 = vector.broadcast %cst_79 : f32 to vector<2x128xf32>
    %154 = arith.addf %153, %152 : vector<2x128xf32>
    %155 = arith.divf %153, %154 : vector<2x128xf32>
    %156 = vector.extract_strided_slice %143 {offsets = [0, 256], sizes = [2, 128], strides = [1, 1]} : vector<2x512xf32> to vector<2x128xf32>
    %157 = math.tanh %156 : vector<2x128xf32>
    %158 = vector.extract_strided_slice %143 {offsets = [0, 384], sizes = [2, 128], strides = [1, 1]} : vector<2x512xf32> to vector<2x128xf32>
    %159 = arith.negf %158 : vector<2x128xf32>
    %160 = math.exp %159 : vector<2x128xf32>
    %cst_80 = arith.constant 1.000000e+00 : f32
    %161 = vector.broadcast %cst_80 : f32 to vector<2x128xf32>
    %162 = arith.addf %161, %160 : vector<2x128xf32>
    %163 = arith.divf %161, %162 : vector<2x128xf32>
    %164 = arith.mulf %155, %135 : vector<2x128xf32>
    %165 = arith.mulf %149, %157 : vector<2x128xf32>
    %166 = arith.addf %164, %165 : vector<2x128xf32>
    %167 = math.tanh %166 : vector<2x128xf32>
    %168 = arith.mulf %163, %167 : vector<2x128xf32>
    %c1_81 = arith.constant 1 : index
    %c0_82 = arith.constant 0 : index
    %c0_83 = arith.constant 0 : index
    %169 = vector.load %arg11[%c1_81, %c0_82, %c0_83] : memref<2x2x128xf32, #tpu.memory_space<vmem>>, vector<1x2x128xf32>
    %170 = vector.shape_cast %169 : vector<1x2x128xf32> to vector<2x128xf32>
    %171 = vector.shape_cast %168 : vector<2x128xf32> to vector<1x2x128xf32>
    tpu.vector_store %arg11[%c1_81, %c0_82, %c0_83], %171 {strides = array<i32>} : memref<2x2x128xf32, #tpu.memory_space<vmem>>, vector<1x2x128xf32>,
    %c1_84 = arith.constant 1 : index
    %c0_85 = arith.constant 0 : index
    %c0_86 = arith.constant 0 : index
    %172 = vector.load %arg12[%c1_84, %c0_85, %c0_86] : memref<2x2x128xf32, #tpu.memory_space<vmem>>, vector<1x2x128xf32>
    %173 = vector.shape_cast %172 : vector<1x2x128xf32> to vector<2x128xf32>
    %174 = vector.shape_cast %166 : vector<2x128xf32> to vector<1x2x128xf32>
    tpu.vector_store %arg12[%c1_84, %c0_85, %c0_86], %174 {strides = array<i32>} : memref<2x2x128xf32, #tpu.memory_space<vmem>>, vector<1x2x128xf32>,
    %175 = arith.index_cast %c1_i32 : i32 to index
    %c0_87 = arith.constant 0 : index
    %c0_88 = arith.constant 0 : index
    %176 = vector.load %arg8[%175, %c0_87, %c0_88] : memref<8x2x128xf32, #tpu.memory_space<vmem>>, vector<1x2x128xf32>
    %177 = vector.shape_cast %176 : vector<1x2x128xf32> to vector<2x128xf32>
    %178 = vector.shape_cast %168 : vector<2x128xf32> to vector<1x2x128xf32>
    tpu.vector_store %arg8[%175, %c0_87, %c0_88], %178 {strides = array<i32>} : memref<8x2x128xf32, #tpu.memory_space<vmem>>, vector<1x2x128xf32>,
    %c2_i32 = arith.constant 2 : i32
    %179 = arith.index_cast %c2_i32 : i32 to index
    %c0_89 = arith.constant 0 : index
    %c0_90 = arith.constant 0 : index
    %180 = vector.load %arg1[%179, %c0_89, %c0_90] : memref<8x2x512xf32, #tpu.memory_space<vmem>>, vector<1x2x512xf32>
    %181 = vector.shape_cast %180 : vector<1x2x512xf32> to vector<2x512xf32>
    %c0_91 = arith.constant 0 : index
    %c0_92 = arith.constant 0 : index
    %c0_93 = arith.constant 0 : index
    %182 = vector.load %arg11[%c0_91, %c0_92, %c0_93] : memref<2x2x128xf32, #tpu.memory_space<vmem>>, vector<1x2x128xf32>
    %183 = vector.shape_cast %182 : vector<1x2x128xf32> to vector<2x128xf32>
    %c0_94 = arith.constant 0 : index
    %c0_95 = arith.constant 0 : index
    %c0_96 = arith.constant 0 : index
    %184 = vector.load %arg12[%c0_94, %c0_95, %c0_96] : memref<2x2x128xf32, #tpu.memory_space<vmem>>, vector<1x2x128xf32>
    %185 = vector.shape_cast %184 : vector<1x2x128xf32> to vector<2x128xf32>
    %c0_97 = arith.constant 0 : index
    %c0_98 = arith.constant 0 : index
    %186 = vector.load %arg2[%c0_97, %c0_98] : memref<128x512xf32, #tpu.memory_space<vmem>>, vector<128x512xf32>
    %cst_99 = arith.constant dense<0.000000e+00> : vector<2x512xf32>
    %187 = tpu.matmul %183, %186, %cst_99 {dimension_numbers = #tpu.dot_dimension_numbers<[1], [0], [0], [1], [0, 0, 1, 1], [], []>} : vector<2x128xf32>, vector<128x512xf32>, vector<2x512xf32> -> vector<2x512xf32>
    %188 = arith.addf %181, %187 : vector<2x512xf32>
    %189 = vector.extract_strided_slice %188 {offsets = [0, 0], sizes = [2, 128], strides = [1, 1]} : vector<2x512xf32> to vector<2x128xf32>
    %190 = arith.negf %189 : vector<2x128xf32>
    %191 = math.exp %190 : vector<2x128xf32>
    %cst_100 = arith.constant 1.000000e+00 : f32
    %192 = vector.broadcast %cst_100 : f32 to vector<2x128xf32>
    %193 = arith.addf %192, %191 : vector<2x128xf32>
    %194 = arith.divf %192, %193 : vector<2x128xf32>
    %195 = vector.extract_strided_slice %188 {offsets = [0, 128], sizes = [2, 128], strides = [1, 1]} : vector<2x512xf32> to vector<2x128xf32>
    %196 = arith.negf %195 : vector<2x128xf32>
    %197 = math.exp %196 : vector<2x128xf32>
    %cst_101 = arith.constant 1.000000e+00 : f32
    %198 = vector.broadcast %cst_101 : f32 to vector<2x128xf32>
    %199 = arith.addf %198, %197 : vector<2x128xf32>
    %200 = arith.divf %198, %199 : vector<2x128xf32>
    %201 = vector.extract_strided_slice %188 {offsets = [0, 256], sizes = [2, 128], strides = [1, 1]} : vector<2x512xf32> to vector<2x128xf32>
    %202 = math.tanh %201 : vector<2x128xf32>
    %203 = vector.extract_strided_slice %188 {offsets = [0, 384], sizes = [2, 128], strides = [1, 1]} : vector<2x512xf32> to vector<2x128xf32>
    %204 = arith.negf %203 : vector<2x128xf32>
    %205 = math.exp %204 : vector<2x128xf32>
    %cst_102 = arith.constant 1.000000e+00 : f32
    %206 = vector.broadcast %cst_102 : f32 to vector<2x128xf32>
    %207 = arith.addf %206, %205 : vector<2x128xf32>
    %208 = arith.divf %206, %207 : vector<2x128xf32>
    %209 = arith.mulf %200, %185 : vector<2x128xf32>
    %210 = arith.mulf %194, %202 : vector<2x128xf32>
    %211 = arith.addf %209, %210 : vector<2x128xf32>
    %212 = math.tanh %211 : vector<2x128xf32>
    %213 = arith.mulf %208, %212 : vector<2x128xf32>
    %c0_103 = arith.constant 0 : index
    %c0_104 = arith.constant 0 : index
    %c0_105 = arith.constant 0 : index
    %214 = vector.load %arg11[%c0_103, %c0_104, %c0_105] : memref<2x2x128xf32, #tpu.memory_space<vmem>>, vector<1x2x128xf32>
    %215 = vector.shape_cast %214 : vector<1x2x128xf32> to vector<2x128xf32>
    %216 = vector.shape_cast %213 : vector<2x128xf32> to vector<1x2x128xf32>
    tpu.vector_store %arg11[%c0_103, %c0_104, %c0_105], %216 {strides = array<i32>} : memref<2x2x128xf32, #tpu.memory_space<vmem>>, vector<1x2x128xf32>,
    %c0_106 = arith.constant 0 : index
    %c0_107 = arith.constant 0 : index
    %c0_108 = arith.constant 0 : index
    %217 = vector.load %arg12[%c0_106, %c0_107, %c0_108] : memref<2x2x128xf32, #tpu.memory_space<vmem>>, vector<1x2x128xf32>
    %218 = vector.shape_cast %217 : vector<1x2x128xf32> to vector<2x128xf32>
    %219 = vector.shape_cast %211 : vector<2x128xf32> to vector<1x2x128xf32>
    tpu.vector_store %arg12[%c0_106, %c0_107, %c0_108], %219 {strides = array<i32>} : memref<2x2x128xf32, #tpu.memory_space<vmem>>, vector<1x2x128xf32>,
    %c1_109 = arith.constant 1 : index
    %c0_110 = arith.constant 0 : index
    %c0_111 = arith.constant 0 : index
    %220 = vector.load %arg11[%c1_109, %c0_110, %c0_111] : memref<2x2x128xf32, #tpu.memory_space<vmem>>, vector<1x2x128xf32>
    %221 = vector.shape_cast %220 : vector<1x2x128xf32> to vector<2x128xf32>
    %c1_112 = arith.constant 1 : index
    %c0_113 = arith.constant 0 : index
    %c0_114 = arith.constant 0 : index
    %222 = vector.load %arg12[%c1_112, %c0_113, %c0_114] : memref<2x2x128xf32, #tpu.memory_space<vmem>>, vector<1x2x128xf32>
    %223 = vector.shape_cast %222 : vector<1x2x128xf32> to vector<2x128xf32>
    %c0_115 = arith.constant 0 : index
    %c0_116 = arith.constant 0 : index
    %224 = vector.load %arg3[%c0_115, %c0_116] : memref<128x512xf32, #tpu.memory_space<vmem>>, vector<128x512xf32>
    %cst_117 = arith.constant dense<0.000000e+00> : vector<2x512xf32>
    %225 = tpu.matmul %221, %224, %cst_117 {dimension_numbers = #tpu.dot_dimension_numbers<[1], [0], [0], [1], [0, 0, 1, 1], [], []>} : vector<2x128xf32>, vector<128x512xf32>, vector<2x512xf32> -> vector<2x512xf32>
    %c0_118 = arith.constant 0 : index
    %c0_119 = arith.constant 0 : index
    %226 = vector.load %arg4[%c0_118, %c0_119] : memref<128x512xf32, #tpu.memory_space<vmem>>, vector<128x512xf32>
    %cst_120 = arith.constant dense<0.000000e+00> : vector<2x512xf32>
    %227 = tpu.matmul %213, %226, %cst_120 {dimension_numbers = #tpu.dot_dimension_numbers<[1], [0], [0], [1], [0, 0, 1, 1], [], []>} : vector<2x128xf32>, vector<128x512xf32>, vector<2x512xf32> -> vector<2x512xf32>
    %228 = arith.addf %227, %225 : vector<2x512xf32>
    %c0_121 = arith.constant 0 : index
    %c0_122 = arith.constant 0 : index
    %229 = vector.load %arg5[%c0_121, %c0_122] : memref<1x512xf32, #tpu.memory_space<vmem>>, vector<1x512xf32>
    %230 = vector.broadcast %229 : vector<1x512xf32> to vector<2x512xf32>
    %231 = arith.addf %228, %230 : vector<2x512xf32>
    %232 = vector.extract_strided_slice %231 {offsets = [0, 0], sizes = [2, 128], strides = [1, 1]} : vector<2x512xf32> to vector<2x128xf32>
    %233 = arith.negf %232 : vector<2x128xf32>
    %234 = math.exp %233 : vector<2x128xf32>
    %cst_123 = arith.constant 1.000000e+00 : f32
    %235 = vector.broadcast %cst_123 : f32 to vector<2x128xf32>
    %236 = arith.addf %235, %234 : vector<2x128xf32>
    %237 = arith.divf %235, %236 : vector<2x128xf32>
    %238 = vector.extract_strided_slice %231 {offsets = [0, 128], sizes = [2, 128], strides = [1, 1]} : vector<2x512xf32> to vector<2x128xf32>
    %239 = arith.negf %238 : vector<2x128xf32>
    %240 = math.exp %239 : vector<2x128xf32>
    %cst_124 = arith.constant 1.000000e+00 : f32
    %241 = vector.broadcast %cst_124 : f32 to vector<2x128xf32>
    %242 = arith.addf %241, %240 : vector<2x128xf32>
    %243 = arith.divf %241, %242 : vector<2x128xf32>
    %244 = vector.extract_strided_slice %231 {offsets = [0, 256], sizes = [2, 128], strides = [1, 1]} : vector<2x512xf32> to vector<2x128xf32>
    %245 = math.tanh %244 : vector<2x128xf32>
    %246 = vector.extract_strided_slice %231 {offsets = [0, 384], sizes = [2, 128], strides = [1, 1]} : vector<2x512xf32> to vector<2x128xf32>
    %247 = arith.negf %246 : vector<2x128xf32>
    %248 = math.exp %247 : vector<2x128xf32>
    %cst_125 = arith.constant 1.000000e+00 : f32
    %249 = vector.broadcast %cst_125 : f32 to vector<2x128xf32>
    %250 = arith.addf %249, %248 : vector<2x128xf32>
    %251 = arith.divf %249, %250 : vector<2x128xf32>
    %252 = arith.mulf %243, %223 : vector<2x128xf32>
    %253 = arith.mulf %237, %245 : vector<2x128xf32>
    %254 = arith.addf %252, %253 : vector<2x128xf32>
    %255 = math.tanh %254 : vector<2x128xf32>
    %256 = arith.mulf %251, %255 : vector<2x128xf32>
    %c1_126 = arith.constant 1 : index
    %c0_127 = arith.constant 0 : index
    %c0_128 = arith.constant 0 : index
    %257 = vector.load %arg11[%c1_126, %c0_127, %c0_128] : memref<2x2x128xf32, #tpu.memory_space<vmem>>, vector<1x2x128xf32>
    %258 = vector.shape_cast %257 : vector<1x2x128xf32> to vector<2x128xf32>
    %259 = vector.shape_cast %256 : vector<2x128xf32> to vector<1x2x128xf32>
    tpu.vector_store %arg11[%c1_126, %c0_127, %c0_128], %259 {strides = array<i32>} : memref<2x2x128xf32, #tpu.memory_space<vmem>>, vector<1x2x128xf32>,
    %c1_129 = arith.constant 1 : index
    %c0_130 = arith.constant 0 : index
    %c0_131 = arith.constant 0 : index
    %260 = vector.load %arg12[%c1_129, %c0_130, %c0_131] : memref<2x2x128xf32, #tpu.memory_space<vmem>>, vector<1x2x128xf32>
    %261 = vector.shape_cast %260 : vector<1x2x128xf32> to vector<2x128xf32>
    %262 = vector.shape_cast %254 : vector<2x128xf32> to vector<1x2x128xf32>
    tpu.vector_store %arg12[%c1_129, %c0_130, %c0_131], %262 {strides = array<i32>} : memref<2x2x128xf32, #tpu.memory_space<vmem>>, vector<1x2x128xf32>,
    %263 = arith.index_cast %c2_i32 : i32 to index
    %c0_132 = arith.constant 0 : index
    %c0_133 = arith.constant 0 : index
    %264 = vector.load %arg8[%263, %c0_132, %c0_133] : memref<8x2x128xf32, #tpu.memory_space<vmem>>, vector<1x2x128xf32>
    %265 = vector.shape_cast %264 : vector<1x2x128xf32> to vector<2x128xf32>
    %266 = vector.shape_cast %256 : vector<2x128xf32> to vector<1x2x128xf32>
    tpu.vector_store %arg8[%263, %c0_132, %c0_133], %266 {strides = array<i32>} : memref<8x2x128xf32, #tpu.memory_space<vmem>>, vector<1x2x128xf32>,
    %c3_i32 = arith.constant 3 : i32
    %267 = arith.index_cast %c3_i32 : i32 to index
    %c0_134 = arith.constant 0 : index
    %c0_135 = arith.constant 0 : index
    %268 = vector.load %arg1[%267, %c0_134, %c0_135] : memref<8x2x512xf32, #tpu.memory_space<vmem>>, vector<1x2x512xf32>
    %269 = vector.shape_cast %268 : vector<1x2x512xf32> to vector<2x512xf32>
    %c0_136 = arith.constant 0 : index
    %c0_137 = arith.constant 0 : index
    %c0_138 = arith.constant 0 : index
    %270 = vector.load %arg11[%c0_136, %c0_137, %c0_138] : memref<2x2x128xf32, #tpu.memory_space<vmem>>, vector<1x2x128xf32>
    %271 = vector.shape_cast %270 : vector<1x2x128xf32> to vector<2x128xf32>
    %c0_139 = arith.constant 0 : index
    %c0_140 = arith.constant 0 : index
    %c0_141 = arith.constant 0 : index
    %272 = vector.load %arg12[%c0_139, %c0_140, %c0_141] : memref<2x2x128xf32, #tpu.memory_space<vmem>>, vector<1x2x128xf32>
    %273 = vector.shape_cast %272 : vector<1x2x128xf32> to vector<2x128xf32>
    %c0_142 = arith.constant 0 : index
    %c0_143 = arith.constant 0 : index
    %274 = vector.load %arg2[%c0_142, %c0_143] : memref<128x512xf32, #tpu.memory_space<vmem>>, vector<128x512xf32>
    %cst_144 = arith.constant dense<0.000000e+00> : vector<2x512xf32>
    %275 = tpu.matmul %271, %274, %cst_144 {dimension_numbers = #tpu.dot_dimension_numbers<[1], [0], [0], [1], [0, 0, 1, 1], [], []>} : vector<2x128xf32>, vector<128x512xf32>, vector<2x512xf32> -> vector<2x512xf32>
    %276 = arith.addf %269, %275 : vector<2x512xf32>
    %277 = vector.extract_strided_slice %276 {offsets = [0, 0], sizes = [2, 128], strides = [1, 1]} : vector<2x512xf32> to vector<2x128xf32>
    %278 = arith.negf %277 : vector<2x128xf32>
    %279 = math.exp %278 : vector<2x128xf32>
    %cst_145 = arith.constant 1.000000e+00 : f32
    %280 = vector.broadcast %cst_145 : f32 to vector<2x128xf32>
    %281 = arith.addf %280, %279 : vector<2x128xf32>
    %282 = arith.divf %280, %281 : vector<2x128xf32>
    %283 = vector.extract_strided_slice %276 {offsets = [0, 128], sizes = [2, 128], strides = [1, 1]} : vector<2x512xf32> to vector<2x128xf32>
    %284 = arith.negf %283 : vector<2x128xf32>
    %285 = math.exp %284 : vector<2x128xf32>
    %cst_146 = arith.constant 1.000000e+00 : f32
    %286 = vector.broadcast %cst_146 : f32 to vector<2x128xf32>
    %287 = arith.addf %286, %285 : vector<2x128xf32>
    %288 = arith.divf %286, %287 : vector<2x128xf32>
    %289 = vector.extract_strided_slice %276 {offsets = [0, 256], sizes = [2, 128], strides = [1, 1]} : vector<2x512xf32> to vector<2x128xf32>
    %290 = math.tanh %289 : vector<2x128xf32>
    %291 = vector.extract_strided_slice %276 {offsets = [0, 384], sizes = [2, 128], strides = [1, 1]} : vector<2x512xf32> to vector<2x128xf32>
    %292 = arith.negf %291 : vector<2x128xf32>
    %293 = math.exp %292 : vector<2x128xf32>
    %cst_147 = arith.constant 1.000000e+00 : f32
    %294 = vector.broadcast %cst_147 : f32 to vector<2x128xf32>
    %295 = arith.addf %294, %293 : vector<2x128xf32>
    %296 = arith.divf %294, %295 : vector<2x128xf32>
    %297 = arith.mulf %288, %273 : vector<2x128xf32>
    %298 = arith.mulf %282, %290 : vector<2x128xf32>
    %299 = arith.addf %297, %298 : vector<2x128xf32>
    %300 = math.tanh %299 : vector<2x128xf32>
    %301 = arith.mulf %296, %300 : vector<2x128xf32>
    %c0_148 = arith.constant 0 : index
    %c0_149 = arith.constant 0 : index
    %c0_150 = arith.constant 0 : index
    %302 = vector.load %arg11[%c0_148, %c0_149, %c0_150] : memref<2x2x128xf32, #tpu.memory_space<vmem>>, vector<1x2x128xf32>
    %303 = vector.shape_cast %302 : vector<1x2x128xf32> to vector<2x128xf32>
    %304 = vector.shape_cast %301 : vector<2x128xf32> to vector<1x2x128xf32>
    tpu.vector_store %arg11[%c0_148, %c0_149, %c0_150], %304 {strides = array<i32>} : memref<2x2x128xf32, #tpu.memory_space<vmem>>, vector<1x2x128xf32>,
    %c0_151 = arith.constant 0 : index
    %c0_152 = arith.constant 0 : index
    %c0_153 = arith.constant 0 : index
    %305 = vector.load %arg12[%c0_151, %c0_152, %c0_153] : memref<2x2x128xf32, #tpu.memory_space<vmem>>, vector<1x2x128xf32>
    %306 = vector.shape_cast %305 : vector<1x2x128xf32> to vector<2x128xf32>
    %307 = vector.shape_cast %299 : vector<2x128xf32> to vector<1x2x128xf32>
    tpu.vector_store %arg12[%c0_151, %c0_152, %c0_153], %307 {strides = array<i32>} : memref<2x2x128xf32, #tpu.memory_space<vmem>>, vector<1x2x128xf32>,
    %c1_154 = arith.constant 1 : index
    %c0_155 = arith.constant 0 : index
    %c0_156 = arith.constant 0 : index
    %308 = vector.load %arg11[%c1_154, %c0_155, %c0_156] : memref<2x2x128xf32, #tpu.memory_space<vmem>>, vector<1x2x128xf32>
    %309 = vector.shape_cast %308 : vector<1x2x128xf32> to vector<2x128xf32>
    %c1_157 = arith.constant 1 : index
    %c0_158 = arith.constant 0 : index
    %c0_159 = arith.constant 0 : index
    %310 = vector.load %arg12[%c1_157, %c0_158, %c0_159] : memref<2x2x128xf32, #tpu.memory_space<vmem>>, vector<1x2x128xf32>
    %311 = vector.shape_cast %310 : vector<1x2x128xf32> to vector<2x128xf32>
    %c0_160 = arith.constant 0 : index
    %c0_161 = arith.constant 0 : index
    %312 = vector.load %arg3[%c0_160, %c0_161] : memref<128x512xf32, #tpu.memory_space<vmem>>, vector<128x512xf32>
    %cst_162 = arith.constant dense<0.000000e+00> : vector<2x512xf32>
    %313 = tpu.matmul %309, %312, %cst_162 {dimension_numbers = #tpu.dot_dimension_numbers<[1], [0], [0], [1], [0, 0, 1, 1], [], []>} : vector<2x128xf32>, vector<128x512xf32>, vector<2x512xf32> -> vector<2x512xf32>
    %c0_163 = arith.constant 0 : index
    %c0_164 = arith.constant 0 : index
    %314 = vector.load %arg4[%c0_163, %c0_164] : memref<128x512xf32, #tpu.memory_space<vmem>>, vector<128x512xf32>
    %cst_165 = arith.constant dense<0.000000e+00> : vector<2x512xf32>
    %315 = tpu.matmul %301, %314, %cst_165 {dimension_numbers = #tpu.dot_dimension_numbers<[1], [0], [0], [1], [0, 0, 1, 1], [], []>} : vector<2x128xf32>, vector<128x512xf32>, vector<2x512xf32> -> vector<2x512xf32>
    %316 = arith.addf %315, %313 : vector<2x512xf32>
    %c0_166 = arith.constant 0 : index
    %c0_167 = arith.constant 0 : index
    %317 = vector.load %arg5[%c0_166, %c0_167] : memref<1x512xf32, #tpu.memory_space<vmem>>, vector<1x512xf32>
    %318 = vector.broadcast %317 : vector<1x512xf32> to vector<2x512xf32>
    %319 = arith.addf %316, %318 : vector<2x512xf32>
    %320 = vector.extract_strided_slice %319 {offsets = [0, 0], sizes = [2, 128], strides = [1, 1]} : vector<2x512xf32> to vector<2x128xf32>
    %321 = arith.negf %320 : vector<2x128xf32>
    %322 = math.exp %321 : vector<2x128xf32>
    %cst_168 = arith.constant 1.000000e+00 : f32
    %323 = vector.broadcast %cst_168 : f32 to vector<2x128xf32>
    %324 = arith.addf %323, %322 : vector<2x128xf32>
    %325 = arith.divf %323, %324 : vector<2x128xf32>
    %326 = vector.extract_strided_slice %319 {offsets = [0, 128], sizes = [2, 128], strides = [1, 1]} : vector<2x512xf32> to vector<2x128xf32>
    %327 = arith.negf %326 : vector<2x128xf32>
    %328 = math.exp %327 : vector<2x128xf32>
    %cst_169 = arith.constant 1.000000e+00 : f32
    %329 = vector.broadcast %cst_169 : f32 to vector<2x128xf32>
    %330 = arith.addf %329, %328 : vector<2x128xf32>
    %331 = arith.divf %329, %330 : vector<2x128xf32>
    %332 = vector.extract_strided_slice %319 {offsets = [0, 256], sizes = [2, 128], strides = [1, 1]} : vector<2x512xf32> to vector<2x128xf32>
    %333 = math.tanh %332 : vector<2x128xf32>
    %334 = vector.extract_strided_slice %319 {offsets = [0, 384], sizes = [2, 128], strides = [1, 1]} : vector<2x512xf32> to vector<2x128xf32>
    %335 = arith.negf %334 : vector<2x128xf32>
    %336 = math.exp %335 : vector<2x128xf32>
    %cst_170 = arith.constant 1.000000e+00 : f32
    %337 = vector.broadcast %cst_170 : f32 to vector<2x128xf32>
    %338 = arith.addf %337, %336 : vector<2x128xf32>
    %339 = arith.divf %337, %338 : vector<2x128xf32>
    %340 = arith.mulf %331, %311 : vector<2x128xf32>
    %341 = arith.mulf %325, %333 : vector<2x128xf32>
    %342 = arith.addf %340, %341 : vector<2x128xf32>
    %343 = math.tanh %342 : vector<2x128xf32>
    %344 = arith.mulf %339, %343 : vector<2x128xf32>
    %c1_171 = arith.constant 1 : index
    %c0_172 = arith.constant 0 : index
    %c0_173 = arith.constant 0 : index
    %345 = vector.load %arg11[%c1_171, %c0_172, %c0_173] : memref<2x2x128xf32, #tpu.memory_space<vmem>>, vector<1x2x128xf32>
    %346 = vector.shape_cast %345 : vector<1x2x128xf32> to vector<2x128xf32>
    %347 = vector.shape_cast %344 : vector<2x128xf32> to vector<1x2x128xf32>
    tpu.vector_store %arg11[%c1_171, %c0_172, %c0_173], %347 {strides = array<i32>} : memref<2x2x128xf32, #tpu.memory_space<vmem>>, vector<1x2x128xf32>,
    %c1_174 = arith.constant 1 : index
    %c0_175 = arith.constant 0 : index
    %c0_176 = arith.constant 0 : index
    %348 = vector.load %arg12[%c1_174, %c0_175, %c0_176] : memref<2x2x128xf32, #tpu.memory_space<vmem>>, vector<1x2x128xf32>
    %349 = vector.shape_cast %348 : vector<1x2x128xf32> to vector<2x128xf32>
    %350 = vector.shape_cast %342 : vector<2x128xf32> to vector<1x2x128xf32>
    tpu.vector_store %arg12[%c1_174, %c0_175, %c0_176], %350 {strides = array<i32>} : memref<2x2x128xf32, #tpu.memory_space<vmem>>, vector<1x2x128xf32>,
    %351 = arith.index_cast %c3_i32 : i32 to index
    %c0_177 = arith.constant 0 : index
    %c0_178 = arith.constant 0 : index
    %352 = vector.load %arg8[%351, %c0_177, %c0_178] : memref<8x2x128xf32, #tpu.memory_space<vmem>>, vector<1x2x128xf32>
    %353 = vector.shape_cast %352 : vector<1x2x128xf32> to vector<2x128xf32>
    %354 = vector.shape_cast %344 : vector<2x128xf32> to vector<1x2x128xf32>
    tpu.vector_store %arg8[%351, %c0_177, %c0_178], %354 {strides = array<i32>} : memref<8x2x128xf32, #tpu.memory_space<vmem>>, vector<1x2x128xf32>,
    %c4_i32 = arith.constant 4 : i32
    %355 = arith.index_cast %c4_i32 : i32 to index
    %c0_179 = arith.constant 0 : index
    %c0_180 = arith.constant 0 : index
    %356 = vector.load %arg1[%355, %c0_179, %c0_180] : memref<8x2x512xf32, #tpu.memory_space<vmem>>, vector<1x2x512xf32>
    %357 = vector.shape_cast %356 : vector<1x2x512xf32> to vector<2x512xf32>
    %c0_181 = arith.constant 0 : index
    %c0_182 = arith.constant 0 : index
    %c0_183 = arith.constant 0 : index
    %358 = vector.load %arg11[%c0_181, %c0_182, %c0_183] : memref<2x2x128xf32, #tpu.memory_space<vmem>>, vector<1x2x128xf32>
    %359 = vector.shape_cast %358 : vector<1x2x128xf32> to vector<2x128xf32>
    %c0_184 = arith.constant 0 : index
    %c0_185 = arith.constant 0 : index
    %c0_186 = arith.constant 0 : index
    %360 = vector.load %arg12[%c0_184, %c0_185, %c0_186] : memref<2x2x128xf32, #tpu.memory_space<vmem>>, vector<1x2x128xf32>
    %361 = vector.shape_cast %360 : vector<1x2x128xf32> to vector<2x128xf32>
    %c0_187 = arith.constant 0 : index
    %c0_188 = arith.constant 0 : index
    %362 = vector.load %arg2[%c0_187, %c0_188] : memref<128x512xf32, #tpu.memory_space<vmem>>, vector<128x512xf32>
    %cst_189 = arith.constant dense<0.000000e+00> : vector<2x512xf32>
    %363 = tpu.matmul %359, %362, %cst_189 {dimension_numbers = #tpu.dot_dimension_numbers<[1], [0], [0], [1], [0, 0, 1, 1], [], []>} : vector<2x128xf32>, vector<128x512xf32>, vector<2x512xf32> -> vector<2x512xf32>
    %364 = arith.addf %357, %363 : vector<2x512xf32>
    %365 = vector.extract_strided_slice %364 {offsets = [0, 0], sizes = [2, 128], strides = [1, 1]} : vector<2x512xf32> to vector<2x128xf32>
    %366 = arith.negf %365 : vector<2x128xf32>
    %367 = math.exp %366 : vector<2x128xf32>
    %cst_190 = arith.constant 1.000000e+00 : f32
    %368 = vector.broadcast %cst_190 : f32 to vector<2x128xf32>
    %369 = arith.addf %368, %367 : vector<2x128xf32>
    %370 = arith.divf %368, %369 : vector<2x128xf32>
    %371 = vector.extract_strided_slice %364 {offsets = [0, 128], sizes = [2, 128], strides = [1, 1]} : vector<2x512xf32> to vector<2x128xf32>
    %372 = arith.negf %371 : vector<2x128xf32>
    %373 = math.exp %372 : vector<2x128xf32>
    %cst_191 = arith.constant 1.000000e+00 : f32
    %374 = vector.broadcast %cst_191 : f32 to vector<2x128xf32>
    %375 = arith.addf %374, %373 : vector<2x128xf32>
    %376 = arith.divf %374, %375 : vector<2x128xf32>
    %377 = vector.extract_strided_slice %364 {offsets = [0, 256], sizes = [2, 128], strides = [1, 1]} : vector<2x512xf32> to vector<2x128xf32>
    %378 = math.tanh %377 : vector<2x128xf32>
    %379 = vector.extract_strided_slice %364 {offsets = [0, 384], sizes = [2, 128], strides = [1, 1]} : vector<2x512xf32> to vector<2x128xf32>
    %380 = arith.negf %379 : vector<2x128xf32>
    %381 = math.exp %380 : vector<2x128xf32>
    %cst_192 = arith.constant 1.000000e+00 : f32
    %382 = vector.broadcast %cst_192 : f32 to vector<2x128xf32>
    %383 = arith.addf %382, %381 : vector<2x128xf32>
    %384 = arith.divf %382, %383 : vector<2x128xf32>
    %385 = arith.mulf %376, %361 : vector<2x128xf32>
    %386 = arith.mulf %370, %378 : vector<2x128xf32>
    %387 = arith.addf %385, %386 : vector<2x128xf32>
    %388 = math.tanh %387 : vector<2x128xf32>
    %389 = arith.mulf %384, %388 : vector<2x128xf32>
    %c0_193 = arith.constant 0 : index
    %c0_194 = arith.constant 0 : index
    %c0_195 = arith.constant 0 : index
    %390 = vector.load %arg11[%c0_193, %c0_194, %c0_195] : memref<2x2x128xf32, #tpu.memory_space<vmem>>, vector<1x2x128xf32>
    %391 = vector.shape_cast %390 : vector<1x2x128xf32> to vector<2x128xf32>
    %392 = vector.shape_cast %389 : vector<2x128xf32> to vector<1x2x128xf32>
    tpu.vector_store %arg11[%c0_193, %c0_194, %c0_195], %392 {strides = array<i32>} : memref<2x2x128xf32, #tpu.memory_space<vmem>>, vector<1x2x128xf32>,
    %c0_196 = arith.constant 0 : index
    %c0_197 = arith.constant 0 : index
    %c0_198 = arith.constant 0 : index
    %393 = vector.load %arg12[%c0_196, %c0_197, %c0_198] : memref<2x2x128xf32, #tpu.memory_space<vmem>>, vector<1x2x128xf32>
    %394 = vector.shape_cast %393 : vector<1x2x128xf32> to vector<2x128xf32>
    %395 = vector.shape_cast %387 : vector<2x128xf32> to vector<1x2x128xf32>
    tpu.vector_store %arg12[%c0_196, %c0_197, %c0_198], %395 {strides = array<i32>} : memref<2x2x128xf32, #tpu.memory_space<vmem>>, vector<1x2x128xf32>,
    %c1_199 = arith.constant 1 : index
    %c0_200 = arith.constant 0 : index
    %c0_201 = arith.constant 0 : index
    %396 = vector.load %arg11[%c1_199, %c0_200, %c0_201] : memref<2x2x128xf32, #tpu.memory_space<vmem>>, vector<1x2x128xf32>
    %397 = vector.shape_cast %396 : vector<1x2x128xf32> to vector<2x128xf32>
    %c1_202 = arith.constant 1 : index
    %c0_203 = arith.constant 0 : index
    %c0_204 = arith.constant 0 : index
    %398 = vector.load %arg12[%c1_202, %c0_203, %c0_204] : memref<2x2x128xf32, #tpu.memory_space<vmem>>, vector<1x2x128xf32>
    %399 = vector.shape_cast %398 : vector<1x2x128xf32> to vector<2x128xf32>
    %c0_205 = arith.constant 0 : index
    %c0_206 = arith.constant 0 : index
    %400 = vector.load %arg3[%c0_205, %c0_206] : memref<128x512xf32, #tpu.memory_space<vmem>>, vector<128x512xf32>
    %cst_207 = arith.constant dense<0.000000e+00> : vector<2x512xf32>
    %401 = tpu.matmul %397, %400, %cst_207 {dimension_numbers = #tpu.dot_dimension_numbers<[1], [0], [0], [1], [0, 0, 1, 1], [], []>} : vector<2x128xf32>, vector<128x512xf32>, vector<2x512xf32> -> vector<2x512xf32>
    %c0_208 = arith.constant 0 : index
    %c0_209 = arith.constant 0 : index
    %402 = vector.load %arg4[%c0_208, %c0_209] : memref<128x512xf32, #tpu.memory_space<vmem>>, vector<128x512xf32>
    %cst_210 = arith.constant dense<0.000000e+00> : vector<2x512xf32>
    %403 = tpu.matmul %389, %402, %cst_210 {dimension_numbers = #tpu.dot_dimension_numbers<[1], [0], [0], [1], [0, 0, 1, 1], [], []>} : vector<2x128xf32>, vector<128x512xf32>, vector<2x512xf32> -> vector<2x512xf32>
    %404 = arith.addf %403, %401 : vector<2x512xf32>
    %c0_211 = arith.constant 0 : index
    %c0_212 = arith.constant 0 : index
    %405 = vector.load %arg5[%c0_211, %c0_212] : memref<1x512xf32, #tpu.memory_space<vmem>>, vector<1x512xf32>
    %406 = vector.broadcast %405 : vector<1x512xf32> to vector<2x512xf32>
    %407 = arith.addf %404, %406 : vector<2x512xf32>
    %408 = vector.extract_strided_slice %407 {offsets = [0, 0], sizes = [2, 128], strides = [1, 1]} : vector<2x512xf32> to vector<2x128xf32>
    %409 = arith.negf %408 : vector<2x128xf32>
    %410 = math.exp %409 : vector<2x128xf32>
    %cst_213 = arith.constant 1.000000e+00 : f32
    %411 = vector.broadcast %cst_213 : f32 to vector<2x128xf32>
    %412 = arith.addf %411, %410 : vector<2x128xf32>
    %413 = arith.divf %411, %412 : vector<2x128xf32>
    %414 = vector.extract_strided_slice %407 {offsets = [0, 128], sizes = [2, 128], strides = [1, 1]} : vector<2x512xf32> to vector<2x128xf32>
    %415 = arith.negf %414 : vector<2x128xf32>
    %416 = math.exp %415 : vector<2x128xf32>
    %cst_214 = arith.constant 1.000000e+00 : f32
    %417 = vector.broadcast %cst_214 : f32 to vector<2x128xf32>
    %418 = arith.addf %417, %416 : vector<2x128xf32>
    %419 = arith.divf %417, %418 : vector<2x128xf32>
    %420 = vector.extract_strided_slice %407 {offsets = [0, 256], sizes = [2, 128], strides = [1, 1]} : vector<2x512xf32> to vector<2x128xf32>
    %421 = math.tanh %420 : vector<2x128xf32>
    %422 = vector.extract_strided_slice %407 {offsets = [0, 384], sizes = [2, 128], strides = [1, 1]} : vector<2x512xf32> to vector<2x128xf32>
    %423 = arith.negf %422 : vector<2x128xf32>
    %424 = math.exp %423 : vector<2x128xf32>
    %cst_215 = arith.constant 1.000000e+00 : f32
    %425 = vector.broadcast %cst_215 : f32 to vector<2x128xf32>
    %426 = arith.addf %425, %424 : vector<2x128xf32>
    %427 = arith.divf %425, %426 : vector<2x128xf32>
    %428 = arith.mulf %419, %399 : vector<2x128xf32>
    %429 = arith.mulf %413, %421 : vector<2x128xf32>
    %430 = arith.addf %428, %429 : vector<2x128xf32>
    %431 = math.tanh %430 : vector<2x128xf32>
    %432 = arith.mulf %427, %431 : vector<2x128xf32>
    %c1_216 = arith.constant 1 : index
    %c0_217 = arith.constant 0 : index
    %c0_218 = arith.constant 0 : index
    %433 = vector.load %arg11[%c1_216, %c0_217, %c0_218] : memref<2x2x128xf32, #tpu.memory_space<vmem>>, vector<1x2x128xf32>
    %434 = vector.shape_cast %433 : vector<1x2x128xf32> to vector<2x128xf32>
    %435 = vector.shape_cast %432 : vector<2x128xf32> to vector<1x2x128xf32>
    tpu.vector_store %arg11[%c1_216, %c0_217, %c0_218], %435 {strides = array<i32>} : memref<2x2x128xf32, #tpu.memory_space<vmem>>, vector<1x2x128xf32>,
    %c1_219 = arith.constant 1 : index
    %c0_220 = arith.constant 0 : index
    %c0_221 = arith.constant 0 : index
    %436 = vector.load %arg12[%c1_219, %c0_220, %c0_221] : memref<2x2x128xf32, #tpu.memory_space<vmem>>, vector<1x2x128xf32>
    %437 = vector.shape_cast %436 : vector<1x2x128xf32> to vector<2x128xf32>
    %438 = vector.shape_cast %430 : vector<2x128xf32> to vector<1x2x128xf32>
    tpu.vector_store %arg12[%c1_219, %c0_220, %c0_221], %438 {strides = array<i32>} : memref<2x2x128xf32, #tpu.memory_space<vmem>>, vector<1x2x128xf32>,
    %439 = arith.index_cast %c4_i32 : i32 to index
    %c0_222 = arith.constant 0 : index
    %c0_223 = arith.constant 0 : index
    %440 = vector.load %arg8[%439, %c0_222, %c0_223] : memref<8x2x128xf32, #tpu.memory_space<vmem>>, vector<1x2x128xf32>
    %441 = vector.shape_cast %440 : vector<1x2x128xf32> to vector<2x128xf32>
    %442 = vector.shape_cast %432 : vector<2x128xf32> to vector<1x2x128xf32>
    tpu.vector_store %arg8[%439, %c0_222, %c0_223], %442 {strides = array<i32>} : memref<8x2x128xf32, #tpu.memory_space<vmem>>, vector<1x2x128xf32>,
    %c5_i32 = arith.constant 5 : i32
    %443 = arith.index_cast %c5_i32 : i32 to index
    %c0_224 = arith.constant 0 : index
    %c0_225 = arith.constant 0 : index
    %444 = vector.load %arg1[%443, %c0_224, %c0_225] : memref<8x2x512xf32, #tpu.memory_space<vmem>>, vector<1x2x512xf32>
    %445 = vector.shape_cast %444 : vector<1x2x512xf32> to vector<2x512xf32>
    %c0_226 = arith.constant 0 : index
    %c0_227 = arith.constant 0 : index
    %c0_228 = arith.constant 0 : index
    %446 = vector.load %arg11[%c0_226, %c0_227, %c0_228] : memref<2x2x128xf32, #tpu.memory_space<vmem>>, vector<1x2x128xf32>
    %447 = vector.shape_cast %446 : vector<1x2x128xf32> to vector<2x128xf32>
    %c0_229 = arith.constant 0 : index
    %c0_230 = arith.constant 0 : index
    %c0_231 = arith.constant 0 : index
    %448 = vector.load %arg12[%c0_229, %c0_230, %c0_231] : memref<2x2x128xf32, #tpu.memory_space<vmem>>, vector<1x2x128xf32>
    %449 = vector.shape_cast %448 : vector<1x2x128xf32> to vector<2x128xf32>
    %c0_232 = arith.constant 0 : index
    %c0_233 = arith.constant 0 : index
    %450 = vector.load %arg2[%c0_232, %c0_233] : memref<128x512xf32, #tpu.memory_space<vmem>>, vector<128x512xf32>
    %cst_234 = arith.constant dense<0.000000e+00> : vector<2x512xf32>
    %451 = tpu.matmul %447, %450, %cst_234 {dimension_numbers = #tpu.dot_dimension_numbers<[1], [0], [0], [1], [0, 0, 1, 1], [], []>} : vector<2x128xf32>, vector<128x512xf32>, vector<2x512xf32> -> vector<2x512xf32>
    %452 = arith.addf %445, %451 : vector<2x512xf32>
    %453 = vector.extract_strided_slice %452 {offsets = [0, 0], sizes = [2, 128], strides = [1, 1]} : vector<2x512xf32> to vector<2x128xf32>
    %454 = arith.negf %453 : vector<2x128xf32>
    %455 = math.exp %454 : vector<2x128xf32>
    %cst_235 = arith.constant 1.000000e+00 : f32
    %456 = vector.broadcast %cst_235 : f32 to vector<2x128xf32>
    %457 = arith.addf %456, %455 : vector<2x128xf32>
    %458 = arith.divf %456, %457 : vector<2x128xf32>
    %459 = vector.extract_strided_slice %452 {offsets = [0, 128], sizes = [2, 128], strides = [1, 1]} : vector<2x512xf32> to vector<2x128xf32>
    %460 = arith.negf %459 : vector<2x128xf32>
    %461 = math.exp %460 : vector<2x128xf32>
    %cst_236 = arith.constant 1.000000e+00 : f32
    %462 = vector.broadcast %cst_236 : f32 to vector<2x128xf32>
    %463 = arith.addf %462, %461 : vector<2x128xf32>
    %464 = arith.divf %462, %463 : vector<2x128xf32>
    %465 = vector.extract_strided_slice %452 {offsets = [0, 256], sizes = [2, 128], strides = [1, 1]} : vector<2x512xf32> to vector<2x128xf32>
    %466 = math.tanh %465 : vector<2x128xf32>
    %467 = vector.extract_strided_slice %452 {offsets = [0, 384], sizes = [2, 128], strides = [1, 1]} : vector<2x512xf32> to vector<2x128xf32>
    %468 = arith.negf %467 : vector<2x128xf32>
    %469 = math.exp %468 : vector<2x128xf32>
    %cst_237 = arith.constant 1.000000e+00 : f32
    %470 = vector.broadcast %cst_237 : f32 to vector<2x128xf32>
    %471 = arith.addf %470, %469 : vector<2x128xf32>
    %472 = arith.divf %470, %471 : vector<2x128xf32>
    %473 = arith.mulf %464, %449 : vector<2x128xf32>
    %474 = arith.mulf %458, %466 : vector<2x128xf32>
    %475 = arith.addf %473, %474 : vector<2x128xf32>
    %476 = math.tanh %475 : vector<2x128xf32>
    %477 = arith.mulf %472, %476 : vector<2x128xf32>
    %c0_238 = arith.constant 0 : index
    %c0_239 = arith.constant 0 : index
    %c0_240 = arith.constant 0 : index
    %478 = vector.load %arg11[%c0_238, %c0_239, %c0_240] : memref<2x2x128xf32, #tpu.memory_space<vmem>>, vector<1x2x128xf32>
    %479 = vector.shape_cast %478 : vector<1x2x128xf32> to vector<2x128xf32>
    %480 = vector.shape_cast %477 : vector<2x128xf32> to vector<1x2x128xf32>
    tpu.vector_store %arg11[%c0_238, %c0_239, %c0_240], %480 {strides = array<i32>} : memref<2x2x128xf32, #tpu.memory_space<vmem>>, vector<1x2x128xf32>,
    %c0_241 = arith.constant 0 : index
    %c0_242 = arith.constant 0 : index
    %c0_243 = arith.constant 0 : index
    %481 = vector.load %arg12[%c0_241, %c0_242, %c0_243] : memref<2x2x128xf32, #tpu.memory_space<vmem>>, vector<1x2x128xf32>
    %482 = vector.shape_cast %481 : vector<1x2x128xf32> to vector<2x128xf32>
    %483 = vector.shape_cast %475 : vector<2x128xf32> to vector<1x2x128xf32>
    tpu.vector_store %arg12[%c0_241, %c0_242, %c0_243], %483 {strides = array<i32>} : memref<2x2x128xf32, #tpu.memory_space<vmem>>, vector<1x2x128xf32>,
    %c1_244 = arith.constant 1 : index
    %c0_245 = arith.constant 0 : index
    %c0_246 = arith.constant 0 : index
    %484 = vector.load %arg11[%c1_244, %c0_245, %c0_246] : memref<2x2x128xf32, #tpu.memory_space<vmem>>, vector<1x2x128xf32>
    %485 = vector.shape_cast %484 : vector<1x2x128xf32> to vector<2x128xf32>
    %c1_247 = arith.constant 1 : index
    %c0_248 = arith.constant 0 : index
    %c0_249 = arith.constant 0 : index
    %486 = vector.load %arg12[%c1_247, %c0_248, %c0_249] : memref<2x2x128xf32, #tpu.memory_space<vmem>>, vector<1x2x128xf32>
    %487 = vector.shape_cast %486 : vector<1x2x128xf32> to vector<2x128xf32>
    %c0_250 = arith.constant 0 : index
    %c0_251 = arith.constant 0 : index
    %488 = vector.load %arg3[%c0_250, %c0_251] : memref<128x512xf32, #tpu.memory_space<vmem>>, vector<128x512xf32>
    %cst_252 = arith.constant dense<0.000000e+00> : vector<2x512xf32>
    %489 = tpu.matmul %485, %488, %cst_252 {dimension_numbers = #tpu.dot_dimension_numbers<[1], [0], [0], [1], [0, 0, 1, 1], [], []>} : vector<2x128xf32>, vector<128x512xf32>, vector<2x512xf32> -> vector<2x512xf32>
    %c0_253 = arith.constant 0 : index
    %c0_254 = arith.constant 0 : index
    %490 = vector.load %arg4[%c0_253, %c0_254] : memref<128x512xf32, #tpu.memory_space<vmem>>, vector<128x512xf32>
    %cst_255 = arith.constant dense<0.000000e+00> : vector<2x512xf32>
    %491 = tpu.matmul %477, %490, %cst_255 {dimension_numbers = #tpu.dot_dimension_numbers<[1], [0], [0], [1], [0, 0, 1, 1], [], []>} : vector<2x128xf32>, vector<128x512xf32>, vector<2x512xf32> -> vector<2x512xf32>
    %492 = arith.addf %491, %489 : vector<2x512xf32>
    %c0_256 = arith.constant 0 : index
    %c0_257 = arith.constant 0 : index
    %493 = vector.load %arg5[%c0_256, %c0_257] : memref<1x512xf32, #tpu.memory_space<vmem>>, vector<1x512xf32>
    %494 = vector.broadcast %493 : vector<1x512xf32> to vector<2x512xf32>
    %495 = arith.addf %492, %494 : vector<2x512xf32>
    %496 = vector.extract_strided_slice %495 {offsets = [0, 0], sizes = [2, 128], strides = [1, 1]} : vector<2x512xf32> to vector<2x128xf32>
    %497 = arith.negf %496 : vector<2x128xf32>
    %498 = math.exp %497 : vector<2x128xf32>
    %cst_258 = arith.constant 1.000000e+00 : f32
    %499 = vector.broadcast %cst_258 : f32 to vector<2x128xf32>
    %500 = arith.addf %499, %498 : vector<2x128xf32>
    %501 = arith.divf %499, %500 : vector<2x128xf32>
    %502 = vector.extract_strided_slice %495 {offsets = [0, 128], sizes = [2, 128], strides = [1, 1]} : vector<2x512xf32> to vector<2x128xf32>
    %503 = arith.negf %502 : vector<2x128xf32>
    %504 = math.exp %503 : vector<2x128xf32>
    %cst_259 = arith.constant 1.000000e+00 : f32
    %505 = vector.broadcast %cst_259 : f32 to vector<2x128xf32>
    %506 = arith.addf %505, %504 : vector<2x128xf32>
    %507 = arith.divf %505, %506 : vector<2x128xf32>
    %508 = vector.extract_strided_slice %495 {offsets = [0, 256], sizes = [2, 128], strides = [1, 1]} : vector<2x512xf32> to vector<2x128xf32>
    %509 = math.tanh %508 : vector<2x128xf32>
    %510 = vector.extract_strided_slice %495 {offsets = [0, 384], sizes = [2, 128], strides = [1, 1]} : vector<2x512xf32> to vector<2x128xf32>
    %511 = arith.negf %510 : vector<2x128xf32>
    %512 = math.exp %511 : vector<2x128xf32>
    %cst_260 = arith.constant 1.000000e+00 : f32
    %513 = vector.broadcast %cst_260 : f32 to vector<2x128xf32>
    %514 = arith.addf %513, %512 : vector<2x128xf32>
    %515 = arith.divf %513, %514 : vector<2x128xf32>
    %516 = arith.mulf %507, %487 : vector<2x128xf32>
    %517 = arith.mulf %501, %509 : vector<2x128xf32>
    %518 = arith.addf %516, %517 : vector<2x128xf32>
    %519 = math.tanh %518 : vector<2x128xf32>
    %520 = arith.mulf %515, %519 : vector<2x128xf32>
    %c1_261 = arith.constant 1 : index
    %c0_262 = arith.constant 0 : index
    %c0_263 = arith.constant 0 : index
    %521 = vector.load %arg11[%c1_261, %c0_262, %c0_263] : memref<2x2x128xf32, #tpu.memory_space<vmem>>, vector<1x2x128xf32>
    %522 = vector.shape_cast %521 : vector<1x2x128xf32> to vector<2x128xf32>
    %523 = vector.shape_cast %520 : vector<2x128xf32> to vector<1x2x128xf32>
    tpu.vector_store %arg11[%c1_261, %c0_262, %c0_263], %523 {strides = array<i32>} : memref<2x2x128xf32, #tpu.memory_space<vmem>>, vector<1x2x128xf32>,
    %c1_264 = arith.constant 1 : index
    %c0_265 = arith.constant 0 : index
    %c0_266 = arith.constant 0 : index
    %524 = vector.load %arg12[%c1_264, %c0_265, %c0_266] : memref<2x2x128xf32, #tpu.memory_space<vmem>>, vector<1x2x128xf32>
    %525 = vector.shape_cast %524 : vector<1x2x128xf32> to vector<2x128xf32>
    %526 = vector.shape_cast %518 : vector<2x128xf32> to vector<1x2x128xf32>
    tpu.vector_store %arg12[%c1_264, %c0_265, %c0_266], %526 {strides = array<i32>} : memref<2x2x128xf32, #tpu.memory_space<vmem>>, vector<1x2x128xf32>,
    %527 = arith.index_cast %c5_i32 : i32 to index
    %c0_267 = arith.constant 0 : index
    %c0_268 = arith.constant 0 : index
    %528 = vector.load %arg8[%527, %c0_267, %c0_268] : memref<8x2x128xf32, #tpu.memory_space<vmem>>, vector<1x2x128xf32>
    %529 = vector.shape_cast %528 : vector<1x2x128xf32> to vector<2x128xf32>
    %530 = vector.shape_cast %520 : vector<2x128xf32> to vector<1x2x128xf32>
    tpu.vector_store %arg8[%527, %c0_267, %c0_268], %530 {strides = array<i32>} : memref<8x2x128xf32, #tpu.memory_space<vmem>>, vector<1x2x128xf32>,
    %c6_i32 = arith.constant 6 : i32
    %531 = arith.index_cast %c6_i32 : i32 to index
    %c0_269 = arith.constant 0 : index
    %c0_270 = arith.constant 0 : index
    %532 = vector.load %arg1[%531, %c0_269, %c0_270] : memref<8x2x512xf32, #tpu.memory_space<vmem>>, vector<1x2x512xf32>
    %533 = vector.shape_cast %532 : vector<1x2x512xf32> to vector<2x512xf32>
    %c0_271 = arith.constant 0 : index
    %c0_272 = arith.constant 0 : index
    %c0_273 = arith.constant 0 : index
    %534 = vector.load %arg11[%c0_271, %c0_272, %c0_273] : memref<2x2x128xf32, #tpu.memory_space<vmem>>, vector<1x2x128xf32>
    %535 = vector.shape_cast %534 : vector<1x2x128xf32> to vector<2x128xf32>
    %c0_274 = arith.constant 0 : index
    %c0_275 = arith.constant 0 : index
    %c0_276 = arith.constant 0 : index
    %536 = vector.load %arg12[%c0_274, %c0_275, %c0_276] : memref<2x2x128xf32, #tpu.memory_space<vmem>>, vector<1x2x128xf32>
    %537 = vector.shape_cast %536 : vector<1x2x128xf32> to vector<2x128xf32>
    %c0_277 = arith.constant 0 : index
    %c0_278 = arith.constant 0 : index
    %538 = vector.load %arg2[%c0_277, %c0_278] : memref<128x512xf32, #tpu.memory_space<vmem>>, vector<128x512xf32>
    %cst_279 = arith.constant dense<0.000000e+00> : vector<2x512xf32>
    %539 = tpu.matmul %535, %538, %cst_279 {dimension_numbers = #tpu.dot_dimension_numbers<[1], [0], [0], [1], [0, 0, 1, 1], [], []>} : vector<2x128xf32>, vector<128x512xf32>, vector<2x512xf32> -> vector<2x512xf32>
    %540 = arith.addf %533, %539 : vector<2x512xf32>
    %541 = vector.extract_strided_slice %540 {offsets = [0, 0], sizes = [2, 128], strides = [1, 1]} : vector<2x512xf32> to vector<2x128xf32>
    %542 = arith.negf %541 : vector<2x128xf32>
    %543 = math.exp %542 : vector<2x128xf32>
    %cst_280 = arith.constant 1.000000e+00 : f32
    %544 = vector.broadcast %cst_280 : f32 to vector<2x128xf32>
    %545 = arith.addf %544, %543 : vector<2x128xf32>
    %546 = arith.divf %544, %545 : vector<2x128xf32>
    %547 = vector.extract_strided_slice %540 {offsets = [0, 128], sizes = [2, 128], strides = [1, 1]} : vector<2x512xf32> to vector<2x128xf32>
    %548 = arith.negf %547 : vector<2x128xf32>
    %549 = math.exp %548 : vector<2x128xf32>
    %cst_281 = arith.constant 1.000000e+00 : f32
    %550 = vector.broadcast %cst_281 : f32 to vector<2x128xf32>
    %551 = arith.addf %550, %549 : vector<2x128xf32>
    %552 = arith.divf %550, %551 : vector<2x128xf32>
    %553 = vector.extract_strided_slice %540 {offsets = [0, 256], sizes = [2, 128], strides = [1, 1]} : vector<2x512xf32> to vector<2x128xf32>
    %554 = math.tanh %553 : vector<2x128xf32>
    %555 = vector.extract_strided_slice %540 {offsets = [0, 384], sizes = [2, 128], strides = [1, 1]} : vector<2x512xf32> to vector<2x128xf32>
    %556 = arith.negf %555 : vector<2x128xf32>
    %557 = math.exp %556 : vector<2x128xf32>
    %cst_282 = arith.constant 1.000000e+00 : f32
    %558 = vector.broadcast %cst_282 : f32 to vector<2x128xf32>
    %559 = arith.addf %558, %557 : vector<2x128xf32>
    %560 = arith.divf %558, %559 : vector<2x128xf32>
    %561 = arith.mulf %552, %537 : vector<2x128xf32>
    %562 = arith.mulf %546, %554 : vector<2x128xf32>
    %563 = arith.addf %561, %562 : vector<2x128xf32>
    %564 = math.tanh %563 : vector<2x128xf32>
    %565 = arith.mulf %560, %564 : vector<2x128xf32>
    %c0_283 = arith.constant 0 : index
    %c0_284 = arith.constant 0 : index
    %c0_285 = arith.constant 0 : index
    %566 = vector.load %arg11[%c0_283, %c0_284, %c0_285] : memref<2x2x128xf32, #tpu.memory_space<vmem>>, vector<1x2x128xf32>
    %567 = vector.shape_cast %566 : vector<1x2x128xf32> to vector<2x128xf32>
    %568 = vector.shape_cast %565 : vector<2x128xf32> to vector<1x2x128xf32>
    tpu.vector_store %arg11[%c0_283, %c0_284, %c0_285], %568 {strides = array<i32>} : memref<2x2x128xf32, #tpu.memory_space<vmem>>, vector<1x2x128xf32>,
    %c0_286 = arith.constant 0 : index
    %c0_287 = arith.constant 0 : index
    %c0_288 = arith.constant 0 : index
    %569 = vector.load %arg12[%c0_286, %c0_287, %c0_288] : memref<2x2x128xf32, #tpu.memory_space<vmem>>, vector<1x2x128xf32>
    %570 = vector.shape_cast %569 : vector<1x2x128xf32> to vector<2x128xf32>
    %571 = vector.shape_cast %563 : vector<2x128xf32> to vector<1x2x128xf32>
    tpu.vector_store %arg12[%c0_286, %c0_287, %c0_288], %571 {strides = array<i32>} : memref<2x2x128xf32, #tpu.memory_space<vmem>>, vector<1x2x128xf32>,
    %c1_289 = arith.constant 1 : index
    %c0_290 = arith.constant 0 : index
    %c0_291 = arith.constant 0 : index
    %572 = vector.load %arg11[%c1_289, %c0_290, %c0_291] : memref<2x2x128xf32, #tpu.memory_space<vmem>>, vector<1x2x128xf32>
    %573 = vector.shape_cast %572 : vector<1x2x128xf32> to vector<2x128xf32>
    %c1_292 = arith.constant 1 : index
    %c0_293 = arith.constant 0 : index
    %c0_294 = arith.constant 0 : index
    %574 = vector.load %arg12[%c1_292, %c0_293, %c0_294] : memref<2x2x128xf32, #tpu.memory_space<vmem>>, vector<1x2x128xf32>
    %575 = vector.shape_cast %574 : vector<1x2x128xf32> to vector<2x128xf32>
    %c0_295 = arith.constant 0 : index
    %c0_296 = arith.constant 0 : index
    %576 = vector.load %arg3[%c0_295, %c0_296] : memref<128x512xf32, #tpu.memory_space<vmem>>, vector<128x512xf32>
    %cst_297 = arith.constant dense<0.000000e+00> : vector<2x512xf32>
    %577 = tpu.matmul %573, %576, %cst_297 {dimension_numbers = #tpu.dot_dimension_numbers<[1], [0], [0], [1], [0, 0, 1, 1], [], []>} : vector<2x128xf32>, vector<128x512xf32>, vector<2x512xf32> -> vector<2x512xf32>
    %c0_298 = arith.constant 0 : index
    %c0_299 = arith.constant 0 : index
    %578 = vector.load %arg4[%c0_298, %c0_299] : memref<128x512xf32, #tpu.memory_space<vmem>>, vector<128x512xf32>
    %cst_300 = arith.constant dense<0.000000e+00> : vector<2x512xf32>
    %579 = tpu.matmul %565, %578, %cst_300 {dimension_numbers = #tpu.dot_dimension_numbers<[1], [0], [0], [1], [0, 0, 1, 1], [], []>} : vector<2x128xf32>, vector<128x512xf32>, vector<2x512xf32> -> vector<2x512xf32>
    %580 = arith.addf %579, %577 : vector<2x512xf32>
    %c0_301 = arith.constant 0 : index
    %c0_302 = arith.constant 0 : index
    %581 = vector.load %arg5[%c0_301, %c0_302] : memref<1x512xf32, #tpu.memory_space<vmem>>, vector<1x512xf32>
    %582 = vector.broadcast %581 : vector<1x512xf32> to vector<2x512xf32>
    %583 = arith.addf %580, %582 : vector<2x512xf32>
    %584 = vector.extract_strided_slice %583 {offsets = [0, 0], sizes = [2, 128], strides = [1, 1]} : vector<2x512xf32> to vector<2x128xf32>
    %585 = arith.negf %584 : vector<2x128xf32>
    %586 = math.exp %585 : vector<2x128xf32>
    %cst_303 = arith.constant 1.000000e+00 : f32
    %587 = vector.broadcast %cst_303 : f32 to vector<2x128xf32>
    %588 = arith.addf %587, %586 : vector<2x128xf32>
    %589 = arith.divf %587, %588 : vector<2x128xf32>
    %590 = vector.extract_strided_slice %583 {offsets = [0, 128], sizes = [2, 128], strides = [1, 1]} : vector<2x512xf32> to vector<2x128xf32>
    %591 = arith.negf %590 : vector<2x128xf32>
    %592 = math.exp %591 : vector<2x128xf32>
    %cst_304 = arith.constant 1.000000e+00 : f32
    %593 = vector.broadcast %cst_304 : f32 to vector<2x128xf32>
    %594 = arith.addf %593, %592 : vector<2x128xf32>
    %595 = arith.divf %593, %594 : vector<2x128xf32>
    %596 = vector.extract_strided_slice %583 {offsets = [0, 256], sizes = [2, 128], strides = [1, 1]} : vector<2x512xf32> to vector<2x128xf32>
    %597 = math.tanh %596 : vector<2x128xf32>
    %598 = vector.extract_strided_slice %583 {offsets = [0, 384], sizes = [2, 128], strides = [1, 1]} : vector<2x512xf32> to vector<2x128xf32>
    %599 = arith.negf %598 : vector<2x128xf32>
    %600 = math.exp %599 : vector<2x128xf32>
    %cst_305 = arith.constant 1.000000e+00 : f32
    %601 = vector.broadcast %cst_305 : f32 to vector<2x128xf32>
    %602 = arith.addf %601, %600 : vector<2x128xf32>
    %603 = arith.divf %601, %602 : vector<2x128xf32>
    %604 = arith.mulf %595, %575 : vector<2x128xf32>
    %605 = arith.mulf %589, %597 : vector<2x128xf32>
    %606 = arith.addf %604, %605 : vector<2x128xf32>
    %607 = math.tanh %606 : vector<2x128xf32>
    %608 = arith.mulf %603, %607 : vector<2x128xf32>
    %c1_306 = arith.constant 1 : index
    %c0_307 = arith.constant 0 : index
    %c0_308 = arith.constant 0 : index
    %609 = vector.load %arg11[%c1_306, %c0_307, %c0_308] : memref<2x2x128xf32, #tpu.memory_space<vmem>>, vector<1x2x128xf32>
    %610 = vector.shape_cast %609 : vector<1x2x128xf32> to vector<2x128xf32>
    %611 = vector.shape_cast %608 : vector<2x128xf32> to vector<1x2x128xf32>
    tpu.vector_store %arg11[%c1_306, %c0_307, %c0_308], %611 {strides = array<i32>} : memref<2x2x128xf32, #tpu.memory_space<vmem>>, vector<1x2x128xf32>,
    %c1_309 = arith.constant 1 : index
    %c0_310 = arith.constant 0 : index
    %c0_311 = arith.constant 0 : index
    %612 = vector.load %arg12[%c1_309, %c0_310, %c0_311] : memref<2x2x128xf32, #tpu.memory_space<vmem>>, vector<1x2x128xf32>
    %613 = vector.shape_cast %612 : vector<1x2x128xf32> to vector<2x128xf32>
    %614 = vector.shape_cast %606 : vector<2x128xf32> to vector<1x2x128xf32>
    tpu.vector_store %arg12[%c1_309, %c0_310, %c0_311], %614 {strides = array<i32>} : memref<2x2x128xf32, #tpu.memory_space<vmem>>, vector<1x2x128xf32>,
    %615 = arith.index_cast %c6_i32 : i32 to index
    %c0_312 = arith.constant 0 : index
    %c0_313 = arith.constant 0 : index
    %616 = vector.load %arg8[%615, %c0_312, %c0_313] : memref<8x2x128xf32, #tpu.memory_space<vmem>>, vector<1x2x128xf32>
    %617 = vector.shape_cast %616 : vector<1x2x128xf32> to vector<2x128xf32>
    %618 = vector.shape_cast %608 : vector<2x128xf32> to vector<1x2x128xf32>
    tpu.vector_store %arg8[%615, %c0_312, %c0_313], %618 {strides = array<i32>} : memref<8x2x128xf32, #tpu.memory_space<vmem>>, vector<1x2x128xf32>,
    %c7_i32 = arith.constant 7 : i32
    %619 = arith.index_cast %c7_i32 : i32 to index
    %c0_314 = arith.constant 0 : index
    %c0_315 = arith.constant 0 : index
    %620 = vector.load %arg1[%619, %c0_314, %c0_315] : memref<8x2x512xf32, #tpu.memory_space<vmem>>, vector<1x2x512xf32>
    %621 = vector.shape_cast %620 : vector<1x2x512xf32> to vector<2x512xf32>
    %c0_316 = arith.constant 0 : index
    %c0_317 = arith.constant 0 : index
    %c0_318 = arith.constant 0 : index
    %622 = vector.load %arg11[%c0_316, %c0_317, %c0_318] : memref<2x2x128xf32, #tpu.memory_space<vmem>>, vector<1x2x128xf32>
    %623 = vector.shape_cast %622 : vector<1x2x128xf32> to vector<2x128xf32>
    %c0_319 = arith.constant 0 : index
    %c0_320 = arith.constant 0 : index
    %c0_321 = arith.constant 0 : index
    %624 = vector.load %arg12[%c0_319, %c0_320, %c0_321] : memref<2x2x128xf32, #tpu.memory_space<vmem>>, vector<1x2x128xf32>
    %625 = vector.shape_cast %624 : vector<1x2x128xf32> to vector<2x128xf32>
    %c0_322 = arith.constant 0 : index
    %c0_323 = arith.constant 0 : index
    %626 = vector.load %arg2[%c0_322, %c0_323] : memref<128x512xf32, #tpu.memory_space<vmem>>, vector<128x512xf32>
    %cst_324 = arith.constant dense<0.000000e+00> : vector<2x512xf32>
    %627 = tpu.matmul %623, %626, %cst_324 {dimension_numbers = #tpu.dot_dimension_numbers<[1], [0], [0], [1], [0, 0, 1, 1], [], []>} : vector<2x128xf32>, vector<128x512xf32>, vector<2x512xf32> -> vector<2x512xf32>
    %628 = arith.addf %621, %627 : vector<2x512xf32>
    %629 = vector.extract_strided_slice %628 {offsets = [0, 0], sizes = [2, 128], strides = [1, 1]} : vector<2x512xf32> to vector<2x128xf32>
    %630 = arith.negf %629 : vector<2x128xf32>
    %631 = math.exp %630 : vector<2x128xf32>
    %cst_325 = arith.constant 1.000000e+00 : f32
    %632 = vector.broadcast %cst_325 : f32 to vector<2x128xf32>
    %633 = arith.addf %632, %631 : vector<2x128xf32>
    %634 = arith.divf %632, %633 : vector<2x128xf32>
    %635 = vector.extract_strided_slice %628 {offsets = [0, 128], sizes = [2, 128], strides = [1, 1]} : vector<2x512xf32> to vector<2x128xf32>
    %636 = arith.negf %635 : vector<2x128xf32>
    %637 = math.exp %636 : vector<2x128xf32>
    %cst_326 = arith.constant 1.000000e+00 : f32
    %638 = vector.broadcast %cst_326 : f32 to vector<2x128xf32>
    %639 = arith.addf %638, %637 : vector<2x128xf32>
    %640 = arith.divf %638, %639 : vector<2x128xf32>
    %641 = vector.extract_strided_slice %628 {offsets = [0, 256], sizes = [2, 128], strides = [1, 1]} : vector<2x512xf32> to vector<2x128xf32>
    %642 = math.tanh %641 : vector<2x128xf32>
    %643 = vector.extract_strided_slice %628 {offsets = [0, 384], sizes = [2, 128], strides = [1, 1]} : vector<2x512xf32> to vector<2x128xf32>
    %644 = arith.negf %643 : vector<2x128xf32>
    %645 = math.exp %644 : vector<2x128xf32>
    %cst_327 = arith.constant 1.000000e+00 : f32
    %646 = vector.broadcast %cst_327 : f32 to vector<2x128xf32>
    %647 = arith.addf %646, %645 : vector<2x128xf32>
    %648 = arith.divf %646, %647 : vector<2x128xf32>
    %649 = arith.mulf %640, %625 : vector<2x128xf32>
    %650 = arith.mulf %634, %642 : vector<2x128xf32>
    %651 = arith.addf %649, %650 : vector<2x128xf32>
    %652 = math.tanh %651 : vector<2x128xf32>
    %653 = arith.mulf %648, %652 : vector<2x128xf32>
    %c0_328 = arith.constant 0 : index
    %c0_329 = arith.constant 0 : index
    %c0_330 = arith.constant 0 : index
    %654 = vector.load %arg11[%c0_328, %c0_329, %c0_330] : memref<2x2x128xf32, #tpu.memory_space<vmem>>, vector<1x2x128xf32>
    %655 = vector.shape_cast %654 : vector<1x2x128xf32> to vector<2x128xf32>
    %656 = vector.shape_cast %653 : vector<2x128xf32> to vector<1x2x128xf32>
    tpu.vector_store %arg11[%c0_328, %c0_329, %c0_330], %656 {strides = array<i32>} : memref<2x2x128xf32, #tpu.memory_space<vmem>>, vector<1x2x128xf32>,
    %c0_331 = arith.constant 0 : index
    %c0_332 = arith.constant 0 : index
    %c0_333 = arith.constant 0 : index
    %657 = vector.load %arg12[%c0_331, %c0_332, %c0_333] : memref<2x2x128xf32, #tpu.memory_space<vmem>>, vector<1x2x128xf32>
    %658 = vector.shape_cast %657 : vector<1x2x128xf32> to vector<2x128xf32>
    %659 = vector.shape_cast %651 : vector<2x128xf32> to vector<1x2x128xf32>
    tpu.vector_store %arg12[%c0_331, %c0_332, %c0_333], %659 {strides = array<i32>} : memref<2x2x128xf32, #tpu.memory_space<vmem>>, vector<1x2x128xf32>,
    %c1_334 = arith.constant 1 : index
    %c0_335 = arith.constant 0 : index
    %c0_336 = arith.constant 0 : index
    %660 = vector.load %arg11[%c1_334, %c0_335, %c0_336] : memref<2x2x128xf32, #tpu.memory_space<vmem>>, vector<1x2x128xf32>
    %661 = vector.shape_cast %660 : vector<1x2x128xf32> to vector<2x128xf32>
    %c1_337 = arith.constant 1 : index
    %c0_338 = arith.constant 0 : index
    %c0_339 = arith.constant 0 : index
    %662 = vector.load %arg12[%c1_337, %c0_338, %c0_339] : memref<2x2x128xf32, #tpu.memory_space<vmem>>, vector<1x2x128xf32>
    %663 = vector.shape_cast %662 : vector<1x2x128xf32> to vector<2x128xf32>
    %c0_340 = arith.constant 0 : index
    %c0_341 = arith.constant 0 : index
    %664 = vector.load %arg3[%c0_340, %c0_341] : memref<128x512xf32, #tpu.memory_space<vmem>>, vector<128x512xf32>
    %cst_342 = arith.constant dense<0.000000e+00> : vector<2x512xf32>
    %665 = tpu.matmul %661, %664, %cst_342 {dimension_numbers = #tpu.dot_dimension_numbers<[1], [0], [0], [1], [0, 0, 1, 1], [], []>} : vector<2x128xf32>, vector<128x512xf32>, vector<2x512xf32> -> vector<2x512xf32>
    %c0_343 = arith.constant 0 : index
    %c0_344 = arith.constant 0 : index
    %666 = vector.load %arg4[%c0_343, %c0_344] : memref<128x512xf32, #tpu.memory_space<vmem>>, vector<128x512xf32>
    %cst_345 = arith.constant dense<0.000000e+00> : vector<2x512xf32>
    %667 = tpu.matmul %653, %666, %cst_345 {dimension_numbers = #tpu.dot_dimension_numbers<[1], [0], [0], [1], [0, 0, 1, 1], [], []>} : vector<2x128xf32>, vector<128x512xf32>, vector<2x512xf32> -> vector<2x512xf32>
    %668 = arith.addf %667, %665 : vector<2x512xf32>
    %c0_346 = arith.constant 0 : index
    %c0_347 = arith.constant 0 : index
    %669 = vector.load %arg5[%c0_346, %c0_347] : memref<1x512xf32, #tpu.memory_space<vmem>>, vector<1x512xf32>
    %670 = vector.broadcast %669 : vector<1x512xf32> to vector<2x512xf32>
    %671 = arith.addf %668, %670 : vector<2x512xf32>
    %672 = vector.extract_strided_slice %671 {offsets = [0, 0], sizes = [2, 128], strides = [1, 1]} : vector<2x512xf32> to vector<2x128xf32>
    %673 = arith.negf %672 : vector<2x128xf32>
    %674 = math.exp %673 : vector<2x128xf32>
    %cst_348 = arith.constant 1.000000e+00 : f32
    %675 = vector.broadcast %cst_348 : f32 to vector<2x128xf32>
    %676 = arith.addf %675, %674 : vector<2x128xf32>
    %677 = arith.divf %675, %676 : vector<2x128xf32>
    %678 = vector.extract_strided_slice %671 {offsets = [0, 128], sizes = [2, 128], strides = [1, 1]} : vector<2x512xf32> to vector<2x128xf32>
    %679 = arith.negf %678 : vector<2x128xf32>
    %680 = math.exp %679 : vector<2x128xf32>
    %cst_349 = arith.constant 1.000000e+00 : f32
    %681 = vector.broadcast %cst_349 : f32 to vector<2x128xf32>
    %682 = arith.addf %681, %680 : vector<2x128xf32>
    %683 = arith.divf %681, %682 : vector<2x128xf32>
    %684 = vector.extract_strided_slice %671 {offsets = [0, 256], sizes = [2, 128], strides = [1, 1]} : vector<2x512xf32> to vector<2x128xf32>
    %685 = math.tanh %684 : vector<2x128xf32>
    %686 = vector.extract_strided_slice %671 {offsets = [0, 384], sizes = [2, 128], strides = [1, 1]} : vector<2x512xf32> to vector<2x128xf32>
    %687 = arith.negf %686 : vector<2x128xf32>
    %688 = math.exp %687 : vector<2x128xf32>
    %cst_350 = arith.constant 1.000000e+00 : f32
    %689 = vector.broadcast %cst_350 : f32 to vector<2x128xf32>
    %690 = arith.addf %689, %688 : vector<2x128xf32>
    %691 = arith.divf %689, %690 : vector<2x128xf32>
    %692 = arith.mulf %683, %663 : vector<2x128xf32>
    %693 = arith.mulf %677, %685 : vector<2x128xf32>
    %694 = arith.addf %692, %693 : vector<2x128xf32>
    %695 = math.tanh %694 : vector<2x128xf32>
    %696 = arith.mulf %691, %695 : vector<2x128xf32>
    %c1_351 = arith.constant 1 : index
    %c0_352 = arith.constant 0 : index
    %c0_353 = arith.constant 0 : index
    %697 = vector.load %arg11[%c1_351, %c0_352, %c0_353] : memref<2x2x128xf32, #tpu.memory_space<vmem>>, vector<1x2x128xf32>
    %698 = vector.shape_cast %697 : vector<1x2x128xf32> to vector<2x128xf32>
    %699 = vector.shape_cast %696 : vector<2x128xf32> to vector<1x2x128xf32>
    tpu.vector_store %arg11[%c1_351, %c0_352, %c0_353], %699 {strides = array<i32>} : memref<2x2x128xf32, #tpu.memory_space<vmem>>, vector<1x2x128xf32>,
    %c1_354 = arith.constant 1 : index
    %c0_355 = arith.constant 0 : index
    %c0_356 = arith.constant 0 : index
    %700 = vector.load %arg12[%c1_354, %c0_355, %c0_356] : memref<2x2x128xf32, #tpu.memory_space<vmem>>, vector<1x2x128xf32>
    %701 = vector.shape_cast %700 : vector<1x2x128xf32> to vector<2x128xf32>
    %702 = vector.shape_cast %694 : vector<2x128xf32> to vector<1x2x128xf32>
    tpu.vector_store %arg12[%c1_354, %c0_355, %c0_356], %702 {strides = array<i32>} : memref<2x2x128xf32, #tpu.memory_space<vmem>>, vector<1x2x128xf32>,
    %703 = arith.index_cast %c7_i32 : i32 to index
    %c0_357 = arith.constant 0 : index
    %c0_358 = arith.constant 0 : index
    %704 = vector.load %arg8[%703, %c0_357, %c0_358] : memref<8x2x128xf32, #tpu.memory_space<vmem>>, vector<1x2x128xf32>
    %705 = vector.shape_cast %704 : vector<1x2x128xf32> to vector<2x128xf32>
    %706 = vector.shape_cast %696 : vector<2x128xf32> to vector<1x2x128xf32>
    tpu.vector_store %arg8[%703, %c0_357, %c0_358], %706 {strides = array<i32>} : memref<8x2x128xf32, #tpu.memory_space<vmem>>, vector<1x2x128xf32>,
    %c8_i32 = arith.constant 8 : i32
    %c0_i32_359 = arith.constant 0 : i32
    %707 = arith.cmpi eq, %arg0, %c0_i32_359 : i32
    %708 = arith.extui %707 : i1 to i32
    %c0_i32_360 = arith.constant 0 : i32
    %709 = arith.cmpi ne, %708, %c0_i32_360 : i32
    scf.if %709 {
      %c0_361 = arith.constant 0 : index
      %c0_362 = arith.constant 0 : index
      %c0_363 = arith.constant 0 : index
      %710 = vector.load %arg11[%c0_361, %c0_362, %c0_363] : memref<2x2x128xf32, #tpu.memory_space<vmem>>, vector<2x2x128xf32>
      %c0_364 = arith.constant 0 : index
      %c0_365 = arith.constant 0 : index
      %c0_366 = arith.constant 0 : index
      %711 = vector.load %arg9[%c0_364, %c0_365, %c0_366] : memref<2x2x128xf32, #tpu.memory_space<vmem>>, vector<2x2x128xf32>
      tpu.vector_store %arg9[%c0_364, %c0_365, %c0_366], %710 {strides = array<i32>} : memref<2x2x128xf32, #tpu.memory_space<vmem>>, vector<2x2x128xf32>,
      %c0_367 = arith.constant 0 : index
      %c0_368 = arith.constant 0 : index
      %c0_369 = arith.constant 0 : index
      %712 = vector.load %arg12[%c0_367, %c0_368, %c0_369] : memref<2x2x128xf32, #tpu.memory_space<vmem>>, vector<2x2x128xf32>
      %c0_370 = arith.constant 0 : index
      %c0_371 = arith.constant 0 : index
      %c0_372 = arith.constant 0 : index
      %713 = vector.load %arg10[%c0_370, %c0_371, %c0_372] : memref<2x2x128xf32, #tpu.memory_space<vmem>>, vector<2x2x128xf32>
      tpu.vector_store %arg10[%c0_370, %c0_371, %c0_372], %712 {strides = array<i32>} : memref<2x2x128xf32, #tpu.memory_space<vmem>>, vector<2x2x128xf32>,
    } else {
    }
    return
  }
  func.func @transform_0(%arg0: i32) -> (i32, i32, i32) {
    %c0_i32 = arith.constant 0 : i32
    %c0_i32_0 = arith.constant 0 : i32
    %c0_i32_1 = arith.constant 0 : i32
    return %arg0, %c0_i32, %c0_i32_0 : i32, i32, i32
  }
  func.func @transform_1(%arg0: i32) -> (i32, i32) {
    %c0_i32 = arith.constant 0 : i32
    %c0_i32_0 = arith.constant 0 : i32
    %c0_i32_1 = arith.constant 0 : i32
    return %c0_i32, %c0_i32_0 : i32, i32
  }
  func.func @transform_2(%arg0: i32) -> (i32, i32) {
    %c0_i32 = arith.constant 0 : i32
    %c0_i32_0 = arith.constant 0 : i32
    %c0_i32_1 = arith.constant 0 : i32
    return %c0_i32, %c0_i32_0 : i32, i32
  }
  func.func @transform_3(%arg0: i32) -> (i32, i32) {
    %c0_i32 = arith.constant 0 : i32
    %c0_i32_0 = arith.constant 0 : i32
    %c0_i32_1 = arith.constant 0 : i32
    return %c0_i32, %c0_i32_0 : i32, i32
  }
  func.func @transform_4(%arg0: i32) -> (i32, i32) {
    %c0_i32 = arith.constant 0 : i32
    %c0_i32_0 = arith.constant 0 : i32
    %c0_i32_1 = arith.constant 0 : i32
    return %c0_i32, %c0_i32_0 : i32, i32
  }
  func.func @transform_5(%arg0: i32) -> (i32, i32, i32) {
    %c0_i32 = arith.constant 0 : i32
    %c0_i32_0 = arith.constant 0 : i32
    %c0_i32_1 = arith.constant 0 : i32
    %c0_i32_2 = arith.constant 0 : i32
    return %c0_i32, %c0_i32_0, %c0_i32_1 : i32, i32, i32
  }
  func.func @transform_6(%arg0: i32) -> (i32, i32, i32) {
    %c0_i32 = arith.constant 0 : i32
    %c0_i32_0 = arith.constant 0 : i32
    %c0_i32_1 = arith.constant 0 : i32
    %c0_i32_2 = arith.constant 0 : i32
    return %c0_i32, %c0_i32_0, %c0_i32_1 : i32, i32, i32
  }
  func.func @transform_7(%arg0: i32) -> (i32, i32, i32) {
    %c0_i32 = arith.constant 0 : i32
    %c0_i32_0 = arith.constant 0 : i32
    %c0_i32_1 = arith.constant 0 : i32
    return %arg0, %c0_i32, %c0_i32_0 : i32, i32, i32
  }
  func.func @transform_8(%arg0: i32) -> (i32, i32, i32) {
    %c0_i32 = arith.constant 0 : i32
    %c0_i32_0 = arith.constant 0 : i32
    %c0_i32_1 = arith.constant 0 : i32
    %c0_i32_2 = arith.constant 0 : i32
    return %c0_i32, %c0_i32_0, %c0_i32_1 : i32, i32, i32
  }
  func.func @transform_9(%arg0: i32) -> (i32, i32, i32) {
    %c0_i32 = arith.constant 0 : i32
    %c0_i32_0 = arith.constant 0 : i32
    %c0_i32_1 = arith.constant 0 : i32
    %c0_i32_2 = arith.constant 0 : i32
    return %c0_i32, %c0_i32_0, %c0_i32_1 : i32, i32, i32
  }
}

</mosaic_0001>

<bundles_post_ra>
// kernel: tpu_custom_call.1
= control target key start
LH: loop header
LB: loop body
LE: loop exit
PB: predicated region body
PF: predicated region fallthrough
CT: control target
= control target key end

     0   :  { %15 = vsyncpa [#allocation5], 0  ;;  %s9839_s0 = inlined_call_operand.hbm [shape: f32[8,2,512], index: 0, kind: input, shape index: {}]   ;;  %s9840_s1 = inlined_call_operand.hbm [shape: f32[128,512], index: 1, kind: input, shape index: {}]   ;;  %s9841_s2 = inlined_call_operand.hbm [shape: f32[128,512], index: 2, kind: input, shape index: {}]   ;;  %s9842_s3 = inlined_call_operand.hbm [shape: f32[128,512], index: 3, kind: input, shape index: {}]   ;;  %s9843_s4 = inlined_call_operand.vmem [shape: f32[1,512], index: 4, kind: input, shape index: {}]   ;;  %s9844_s5 = inlined_call_operand.vmem [shape: f32[2,2,128], index: 5, kind: input, shape index: {}]   ;;  %s9845_s6 = inlined_call_operand.hbm [shape: f32[2,2,128], index: 6, kind: input, shape index: {}]   ;;  %s9846_s7 = inlined_call_operand.hbm [shape: f32[8,2,128], index: 7, kind: output, shape index: {0}]   ;;  %s9847_s8 = inlined_call_operand.hbm [shape: f32[2,2,128], index: 8, kind: output, shape index: {1}]   ;;  %s9848_s9 = inlined_call_operand.hbm [shape: f32[2,2,128], index: 9, kind: output, shape index: {2}]  }
   0x1   :  { %16 = vsyncpa [#allocation8], 0 }
   0x2   :  { %17 = vsyncpa [#allocation11], 0 }
   0x3   :  { %18 = vsyncpa [#allocation6], 0 }
   0x4   :  { %19 = vsyncpa [#allocation15], 0  ;;  %s6533_s30 = smov [#allocation7]  }
   0x5   :  { %s37_s10 = sshll.u32 %s6533_s30, 4  ;;  %s38_s10 = int_to_ptr.vmem [resolvable:$true] %s37_s10 }
   0x6   :  { %s6371_s11 = scalar_lea.vmem %s38_s10, 8192  ;;  %p6376_p1 = scmp.lt.s32.totalorder %s38_s10, %s38_s10 }
   0x7   :  { %p6372_p0 = scmp.ne.s32.totalorder %s38_s10, %s6371_s11  ;;  %p6377_p2 = scmp.lt.s32.totalorder %s6371_s11, %s6371_s11 }
   0x9   :  { %p6378_p3 = por %p6377_p2, %p6376_p1 }
   0xb   :  { %p6379_p4 = pnand %p6378_p3, %p6372_p0 }
   0xd   :  { %6382 = shalt.err (!%p6379_p4)
}
   0xe   :  { %s6534_s12 = smov 512   ;;  %s6535_s13 = smov 32  }
   0xf   :  { %43 = dma.hbm_to_vmem [thread:$0]  %s9840_s1, 8192, %s38_s10, [#allocation8], %s6534_s12, %s6534_s12, %s6535_s13  }
  0x10   :  { %s6536_s16 = smov [#allocation10]   ;;  %s6537_s18 = smov [#allocation4]  }
  0x11   :  { %s61_s17 = sshll.u32 %s6536_s16, 4  ;;  %s25_s19 = sshll.u32 %s6537_s18, 4  ;;  %s62_s17 = int_to_ptr.vmem [resolvable:$true] %s61_s17  ;;  %s26_s19 = int_to_ptr.vmem [resolvable:$true] %s25_s19 }
  0x12   :  { %s6391_s20 = scalar_lea.vmem %s62_s17, 8192  ;;  %p6396_p6 = scmp.lt.s32.totalorder %s62_s17, %s62_s17 }
  0x13   :  { %p6392_p5 = scmp.ne.s32.totalorder %s62_s17, %s6391_s20  ;;  %p6397_p7 = scmp.lt.s32.totalorder %s6391_s20, %s6391_s20 }
  0x15   :  { %p6398_p8 = por %p6397_p7, %p6396_p6 }
  0x17   :  { %p6399_p9 = pnand %p6398_p8, %p6392_p5 }
  0x19   :  { %6402 = shalt.err (!%p6399_p9)
}
  0x1a   :  { %67 = dma.hbm_to_vmem [thread:$0]  %s9842_s3, 8192, %s62_s17, [#allocation11], %s6534_s12, %s6534_s12, %s6535_s13  }
  0x1b   :  { %s6411_s1 = scalar_lea.vmem %s26_s19, 1024  ;;  %p6416_p11 = scmp.lt.s32.totalorder %s26_s19, %s26_s19 }
  0x1c   :  { %p6412_p10 = scmp.ne.s32.totalorder %s26_s19, %s6411_s1  ;;  %p6417_p12 = scmp.lt.s32.totalorder %s6411_s1, %s6411_s1 }
  0x1e   :  { %p6418_p13 = por %p6417_p12, %p6416_p11 }
  0x20   :  { %p6419_p0 = pnand %p6418_p13, %p6412_p10 }
  0x22   :  { %6422 = shalt.err (!%p6419_p0)
}
  0x23   :  { %s6538_s23 = smov 128   ;;  %s6539_s24 = smov 8  }
  0x24   :  { %31 = dma.hbm_to_vmem [thread:$0]  %s9839_s0, 1024, %s26_s19, [#allocation5], %s6538_s23, %s6538_s23, %s6539_s24  }
  0x25   :  { %s6540_s27 = smov [#allocation9]   ;;  %s6541_s29 = smov [#allocation12]  }
  0x26   :  { %s49_s28 = sshll.u32 %s6540_s27, 4  ;;  %s77_s30 = sshll.u32 %s6541_s29, 4  ;;  %s50_s28 = int_to_ptr.vmem [resolvable:$true] %s49_s28  ;;  %s78_s30 = int_to_ptr.vmem [resolvable:$true] %s77_s30 }
  0x27   :  { %s6431_s3 = scalar_lea.vmem %s50_s28, 8192  ;;  %p6436_p2 = scmp.lt.s32.totalorder %s50_s28, %s50_s28 }
  0x28   :  { %p6432_p1 = scmp.ne.s32.totalorder %s50_s28, %s6431_s3  ;;  %p6437_p3 = scmp.lt.s32.totalorder %s6431_s3, %s6431_s3 }
  0x2a   :  { %p6438_p4 = por %p6437_p3, %p6436_p2 }
  0x2c   :  { %p6439_p5 = pnand %p6438_p4, %p6432_p1 }
  0x2e   :  { %6442 = shalt.err (!%p6439_p5)
}
  0x2f   :  { %55 = dma.hbm_to_vmem [thread:$0]  %s9841_s2, 8192, %s50_s28, [#allocation8], %s6534_s12, %s6534_s12, %s6535_s13  }
  0x30   :  { %s6451_s0 = scalar_lea.vmem %s78_s30, 64  ;;  %p6456_p7 = scmp.lt.s32.totalorder %s78_s30, %s78_s30 }
  0x31   :  { %p6452_p6 = scmp.ne.s32.totalorder %s78_s30, %s6451_s0  ;;  %p6457_p8 = scmp.lt.s32.totalorder %s6451_s0, %s6451_s0 }
  0x33   :  { %p6458_p9 = por %p6457_p8, %p6456_p7 }
  0x35   :  { %p6459_p10 = pnand %p6458_p9, %p6452_p6 }
  0x37   :  { %6462 = shalt.err (!%p6459_p10)
}
  0x38   :  { %s6542_s14 = smov 2  }
  0x39   :  { %83 = dma.hbm_to_vmem [thread:$0]  %s9845_s6, 64, %s78_s30, [#allocation11], %s6535_s13, %s6535_s13, %s6542_s14  }
  0x3a   :  { %6523 = dma.done.wait [#allocation5], 1024  }
  0x3b   :  { %6524 = vsyncadd [#allocation5], 4294966272 }
  0x3c   :  { %6525 = dma.done.wait [#allocation8], 16384  }
  0x3d   :  { %6526 = vsyncadd [#allocation8], 4294950912 }
  0x3e   :  { %6527 = dma.done.wait [#allocation11], 8256  }
  0x3f   :  { %6528 = vsyncadd [#allocation11], 4294959040  ;;  %v9849_v0 = vmov 0.0   ;;  %v6627_v1 = vld [vmem:[#allocation7 + $0x1e8] sm:$0xff]  ;;  %v6629_v2 = vld [vmem:[#allocation7 + $0x1f8] sm:$0xff] }
  0x40   :  { %242 = vmatprep.mubr.f32.mxu0 %v9849_v0  ;;  %313 = vmatprep.mubr.f32.mxu1 %v9849_v0  ;;  %v6631_v3 = vld [vmem:[#allocation7 + $0x1e0] sm:$0xff]  ;;  %v6635_v4 = vld [vmem:[#allocation7 + $0x1f0] sm:$0xff]  ;;  %v6637_v5 = vld [vmem:[#allocation7 + $0x1c8] sm:$0xff] }
  0x41   :  { %178 = vmatprep.subr.mxu0 %v6627_v1  ;;  %249 = vmatprep.subr.mxu1 %v6629_v2  ;;  %v6639_v6 = vld [vmem:[#allocation7 + $0x1d8] sm:$0xff]  ;;  %v6643_v7 = vld [vmem:[#allocation7 + $0x1c0] sm:$0xff]  ;;  %v6645_v8 = vld [vmem:[#allocation7 + $0x1d0] sm:$0xff] }
  0x42   :  { %179 = vmatpush1.msra.mxu0 %v6631_v3  ;;  %250 = vmatpush1.msra.mxu1 %v6635_v4  ;;  %v6647_v9 = vld [vmem:[#allocation7 + $0x1a8] sm:$0xff]  ;;  %v6651_v10 = vld [vmem:[#allocation7 + $0x1b8] sm:$0xff]  ;;  %v6653_v11 = vld [vmem:[#allocation7 + $0x1a0] sm:$0xff] }
  0x43   :  { %180 = vmatprep.subr.mxu0 %v6637_v5  ;;  %251 = vmatprep.subr.mxu1 %v6639_v6  ;;  %v6655_v12 = vld [vmem:[#allocation7 + $0x1b0] sm:$0xff]  ;;  %v6659_v13 = vld [vmem:[#allocation7 + $0x188] sm:$0xff]  ;;  %v6661_v14 = vld [vmem:[#allocation7 + $0x198] sm:$0xff] }
  0x44   :  { %181 = vmatpush1.msra.mxu0 %v6643_v7  ;;  %252 = vmatpush1.msra.mxu1 %v6645_v8  ;;  %v6665_v15 = vld [vmem:[#allocation7 + $0x180] sm:$0xff]  ;;  %v6667_v16 = vld [vmem:[#allocation7 + $0x190] sm:$0xff]  ;;  %v6671_v17 = vld [vmem:[#allocation7 + $0x168] sm:$0xff] }
  0x45   :  { %182 = vmatprep.subr.mxu0 %v6647_v9  ;;  %253 = vmatprep.subr.mxu1 %v6651_v10  ;;  %v6673_v18 = vld [vmem:[#allocation7 + $0x178] sm:$0xff]  ;;  %v6677_v19 = vld [vmem:[#allocation7 + $0x160] sm:$0xff]  ;;  %v6679_v20 = vld [vmem:[#allocation7 + $0x170] sm:$0xff] }
  0x46   :  { %183 = vmatpush1.msra.mxu0 %v6653_v11  ;;  %254 = vmatpush1.msra.mxu1 %v6655_v12  ;;  %v6683_v21 = vld [vmem:[#allocation7 + $0x148] sm:$0xff]  ;;  %v6685_v22 = vld [vmem:[#allocation7 + $0x158] sm:$0xff]  ;;  %v6689_v23 = vld [vmem:[#allocation7 + $0x140] sm:$0xff] }
  0x47   :  { %184 = vmatprep.subr.mxu0 %v6659_v13  ;;  %255 = vmatprep.subr.mxu1 %v6661_v14  ;;  %v6691_v24 = vld [vmem:[#allocation7 + $0x150] sm:$0xff]  ;;  %v6695_v25 = vld [vmem:[#allocation7 + $0x128] sm:$0xff]  ;;  %v6697_v26 = vld [vmem:[#allocation7 + $0x138] sm:$0xff] }
  0x48   :  { %185 = vmatpush1.msra.mxu0 %v6665_v15  ;;  %256 = vmatpush1.msra.mxu1 %v6667_v16  ;;  %v6701_v27 = vld [vmem:[#allocation7 + $0x120] sm:$0xff]  ;;  %v6703_v28 = vld [vmem:[#allocation7 + $0x130] sm:$0xff]  ;;  %v6707_v29 = vld [vmem:[#allocation7 + $0x108] sm:$0xff] }
  0x49   :  { %186 = vmatprep.subr.mxu0 %v6671_v17  ;;  %257 = vmatprep.subr.mxu1 %v6673_v18  ;;  %v6709_v30 = vld [vmem:[#allocation7 + $0x118] sm:$0xff]  ;;  %v6713_v31 = vld [vmem:[#allocation7 + $0x100] sm:$0xff]  ;;  %v6715_v32 = vld [vmem:[#allocation7 + $0x110] sm:$0xff] }
  0x4a   :  { %187 = vmatpush1.msra.mxu0 %v6677_v19  ;;  %258 = vmatpush1.msra.mxu1 %v6679_v20  ;;  %v6719_v33 = vld [vmem:[#allocation7 + $0xe8] sm:$0xff]  ;;  %v6721_v34 = vld [vmem:[#allocation7 + $0xf8] sm:$0xff]  ;;  %v6725_v35 = vld [vmem:[#allocation7 + $0xe0] sm:$0xff] }
  0x4b   :  { %188 = vmatprep.subr.mxu0 %v6683_v21  ;;  %259 = vmatprep.subr.mxu1 %v6685_v22  ;;  %v6727_v36 = vld [vmem:[#allocation7 + $0xf0] sm:$0xff]  ;;  %v6731_v37 = vld [vmem:[#allocation7 + $0xc8] sm:$0xff]  ;;  %v6733_v38 = vld [vmem:[#allocation7 + $0xd8] sm:$0xff] }
  0x4c   :  { %189 = vmatpush1.msra.mxu0 %v6689_v23  ;;  %260 = vmatpush1.msra.mxu1 %v6691_v24  ;;  %v6737_v39 = vld [vmem:[#allocation7 + $0xc0] sm:$0xff]  ;;  %v6739_v40 = vld [vmem:[#allocation7 + $0xd0] sm:$0xff]  ;;  %v6743_v41 = vld [vmem:[#allocation7 + $0xa8] sm:$0xff] }
  0x4d   :  { %190 = vmatprep.subr.mxu0 %v6695_v25  ;;  %261 = vmatprep.subr.mxu1 %v6697_v26  ;;  %v6745_v42 = vld [vmem:[#allocation7 + $0xb8] sm:$0xff]  ;;  %v6749_v43 = vld [vmem:[#allocation7 + $0xa0] sm:$0xff]  ;;  %v6751_v44 = vld [vmem:[#allocation7 + $0xb0] sm:$0xff] }
  0x4e   :  { %191 = vmatpush1.msra.mxu0 %v6701_v27  ;;  %262 = vmatpush1.msra.mxu1 %v6703_v28  ;;  %v6755_v45 = vld [vmem:[#allocation7 + $0x88] sm:$0xff]  ;;  %v6757_v46 = vld [vmem:[#allocation7 + $0x98] sm:$0xff]  ;;  %v6761_v47 = vld [vmem:[#allocation7 + $0x80] sm:$0xff] }
  0x4f   :  { %192 = vmatprep.subr.mxu0 %v6707_v29  ;;  %263 = vmatprep.subr.mxu1 %v6709_v30  ;;  %10398 = vst [vmem:[#allocation22_spill] sm:$0xff] %v6757_v46  ;;  %10399 = vst [vmem:[#allocation23_spill] sm:$0xff] %v6761_v47  ;;  %v6763_v48 = vld [vmem:[#allocation7 + $0x90] sm:$0xff]  ;;  %v103_v49 = vld [vmem:[%s9844_s5] sm:$0xf]  }
  0x50   :  { %193 = vmatpush1.msra.mxu0 %v6713_v31  ;;  %264 = vmatpush1.msra.mxu1 %v6715_v32  ;;  %10400 = vst [vmem:[#allocation24_spill] sm:$0xff] %v6763_v48  ;;  %v6770_v50 = vld [vmem:[#allocation7 + $0x68] sm:$0xff]  ;;  %v6772_v51 = vld [vmem:[#allocation7 + $0x78] sm:$0xff]  ;;  %105 = vst [vmem:[#allocation2] sm:$0xf] %v103_v49  }
  0x51   :  { %194 = vmatprep.subr.mxu0 %v6719_v33  ;;  %265 = vmatprep.subr.mxu1 %v6721_v34  ;;  %10401 = vst [vmem:[#allocation25_spill] sm:$0xff] %v6770_v50  ;;  %10402 = vst [vmem:[#allocation26_spill] sm:$0xff] %v6772_v51  ;;  %v6776_v52 = vld [vmem:[#allocation7 + $0x60] sm:$0xff]  ;;  %v6778_v53 = vld [vmem:[#allocation7 + $0x70] sm:$0xff] }
  0x52   :  { %195 = vmatpush1.msra.mxu0 %v6725_v35  ;;  %266 = vmatpush1.msra.mxu1 %v6727_v36  ;;  %10403 = vst [vmem:[#allocation27_spill] sm:$0xff] %v6776_v52  ;;  %10404 = vst [vmem:[#allocation28_spill] sm:$0xff] %v6778_v53  ;;  %v6782_v54 = vld [vmem:[#allocation7 + $0x48] sm:$0xff]  ;;  %v6784_v55 = vld [vmem:[#allocation7 + $0x58] sm:$0xff] }
  0x53   :  { %196 = vmatprep.subr.mxu0 %v6731_v37  ;;  %267 = vmatprep.subr.mxu1 %v6733_v38  ;;  %10405 = vst [vmem:[#allocation29_spill] sm:$0xff] %v6782_v54  ;;  %10406 = vst [vmem:[#allocation30_spill] sm:$0xff] %v6784_v55  ;;  %v6788_v56 = vld [vmem:[#allocation7 + $0x40] sm:$0xff]  ;;  %v6790_v57 = vld [vmem:[#allocation7 + $0x50] sm:$0xff] }
  0x54   :  { %197 = vmatpush1.msra.mxu0 %v6737_v39  ;;  %268 = vmatpush1.msra.mxu1 %v6739_v40  ;;  %10407 = vst [vmem:[#allocation31_spill] sm:$0xff] %v6788_v56  ;;  %10408 = vst [vmem:[#allocation32_spill] sm:$0xff] %v6790_v57  ;;  %v6794_v58 = vld [vmem:[#allocation7 + $0x28] sm:$0xff]  ;;  %v6796_v59 = vld [vmem:[#allocation7 + $0x38] sm:$0xff] }
  0x55   :  { %198 = vmatprep.subr.mxu0 %v6743_v41  ;;  %269 = vmatprep.subr.mxu1 %v6745_v42  ;;  %10409 = vst [vmem:[#allocation33_spill] sm:$0xff] %v6794_v58  ;;  %10410 = vst [vmem:[#allocation34_spill] sm:$0xff] %v6796_v59  ;;  %v6800_v60 = vld [vmem:[#allocation7 + $0x20] sm:$0xff]  ;;  %v6802_v61 = vld [vmem:[#allocation7 + $0x30] sm:$0xff] }
  0x56   :  { %199 = vmatpush1.msra.mxu0 %v6749_v43  ;;  %270 = vmatpush1.msra.mxu1 %v6751_v44  ;;  %10411 = vst [vmem:[#allocation35_spill] sm:$0xff] %v6800_v60  ;;  %10412 = vst [vmem:[#allocation36_spill] sm:$0xff] %v6802_v61  ;;  %v6806_v62 = vld [vmem:[#allocation7 + $0x8] sm:$0xff]  ;;  %v6808_v63 = vld [vmem:[#allocation7 + $0x18] sm:$0xff] }
  0x57   :  { %200 = vmatprep.subr.mxu0 %v6755_v45  ;;  %271 = vmatprep.subr.mxu1 %v6757_v46  ;;  %10413 = vst [vmem:[#allocation37_spill] sm:$0xff] %v6806_v62  ;;  %10414 = vst [vmem:[#allocation38_spill] sm:$0xff] %v6808_v63  ;;  %v6812_v49 = vld [vmem:[#allocation7] sm:$0xff]  ;;  %v6814_v0 = vld [vmem:[#allocation7 + $0x10] sm:$0xff] }
  0x58   :  { %201 = vmatpush1.msra.mxu0 %v6761_v47  ;;  %272 = vmatpush1.msra.mxu1 %v6763_v48  ;;  %10415 = vst [vmem:[#allocation39_spill] sm:$0xff] %v6812_v49  ;;  %10416 = vst [vmem:[#allocation40_spill] sm:$0xff] %v6814_v0 }
  0x59   :  { %202 = vmatprep.subr.mxu0 %v6770_v50  ;;  %273 = vmatprep.subr.mxu1 %v6772_v51 }
  0x5a   :  { %203 = vmatpush1.msra.mxu0 %v6776_v52  ;;  %274 = vmatpush1.msra.mxu1 %v6778_v53 }
  0x5b   :  { %204 = vmatprep.subr.mxu0 %v6782_v54  ;;  %275 = vmatprep.subr.mxu1 %v6784_v55  ;;  %v112_v55 = vld [vmem:[#allocation2] sm:$0x3]  ;;  %v7036_v54 = vld [vmem:[#allocation10 + $0x188] sm:$0xff] }
  0x5c   :  { %205 = vmatpush1.msra.mxu0 %v6788_v56  ;;  %276 = vmatpush1.msra.mxu1 %v6790_v57  ;;  %v443_v57 = vld [vmem:[#allocation9 + $0x1f8] sm:$0xff]  ;;  %10490 = vst [vmem:[#allocation113_spill] sm:$0xff] %v7036_v54 }
  0x5d   :  { %206 = vmatprep.subr.mxu0 %v6794_v58  ;;  %277 = vmatprep.subr.mxu1 %v6796_v59  ;;  %v10417_v59 = vmov 0.0   ;;  %v441_v58 = vld [vmem:[#allocation9 + $0x1e8] sm:$0xff]  ;;  %v7026_v56 = vld [vmem:[#allocation10 + $0x1b8] sm:$0xff] }
  0x5e   :  { %207 = vmatpush1.msra.mxu0 %v6800_v60  ;;  %278 = vmatpush1.msra.mxu1 %v6802_v61  ;;  %v440_v61 = vld [vmem:[#allocation9 + $0x1e0] sm:$0xff]  ;;  %v442_v60 = vld [vmem:[#allocation9 + $0x1f0] sm:$0xff]  ;;  %10487 = vst [vmem:[#allocation110_spill] sm:$0xff] %v7026_v56 }
  0x5f   :  { %208 = vmatprep.subr.mxu0 %v6806_v62  ;;  %279 = vmatprep.subr.mxu1 %v6808_v63  ;;  %v6824_v62 = vld [vmem:[#allocation9 + $0x1c8] sm:$0xff]  ;;  %v6826_v63 = vld [vmem:[#allocation9 + $0x1d8] sm:$0xff] }
  0x60   :  { %209 = vmatpush1.msra.mxu0 %v6812_v49  ;;  %280 = vmatpush1.msra.mxu1 %v6814_v0  ;;  %10418 = vst [vmem:[#allocation41_spill] sm:$0xff] %v6824_v62  ;;  %10419 = vst [vmem:[#allocation42_spill] sm:$0xff] %v6826_v63  ;;  %v6832_v0 = vld [vmem:[#allocation9 + $0x1d0] sm:$0xff] }
  0x61   :  { %243 = vmatmul.mubr.f32.vlgmr.msra.gmra.mxu0 %v112_v55  ;;  %314 = vmatmul.mubr.f32.vlgmr.msra.gmra.mxu1 %v112_v55  ;;  %v6830_v55 = vld [vmem:[#allocation9 + $0x1c0] sm:$0xff]  ;;  %10421 = vst [vmem:[#allocation44_spill] sm:$0xff] %v6832_v0  ;;  %v7020_v49 = vld [vmem:[#allocation10 + $0x1d0] sm:$0xff] }
  0x62   :  { %508 = vmatprep.mubr.f32.mxu0 %v10417_v59  ;;  %579 = vmatprep.mubr.f32.mxu1 %v10417_v59  ;;  %10420 = vst [vmem:[#allocation43_spill] sm:$0xff] %v6830_v55  ;;  %10485 = vst [vmem:[#allocation108_spill] sm:$0xff] %v7020_v49 }
  0x63   :  { %444 = vmatprep.subr.mxu0 %v441_v58  ;;  %515 = vmatprep.subr.mxu1 %v443_v57  ;;  %v6836_v57 = vld [vmem:[#allocation9 + $0x1a8] sm:$0xff]  ;;  %v6838_v58 = vld [vmem:[#allocation9 + $0x1b8] sm:$0xff] }
  0x64   :  { %445 = vmatpush1.msra.mxu0 %v440_v61  ;;  %516 = vmatpush1.msra.mxu1 %v442_v60  ;;  %10422 = vst [vmem:[#allocation45_spill] sm:$0xff] %v6836_v57  ;;  %10423 = vst [vmem:[#allocation46_spill] sm:$0xff] %v6838_v58  ;;  %v6842_v60 = vld [vmem:[#allocation9 + $0x1a0] sm:$0xff]  ;;  %v6844_v61 = vld [vmem:[#allocation9 + $0x1b0] sm:$0xff] }
  0x65   :  { %446 = vmatprep.subr.mxu0 %v6824_v62  ;;  %517 = vmatprep.subr.mxu1 %v6826_v63  ;;  %10424 = vst [vmem:[#allocation47_spill] sm:$0xff] %v6842_v60  ;;  %10425 = vst [vmem:[#allocation48_spill] sm:$0xff] %v6844_v61  ;;  %v6848_v63 = vld [vmem:[#allocation9 + $0x188] sm:$0xff]  ;;  %v7009_v62 = vld [vmem:[#allocation10 + $0x1e0] sm:$0xff] }
  0x66   :  { %447 = vmatpush1.msra.mxu0 %v6830_v55  ;;  %518 = vmatpush1.msra.mxu1 %v6832_v0  ;;  %10426 = vst [vmem:[#allocation49_spill] sm:$0xff] %v6848_v63  ;;  %v6850_v55 = vld [vmem:[#allocation9 + $0x198] sm:$0xff]  ;;  %v6854_v0 = vld [vmem:[#allocation9 + $0x180] sm:$0xff]  ;;  %10480 = vst [vmem:[#allocation103_spill] sm:$0xff] %v7009_v62 }
  0x67   :  { %448 = vmatprep.subr.mxu0 %v6836_v57  ;;  %519 = vmatprep.subr.mxu1 %v6838_v58  ;;  %10427 = vst [vmem:[#allocation50_spill] sm:$0xff] %v6850_v55  ;;  %10428 = vst [vmem:[#allocation51_spill] sm:$0xff] %v6854_v0  ;;  %v6856_v57 = vld [vmem:[#allocation9 + $0x190] sm:$0xff]  ;;  %v6860_v58 = vld [vmem:[#allocation9 + $0x168] sm:$0xff] }
  0x68   :  { %449 = vmatpush1.msra.mxu0 %v6842_v60  ;;  %520 = vmatpush1.msra.mxu1 %v6844_v61  ;;  %10429 = vst [vmem:[#allocation52_spill] sm:$0xff] %v6856_v57  ;;  %10430 = vst [vmem:[#allocation53_spill] sm:$0xff] %v6860_v58  ;;  %v6862_v60 = vld [vmem:[#allocation9 + $0x178] sm:$0xff]  ;;  %v6866_v61 = vld [vmem:[#allocation9 + $0x160] sm:$0xff] }
  0x69   :  { %450 = vmatprep.subr.mxu0 %v6848_v63  ;;  %521 = vmatprep.subr.mxu1 %v6850_v55  ;;  %10431 = vst [vmem:[#allocation54_spill] sm:$0xff] %v6862_v60  ;;  %10432 = vst [vmem:[#allocation55_spill] sm:$0xff] %v6866_v61  ;;  %v6868_v63 = vld [vmem:[#allocation9 + $0x170] sm:$0xff]  ;;  %v6872_v55 = vld [vmem:[#allocation9 + $0x148] sm:$0xff] }
  0x6a   :  { %451 = vmatpush1.msra.mxu0 %v6854_v0  ;;  %522 = vmatpush1.msra.mxu1 %v6856_v57  ;;  %10433 = vst [vmem:[#allocation56_spill] sm:$0xff] %v6868_v63  ;;  %10434 = vst [vmem:[#allocation57_spill] sm:$0xff] %v6872_v55  ;;  %v6874_v0 = vld [vmem:[#allocation9 + $0x158] sm:$0xff]  ;;  %v6878_v57 = vld [vmem:[#allocation9 + $0x140] sm:$0xff] }
  0x6b   :  { %452 = vmatprep.subr.mxu0 %v6860_v58  ;;  %523 = vmatprep.subr.mxu1 %v6862_v60  ;;  %10435 = vst [vmem:[#allocation58_spill] sm:$0xff] %v6874_v0  ;;  %10436 = vst [vmem:[#allocation59_spill] sm:$0xff] %v6878_v57  ;;  %v6880_v58 = vld [vmem:[#allocation9 + $0x150] sm:$0xff]  ;;  %v6884_v60 = vld [vmem:[#allocation9 + $0x128] sm:$0xff] }
  0x6c   :  { %453 = vmatpush1.msra.mxu0 %v6866_v61  ;;  %524 = vmatpush1.msra.mxu1 %v6868_v63  ;;  %10437 = vst [vmem:[#allocation60_spill] sm:$0xff] %v6880_v58  ;;  %10438 = vst [vmem:[#allocation61_spill] sm:$0xff] %v6884_v60  ;;  %v6886_v61 = vld [vmem:[#allocation9 + $0x138] sm:$0xff]  ;;  %v6890_v63 = vld [vmem:[#allocation9 + $0x120] sm:$0xff] }
  0x6d   :  { %454 = vmatprep.subr.mxu0 %v6872_v55  ;;  %525 = vmatprep.subr.mxu1 %v6874_v0  ;;  %10439 = vst [vmem:[#allocation62_spill] sm:$0xff] %v6886_v61  ;;  %10440 = vst [vmem:[#allocation63_spill] sm:$0xff] %v6890_v63  ;;  %v6892_v55 = vld [vmem:[#allocation9 + $0x130] sm:$0xff]  ;;  %v6896_v0 = vld [vmem:[#allocation9 + $0x108] sm:$0xff] }
  0x6e   :  { %455 = vmatpush1.msra.mxu0 %v6878_v57  ;;  %526 = vmatpush1.msra.mxu1 %v6880_v58  ;;  %10441 = vst [vmem:[#allocation64_spill] sm:$0xff] %v6892_v55  ;;  %10442 = vst [vmem:[#allocation65_spill] sm:$0xff] %v6896_v0  ;;  %v6898_v57 = vld [vmem:[#allocation9 + $0x118] sm:$0xff]  ;;  %v6902_v58 = vld [vmem:[#allocation9 + $0x100] sm:$0xff] }
  0x6f   :  { %456 = vmatprep.subr.mxu0 %v6884_v60  ;;  %527 = vmatprep.subr.mxu1 %v6886_v61  ;;  %10443 = vst [vmem:[#allocation66_spill] sm:$0xff] %v6898_v57  ;;  %10444 = vst [vmem:[#allocation67_spill] sm:$0xff] %v6902_v58  ;;  %v6904_v60 = vld [vmem:[#allocation9 + $0x110] sm:$0xff]  ;;  %v6908_v61 = vld [vmem:[#allocation9 + $0xe8] sm:$0xff] }
  0x70   :  { %457 = vmatpush1.msra.mxu0 %v6890_v63  ;;  %528 = vmatpush1.msra.mxu1 %v6892_v55  ;;  %10445 = vst [vmem:[#allocation68_spill] sm:$0xff] %v6904_v60  ;;  %10446 = vst [vmem:[#allocation69_spill] sm:$0xff] %v6908_v61  ;;  %v6910_v63 = vld [vmem:[#allocation9 + $0xf8] sm:$0xff]  ;;  %v6914_v55 = vld [vmem:[#allocation9 + $0xe0] sm:$0xff] }
  0x71   :  { %458 = vmatprep.subr.mxu0 %v6896_v0  ;;  %529 = vmatprep.subr.mxu1 %v6898_v57  ;;  %10447 = vst [vmem:[#allocation70_spill] sm:$0xff] %v6910_v63  ;;  %10448 = vst [vmem:[#allocation71_spill] sm:$0xff] %v6914_v55  ;;  %v6916_v0 = vld [vmem:[#allocation9 + $0xf0] sm:$0xff]  ;;  %v6920_v57 = vld [vmem:[#allocation9 + $0xc8] sm:$0xff] }
  0x72   :  { %459 = vmatpush1.msra.mxu0 %v6902_v58  ;;  %530 = vmatpush1.msra.mxu1 %v6904_v60  ;;  %10449 = vst [vmem:[#allocation72_spill] sm:$0xff] %v6916_v0  ;;  %10450 = vst [vmem:[#allocation73_spill] sm:$0xff] %v6920_v57  ;;  %v6922_v58 = vld [vmem:[#allocation9 + $0xd8] sm:$0xff]  ;;  %v6926_v60 = vld [vmem:[#allocation9 + $0xc0] sm:$0xff] }
  0x73   :  { %460 = vmatprep.subr.mxu0 %v6908_v61  ;;  %531 = vmatprep.subr.mxu1 %v6910_v63  ;;  %10451 = vst [vmem:[#allocation74_spill] sm:$0xff] %v6922_v58  ;;  %10452 = vst [vmem:[#allocation75_spill] sm:$0xff] %v6926_v60  ;;  %v6928_v61 = vld [vmem:[#allocation9 + $0xd0] sm:$0xff]  ;;  %v6932_v63 = vld [vmem:[#allocation9 + $0xa8] sm:$0xff] }
  0x74   :  { %461 = vmatpush1.msra.mxu0 %v6914_v55  ;;  %532 = vmatpush1.msra.mxu1 %v6916_v0  ;;  %10453 = vst [vmem:[#allocation76_spill] sm:$0xff] %v6928_v61  ;;  %10454 = vst [vmem:[#allocation77_spill] sm:$0xff] %v6932_v63  ;;  %v6934_v55 = vld [vmem:[#allocation9 + $0xb8] sm:$0xff]  ;;  %v6938_v0 = vld [vmem:[#allocation9 + $0xa0] sm:$0xff] }
  0x75   :  { %462 = vmatprep.subr.mxu0 %v6920_v57  ;;  %533 = vmatprep.subr.mxu1 %v6922_v58  ;;  %10455 = vst [vmem:[#allocation78_spill] sm:$0xff] %v6934_v55  ;;  %10456 = vst [vmem:[#allocation79_spill] sm:$0xff] %v6938_v0  ;;  %v6940_v57 = vld [vmem:[#allocation9 + $0xb0] sm:$0xff]  ;;  %v6944_v58 = vld [vmem:[#allocation9 + $0x88] sm:$0xff] }
  0x76   :  { %463 = vmatpush1.msra.mxu0 %v6926_v60  ;;  %534 = vmatpush1.msra.mxu1 %v6928_v61  ;;  %10457 = vst [vmem:[#allocation80_spill] sm:$0xff] %v6940_v57  ;;  %10458 = vst [vmem:[#allocation81_spill] sm:$0xff] %v6944_v58  ;;  %v6946_v60 = vld [vmem:[#allocation9 + $0x98] sm:$0xff]  ;;  %v6950_v61 = vld [vmem:[#allocation9 + $0x80] sm:$0xff] }
  0x77   :  { %464 = vmatprep.subr.mxu0 %v6932_v63  ;;  %535 = vmatprep.subr.mxu1 %v6934_v55  ;;  %10459 = vst [vmem:[#allocation82_spill] sm:$0xff] %v6946_v60  ;;  %10460 = vst [vmem:[#allocation83_spill] sm:$0xff] %v6950_v61  ;;  %v6952_v63 = vld [vmem:[#allocation9 + $0x90] sm:$0xff]  ;;  %v6956_v55 = vld [vmem:[#allocation9 + $0x68] sm:$0xff] }
  0x78   :  { %465 = vmatpush1.msra.mxu0 %v6938_v0  ;;  %536 = vmatpush1.msra.mxu1 %v6940_v57  ;;  %10461 = vst [vmem:[#allocation84_spill] sm:$0xff] %v6952_v63  ;;  %10462 = vst [vmem:[#allocation85_spill] sm:$0xff] %v6956_v55  ;;  %v6958_v0 = vld [vmem:[#allocation9 + $0x78] sm:$0xff]  ;;  %v6962_v57 = vld [vmem:[#allocation9 + $0x60] sm:$0xff] }
  0x79   :  { %466 = vmatprep.subr.mxu0 %v6944_v58  ;;  %537 = vmatprep.subr.mxu1 %v6946_v60  ;;  %10463 = vst [vmem:[#allocation86_spill] sm:$0xff] %v6958_v0  ;;  %10464 = vst [vmem:[#allocation87_spill] sm:$0xff] %v6962_v57  ;;  %v6964_v58 = vld [vmem:[#allocation9 + $0x70] sm:$0xff]  ;;  %v6968_v60 = vld [vmem:[#allocation9 + $0x48] sm:$0xff] }
  0x7a   :  { %467 = vmatpush1.msra.mxu0 %v6950_v61  ;;  %538 = vmatpush1.msra.mxu1 %v6952_v63  ;;  %10465 = vst [vmem:[#allocation88_spill] sm:$0xff] %v6964_v58  ;;  %10466 = vst [vmem:[#allocation89_spill] sm:$0xff] %v6968_v60  ;;  %v6970_v61 = vld [vmem:[#allocation9 + $0x58] sm:$0xff]  ;;  %v6974_v63 = vld [vmem:[#allocation9 + $0x40] sm:$0xff] }
  0x7b   :  { %468 = vmatprep.subr.mxu0 %v6956_v55  ;;  %539 = vmatprep.subr.mxu1 %v6958_v0  ;;  %10467 = vst [vmem:[#allocation90_spill] sm:$0xff] %v6970_v61  ;;  %10468 = vst [vmem:[#allocation91_spill] sm:$0xff] %v6974_v63  ;;  %v6976_v55 = vld [vmem:[#allocation9 + $0x50] sm:$0xff]  ;;  %v6980_v0 = vld [vmem:[#allocation9 + $0x28] sm:$0xff] }
  0x7c   :  { %469 = vmatpush1.msra.mxu0 %v6962_v57  ;;  %540 = vmatpush1.msra.mxu1 %v6964_v58  ;;  %10469 = vst [vmem:[#allocation92_spill] sm:$0xff] %v6976_v55  ;;  %10470 = vst [vmem:[#allocation93_spill] sm:$0xff] %v6980_v0  ;;  %v6982_v57 = vld [vmem:[#allocation9 + $0x38] sm:$0xff]  ;;  %v6986_v58 = vld [vmem:[#allocation9 + $0x20] sm:$0xff] }
  0x7d   :  { %470 = vmatprep.subr.mxu0 %v6968_v60  ;;  %541 = vmatprep.subr.mxu1 %v6970_v61  ;;  %10471 = vst [vmem:[#allocation94_spill] sm:$0xff] %v6982_v57  ;;  %10472 = vst [vmem:[#allocation95_spill] sm:$0xff] %v6986_v58  ;;  %v6988_v60 = vld [vmem:[#allocation9 + $0x30] sm:$0xff]  ;;  %v6992_v61 = vld [vmem:[#allocation9 + $0x8] sm:$0xff] }
  0x7e   :  { %471 = vmatpush1.msra.mxu0 %v6974_v63  ;;  %542 = vmatpush1.msra.mxu1 %v6976_v55  ;;  %10473 = vst [vmem:[#allocation96_spill] sm:$0xff] %v6988_v60  ;;  %10474 = vst [vmem:[#allocation97_spill] sm:$0xff] %v6992_v61  ;;  %v6994_v63 = vld [vmem:[#allocation9 + $0x18] sm:$0xff]  ;;  %v6998_v55 = vld [vmem:[#allocation9] sm:$0xff] }
  0x7f   :  { %472 = vmatprep.subr.mxu0 %v6980_v0  ;;  %543 = vmatprep.subr.mxu1 %v6982_v57  ;;  %10475 = vst [vmem:[#allocation98_spill] sm:$0xff] %v6994_v63  ;;  %10476 = vst [vmem:[#allocation99_spill] sm:$0xff] %v6998_v55  ;;  %v7000_v0 = vld [vmem:[#allocation9 + $0x10] sm:$0xff]  ;;  %v377_v57 = vld [vmem:[#allocation2 + $0x2] sm:$0x3] }
  0x80   :  { %473 = vmatpush1.msra.mxu0 %v6986_v58  ;;  %544 = vmatpush1.msra.mxu1 %v6988_v60  ;;  %10477 = vst [vmem:[#allocation100_spill] sm:$0xff] %v7000_v0  ;;  %v7004_v58 = vld [vmem:[#allocation10 + $0x1e8] sm:$0xff]  ;;  %v7006_v60 = vld [vmem:[#allocation10 + $0x1f8] sm:$0xff] }
  0x81   :  { %474 = vmatprep.subr.mxu0 %v6992_v61  ;;  %545 = vmatprep.subr.mxu1 %v6994_v63  ;;  %10478 = vst [vmem:[#allocation101_spill] sm:$0xff] %v7004_v58  ;;  %10479 = vst [vmem:[#allocation102_spill] sm:$0xff] %v7006_v60  ;;  %v7011_v61 = vld [vmem:[#allocation10 + $0x1f0] sm:$0xff]  ;;  %v7013_v63 = vld [vmem:[#allocation10 + $0x1c8] sm:$0xff] }
  0x82   :  { %475 = vmatpush1.msra.mxu0 %v6998_v55  ;;  %546 = vmatpush1.msra.mxu1 %v7000_v0  ;;  %10481 = vst [vmem:[#allocation104_spill] sm:$0xff] %v7011_v61  ;;  %10482 = vst [vmem:[#allocation105_spill] sm:$0xff] %v7013_v63  ;;  %v7016_v55 = vld [vmem:[#allocation10 + $0x1d8] sm:$0xff]  ;;  %v7018_v0 = vld [vmem:[#allocation10 + $0x1c0] sm:$0xff] }
  0x83   :  { %509 = vmatmul.mubr.f32.vlgmr.msra.gmra.mxu0 %v377_v57  ;;  %650 = vmatprep.subr.mxu0 %v7004_v58  ;;  %10483 = vst [vmem:[#allocation106_spill] sm:$0xff] %v7016_v55  ;;  %10484 = vst [vmem:[#allocation107_spill] sm:$0xff] %v7018_v0  ;;  %v7024_v58 = vld [vmem:[#allocation10 + $0x1a8] sm:$0xff] }
  0x84   :  { %721 = vmatprep.subr.mxu1 %v7006_v60  ;;  %580 = vmatmul.mubr.f32.vlgmr.msra.gmra.mxu1 %v377_v57  ;;  %10486 = vst [vmem:[#allocation109_spill] sm:$0xff] %v7024_v58  ;;  %v7030_v60 = vld [vmem:[#allocation10 + $0x1a0] sm:$0xff]  ;;  %v7032_v57 = vld [vmem:[#allocation10 + $0x1b0] sm:$0xff] }
  0x85   :  { %651 = vmatpush1.msra.mxu0 %v7009_v62  ;;  %722 = vmatpush1.msra.mxu1 %v7011_v61  ;;  %10488 = vst [vmem:[#allocation111_spill] sm:$0xff] %v7030_v60  ;;  %10489 = vst [vmem:[#allocation112_spill] sm:$0xff] %v7032_v57  ;;  %v7038_v62 = vld [vmem:[#allocation10 + $0x198] sm:$0xff]  ;;  %v7042_v61 = vld [vmem:[#allocation10 + $0x180] sm:$0xff] }
  0x86   :  { %652 = vmatprep.subr.mxu0 %v7013_v63  ;;  %723 = vmatprep.subr.mxu1 %v7016_v55  ;;  %10491 = vst [vmem:[#allocation114_spill] sm:$0xff] %v7038_v62  ;;  %10492 = vst [vmem:[#allocation115_spill] sm:$0xff] %v7042_v61  ;;  %v7044_v63 = vld [vmem:[#allocation10 + $0x190] sm:$0xff]  ;;  %v7048_v55 = vld [vmem:[#allocation10 + $0x168] sm:$0xff] }
  0x87   :  { %653 = vmatpush1.msra.mxu0 %v7018_v0  ;;  %724 = vmatpush1.msra.mxu1 %v7020_v49  ;;  %10493 = vst [vmem:[#allocation116_spill] sm:$0xff] %v7044_v63  ;;  %10494 = vst [vmem:[#allocation117_spill] sm:$0xff] %v7048_v55  ;;  %v7050_v0 = vld [vmem:[#allocation10 + $0x178] sm:$0xff]  ;;  %v7054_v49 = vld [vmem:[#allocation10 + $0x160] sm:$0xff] }
  0x88   :  { %654 = vmatprep.subr.mxu0 %v7024_v58  ;;  %725 = vmatprep.subr.mxu1 %v7026_v56  ;;  %10495 = vst [vmem:[#allocation118_spill] sm:$0xff] %v7050_v0  ;;  %10496 = vst [vmem:[#allocation119_spill] sm:$0xff] %v7054_v49  ;;  %v7056_v58 = vld [vmem:[#allocation10 + $0x170] sm:$0xff]  ;;  %v7060_v56 = vld [vmem:[#allocation10 + $0x148] sm:$0xff] }
  0x89   :  { %655 = vmatpush1.msra.mxu0 %v7030_v60  ;;  %726 = vmatpush1.msra.mxu1 %v7032_v57  ;;  %10497 = vst [vmem:[#allocation120_spill] sm:$0xff] %v7056_v58  ;;  %10498 = vst [vmem:[#allocation121_spill] sm:$0xff] %v7060_v56  ;;  %v7062_v60 = vld [vmem:[#allocation10 + $0x158] sm:$0xff]  ;;  %v7066_v57 = vld [vmem:[#allocation10 + $0x140] sm:$0xff] }
  0x8a   :  { %656 = vmatprep.subr.mxu0 %v7036_v54  ;;  %727 = vmatprep.subr.mxu1 %v7038_v62  ;;  %10499 = vst [vmem:[#allocation122_spill] sm:$0xff] %v7062_v60  ;;  %10500 = vst [vmem:[#allocation123_spill] sm:$0xff] %v7066_v57  ;;  %v7068_v54 = vld [vmem:[#allocation10 + $0x150] sm:$0xff]  ;;  %v7072_v62 = vld [vmem:[#allocation10 + $0x128] sm:$0xff] }
  0x8b   :  { %657 = vmatpush1.msra.mxu0 %v7042_v61  ;;  %728 = vmatpush1.msra.mxu1 %v7044_v63  ;;  %10501 = vst [vmem:[#allocation124_spill] sm:$0xff] %v7068_v54  ;;  %10502 = vst [vmem:[#allocation125_spill] sm:$0xff] %v7072_v62  ;;  %v7074_v61 = vld [vmem:[#allocation10 + $0x138] sm:$0xff]  ;;  %v7078_v63 = vld [vmem:[#allocation10 + $0x120] sm:$0xff] }
  0x8c   :  { %658 = vmatprep.subr.mxu0 %v7048_v55  ;;  %729 = vmatprep.subr.mxu1 %v7050_v0  ;;  %10503 = vst [vmem:[#allocation126_spill] sm:$0xff] %v7074_v61  ;;  %10504 = vst [vmem:[#allocation127_spill] sm:$0xff] %v7078_v63  ;;  %v7080_v55 = vld [vmem:[#allocation10 + $0x130] sm:$0xff]  ;;  %v7084_v0 = vld [vmem:[#allocation10 + $0x108] sm:$0xff] }
  0x8d   :  { %659 = vmatpush1.msra.mxu0 %v7054_v49  ;;  %730 = vmatpush1.msra.mxu1 %v7056_v58  ;;  %10505 = vst [vmem:[#allocation128_spill] sm:$0xff] %v7080_v55  ;;  %10506 = vst [vmem:[#allocation129_spill] sm:$0xff] %v7084_v0  ;;  %v7086_v49 = vld [vmem:[#allocation10 + $0x118] sm:$0xff]  ;;  %v7090_v58 = vld [vmem:[#allocation10 + $0x100] sm:$0xff] }
  0x8e   :  { %660 = vmatprep.subr.mxu0 %v7060_v56  ;;  %731 = vmatprep.subr.mxu1 %v7062_v60  ;;  %10507 = vst [vmem:[#allocation130_spill] sm:$0xff] %v7086_v49  ;;  %10508 = vst [vmem:[#allocation131_spill] sm:$0xff] %v7090_v58  ;;  %v7092_v56 = vld [vmem:[#allocation10 + $0x110] sm:$0xff]  ;;  %v7096_v60 = vld [vmem:[#allocation10 + $0xe8] sm:$0xff] }
  0x8f   :  { %661 = vmatpush1.msra.mxu0 %v7066_v57  ;;  %732 = vmatpush1.msra.mxu1 %v7068_v54  ;;  %10509 = vst [vmem:[#allocation132_spill] sm:$0xff] %v7092_v56  ;;  %10510 = vst [vmem:[#allocation133_spill] sm:$0xff] %v7096_v60  ;;  %v7098_v57 = vld [vmem:[#allocation10 + $0xf8] sm:$0xff]  ;;  %v7102_v54 = vld [vmem:[#allocation10 + $0xe0] sm:$0xff] }
  0x90   :  { %662 = vmatprep.subr.mxu0 %v7072_v62  ;;  %733 = vmatprep.subr.mxu1 %v7074_v61  ;;  %10511 = vst [vmem:[#allocation134_spill] sm:$0xff] %v7098_v57  ;;  %10512 = vst [vmem:[#allocation135_spill] sm:$0xff] %v7102_v54  ;;  %v7104_v62 = vld [vmem:[#allocation10 + $0xf0] sm:$0xff]  ;;  %v7108_v61 = vld [vmem:[#allocation10 + $0xc8] sm:$0xff] }
  0x91   :  { %663 = vmatpush1.msra.mxu0 %v7078_v63  ;;  %734 = vmatpush1.msra.mxu1 %v7080_v55  ;;  %10513 = vst [vmem:[#allocation136_spill] sm:$0xff] %v7104_v62  ;;  %10514 = vst [vmem:[#allocation137_spill] sm:$0xff] %v7108_v61  ;;  %v7110_v63 = vld [vmem:[#allocation10 + $0xd8] sm:$0xff]  ;;  %v7114_v55 = vld [vmem:[#allocation10 + $0xc0] sm:$0xff] }
  0x92   :  { %664 = vmatprep.subr.mxu0 %v7084_v0  ;;  %735 = vmatprep.subr.mxu1 %v7086_v49  ;;  %10515 = vst [vmem:[#allocation138_spill] sm:$0xff] %v7110_v63  ;;  %10516 = vst [vmem:[#allocation139_spill] sm:$0xff] %v7114_v55  ;;  %v7116_v0 = vld [vmem:[#allocation10 + $0xd0] sm:$0xff]  ;;  %v7120_v49 = vld [vmem:[#allocation10 + $0xa8] sm:$0xff] }
  0x93   :  { %665 = vmatpush1.msra.mxu0 %v7090_v58  ;;  %736 = vmatpush1.msra.mxu1 %v7092_v56  ;;  %10517 = vst [vmem:[#allocation140_spill] sm:$0xff] %v7116_v0  ;;  %10518 = vst [vmem:[#allocation141_spill] sm:$0xff] %v7120_v49  ;;  %v7122_v58 = vld [vmem:[#allocation10 + $0xb8] sm:$0xff]  ;;  %v7126_v56 = vld [vmem:[#allocation10 + $0xa0] sm:$0xff] }
  0x94   :  { %666 = vmatprep.subr.mxu0 %v7096_v60  ;;  %737 = vmatprep.subr.mxu1 %v7098_v57  ;;  %10519 = vst [vmem:[#allocation142_spill] sm:$0xff] %v7122_v58  ;;  %10520 = vst [vmem:[#allocation143_spill] sm:$0xff] %v7126_v56  ;;  %v7128_v60 = vld [vmem:[#allocation10 + $0xb0] sm:$0xff]  ;;  %v7132_v57 = vld [vmem:[#allocation10 + $0x88] sm:$0xff] }
  0x95   :  { %667 = vmatpush1.msra.mxu0 %v7102_v54  ;;  %738 = vmatpush1.msra.mxu1 %v7104_v62  ;;  %10521 = vst [vmem:[#allocation144_spill] sm:$0xff] %v7128_v60  ;;  %10522 = vst [vmem:[#allocation145_spill] sm:$0xff] %v7132_v57  ;;  %v7134_v54 = vld [vmem:[#allocation10 + $0x98] sm:$0xff]  ;;  %v107_v62 = vld [vmem:[#allocation12] sm:$0xf]  }
  0x96   :  { %668 = vmatprep.subr.mxu0 %v7108_v61  ;;  %739 = vmatprep.subr.mxu1 %v7110_v63  ;;  %10523 = vst [vmem:[#allocation146_spill] sm:$0xff] %v7134_v54  ;;  %v7138_v61 = vld [vmem:[#allocation10 + $0x80] sm:$0xff]  ;;  %v7140_v63 = vld [vmem:[#allocation10 + $0x90] sm:$0xff]  ;;  %109 = vst [vmem:[#allocation3] sm:$0xf] %v107_v62  }
  0x97   :  { %669 = vmatpush1.msra.mxu0 %v7114_v55  ;;  %740 = vmatpush1.msra.mxu1 %v7116_v0  ;;  %10524 = vst [vmem:[#allocation147_spill] sm:$0xff] %v7138_v61  ;;  %10525 = vst [vmem:[#allocation148_spill] sm:$0xff] %v7140_v63  ;;  %v7144_v55 = vld [vmem:[#allocation10 + $0x68] sm:$0xff]  ;;  %v7146_v0 = vld [vmem:[#allocation10 + $0x78] sm:$0xff] }
  0x98   :  { %670 = vmatprep.subr.mxu0 %v7120_v49  ;;  %741 = vmatprep.subr.mxu1 %v7122_v58  ;;  %10526 = vst [vmem:[#allocation149_spill] sm:$0xff] %v7144_v55  ;;  %10527 = vst [vmem:[#allocation150_spill] sm:$0xff] %v7146_v0  ;;  %v7150_v49 = vld [vmem:[#allocation10 + $0x60] sm:$0xff]  ;;  %v7152_v58 = vld [vmem:[#allocation10 + $0x70] sm:$0xff] }
  0x99   :  { %671 = vmatpush1.msra.mxu0 %v7126_v56  ;;  %742 = vmatpush1.msra.mxu1 %v7128_v60  ;;  %10528 = vst [vmem:[#allocation151_spill] sm:$0xff] %v7150_v49  ;;  %10529 = vst [vmem:[#allocation152_spill] sm:$0xff] %v7152_v58  ;;  %v7156_v62 = vld [vmem:[#allocation10 + $0x48] sm:$0xff]  ;;  %v7158_v56 = vld [vmem:[#allocation10 + $0x58] sm:$0xff] }
  0x9a   :  { %672 = vmatprep.subr.mxu0 %v7132_v57  ;;  %743 = vmatprep.subr.mxu1 %v7134_v54  ;;  %10530 = vst [vmem:[#allocation153_spill] sm:$0xff] %v7156_v62  ;;  %10531 = vst [vmem:[#allocation154_spill] sm:$0xff] %v7158_v56  ;;  %v7162_v60 = vld [vmem:[#allocation10 + $0x40] sm:$0xff]  ;;  %v7164_v57 = vld [vmem:[#allocation10 + $0x50] sm:$0xff] }
  0x9b   :  { %673 = vmatpush1.msra.mxu0 %v7138_v61  ;;  %744 = vmatpush1.msra.mxu1 %v7140_v63  ;;  %10532 = vst [vmem:[#allocation155_spill] sm:$0xff] %v7162_v60  ;;  %10533 = vst [vmem:[#allocation156_spill] sm:$0xff] %v7164_v57  ;;  %v7168_v54 = vld [vmem:[#allocation10 + $0x28] sm:$0xff]  ;;  %v7170_v61 = vld [vmem:[#allocation10 + $0x38] sm:$0xff] }
  0x9c   :  { %674 = vmatprep.subr.mxu0 %v7144_v55  ;;  %745 = vmatprep.subr.mxu1 %v7146_v0  ;;  %10534 = vst [vmem:[#allocation157_spill] sm:$0xff] %v7168_v54  ;;  %10535 = vst [vmem:[#allocation158_spill] sm:$0xff] %v7170_v61  ;;  %v7174_v63 = vld [vmem:[#allocation10 + $0x20] sm:$0xff]  ;;  %v7176_v55 = vld [vmem:[#allocation10 + $0x30] sm:$0xff] }
  0x9d   :  { %675 = vmatpush1.msra.mxu0 %v7150_v49  ;;  %746 = vmatpush1.msra.mxu1 %v7152_v58  ;;  %10536 = vst [vmem:[#allocation159_spill] sm:$0xff] %v7174_v63  ;;  %10537 = vst [vmem:[#allocation160_spill] sm:$0xff] %v7176_v55  ;;  %v7180_v0 = vld [vmem:[#allocation10 + $0x8] sm:$0xff]  ;;  %v7182_v49 = vld [vmem:[#allocation10 + $0x18] sm:$0xff] }
  0x9e   :  { %676 = vmatprep.subr.mxu0 %v7156_v62  ;;  %747 = vmatprep.subr.mxu1 %v7158_v56  ;;  %10538 = vst [vmem:[#allocation161_spill] sm:$0xff] %v7180_v0  ;;  %10539 = vst [vmem:[#allocation162_spill] sm:$0xff] %v7182_v49  ;;  %v7186_v58 = vld [vmem:[#allocation10] sm:$0xff]  ;;  %v7188_v62 = vld [vmem:[#allocation10 + $0x10] sm:$0xff] }
  0x9f   :  { %677 = vmatpush1.msra.mxu0 %v7162_v60  ;;  %748 = vmatpush1.msra.mxu1 %v7164_v57  ;;  %10540 = vst [vmem:[#allocation163_spill] sm:$0xff] %v7186_v58  ;;  %10541 = vst [vmem:[#allocation164_spill] sm:$0xff] %v7188_v62 }
  0xa0   :  { %678 = vmatprep.subr.mxu0 %v7168_v54  ;;  %749 = vmatprep.subr.mxu1 %v7170_v61  ;;  %v6544_v61 = vmov 1983009808   ;;  %v329_v54 = vlaneseq }
  0xa1   :  { %679 = vmatpush1.msra.mxu0 %v7174_v63  ;;  %750 = vmatpush1.msra.mxu1 %v7176_v55  ;;  %v327_v63 = vunpack.c.l.s4 %v6544_v61 }
  0xa2   :  { %680 = vmatprep.subr.mxu0 %v7180_v0  ;;  %751 = vmatprep.subr.mxu1 %v7182_v49  ;;  %v7200_v57 = vshrl.u32 %v329_v54, 7 }
  0xa3   :  { %681 = vmatpush1.msra.mxu0 %v7186_v58  ;;  %752 = vmatpush1.msra.mxu1 %v7188_v62  ;;  %v328_v55 = vunpack.c.0.s8 %v327_v63 }
  0xa4   :  { %714 = vmatprep.mubr.f32.mxu0 %v10417_v59  ;;  %785 = vmatprep.mubr.f32.mxu1 %v10417_v59  ;;  %10542 = vst [vmem:[#allocation165_spill] sm:$0xff] %v7200_v57 }
  0xa5   :  { %913 = vmatprep.subr.mxu0 %v6627_v1  ;;  %984 = vmatprep.subr.mxu1 %v6629_v2  ;;  %v7203_v58 = vsub.s32 %v328_v55, %v7200_v57  ;;  %v111_v2 = vld [vmem:[#allocation4] sm:$0xff] }
 0x121   :  { %v244_v0 = vpop.f32.mrf.mxu0  ;;  %v315_v49 = vpop.f32.mrf.mxu1 }
 0x123   :  { %v246_v62 = vpop.f32.mrf.mxu0  ;;  %v317_v60 = vpop.f32.mrf.mxu1 }
 0x124   :  { %v324_v56 = vcombine.low %v244_v0, %v246_v62  ;;  %v325_v53 = vcombine.low %v315_v49, %v317_v60 }
 0x126   :  { %v332_v59 = vrot.slane %v324_v56, %v7203_v58  ;;  %v339_v1 = vrot.slane %v325_v53, %v7203_v58 }
 0x128   :  { %v340_v52 = vcombine.low %v332_v59, %v339_v1  ;;  %v113_v59 = vld [vmem:[#allocation3] sm:$0x3] }
 0x12a   :  { %v342_v61 = vadd.f32 %v340_v52, %v111_v2 }
 0x12c   :  { %v6044_v51 = vmul.f32 -1.442695, %v342_v61  ;;  %v350_v63 = vrot.slane %v342_v61, 2  ;;  %v361_v50 = vrot.slane %v342_v61, 6  ;;  %v358_v57 = vrot.slane %v342_v61, 4 }
 0x12e   :  { %6107 = vpow2.f32 %v6044_v51  ;;  %v6045_v54 = vmul.f32 -1.442695, %v350_v63  ;;  %v6046_v48 = vmul.f32 -1.442695, %v361_v50  ;;  %v10585_v63 = vld [vmem:[#allocation63_spill] sm:$0xff] }
 0x130   :  { %6109 = vpow2.f32 %v6045_v54  ;;  %v10586_v54 = vld [vmem:[#allocation64_spill] sm:$0xff] }
 0x131   :  { %6111 = vpow2.f32 %v6046_v48  ;;  %v10583_v48 = vld [vmem:[#allocation61_spill] sm:$0xff] }
 0x13b   :  { %v6108_v55 = vpop.eup %6107 }
 0x13c   :  { %v346_v47 = vadd.f32 1.0, %v6108_v55  ;;  %v10587_v55 = vld [vmem:[#allocation65_spill] sm:$0xff] }
 0x13d   :  { %v6110_v46 = vpop.eup %6109 }
 0x13e   :  { %6113 = vrcp.f32 %v346_v47  ;;  %v355_v0 = vadd.f32 1.0, %v6110_v46  ;;  %v6112_v53 = vpop.eup %6111  ;;  %v10581_v46 = vld [vmem:[#allocation59_spill] sm:$0xff]  ;;  %v10582_v47 = vld [vmem:[#allocation60_spill] sm:$0xff] }
 0x13f   :  { %6115 = vtanh.f32 %v358_v57  ;;  %v366_v60 = vadd.f32 1.0, %v6112_v53  ;;  %v10584_v57 = vld [vmem:[#allocation62_spill] sm:$0xff]  ;;  %v10589_v53 = vld [vmem:[#allocation67_spill] sm:$0xff] }
 0x140   :  { %6117 = vrcp.f32 %v355_v0  ;;  %v10588_v0 = vld [vmem:[#allocation66_spill] sm:$0xff] }
 0x141   :  { %6119 = vrcp.f32 %v366_v60  ;;  %v10594_v60 = vld [vmem:[#allocation72_spill] sm:$0xff] }
 0x14b   :  { %v6114_v56 = vpop.eup %6113 }
 0x14c   :  { %v6116_v52 = vpop.eup %6115 }
 0x14d   :  { %v6118_v49 = vpop.eup %6117  ;;  %v370_v62 = vmul.f32 %v6116_v52, %v6114_v56  ;;  %v10590_v56 = vld [vmem:[#allocation68_spill] sm:$0xff]  ;;  %v10592_v52 = vld [vmem:[#allocation70_spill] sm:$0xff] }
 0x14e   :  { %v369_v51 = vmul.f32 %v6118_v49, %v113_v59  ;;  %v6120_v50 = vpop.eup %6119  ;;  %v10591_v59 = vld [vmem:[#allocation69_spill] sm:$0xff]  ;;  %v10593_v49 = vld [vmem:[#allocation71_spill] sm:$0xff] }
 0x150   :  { %v371_v1 = vadd.f32 %v370_v62, %v369_v51  ;;  %v10595_v51 = vld [vmem:[#allocation73_spill] sm:$0xff]  ;;  %v10596_v62 = vld [vmem:[#allocation74_spill] sm:$0xff] }
 0x152   :  { %6121 = vtanh.f32 %v371_v1  ;;  %375 = vst [vmem:[#allocation3] sm:$0x3] %v371_v1  ;;  %v10597_v1 = vld [vmem:[#allocation75_spill] sm:$0xff] }
 0x15f   :  { %v6122_v2 = vpop.eup %6121 }
 0x160   :  { %v373_v61 = vmul.f32 %v6122_v2, %v6120_v50  ;;  %v10598_v50 = vld [vmem:[#allocation76_spill] sm:$0xff]  ;;  %v10599_v2 = vld [vmem:[#allocation77_spill] sm:$0xff] }
 0x162   :  { %374 = vst [vmem:[#allocation2] sm:$0x3] %v373_v61  ;;  %715 = vmatmul.mubr.f32.vlgmr.msra.gmra.mxu0 %v373_v61  ;;  %786 = vmatmul.mubr.f32.vlgmr.msra.gmra.mxu1 %v373_v61  ;;  %v10600_v61 = vld [vmem:[#allocation78_spill] sm:$0xff] }
 0x163   :  { %914 = vmatpush1.msra.mxu0 %v6631_v3  ;;  %985 = vmatpush1.msra.mxu1 %v6635_v4  ;;  %v10543_v3 = vld [vmem:[#allocation22_spill] sm:$0xff]  ;;  %v10544_v4 = vld [vmem:[#allocation23_spill] sm:$0xff] }
 0x164   :  { %915 = vmatprep.subr.mxu0 %v6637_v5  ;;  %986 = vmatprep.subr.mxu1 %v6639_v6  ;;  %v10545_v5 = vld [vmem:[#allocation24_spill] sm:$0xff]  ;;  %v10546_v6 = vld [vmem:[#allocation25_spill] sm:$0xff] }
 0x165   :  { %916 = vmatpush1.msra.mxu0 %v6643_v7  ;;  %987 = vmatpush1.msra.mxu1 %v6645_v8  ;;  %v10547_v7 = vld [vmem:[#allocation26_spill] sm:$0xff]  ;;  %v10548_v8 = vld [vmem:[#allocation27_spill] sm:$0xff] }
 0x166   :  { %917 = vmatprep.subr.mxu0 %v6647_v9  ;;  %988 = vmatprep.subr.mxu1 %v6651_v10  ;;  %v10549_v9 = vld [vmem:[#allocation28_spill] sm:$0xff]  ;;  %v10550_v10 = vld [vmem:[#allocation29_spill] sm:$0xff] }
 0x167   :  { %918 = vmatpush1.msra.mxu0 %v6653_v11  ;;  %989 = vmatpush1.msra.mxu1 %v6655_v12  ;;  %v10551_v11 = vld [vmem:[#allocation30_spill] sm:$0xff]  ;;  %v10552_v12 = vld [vmem:[#allocation31_spill] sm:$0xff] }
 0x168   :  { %919 = vmatprep.subr.mxu0 %v6659_v13  ;;  %990 = vmatprep.subr.mxu1 %v6661_v14  ;;  %v10553_v13 = vld [vmem:[#allocation32_spill] sm:$0xff]  ;;  %v10554_v14 = vld [vmem:[#allocation33_spill] sm:$0xff] }
 0x169   :  { %920 = vmatpush1.msra.mxu0 %v6665_v15  ;;  %991 = vmatpush1.msra.mxu1 %v6667_v16  ;;  %v10555_v15 = vld [vmem:[#allocation34_spill] sm:$0xff]  ;;  %v10556_v16 = vld [vmem:[#allocation35_spill] sm:$0xff] }
 0x16a   :  { %921 = vmatprep.subr.mxu0 %v6671_v17  ;;  %992 = vmatprep.subr.mxu1 %v6673_v18  ;;  %v10557_v17 = vld [vmem:[#allocation36_spill] sm:$0xff]  ;;  %v10558_v18 = vld [vmem:[#allocation37_spill] sm:$0xff] }
 0x16b   :  { %922 = vmatpush1.msra.mxu0 %v6677_v19  ;;  %993 = vmatpush1.msra.mxu1 %v6679_v20  ;;  %v10559_v19 = vld [vmem:[#allocation38_spill] sm:$0xff]  ;;  %v10560_v20 = vld [vmem:[#allocation39_spill] sm:$0xff] }
 0x16c   :  { %923 = vmatprep.subr.mxu0 %v6683_v21  ;;  %994 = vmatprep.subr.mxu1 %v6685_v22  ;;  %v10561_v21 = vmov 0.0   ;;  %v10562_v22 = vld [vmem:[#allocation40_spill] sm:$0xff] }
 0x16d   :  { %924 = vmatpush1.msra.mxu0 %v6689_v23  ;;  %995 = vmatpush1.msra.mxu1 %v6691_v24  ;;  %v847_v23 = vld [vmem:[#allocation2] sm:$0x3]  ;;  %v7273_v24 = vld [vmem:[#allocation9 + $0x1e8] sm:$0xff] }
 0x16e   :  { %925 = vmatprep.subr.mxu0 %v6695_v25  ;;  %996 = vmatprep.subr.mxu1 %v6697_v26  ;;  %v7275_v25 = vld [vmem:[#allocation9 + $0x1f8] sm:$0xff]  ;;  %v7279_v26 = vld [vmem:[#allocation9 + $0x1e0] sm:$0xff] }
 0x16f   :  { %926 = vmatpush1.msra.mxu0 %v6701_v27  ;;  %997 = vmatpush1.msra.mxu1 %v6703_v28  ;;  %v7281_v27 = vld [vmem:[#allocation9 + $0x1f0] sm:$0xff] }
 0x170   :  { %927 = vmatprep.subr.mxu0 %v6707_v29  ;;  %998 = vmatprep.subr.mxu1 %v6709_v30  ;;  %v10563_v28 = vld [vmem:[#allocation41_spill] sm:$0xff]  ;;  %v10564_v29 = vld [vmem:[#allocation42_spill] sm:$0xff]  ;;  %v10565_v30 = vld [vmem:[#allocation43_spill] sm:$0xff] }
 0x171   :  { %928 = vmatpush1.msra.mxu0 %v6713_v31  ;;  %999 = vmatpush1.msra.mxu1 %v6715_v32  ;;  %v10566_v31 = vld [vmem:[#allocation44_spill] sm:$0xff]  ;;  %v10567_v32 = vld [vmem:[#allocation45_spill] sm:$0xff] }
 0x172   :  { %929 = vmatprep.subr.mxu0 %v6719_v33  ;;  %1000 = vmatprep.subr.mxu1 %v6721_v34  ;;  %v10568_v33 = vld [vmem:[#allocation46_spill] sm:$0xff]  ;;  %v10569_v34 = vld [vmem:[#allocation47_spill] sm:$0xff] }
 0x173   :  { %930 = vmatpush1.msra.mxu0 %v6725_v35  ;;  %1001 = vmatpush1.msra.mxu1 %v6727_v36  ;;  %v10570_v35 = vld [vmem:[#allocation48_spill] sm:$0xff]  ;;  %v10571_v36 = vld [vmem:[#allocation49_spill] sm:$0xff] }
 0x174   :  { %931 = vmatprep.subr.mxu0 %v6731_v37  ;;  %1002 = vmatprep.subr.mxu1 %v6733_v38  ;;  %v10572_v37 = vld [vmem:[#allocation50_spill] sm:$0xff]  ;;  %v10573_v38 = vld [vmem:[#allocation51_spill] sm:$0xff] }
 0x175   :  { %932 = vmatpush1.msra.mxu0 %v6737_v39  ;;  %1003 = vmatpush1.msra.mxu1 %v6739_v40  ;;  %v10574_v39 = vld [vmem:[#allocation52_spill] sm:$0xff]  ;;  %v10575_v40 = vld [vmem:[#allocation53_spill] sm:$0xff] }
 0x176   :  { %933 = vmatprep.subr.mxu0 %v6743_v41  ;;  %1004 = vmatprep.subr.mxu1 %v6745_v42  ;;  %v10576_v41 = vld [vmem:[#allocation54_spill] sm:$0xff]  ;;  %v10577_v42 = vld [vmem:[#allocation55_spill] sm:$0xff] }
 0x177   :  { %934 = vmatpush1.msra.mxu0 %v6749_v43  ;;  %1005 = vmatpush1.msra.mxu1 %v6751_v44  ;;  %v10578_v43 = vld [vmem:[#allocation56_spill] sm:$0xff]  ;;  %v10579_v44 = vld [vmem:[#allocation57_spill] sm:$0xff] }
 0x178   :  { %935 = vmatprep.subr.mxu0 %v6755_v45  ;;  %1006 = vmatprep.subr.mxu1 %v10543_v3  ;;  %v10580_v45 = vld [vmem:[#allocation58_spill] sm:$0xff]  ;;  %v10601_v3 = vld [vmem:[#allocation79_spill] sm:$0xff] }
 0x179   :  { %936 = vmatpush1.msra.mxu0 %v10544_v4  ;;  %1007 = vmatpush1.msra.mxu1 %v10545_v5  ;;  %v10602_v4 = vld [vmem:[#allocation80_spill] sm:$0xff]  ;;  %v10603_v5 = vld [vmem:[#allocation81_spill] sm:$0xff] }
 0x17a   :  { %937 = vmatprep.subr.mxu0 %v10546_v6  ;;  %1008 = vmatprep.subr.mxu1 %v10547_v7  ;;  %v10604_v6 = vld [vmem:[#allocation82_spill] sm:$0xff]  ;;  %v10605_v7 = vld [vmem:[#allocation83_spill] sm:$0xff] }
 0x17b   :  { %938 = vmatpush1.msra.mxu0 %v10548_v8  ;;  %1009 = vmatpush1.msra.mxu1 %v10549_v9  ;;  %v10606_v8 = vld [vmem:[#allocation84_spill] sm:$0xff]  ;;  %v10607_v9 = vld [vmem:[#allocation85_spill] sm:$0xff] }
 0x17c   :  { %939 = vmatprep.subr.mxu0 %v10550_v10  ;;  %1010 = vmatprep.subr.mxu1 %v10551_v11  ;;  %v10608_v10 = vld [vmem:[#allocation86_spill] sm:$0xff]  ;;  %v10609_v11 = vld [vmem:[#allocation87_spill] sm:$0xff] }
 0x17d   :  { %940 = vmatpush1.msra.mxu0 %v10552_v12  ;;  %1011 = vmatpush1.msra.mxu1 %v10553_v13  ;;  %v10610_v12 = vld [vmem:[#allocation88_spill] sm:$0xff]  ;;  %v10611_v13 = vld [vmem:[#allocation89_spill] sm:$0xff] }
 0x17e   :  { %941 = vmatprep.subr.mxu0 %v10554_v14  ;;  %1012 = vmatprep.subr.mxu1 %v10555_v15  ;;  %v10612_v14 = vld [vmem:[#allocation90_spill] sm:$0xff]  ;;  %v10613_v15 = vld [vmem:[#allocation91_spill] sm:$0xff] }
 0x17f   :  { %942 = vmatpush1.msra.mxu0 %v10556_v16  ;;  %1013 = vmatpush1.msra.mxu1 %v10557_v17  ;;  %v10614_v16 = vld [vmem:[#allocation92_spill] sm:$0xff]  ;;  %v10615_v17 = vld [vmem:[#allocation93_spill] sm:$0xff] }
 0x180   :  { %943 = vmatprep.subr.mxu0 %v10558_v18  ;;  %1014 = vmatprep.subr.mxu1 %v10559_v19  ;;  %v10616_v18 = vld [vmem:[#allocation94_spill] sm:$0xff]  ;;  %v10617_v19 = vld [vmem:[#allocation95_spill] sm:$0xff] }
 0x181   :  { %944 = vmatpush1.msra.mxu0 %v10560_v20  ;;  %977 = vmatprep.mubr.f32.mxu0 %v10561_v21  ;;  %v10618_v20 = vld [vmem:[#allocation96_spill] sm:$0xff] }
 0x182   :  { %1015 = vmatpush1.msra.mxu1 %v10562_v22  ;;  %1048 = vmatprep.mubr.f32.mxu1 %v10561_v21  ;;  %v10619_v22 = vld [vmem:[#allocation97_spill] sm:$0xff] }
 0x183   :  { %978 = vmatmul.mubr.f32.vlgmr.msra.gmra.mxu0 %v847_v23  ;;  %1049 = vmatmul.mubr.f32.vlgmr.msra.gmra.mxu1 %v847_v23  ;;  %v10620_v23 = vld [vmem:[#allocation98_spill] sm:$0xff] }
 0x184   :  { %1241 = vmatprep.mubr.f32.mxu0 %v10561_v21  ;;  %1312 = vmatprep.mubr.f32.mxu1 %v10561_v21 }
 0x185   :  { %1177 = vmatprep.subr.mxu0 %v7273_v24  ;;  %1248 = vmatprep.subr.mxu1 %v7275_v25 }
 0x186   :  { %1178 = vmatpush1.msra.mxu0 %v7279_v26  ;;  %1249 = vmatpush1.msra.mxu1 %v7281_v27 }
 0x187   :  { %1179 = vmatprep.subr.mxu0 %v10563_v28  ;;  %1250 = vmatprep.subr.mxu1 %v10564_v29  ;;  %v10621_v28 = vld [vmem:[#allocation99_spill] sm:$0xff]  ;;  %v10622_v29 = vld [vmem:[#allocation100_spill] sm:$0xff] }
 0x188   :  { %1180 = vmatpush1.msra.mxu0 %v10565_v30  ;;  %1251 = vmatpush1.msra.mxu1 %v10566_v31  ;;  %v10623_v30 = vld [vmem:[#allocation101_spill] sm:$0xff]  ;;  %v10624_v31 = vld [vmem:[#allocation102_spill] sm:$0xff] }
 0x189   :  { %1181 = vmatprep.subr.mxu0 %v10567_v32  ;;  %1252 = vmatprep.subr.mxu1 %v10568_v33  ;;  %v510_v32 = vpop.f32.mrf.mxu0  ;;  %v10625_v33 = vld [vmem:[#allocation165_spill] sm:$0xff] }
 0x18a   :  { %1182 = vmatpush1.msra.mxu0 %v10569_v34  ;;  %1253 = vmatpush1.msra.mxu1 %v10570_v35  ;;  %v7348_v34 = vsub.s32 0, %v10625_v33  ;;  %v792_v35 = vld [vmem:[%s9843_s4] sm:$0xf] }
 0x18b   :  { %1183 = vmatprep.subr.mxu0 %v10571_v36  ;;  %1254 = vmatprep.subr.mxu1 %v10572_v37  ;;  %v581_v36 = vpop.f32.mrf.mxu1  ;;  %v7354_v37 = vsub.s32 1, %v10625_v33 }
 0x18c   :  { %1184 = vmatpush1.msra.mxu0 %v10573_v38  ;;  %1255 = vmatpush1.msra.mxu1 %v10574_v39  ;;  %10626 = vst [vmem:[#allocation22_spill] sm:$0xff] %v7348_v34  ;;  %v512_v38 = vpop.f32.mrf.mxu0  ;;  %v797_v39 = vrot.slane %v792_v35, %v7348_v34 }
 0x18d   :  { %1185 = vmatprep.subr.mxu0 %v10575_v40  ;;  %1256 = vmatprep.subr.mxu1 %v10576_v41  ;;  %10627 = vst [vmem:[#allocation23_spill] sm:$0xff] %v7354_v37  ;;  %v583_v41 = vpop.f32.mrf.mxu1 }
 0x18e   :  { %1186 = vmatpush1.msra.mxu0 %v10577_v42  ;;  %1257 = vmatpush1.msra.mxu1 %v10578_v43  ;;  %v801_v43 = vrot.slane %v792_v35, %v7354_v37 }
 0x18f   :  { %1187 = vmatprep.subr.mxu0 %v10579_v44  ;;  %1258 = vmatprep.subr.mxu1 %v10580_v45 }
 0x190   :  { %1188 = vmatpush1.msra.mxu0 %v10581_v46  ;;  %1259 = vmatpush1.msra.mxu1 %v10582_v47 }
 0x191   :  { %1189 = vmatprep.subr.mxu0 %v10583_v48  ;;  %1260 = vmatprep.subr.mxu1 %v10584_v57 }
 0x192   :  { %1190 = vmatpush1.msra.mxu0 %v10585_v63  ;;  %1261 = vmatpush1.msra.mxu1 %v10586_v54  ;;  %v7359_v63 = vsub.s32 3, %v10625_v33 }
 0x193   :  { %1191 = vmatprep.subr.mxu0 %v10587_v55  ;;  %1262 = vmatprep.subr.mxu1 %v10588_v0 }
 0x194   :  { %1192 = vmatpush1.msra.mxu0 %v10589_v53  ;;  %1263 = vmatpush1.msra.mxu1 %v10590_v56  ;;  %v809_v53 = vrot.slane %v792_v35, %v7359_v63  ;;  %v7363_v56 = vsub.s32 2, %v10625_v33 }
 0x195   :  { %1193 = vmatprep.subr.mxu0 %v10591_v59  ;;  %1264 = vmatprep.subr.mxu1 %v10592_v52 }
 0x196   :  { %1194 = vmatpush1.msra.mxu0 %v10593_v49  ;;  %1265 = vmatpush1.msra.mxu1 %v10594_v60  ;;  %v805_v49 = vrot.slane %v792_v35, %v7363_v56 }
 0x197   :  { %1195 = vmatprep.subr.mxu0 %v10595_v51  ;;  %1266 = vmatprep.subr.mxu1 %v10596_v62 }
 0x198   :  { %1196 = vmatpush1.msra.mxu0 %v10597_v1  ;;  %1267 = vmatpush1.msra.mxu1 %v10598_v50 }
 0x199   :  { %1197 = vmatprep.subr.mxu0 %v10599_v2  ;;  %1268 = vmatprep.subr.mxu1 %v10600_v61 }
 0x19a   :  { %1198 = vmatpush1.msra.mxu0 %v10601_v3  ;;  %1269 = vmatpush1.msra.mxu1 %v10602_v4 }
 0x19b   :  { %1199 = vmatprep.subr.mxu0 %v10603_v5  ;;  %1270 = vmatprep.subr.mxu1 %v10604_v6 }
 0x19c   :  { %1200 = vmatpush1.msra.mxu0 %v10605_v7  ;;  %1271 = vmatpush1.msra.mxu1 %v10606_v8  ;;  %v379_v8 = vld [vmem:[#allocation3 + $0x2] sm:$0x3] }
 0x19d   :  { %1201 = vmatprep.subr.mxu0 %v10607_v9  ;;  %1272 = vmatprep.subr.mxu1 %v10608_v10 }
 0x19e   :  { %1202 = vmatpush1.msra.mxu0 %v10609_v11  ;;  %1273 = vmatpush1.msra.mxu1 %v10610_v12 }
 0x19f   :  { %1203 = vmatprep.subr.mxu0 %v10611_v13  ;;  %1274 = vmatprep.subr.mxu1 %v10612_v14 }
 0x1a0   :  { %1204 = vmatpush1.msra.mxu0 %v10613_v15  ;;  %1275 = vmatpush1.msra.mxu1 %v10614_v16 }
 0x1a1   :  { %1205 = vmatprep.subr.mxu0 %v10615_v17  ;;  %1276 = vmatprep.subr.mxu1 %v10616_v18  ;;  %v846_v18 = vld [vmem:[#allocation4 + $0x8] sm:$0xff] }
 0x1a2   :  { %1206 = vmatpush1.msra.mxu0 %v10617_v19  ;;  %1277 = vmatpush1.msra.mxu1 %v10618_v20 }
 0x1a3   :  { %1207 = vmatprep.subr.mxu0 %v10619_v22  ;;  %1278 = vmatprep.subr.mxu1 %v10620_v23 }
 0x1a4   :  { %1208 = vmatpush1.msra.mxu0 %v10621_v28  ;;  %1279 = vmatpush1.msra.mxu1 %v10622_v29 }
 0x1a5   :  { %1383 = vmatprep.subr.mxu0 %v10623_v30  ;;  %1454 = vmatprep.subr.mxu1 %v10624_v31 }
 0x222   :  { %v716_v40 = vpop.f32.mrf.mxu0  ;;  %v787_v46 = vpop.f32.mrf.mxu1 }
 0x223   :  { %v717_v42 = vadd.f32 %v716_v40, %v510_v32  ;;  %v788_v52 = vadd.f32 %v787_v46, %v581_v36  ;;  %v10631_v46 = vld [vmem:[#allocation106_spill] sm:$0xff] }
 0x224   :  { %v718_v44 = vpop.f32.mrf.mxu0  ;;  %v789_v55 = vpop.f32.mrf.mxu1 }
 0x225   :  { %v814_v45 = vadd.f32 %v797_v39, %v717_v42  ;;  %v719_v47 = vadd.f32 %v718_v44, %v512_v38  ;;  %v790_v0 = vadd.f32 %v789_v55, %v583_v41  ;;  %v816_v62 = vadd.f32 %v805_v49, %v788_v52  ;;  %v10629_v44 = vld [vmem:[#allocation104_spill] sm:$0xff]  ;;  %v10636_v55 = vld [vmem:[#allocation111_spill] sm:$0xff] }
 0x226   :  { %v10640_v49 = vld [vmem:[#allocation115_spill] sm:$0xff] }
 0x227   :  { %v6047_v48 = vmul.f32 -1.442695, %v814_v45  ;;  %v815_v57 = vadd.f32 %v801_v43, %v719_v47  ;;  %v817_v59 = vadd.f32 %v809_v53, %v790_v0  ;;  %v10628_v43 = vld [vmem:[#allocation103_spill] sm:$0xff]  ;;  %v10630_v45 = vld [vmem:[#allocation105_spill] sm:$0xff]  ;;  %v10637_v0 = vld [vmem:[#allocation112_spill] sm:$0xff] }
 0x228   :  { %v10632_v47 = vld [vmem:[#allocation107_spill] sm:$0xff]  ;;  %v10638_v53 = vld [vmem:[#allocation113_spill] sm:$0xff] }
 0x229   :  { %6123 = vpow2.f32 %v6047_v48  ;;  %v6048_v54 = vmul.f32 -1.442695, %v815_v57  ;;  %v6049_v60 = vmul.f32 -1.442695, %v817_v59  ;;  %v10633_v48 = vld [vmem:[#allocation108_spill] sm:$0xff]  ;;  %v10634_v57 = vld [vmem:[#allocation109_spill] sm:$0xff] }
 0x22a   :  { %v10639_v59 = vld [vmem:[#allocation114_spill] sm:$0xff] }
 0x22b   :  { %6125 = vpow2.f32 %v6048_v54  ;;  %v10635_v54 = vld [vmem:[#allocation110_spill] sm:$0xff] }
 0x22c   :  { %6127 = vpow2.f32 %v6049_v60  ;;  %v10641_v60 = vld [vmem:[#allocation116_spill] sm:$0xff] }
 0x236   :  { %v6124_v51 = vpop.eup %6123 }
 0x237   :  { %v821_v1 = vadd.f32 1.0, %v6124_v51 }
 0x238   :  { %v6126_v50 = vpop.eup %6125 }
 0x239   :  { %6129 = vrcp.f32 %v821_v1  ;;  %v827_v2 = vadd.f32 1.0, %v6126_v50  ;;  %v6128_v4 = vpop.eup %6127  ;;  %v10643_v1 = vld [vmem:[#allocation118_spill] sm:$0xff] }
 0x23a   :  { %6131 = vtanh.f32 %v816_v62  ;;  %v834_v13 = vadd.f32 1.0, %v6128_v4  ;;  %v10642_v62 = vld [vmem:[#allocation117_spill] sm:$0xff] }
 0x23b   :  { %6133 = vrcp.f32 %v827_v2  ;;  %v10644_v2 = vld [vmem:[#allocation119_spill] sm:$0xff] }
 0x23c   :  { %6135 = vrcp.f32 %v834_v13  ;;  %v10651_v13 = vld [vmem:[#allocation126_spill] sm:$0xff] }
 0x243   :  { %v979_v61 = vpop.f32.mrf.mxu0  ;;  %v1050_v3 = vpop.f32.mrf.mxu1 }
 0x245   :  { %v981_v5 = vpop.f32.mrf.mxu0  ;;  %v1052_v6 = vpop.f32.mrf.mxu1 }
 0x246   :  { %v6130_v7 = vpop.eup %6129  ;;  %v1059_v9 = vcombine.low %v979_v61, %v981_v5  ;;  %v1060_v10 = vcombine.low %v1050_v3, %v1052_v6  ;;  %v10645_v61 = vld [vmem:[#allocation120_spill] sm:$0xff]  ;;  %v10646_v5 = vld [vmem:[#allocation121_spill] sm:$0xff]  ;;  %v10647_v6 = vld [vmem:[#allocation122_spill] sm:$0xff] }
 0x247   :  { %v6132_v11 = vpop.eup %6131 }
 0x248   :  { %v6134_v12 = vpop.eup %6133  ;;  %v1067_v14 = vrot.slane %v1059_v9, %v7203_v58  ;;  %v1074_v15 = vrot.slane %v1060_v10, %v7203_v58  ;;  %v838_v16 = vmul.f32 %v6132_v11, %v6130_v7  ;;  %v848_v7 = vld [vmem:[#allocation3] sm:$0x3]  ;;  %v10649_v9 = vld [vmem:[#allocation124_spill] sm:$0xff] }
 0x249   :  { %v837_v17 = vmul.f32 %v6134_v12, %v379_v8  ;;  %v6136_v31 = vpop.eup %6135  ;;  %v10648_v8 = vld [vmem:[#allocation123_spill] sm:$0xff]  ;;  %v10650_v12 = vld [vmem:[#allocation125_spill] sm:$0xff] }
 0x24a   :  { %v1075_v19 = vcombine.low %v1067_v14, %v1074_v15  ;;  %v10652_v14 = vld [vmem:[#allocation127_spill] sm:$0xff]  ;;  %v10653_v15 = vld [vmem:[#allocation128_spill] sm:$0xff] }
 0x24b   :  { %v839_v20 = vadd.f32 %v838_v16, %v837_v17  ;;  %v10654_v17 = vld [vmem:[#allocation129_spill] sm:$0xff] }
 0x24c   :  { %v1077_v22 = vadd.f32 %v1075_v19, %v846_v18  ;;  %v10655_v18 = vld [vmem:[#allocation130_spill] sm:$0xff]  ;;  %v10656_v19 = vld [vmem:[#allocation131_spill] sm:$0xff] }
 0x24d   :  { %6137 = vtanh.f32 %v839_v20  ;;  %843 = vst [vmem:[#allocation3 + $0x2] sm:$0x3] %v839_v20  ;;  %v10657_v20 = vld [vmem:[#allocation132_spill] sm:$0xff] }
 0x24e   :  { %v6050_v23 = vmul.f32 -1.442695, %v1077_v22  ;;  %v1085_v28 = vrot.slane %v1077_v22, 2  ;;  %v1096_v30 = vrot.slane %v1077_v22, 6  ;;  %v1093_v38 = vrot.slane %v1077_v22, 4  ;;  %v10658_v22 = vld [vmem:[#allocation133_spill] sm:$0xff] }
 0x250   :  { %6139 = vpow2.f32 %v6050_v23  ;;  %v6051_v29 = vmul.f32 -1.442695, %v1085_v28  ;;  %v6052_v35 = vmul.f32 -1.442695, %v1096_v30  ;;  %v10659_v23 = vld [vmem:[#allocation134_spill] sm:$0xff]  ;;  %v10660_v28 = vld [vmem:[#allocation135_spill] sm:$0xff] }
 0x251   :  { %v10662_v30 = vld [vmem:[#allocation137_spill] sm:$0xff] }
 0x252   :  { %6141 = vpow2.f32 %v6051_v29  ;;  %v10661_v29 = vld [vmem:[#allocation136_spill] sm:$0xff] }
 0x253   :  { %6143 = vpow2.f32 %v6052_v35  ;;  %v10666_v35 = vld [vmem:[#allocation141_spill] sm:$0xff] }
 0x25a   :  { %v6138_v32 = vpop.eup %6137 }
 0x25b   :  { %v841_v33 = vmul.f32 %v6138_v32, %v6136_v31  ;;  %v10663_v31 = vld [vmem:[#allocation138_spill] sm:$0xff]  ;;  %v10664_v32 = vld [vmem:[#allocation139_spill] sm:$0xff] }
 0x25d   :  { %v6140_v36 = vpop.eup %6139  ;;  %842 = vst [vmem:[#allocation2 + $0x2] sm:$0x3] %v841_v33  ;;  %844 = vst [vmem:[#allocation13] sm:$0x3] %v841_v33  ;;  %v10665_v33 = vld [vmem:[#allocation140_spill] sm:$0xff] }
 0x25e   :  { %v1081_v39 = vadd.f32 1.0, %v6140_v36  ;;  %v10667_v36 = vld [vmem:[#allocation142_spill] sm:$0xff] }
 0x25f   :  { %v6142_v40 = vpop.eup %6141 }
 0x260   :  { %6145 = vrcp.f32 %v1081_v39  ;;  %v1090_v41 = vadd.f32 1.0, %v6142_v40  ;;  %v6144_v52 = vpop.eup %6143  ;;  %v10669_v39 = vld [vmem:[#allocation144_spill] sm:$0xff]  ;;  %v10670_v40 = vld [vmem:[#allocation145_spill] sm:$0xff] }
 0x261   :  { %6147 = vtanh.f32 %v1093_v38  ;;  %v1101_v4 = vadd.f32 1.0, %v6144_v52  ;;  %v10668_v38 = vld [vmem:[#allocation143_spill] sm:$0xff]  ;;  %v10683_v52 = vld [vmem:[#allocation158_spill] sm:$0xff] }
 0x262   :  { %6149 = vrcp.f32 %v1090_v41  ;;  %v10671_v41 = vld [vmem:[#allocation146_spill] sm:$0xff] }
 0x263   :  { %6151 = vrcp.f32 %v1101_v4  ;;  %v7436_v4 = vld [vmem:[#allocation7 + $0x1e0] sm:$0xff] }
 0x264   :  { %v1111_v42 = vld [vmem:[#allocation2 + $0x2] sm:$0x3] }
 0x265   :  { %1242 = vmatmul.mubr.f32.vlgmr.msra.gmra.mxu0 %v1111_v42  ;;  %1313 = vmatmul.mubr.f32.vlgmr.msra.gmra.mxu1 %v1111_v42  ;;  %v10672_v42 = vld [vmem:[#allocation147_spill] sm:$0xff] }
 0x266   :  { %1384 = vmatpush1.msra.mxu0 %v10628_v43  ;;  %1455 = vmatpush1.msra.mxu1 %v10629_v44  ;;  %v10673_v43 = vld [vmem:[#allocation148_spill] sm:$0xff]  ;;  %v10674_v44 = vld [vmem:[#allocation149_spill] sm:$0xff] }
 0x267   :  { %1385 = vmatprep.subr.mxu0 %v10630_v45  ;;  %1456 = vmatprep.subr.mxu1 %v10631_v46  ;;  %v10675_v45 = vld [vmem:[#allocation150_spill] sm:$0xff]  ;;  %v10676_v46 = vld [vmem:[#allocation151_spill] sm:$0xff] }
 0x268   :  { %1386 = vmatpush1.msra.mxu0 %v10632_v47  ;;  %1457 = vmatpush1.msra.mxu1 %v10633_v48  ;;  %v10677_v47 = vld [vmem:[#allocation152_spill] sm:$0xff]  ;;  %v10678_v48 = vld [vmem:[#allocation153_spill] sm:$0xff] }
 0x269   :  { %1387 = vmatprep.subr.mxu0 %v10634_v57  ;;  %1458 = vmatprep.subr.mxu1 %v10635_v54  ;;  %v10679_v57 = vld [vmem:[#allocation154_spill] sm:$0xff] }
 0x26a   :  { %1388 = vmatpush1.msra.mxu0 %v10636_v55  ;;  %1459 = vmatpush1.msra.mxu1 %v10637_v0  ;;  %v10680_v55 = vld [vmem:[#allocation155_spill] sm:$0xff]  ;;  %v10681_v0 = vld [vmem:[#allocation156_spill] sm:$0xff] }
 0x26b   :  { %1389 = vmatprep.subr.mxu0 %v10638_v53  ;;  %1460 = vmatprep.subr.mxu1 %v10639_v59  ;;  %v10682_v59 = vld [vmem:[#allocation157_spill] sm:$0xff] }
 0x26c   :  { %1390 = vmatpush1.msra.mxu0 %v10640_v49  ;;  %1461 = vmatpush1.msra.mxu1 %v10641_v60  ;;  %v10684_v49 = vld [vmem:[#allocation159_spill] sm:$0xff]  ;;  %v10685_v60 = vld [vmem:[#allocation160_spill] sm:$0xff] }
 0x26d   :  { %v6146_v51 = vpop.eup %6145  ;;  %1391 = vmatprep.subr.mxu0 %v10642_v62  ;;  %1462 = vmatprep.subr.mxu1 %v10643_v1  ;;  %v10686_v62 = vld [vmem:[#allocation161_spill] sm:$0xff]  ;;  %v10687_v1 = vld [vmem:[#allocation162_spill] sm:$0xff] }
 0x26e   :  { %v6148_v50 = vpop.eup %6147  ;;  %1392 = vmatpush1.msra.mxu0 %v10644_v2  ;;  %1463 = vmatpush1.msra.mxu1 %v10645_v61  ;;  %v7430_v2 = vld [vmem:[#allocation7 + $0x1e8] sm:$0xff]  ;;  %v7432_v61 = vld [vmem:[#allocation7 + $0x1f8] sm:$0xff] }
 0x26f   :  { %v6150_v3 = vpop.eup %6149  ;;  %1393 = vmatprep.subr.mxu0 %v10646_v5  ;;  %1464 = vmatprep.subr.mxu1 %v10647_v6  ;;  %v1105_v11 = vmul.f32 %v6148_v50, %v6146_v51  ;;  %v10688_v50 = vld [vmem:[#allocation163_spill] sm:$0xff]  ;;  %v7438_v5 = vld [vmem:[#allocation7 + $0x1f0] sm:$0xff] }
 0x270   :  { %1394 = vmatpush1.msra.mxu0 %v10648_v8  ;;  %1465 = vmatpush1.msra.mxu1 %v10649_v9  ;;  %v1104_v10 = vmul.f32 %v6150_v3, %v848_v7  ;;  %v6152_v54 = vpop.eup %6151  ;;  %v10689_v3 = vld [vmem:[#allocation164_spill] sm:$0xff]  ;;  %v7442_v7 = vld [vmem:[#allocation7 + $0x1d8] sm:$0xff]  ;;  %v7446_v8 = vld [vmem:[#allocation7 + $0x1c0] sm:$0xff] }
 0x271   :  { %1395 = vmatprep.subr.mxu0 %v10650_v12  ;;  %1466 = vmatprep.subr.mxu1 %v10651_v13  ;;  %v7440_v6 = vld [vmem:[#allocation7 + $0x1c8] sm:$0xff]  ;;  %v7448_v9 = vld [vmem:[#allocation7 + $0x1d0] sm:$0xff]  ;;  %v7458_v12 = vld [vmem:[#allocation7 + $0x1a0] sm:$0xff] }
 0x272   :  { %1396 = vmatpush1.msra.mxu0 %v10652_v14  ;;  %1467 = vmatpush1.msra.mxu1 %v10653_v15  ;;  %v1106_v16 = vadd.f32 %v1105_v11, %v1104_v10  ;;  %v7452_v10 = vld [vmem:[#allocation7 + $0x1a8] sm:$0xff]  ;;  %v7454_v11 = vld [vmem:[#allocation7 + $0x1b8] sm:$0xff]  ;;  %v7460_v13 = vld [vmem:[#allocation7 + $0x1b0] sm:$0xff] }
 0x273   :  { %1397 = vmatprep.subr.mxu0 %v10654_v17  ;;  %1468 = vmatprep.subr.mxu1 %v10655_v18  ;;  %v7464_v14 = vld [vmem:[#allocation7 + $0x188] sm:$0xff]  ;;  %v7466_v15 = vld [vmem:[#allocation7 + $0x198] sm:$0xff]  ;;  %v7472_v17 = vld [vmem:[#allocation7 + $0x190] sm:$0xff] }
 0x274   :  { %1398 = vmatpush1.msra.mxu0 %v10656_v19  ;;  %1469 = vmatpush1.msra.mxu1 %v10657_v20  ;;  %6153 = vtanh.f32 %v1106_v16  ;;  %1110 = vst [vmem:[#allocation3] sm:$0x3] %v1106_v16  ;;  %v7470_v16 = vld [vmem:[#allocation7 + $0x180] sm:$0xff]  ;;  %v7476_v18 = vld [vmem:[#allocation7 + $0x168] sm:$0xff]  ;;  %v7478_v19 = vld [vmem:[#allocation7 + $0x178] sm:$0xff] }
 0x275   :  { %1399 = vmatprep.subr.mxu0 %v10658_v22  ;;  %1470 = vmatprep.subr.mxu1 %v10659_v23  ;;  %v7482_v20 = vld [vmem:[#allocation7 + $0x160] sm:$0xff]  ;;  %v7484_v22 = vld [vmem:[#allocation7 + $0x170] sm:$0xff]  ;;  %v7488_v23 = vld [vmem:[#allocation7 + $0x148] sm:$0xff] }
 0x276   :  { %1400 = vmatpush1.msra.mxu0 %v10660_v28  ;;  %1471 = vmatpush1.msra.mxu1 %v10661_v29  ;;  %v7490_v28 = vld [vmem:[#allocation7 + $0x158] sm:$0xff]  ;;  %v7494_v29 = vld [vmem:[#allocation7 + $0x140] sm:$0xff] }
 0x277   :  { %1401 = vmatprep.subr.mxu0 %v10662_v30  ;;  %1472 = vmatprep.subr.mxu1 %v10663_v31  ;;  %v7496_v30 = vld [vmem:[#allocation7 + $0x150] sm:$0xff]  ;;  %v7500_v31 = vld [vmem:[#allocation7 + $0x128] sm:$0xff] }
 0x278   :  { %1402 = vmatpush1.msra.mxu0 %v10664_v32  ;;  %1473 = vmatpush1.msra.mxu1 %v10665_v33  ;;  %v7502_v32 = vld [vmem:[#allocation7 + $0x138] sm:$0xff]  ;;  %v7506_v33 = vld [vmem:[#allocation7 + $0x120] sm:$0xff] }
 0x279   :  { %1403 = vmatprep.subr.mxu0 %v10666_v35  ;;  %1474 = vmatprep.subr.mxu1 %v10667_v36  ;;  %v7508_v35 = vld [vmem:[#allocation7 + $0x130] sm:$0xff]  ;;  %v7512_v36 = vld [vmem:[#allocation7 + $0x108] sm:$0xff] }
 0x27a   :  { %1404 = vmatpush1.msra.mxu0 %v10668_v38  ;;  %1475 = vmatpush1.msra.mxu1 %v10669_v39  ;;  %v7514_v38 = vld [vmem:[#allocation7 + $0x118] sm:$0xff]  ;;  %v7518_v39 = vld [vmem:[#allocation7 + $0x100] sm:$0xff] }
 0x27b   :  { %1405 = vmatprep.subr.mxu0 %v10670_v40  ;;  %1476 = vmatprep.subr.mxu1 %v10671_v41  ;;  %v7520_v40 = vld [vmem:[#allocation7 + $0x110] sm:$0xff]  ;;  %v7524_v41 = vld [vmem:[#allocation7 + $0xe8] sm:$0xff] }
 0x27c   :  { %1406 = vmatpush1.msra.mxu0 %v10672_v42  ;;  %1477 = vmatpush1.msra.mxu1 %v10673_v43  ;;  %v7526_v42 = vld [vmem:[#allocation7 + $0xf8] sm:$0xff]  ;;  %v7530_v43 = vld [vmem:[#allocation7 + $0xe0] sm:$0xff] }
 0x27d   :  { %1407 = vmatprep.subr.mxu0 %v10674_v44  ;;  %1478 = vmatprep.subr.mxu1 %v10675_v45  ;;  %v7532_v44 = vld [vmem:[#allocation7 + $0xf0] sm:$0xff]  ;;  %v7536_v45 = vld [vmem:[#allocation7 + $0xc8] sm:$0xff] }
 0x27e   :  { %1408 = vmatpush1.msra.mxu0 %v10676_v46  ;;  %1479 = vmatpush1.msra.mxu1 %v10677_v47  ;;  %10690 = vst [vmem:[#allocation24_spill] sm:$0xff] %v7536_v45  ;;  %v7538_v46 = vld [vmem:[#allocation7 + $0xd8] sm:$0xff]  ;;  %v7542_v47 = vld [vmem:[#allocation7 + $0xc0] sm:$0xff] }
 0x27f   :  { %1409 = vmatprep.subr.mxu0 %v10678_v48  ;;  %1480 = vmatprep.subr.mxu1 %v10679_v57  ;;  %10691 = vst [vmem:[#allocation25_spill] sm:$0xff] %v7538_v46  ;;  %10692 = vst [vmem:[#allocation26_spill] sm:$0xff] %v7542_v47  ;;  %v7544_v48 = vld [vmem:[#allocation7 + $0xd0] sm:$0xff]  ;;  %v7548_v57 = vld [vmem:[#allocation7 + $0xa8] sm:$0xff] }
 0x280   :  { %1410 = vmatpush1.msra.mxu0 %v10680_v55  ;;  %1481 = vmatpush1.msra.mxu1 %v10681_v0  ;;  %10693 = vst [vmem:[#allocation27_spill] sm:$0xff] %v7544_v48  ;;  %10694 = vst [vmem:[#allocation28_spill] sm:$0xff] %v7548_v57  ;;  %v7554_v55 = vld [vmem:[#allocation7 + $0xa0] sm:$0xff]  ;;  %v7556_v0 = vld [vmem:[#allocation7 + $0xb0] sm:$0xff] }
 0x281   :  { %v6154_v53 = vpop.eup %6153  ;;  %1411 = vmatprep.subr.mxu0 %v10682_v59  ;;  %1482 = vmatprep.subr.mxu1 %v10683_v52  ;;  %10696 = vst [vmem:[#allocation30_spill] sm:$0xff] %v7554_v55  ;;  %10697 = vst [vmem:[#allocation31_spill] sm:$0xff] %v7556_v0  ;;  %v7562_v59 = vld [vmem:[#allocation7 + $0x98] sm:$0xff]  ;;  %v7566_v52 = vld [vmem:[#allocation7 + $0x80] sm:$0xff] }
 0x282   :  { %1412 = vmatpush1.msra.mxu0 %v10684_v49  ;;  %1483 = vmatpush1.msra.mxu1 %v10685_v60  ;;  %v1108_v51 = vmul.f32 %v6154_v53, %v6152_v54  ;;  %v7550_v54 = vld [vmem:[#allocation7 + $0xb8] sm:$0xff]  ;;  %v7560_v53 = vld [vmem:[#allocation7 + $0x88] sm:$0xff]  ;;  %10699 = vst [vmem:[#allocation33_spill] sm:$0xff] %v7562_v59  ;;  %10700 = vst [vmem:[#allocation34_spill] sm:$0xff] %v7566_v52 }
 0x283   :  { %1413 = vmatprep.subr.mxu0 %v10686_v62  ;;  %1484 = vmatprep.subr.mxu1 %v10687_v1  ;;  %10695 = vst [vmem:[#allocation29_spill] sm:$0xff] %v7550_v54  ;;  %10698 = vst [vmem:[#allocation32_spill] sm:$0xff] %v7560_v53  ;;  %v7568_v49 = vld [vmem:[#allocation7 + $0x90] sm:$0xff]  ;;  %v7572_v60 = vld [vmem:[#allocation7 + $0x68] sm:$0xff] }
 0x284   :  { %1414 = vmatpush1.msra.mxu0 %v10688_v50  ;;  %1447 = vmatprep.mubr.f32.mxu0 %v10561_v21  ;;  %1109 = vst [vmem:[#allocation2] sm:$0x3] %v1108_v51  ;;  %10701 = vst [vmem:[#allocation35_spill] sm:$0xff] %v7568_v49  ;;  %v7578_v62 = vld [vmem:[#allocation7 + $0x60] sm:$0xff]  ;;  %v7580_v1 = vld [vmem:[#allocation7 + $0x70] sm:$0xff] }
 0x285   :  { %1485 = vmatpush1.msra.mxu1 %v10689_v3  ;;  %1518 = vmatprep.mubr.f32.mxu1 %v10561_v21  ;;  %10702 = vst [vmem:[#allocation36_spill] sm:$0xff] %v7572_v60  ;;  %10704 = vst [vmem:[#allocation38_spill] sm:$0xff] %v7578_v62  ;;  %v7584_v50 = vld [vmem:[#allocation7 + $0x48] sm:$0xff]  ;;  %v7586_v3 = vld [vmem:[#allocation7 + $0x58] sm:$0xff] }
 0x286   :  { %1448 = vmatmul.mubr.f32.vlgmr.msra.gmra.mxu0 %v1108_v51  ;;  %1519 = vmatmul.mubr.f32.vlgmr.msra.gmra.mxu1 %v1108_v51  ;;  %v7574_v51 = vld [vmem:[#allocation7 + $0x78] sm:$0xff]  ;;  %10705 = vst [vmem:[#allocation39_spill] sm:$0xff] %v7580_v1  ;;  %10706 = vst [vmem:[#allocation40_spill] sm:$0xff] %v7584_v50 }
 0x287   :  { %1647 = vmatprep.subr.mxu0 %v7430_v2  ;;  %1718 = vmatprep.subr.mxu1 %v7432_v61  ;;  %10703 = vst [vmem:[#allocation37_spill] sm:$0xff] %v7574_v51  ;;  %10707 = vst [vmem:[#allocation41_spill] sm:$0xff] %v7586_v3 }
 0x288   :  { %1648 = vmatpush1.msra.mxu0 %v7436_v4  ;;  %1719 = vmatpush1.msra.mxu1 %v7438_v5 }
 0x289   :  { %1649 = vmatprep.subr.mxu0 %v7440_v6  ;;  %1720 = vmatprep.subr.mxu1 %v7442_v7 }
 0x28a   :  { %1650 = vmatpush1.msra.mxu0 %v7446_v8  ;;  %1721 = vmatpush1.msra.mxu1 %v7448_v9 }
 0x28b   :  { %1651 = vmatprep.subr.mxu0 %v7452_v10  ;;  %1722 = vmatprep.subr.mxu1 %v7454_v11 }
 0x28c   :  { %1652 = vmatpush1.msra.mxu0 %v7458_v12  ;;  %1723 = vmatpush1.msra.mxu1 %v7460_v13 }
 0x28d   :  { %1653 = vmatprep.subr.mxu0 %v7464_v14  ;;  %1724 = vmatprep.subr.mxu1 %v7466_v15 }
 0x28e   :  { %1654 = vmatpush1.msra.mxu0 %v7470_v16  ;;  %1725 = vmatpush1.msra.mxu1 %v7472_v17 }
 0x28f   :  { %1655 = vmatprep.subr.mxu0 %v7476_v18  ;;  %1726 = vmatprep.subr.mxu1 %v7478_v19 }
 0x290   :  { %1656 = vmatpush1.msra.mxu0 %v7482_v20  ;;  %1727 = vmatpush1.msra.mxu1 %v7484_v22 }
 0x291   :  { %1657 = vmatprep.subr.mxu0 %v7488_v23  ;;  %1728 = vmatprep.subr.mxu1 %v7490_v28 }
 0x292   :  { %1658 = vmatpush1.msra.mxu0 %v7494_v29  ;;  %1729 = vmatpush1.msra.mxu1 %v7496_v30 }
 0x293   :  { %1659 = vmatprep.subr.mxu0 %v7500_v31  ;;  %1730 = vmatprep.subr.mxu1 %v7502_v32 }
 0x294   :  { %1660 = vmatpush1.msra.mxu0 %v7506_v33  ;;  %1731 = vmatpush1.msra.mxu1 %v7508_v35 }
 0x295   :  { %1661 = vmatprep.subr.mxu0 %v7512_v36  ;;  %1732 = vmatprep.subr.mxu1 %v7514_v38 }
 0x296   :  { %1662 = vmatpush1.msra.mxu0 %v7518_v39  ;;  %1733 = vmatpush1.msra.mxu1 %v7520_v40 }
 0x297   :  { %1663 = vmatprep.subr.mxu0 %v7524_v41  ;;  %1734 = vmatprep.subr.mxu1 %v7526_v42 }
 0x298   :  { %1664 = vmatpush1.msra.mxu0 %v7530_v43  ;;  %1735 = vmatpush1.msra.mxu1 %v7532_v44 }
 0x299   :  { %1665 = vmatprep.subr.mxu0 %v7536_v45  ;;  %1736 = vmatprep.subr.mxu1 %v7538_v46 }
 0x29a   :  { %1666 = vmatpush1.msra.mxu0 %v7542_v47  ;;  %1737 = vmatpush1.msra.mxu1 %v7544_v48 }
 0x29b   :  { %1667 = vmatprep.subr.mxu0 %v7548_v57  ;;  %1738 = vmatprep.subr.mxu1 %v7550_v54 }
 0x29c   :  { %1668 = vmatpush1.msra.mxu0 %v7554_v55  ;;  %1739 = vmatpush1.msra.mxu1 %v7556_v0  ;;  %v7590_v0 = vld [vmem:[#allocation7 + $0x40] sm:$0xff] }
 0x29d   :  { %1669 = vmatprep.subr.mxu0 %v7560_v53  ;;  %1740 = vmatprep.subr.mxu1 %v7562_v59  ;;  %10708 = vst [vmem:[#allocation42_spill] sm:$0xff] %v7590_v0  ;;  %v7592_v53 = vld [vmem:[#allocation7 + $0x50] sm:$0xff]  ;;  %v7596_v59 = vld [vmem:[#allocation7 + $0x28] sm:$0xff] }
 0x29e   :  { %1670 = vmatpush1.msra.mxu0 %v7566_v52  ;;  %1741 = vmatpush1.msra.mxu1 %v7568_v49  ;;  %10709 = vst [vmem:[#allocation43_spill] sm:$0xff] %v7592_v53  ;;  %10710 = vst [vmem:[#allocation44_spill] sm:$0xff] %v7596_v59  ;;  %v7598_v52 = vld [vmem:[#allocation7 + $0x38] sm:$0xff]  ;;  %v7602_v49 = vld [vmem:[#allocation7 + $0x20] sm:$0xff] }
 0x29f   :  { %1671 = vmatprep.subr.mxu0 %v7572_v60  ;;  %1742 = vmatprep.subr.mxu1 %v7574_v51  ;;  %10711 = vst [vmem:[#allocation45_spill] sm:$0xff] %v7598_v52  ;;  %10712 = vst [vmem:[#allocation46_spill] sm:$0xff] %v7602_v49  ;;  %v7604_v60 = vld [vmem:[#allocation7 + $0x30] sm:$0xff]  ;;  %v7608_v51 = vld [vmem:[#allocation7 + $0x8] sm:$0xff] }
 0x2a0   :  { %1672 = vmatpush1.msra.mxu0 %v7578_v62  ;;  %1743 = vmatpush1.msra.mxu1 %v7580_v1  ;;  %10713 = vst [vmem:[#allocation47_spill] sm:$0xff] %v7604_v60  ;;  %10714 = vst [vmem:[#allocation48_spill] sm:$0xff] %v7608_v51  ;;  %v7610_v62 = vld [vmem:[#allocation7 + $0x18] sm:$0xff]  ;;  %v7614_v1 = vld [vmem:[#allocation7] sm:$0xff] }
 0x2a1   :  { %1673 = vmatprep.subr.mxu0 %v7584_v50  ;;  %1744 = vmatprep.subr.mxu1 %v7586_v3  ;;  %10715 = vst [vmem:[#allocation49_spill] sm:$0xff] %v7610_v62  ;;  %10716 = vst [vmem:[#allocation50_spill] sm:$0xff] %v7614_v1  ;;  %v7618_v3 = vld [vmem:[#allocation7 + $0x10] sm:$0xff] }
 0x2a2   :  { %1674 = vmatpush1.msra.mxu0 %v7590_v0  ;;  %1745 = vmatpush1.msra.mxu1 %v7592_v53  ;;  %10717 = vst [vmem:[#allocation51_spill] sm:$0xff] %v7618_v3 }
 0x2a3   :  { %1675 = vmatprep.subr.mxu0 %v7596_v59  ;;  %1746 = vmatprep.subr.mxu1 %v7598_v52  ;;  %v1581_v52 = vld [vmem:[#allocation2] sm:$0x3] }
 0x2a4   :  { %1676 = vmatpush1.msra.mxu0 %v7602_v49  ;;  %1747 = vmatpush1.msra.mxu1 %v7604_v60 }
 0x2a5   :  { %1677 = vmatprep.subr.mxu0 %v7608_v51  ;;  %1748 = vmatprep.subr.mxu1 %v7610_v62  ;;  %v7812_v62 = vld [vmem:[#allocation10 + $0x1f8] sm:$0xff] }
 0x2a6   :  { %1678 = vmatpush1.msra.mxu0 %v7614_v1  ;;  %1711 = vmatprep.mubr.f32.mxu0 %v10561_v21  ;;  %v7632_v1 = vld [vmem:[#allocation9 + $0x1c8] sm:$0xff]  ;;  %10779 = vst [vmem:[#allocation112_spill] sm:$0xff] %v7812_v62 }
 0x2a7   :  { %1749 = vmatpush1.msra.mxu1 %v7618_v3  ;;  %1782 = vmatprep.mubr.f32.mxu1 %v10561_v21  ;;  %10718 = vst [vmem:[#allocation52_spill] sm:$0xff] %v7632_v1  ;;  %v7634_v3 = vld [vmem:[#allocation9 + $0x1d8] sm:$0xff] }
 0x2a8   :  { %1712 = vmatmul.mubr.f32.vlgmr.msra.gmra.mxu0 %v1581_v52  ;;  %1783 = vmatmul.mubr.f32.vlgmr.msra.gmra.mxu1 %v1581_v52  ;;  %10719 = vst [vmem:[#allocation53_spill] sm:$0xff] %v7634_v3  ;;  %v7638_v52 = vld [vmem:[#allocation9 + $0x1c0] sm:$0xff] }
 0x2a9   :  { %1911 = vmatprep.subr.mxu0 %v7273_v24  ;;  %1982 = vmatprep.subr.mxu1 %v7275_v25  ;;  %10720 = vst [vmem:[#allocation54_spill] sm:$0xff] %v7638_v52  ;;  %v7640_v24 = vld [vmem:[#allocation9 + $0x1d0] sm:$0xff]  ;;  %v7644_v25 = vld [vmem:[#allocation9 + $0x1a8] sm:$0xff] }
 0x2aa   :  { %1912 = vmatpush1.msra.mxu0 %v7279_v26  ;;  %1983 = vmatpush1.msra.mxu1 %v7281_v27  ;;  %10721 = vst [vmem:[#allocation55_spill] sm:$0xff] %v7640_v24  ;;  %10722 = vst [vmem:[#allocation56_spill] sm:$0xff] %v7644_v25  ;;  %v7646_v26 = vld [vmem:[#allocation9 + $0x1b8] sm:$0xff]  ;;  %v7650_v27 = vld [vmem:[#allocation9 + $0x1a0] sm:$0xff] }
 0x2ab   :  { %1975 = vmatprep.mubr.f32.mxu0 %v10561_v21  ;;  %2046 = vmatprep.mubr.f32.mxu1 %v10561_v21  ;;  %10723 = vst [vmem:[#allocation57_spill] sm:$0xff] %v7646_v26  ;;  %10724 = vst [vmem:[#allocation58_spill] sm:$0xff] %v7650_v27 }
 0x2ac   :  { %1913 = vmatprep.subr.mxu0 %v7632_v1  ;;  %1984 = vmatprep.subr.mxu1 %v7634_v3  ;;  %v7652_v1 = vld [vmem:[#allocation9 + $0x1b0] sm:$0xff]  ;;  %v7656_v3 = vld [vmem:[#allocation9 + $0x188] sm:$0xff] }
 0x2ad   :  { %1914 = vmatpush1.msra.mxu0 %v7638_v52  ;;  %1985 = vmatpush1.msra.mxu1 %v7640_v24  ;;  %10725 = vst [vmem:[#allocation59_spill] sm:$0xff] %v7652_v1  ;;  %10726 = vst [vmem:[#allocation60_spill] sm:$0xff] %v7656_v3  ;;  %v7658_v52 = vld [vmem:[#allocation9 + $0x198] sm:$0xff]  ;;  %v7662_v24 = vld [vmem:[#allocation9 + $0x180] sm:$0xff] }
 0x2ae   :  { %1915 = vmatprep.subr.mxu0 %v7644_v25  ;;  %1986 = vmatprep.subr.mxu1 %v7646_v26  ;;  %10727 = vst [vmem:[#allocation61_spill] sm:$0xff] %v7658_v52  ;;  %10728 = vst [vmem:[#allocation62_spill] sm:$0xff] %v7662_v24  ;;  %v7664_v25 = vld [vmem:[#allocation9 + $0x190] sm:$0xff]  ;;  %v7668_v26 = vld [vmem:[#allocation9 + $0x168] sm:$0xff] }
 0x2af   :  { %1916 = vmatpush1.msra.mxu0 %v7650_v27  ;;  %1987 = vmatpush1.msra.mxu1 %v7652_v1  ;;  %10729 = vst [vmem:[#allocation63_spill] sm:$0xff] %v7664_v25  ;;  %10730 = vst [vmem:[#allocation64_spill] sm:$0xff] %v7668_v26  ;;  %v7670_v27 = vld [vmem:[#allocation9 + $0x178] sm:$0xff]  ;;  %v7674_v1 = vld [vmem:[#allocation9 + $0x160] sm:$0xff] }
 0x2b0   :  { %1917 = vmatprep.subr.mxu0 %v7656_v3  ;;  %1988 = vmatprep.subr.mxu1 %v7658_v52  ;;  %10731 = vst [vmem:[#allocation65_spill] sm:$0xff] %v7670_v27  ;;  %10732 = vst [vmem:[#allocation66_spill] sm:$0xff] %v7674_v1  ;;  %v7676_v3 = vld [vmem:[#allocation9 + $0x170] sm:$0xff]  ;;  %v7680_v52 = vld [vmem:[#allocation9 + $0x148] sm:$0xff] }
 0x2b1   :  { %1918 = vmatpush1.msra.mxu0 %v7662_v24  ;;  %1989 = vmatpush1.msra.mxu1 %v7664_v25  ;;  %10733 = vst [vmem:[#allocation67_spill] sm:$0xff] %v7676_v3  ;;  %10734 = vst [vmem:[#allocation68_spill] sm:$0xff] %v7680_v52  ;;  %v7682_v24 = vld [vmem:[#allocation9 + $0x158] sm:$0xff]  ;;  %v7686_v25 = vld [vmem:[#allocation9 + $0x140] sm:$0xff] }
 0x2b2   :  { %1919 = vmatprep.subr.mxu0 %v7668_v26  ;;  %1990 = vmatprep.subr.mxu1 %v7670_v27  ;;  %10735 = vst [vmem:[#allocation69_spill] sm:$0xff] %v7682_v24  ;;  %10736 = vst [vmem:[#allocation70_spill] sm:$0xff] %v7686_v25  ;;  %v7688_v26 = vld [vmem:[#allocation9 + $0x150] sm:$0xff]  ;;  %v7692_v27 = vld [vmem:[#allocation9 + $0x128] sm:$0xff] }
 0x2b3   :  { %1920 = vmatpush1.msra.mxu0 %v7674_v1  ;;  %1991 = vmatpush1.msra.mxu1 %v7676_v3  ;;  %10737 = vst [vmem:[#allocation71_spill] sm:$0xff] %v7688_v26  ;;  %10738 = vst [vmem:[#allocation72_spill] sm:$0xff] %v7692_v27  ;;  %v7694_v1 = vld [vmem:[#allocation9 + $0x138] sm:$0xff]  ;;  %v7698_v3 = vld [vmem:[#allocation9 + $0x120] sm:$0xff] }
 0x2b4   :  { %1921 = vmatprep.subr.mxu0 %v7680_v52  ;;  %1992 = vmatprep.subr.mxu1 %v7682_v24  ;;  %10739 = vst [vmem:[#allocation73_spill] sm:$0xff] %v7694_v1  ;;  %10740 = vst [vmem:[#allocation74_spill] sm:$0xff] %v7698_v3  ;;  %v7700_v52 = vld [vmem:[#allocation9 + $0x130] sm:$0xff]  ;;  %v7704_v24 = vld [vmem:[#allocation9 + $0x108] sm:$0xff] }
 0x2b5   :  { %1922 = vmatpush1.msra.mxu0 %v7686_v25  ;;  %1993 = vmatpush1.msra.mxu1 %v7688_v26  ;;  %10741 = vst [vmem:[#allocation75_spill] sm:$0xff] %v7700_v52  ;;  %10742 = vst [vmem:[#allocation76_spill] sm:$0xff] %v7704_v24  ;;  %v7706_v25 = vld [vmem:[#allocation9 + $0x118] sm:$0xff]  ;;  %v7710_v26 = vld [vmem:[#allocation9 + $0x100] sm:$0xff] }
 0x2b6   :  { %1923 = vmatprep.subr.mxu0 %v7692_v27  ;;  %1994 = vmatprep.subr.mxu1 %v7694_v1  ;;  %10743 = vst [vmem:[#allocation77_spill] sm:$0xff] %v7706_v25  ;;  %10744 = vst [vmem:[#allocation78_spill] sm:$0xff] %v7710_v26  ;;  %v7712_v27 = vld [vmem:[#allocation9 + $0x110] sm:$0xff]  ;;  %v7716_v1 = vld [vmem:[#allocation9 + $0xe8] sm:$0xff] }
 0x2b7   :  { %1924 = vmatpush1.msra.mxu0 %v7698_v3  ;;  %1995 = vmatpush1.msra.mxu1 %v7700_v52  ;;  %10745 = vst [vmem:[#allocation79_spill] sm:$0xff] %v7712_v27  ;;  %10746 = vst [vmem:[#allocation80_spill] sm:$0xff] %v7716_v1  ;;  %v7718_v3 = vld [vmem:[#allocation9 + $0xf8] sm:$0xff]  ;;  %v7722_v52 = vld [vmem:[#allocation9 + $0xe0] sm:$0xff] }
 0x2b8   :  { %1925 = vmatprep.subr.mxu0 %v7704_v24  ;;  %1996 = vmatprep.subr.mxu1 %v7706_v25  ;;  %10747 = vst [vmem:[#allocation81_spill] sm:$0xff] %v7718_v3  ;;  %10748 = vst [vmem:[#allocation82_spill] sm:$0xff] %v7722_v52  ;;  %v7724_v24 = vld [vmem:[#allocation9 + $0xf0] sm:$0xff]  ;;  %v7728_v25 = vld [vmem:[#allocation9 + $0xc8] sm:$0xff] }
 0x2b9   :  { %1926 = vmatpush1.msra.mxu0 %v7710_v26  ;;  %1997 = vmatpush1.msra.mxu1 %v7712_v27  ;;  %10749 = vst [vmem:[#allocation83_spill] sm:$0xff] %v7724_v24  ;;  %10750 = vst [vmem:[#allocation84_spill] sm:$0xff] %v7728_v25  ;;  %v7730_v26 = vld [vmem:[#allocation9 + $0xd8] sm:$0xff]  ;;  %v7734_v27 = vld [vmem:[#allocation9 + $0xc0] sm:$0xff] }
 0x2ba   :  { %1927 = vmatprep.subr.mxu0 %v7716_v1  ;;  %1998 = vmatprep.subr.mxu1 %v7718_v3  ;;  %10751 = vst [vmem:[#allocation85_spill] sm:$0xff] %v7730_v26  ;;  %10752 = vst [vmem:[#allocation86_spill] sm:$0xff] %v7734_v27  ;;  %v7736_v1 = vld [vmem:[#allocation9 + $0xd0] sm:$0xff]  ;;  %v7740_v3 = vld [vmem:[#allocation9 + $0xa8] sm:$0xff] }
 0x2bb   :  { %1928 = vmatpush1.msra.mxu0 %v7722_v52  ;;  %1999 = vmatpush1.msra.mxu1 %v7724_v24  ;;  %10753 = vst [vmem:[#allocation87_spill] sm:$0xff] %v7736_v1  ;;  %10754 = vst [vmem:[#allocation88_spill] sm:$0xff] %v7740_v3  ;;  %v7742_v52 = vld [vmem:[#allocation9 + $0xb8] sm:$0xff]  ;;  %v7746_v24 = vld [vmem:[#allocation9 + $0xa0] sm:$0xff] }
 0x2bc   :  { %1929 = vmatprep.subr.mxu0 %v7728_v25  ;;  %2000 = vmatprep.subr.mxu1 %v7730_v26  ;;  %10755 = vst [vmem:[#allocation89_spill] sm:$0xff] %v7742_v52  ;;  %10756 = vst [vmem:[#allocation90_spill] sm:$0xff] %v7746_v24  ;;  %v7748_v25 = vld [vmem:[#allocation9 + $0xb0] sm:$0xff]  ;;  %v7752_v26 = vld [vmem:[#allocation9 + $0x88] sm:$0xff] }
 0x2bd   :  { %1930 = vmatpush1.msra.mxu0 %v7734_v27  ;;  %2001 = vmatpush1.msra.mxu1 %v7736_v1  ;;  %10757 = vst [vmem:[#allocation91_spill] sm:$0xff] %v7748_v25  ;;  %10758 = vst [vmem:[#allocation92_spill] sm:$0xff] %v7752_v26  ;;  %v7754_v27 = vld [vmem:[#allocation9 + $0x98] sm:$0xff]  ;;  %v7758_v1 = vld [vmem:[#allocation9 + $0x80] sm:$0xff] }
 0x2be   :  { %1931 = vmatprep.subr.mxu0 %v7740_v3  ;;  %2002 = vmatprep.subr.mxu1 %v7742_v52  ;;  %10759 = vst [vmem:[#allocation93_spill] sm:$0xff] %v7754_v27  ;;  %10760 = vst [vmem:[#allocation94_spill] sm:$0xff] %v7758_v1  ;;  %v7760_v3 = vld [vmem:[#allocation9 + $0x90] sm:$0xff]  ;;  %v7764_v52 = vld [vmem:[#allocation9 + $0x68] sm:$0xff] }
 0x2bf   :  { %1932 = vmatpush1.msra.mxu0 %v7746_v24  ;;  %2003 = vmatpush1.msra.mxu1 %v7748_v25  ;;  %10761 = vst [vmem:[#allocation95_spill] sm:$0xff] %v7760_v3  ;;  %10762 = vst [vmem:[#allocation96_spill] sm:$0xff] %v7764_v52  ;;  %v7766_v24 = vld [vmem:[#allocation9 + $0x78] sm:$0xff]  ;;  %v7770_v25 = vld [vmem:[#allocation9 + $0x60] sm:$0xff] }
 0x2c0   :  { %1933 = vmatprep.subr.mxu0 %v7752_v26  ;;  %2004 = vmatprep.subr.mxu1 %v7754_v27  ;;  %10763 = vst [vmem:[#allocation97_spill] sm:$0xff] %v7766_v24  ;;  %10764 = vst [vmem:[#allocation98_spill] sm:$0xff] %v7770_v25  ;;  %v7772_v26 = vld [vmem:[#allocation9 + $0x70] sm:$0xff]  ;;  %v7776_v27 = vld [vmem:[#allocation9 + $0x48] sm:$0xff] }
 0x2c1   :  { %1934 = vmatpush1.msra.mxu0 %v7758_v1  ;;  %2005 = vmatpush1.msra.mxu1 %v7760_v3  ;;  %10765 = vst [vmem:[#allocation99_spill] sm:$0xff] %v7772_v26  ;;  %10766 = vst [vmem:[#allocation100_spill] sm:$0xff] %v7776_v27  ;;  %v7778_v1 = vld [vmem:[#allocation9 + $0x58] sm:$0xff]  ;;  %v7782_v3 = vld [vmem:[#allocation9 + $0x40] sm:$0xff] }
 0x2c2   :  { %1935 = vmatprep.subr.mxu0 %v7764_v52  ;;  %2006 = vmatprep.subr.mxu1 %v7766_v24  ;;  %10767 = vst [vmem:[#allocation101_spill] sm:$0xff] %v7778_v1  ;;  %10768 = vst [vmem:[#allocation102_spill] sm:$0xff] %v7782_v3  ;;  %v7784_v52 = vld [vmem:[#allocation9 + $0x50] sm:$0xff]  ;;  %v7788_v24 = vld [vmem:[#allocation9 + $0x28] sm:$0xff] }
 0x2c3   :  { %1936 = vmatpush1.msra.mxu0 %v7770_v25  ;;  %2007 = vmatpush1.msra.mxu1 %v7772_v26  ;;  %10769 = vst [vmem:[#allocation165_spill] sm:$0xff] %v7784_v52  ;;  %10770 = vst [vmem:[#allocation103_spill] sm:$0xff] %v7788_v24  ;;  %v7790_v25 = vld [vmem:[#allocation9 + $0x38] sm:$0xff]  ;;  %v7794_v26 = vld [vmem:[#allocation9 + $0x20] sm:$0xff] }
 0x2c4   :  { %1937 = vmatprep.subr.mxu0 %v7776_v27  ;;  %2008 = vmatprep.subr.mxu1 %v7778_v1  ;;  %10771 = vst [vmem:[#allocation104_spill] sm:$0xff] %v7790_v25  ;;  %10772 = vst [vmem:[#allocation105_spill] sm:$0xff] %v7794_v26  ;;  %v7796_v27 = vld [vmem:[#allocation9 + $0x30] sm:$0xff]  ;;  %v7800_v1 = vld [vmem:[#allocation9 + $0x8] sm:$0xff] }
 0x2c5   :  { %1938 = vmatpush1.msra.mxu0 %v7782_v3  ;;  %2009 = vmatpush1.msra.mxu1 %v7784_v52  ;;  %10773 = vst [vmem:[#allocation106_spill] sm:$0xff] %v7796_v27  ;;  %10774 = vst [vmem:[#allocation107_spill] sm:$0xff] %v7800_v1  ;;  %v7802_v3 = vld [vmem:[#allocation9 + $0x18] sm:$0xff]  ;;  %v7804_v52 = vld [vmem:[#allocation9] sm:$0xff] }
 0x2c6   :  { %1939 = vmatprep.subr.mxu0 %v7788_v24  ;;  %2010 = vmatprep.subr.mxu1 %v7790_v25  ;;  %10775 = vst [vmem:[#allocation108_spill] sm:$0xff] %v7802_v3  ;;  %10776 = vst [vmem:[#allocation109_spill] sm:$0xff] %v7804_v52  ;;  %v7808_v24 = vld [vmem:[#allocation9 + $0x10] sm:$0xff]  ;;  %v7810_v25 = vld [vmem:[#allocation10 + $0x1e8] sm:$0xff] }
 0x2c7   :  { %1940 = vmatpush1.msra.mxu0 %v7794_v26  ;;  %2011 = vmatpush1.msra.mxu1 %v7796_v27  ;;  %10777 = vst [vmem:[#allocation110_spill] sm:$0xff] %v7808_v24  ;;  %10778 = vst [vmem:[#allocation111_spill] sm:$0xff] %v7810_v25 }
 0x2c8   :  { %1941 = vmatprep.subr.mxu0 %v7800_v1  ;;  %2012 = vmatprep.subr.mxu1 %v7802_v3  ;;  %v1525_v1 = vld [vmem:[%s9843_s4] sm:$0xf] }
 0x2c9   :  { %1942 = vmatpush1.msra.mxu0 %v7804_v52  ;;  %2013 = vmatpush1.msra.mxu1 %v7808_v24  ;;  %v1530_v51 = vrot.slane %v1525_v1, %v7348_v34  ;;  %v1534_v52 = vrot.slane %v1525_v1, %v7354_v37  ;;  %v1542_v48 = vrot.slane %v1525_v1, %v7359_v63 }
 0x2ca   :  { %2117 = vmatprep.subr.mxu0 %v7810_v25  ;;  %2188 = vmatprep.subr.mxu1 %v7812_v62  ;;  %v1538_v46 = vrot.slane %v1525_v1, %v7363_v56 }
 0x325   :  { %v1243_v27 = vpop.f32.mrf.mxu0  ;;  %v1314_v3 = vpop.f32.mrf.mxu1 }
 0x327   :  { %v1245_v26 = vpop.f32.mrf.mxu0  ;;  %v1316_v49 = vpop.f32.mrf.mxu1 }
 0x346   :  { %v1449_v60 = vpop.f32.mrf.mxu0  ;;  %v1520_v0 = vpop.f32.mrf.mxu1 }
 0x347   :  { %v1450_v59 = vadd.f32 %v1449_v60, %v1243_v27  ;;  %v1521_v34 = vadd.f32 %v1520_v0, %v1314_v3 }
 0x348   :  { %v1451_v53 = vpop.f32.mrf.mxu0  ;;  %v1522_v54 = vpop.f32.mrf.mxu1 }
 0x349   :  { %v1547_v24 = vadd.f32 %v1530_v51, %v1450_v59  ;;  %v1452_v25 = vadd.f32 %v1451_v53, %v1245_v26  ;;  %v1523_v57 = vadd.f32 %v1522_v54, %v1316_v49  ;;  %v1549_v37 = vadd.f32 %v1538_v46, %v1521_v34 }
 0x34b   :  { %v6053_v50 = vmul.f32 -1.442695, %v1547_v24  ;;  %v1548_v62 = vadd.f32 %v1534_v52, %v1452_v25  ;;  %v1550_v47 = vadd.f32 %v1542_v48, %v1523_v57 }
 0x34d   :  { %6155 = vpow2.f32 %v6053_v50  ;;  %v6054_v55 = vmul.f32 -1.442695, %v1548_v62  ;;  %v6055_v60 = vmul.f32 -1.442695, %v1550_v47  ;;  %v1112_v47 = vld [vmem:[#allocation3 + $0x2] sm:$0x3] }
 0x34f   :  { %6157 = vpow2.f32 %v6054_v55 }
 0x350   :  { %6159 = vpow2.f32 %v6055_v60 }
 0x35a   :  { %v6156_v27 = vpop.eup %6155 }
 0x35b   :  { %v1554_v45 = vadd.f32 1.0, %v6156_v27 }
 0x35c   :  { %v6158_v59 = vpop.eup %6157 }
 0x35d   :  { %6161 = vrcp.f32 %v1554_v45  ;;  %v1560_v53 = vadd.f32 1.0, %v6158_v59  ;;  %v6160_v55 = vpop.eup %6159 }
 0x35e   :  { %6163 = vtanh.f32 %v1549_v37  ;;  %v1567_v3 = vadd.f32 1.0, %v6160_v55  ;;  %v1580_v37 = vld [vmem:[#allocation4 + $0x10] sm:$0xff] }
 0x35f   :  { %6165 = vrcp.f32 %v1560_v53 }
 0x360   :  { %6167 = vrcp.f32 %v1567_v3 }
 0x368   :  { %v1713_v51 = vpop.f32.mrf.mxu0  ;;  %v1784_v62 = vpop.f32.mrf.mxu1 }
 0x36a   :  { %v6162_v54 = vpop.eup %6161  ;;  %v1715_v49 = vpop.f32.mrf.mxu0 }
 0x36b   :  { %v1786_v50 = vpop.f32.mrf.mxu1  ;;  %v6164_v48 = vpop.eup %6163  ;;  %v1793_v57 = vcombine.low %v1713_v51, %v1715_v49 }
 0x36c   :  { %v1794_v0 = vcombine.low %v1784_v62, %v1786_v50  ;;  %v6166_v1 = vpop.eup %6165  ;;  %v1571_v34 = vmul.f32 %v6164_v48, %v6162_v54 }
 0x36d   :  { %v1570_v46 = vmul.f32 %v6166_v1, %v1112_v47  ;;  %v1801_v52 = vrot.slane %v1793_v57, %v7203_v58  ;;  %v6168_v51 = vpop.eup %6167  ;;  %v7827_v1 = vld [vmem:[#allocation10 + $0x1e0] sm:$0xff]  ;;  %v7829_v47 = vld [vmem:[#allocation10 + $0x1f0] sm:$0xff] }
 0x36e   :  { %v1808_v45 = vrot.slane %v1794_v0, %v7203_v58 }
 0x36f   :  { %v1572_v24 = vadd.f32 %v1571_v34, %v1570_v46  ;;  %v7831_v34 = vld [vmem:[#allocation10 + $0x1c8] sm:$0xff]  ;;  %v7833_v46 = vld [vmem:[#allocation10 + $0x1d8] sm:$0xff] }
 0x370   :  { %v1809_v25 = vcombine.low %v1801_v52, %v1808_v45  ;;  %v7835_v52 = vld [vmem:[#allocation10 + $0x1c0] sm:$0xff]  ;;  %v7837_v45 = vld [vmem:[#allocation10 + $0x1d0] sm:$0xff] }
 0x371   :  { %6169 = vtanh.f32 %v1572_v24  ;;  %1576 = vst [vmem:[#allocation3 + $0x2] sm:$0x3] %v1572_v24  ;;  %v7843_v24 = vld [vmem:[#allocation10 + $0x1b8] sm:$0xff] }
 0x372   :  { %v1811_v26 = vadd.f32 %v1809_v25, %v1580_v37  ;;  %v7841_v37 = vld [vmem:[#allocation10 + $0x1a8] sm:$0xff]  ;;  %10781 = vst [vmem:[#allocation114_spill] sm:$0xff] %v7843_v24  ;;  %v7847_v25 = vld [vmem:[#allocation10 + $0x1a0] sm:$0xff] }
 0x373   :  { %10780 = vst [vmem:[#allocation113_spill] sm:$0xff] %v7841_v37  ;;  %10782 = vst [vmem:[#allocation115_spill] sm:$0xff] %v7847_v25 }
 0x374   :  { %v6056_v60 = vmul.f32 -1.442695, %v1811_v26  ;;  %v1819_v27 = vrot.slane %v1811_v26, 2  ;;  %v1830_v53 = vrot.slane %v1811_v26, 6  ;;  %v1827_v50 = vrot.slane %v1811_v26, 4  ;;  %v7849_v26 = vld [vmem:[#allocation10 + $0x1b0] sm:$0xff] }
 0x375   :  { %10783 = vst [vmem:[#allocation116_spill] sm:$0xff] %v7849_v26 }
 0x376   :  { %6171 = vpow2.f32 %v6056_v60  ;;  %v6057_v59 = vmul.f32 -1.442695, %v1819_v27  ;;  %v6058_v54 = vmul.f32 -1.442695, %v1830_v53  ;;  %v7853_v60 = vld [vmem:[#allocation10 + $0x188] sm:$0xff]  ;;  %v7855_v27 = vld [vmem:[#allocation10 + $0x198] sm:$0xff] }
 0x377   :  { %10784 = vst [vmem:[#allocation117_spill] sm:$0xff] %v7853_v60  ;;  %10785 = vst [vmem:[#allocation118_spill] sm:$0xff] %v7855_v27  ;;  %v7861_v53 = vld [vmem:[#allocation10 + $0x190] sm:$0xff] }
 0x378   :  { %6173 = vpow2.f32 %v6057_v59  ;;  %v7859_v59 = vld [vmem:[#allocation10 + $0x180] sm:$0xff]  ;;  %10787 = vst [vmem:[#allocation120_spill] sm:$0xff] %v7861_v53 }
 0x379   :  { %6175 = vpow2.f32 %v6058_v54  ;;  %10786 = vst [vmem:[#allocation119_spill] sm:$0xff] %v7859_v59  ;;  %v7873_v54 = vld [vmem:[#allocation10 + $0x170] sm:$0xff] }
 0x37a   :  { %10791 = vst [vmem:[#allocation124_spill] sm:$0xff] %v7873_v54 }
 0x37e   :  { %v6170_v62 = vpop.eup %6169 }
 0x37f   :  { %v1574_v55 = vmul.f32 %v6170_v62, %v6168_v51  ;;  %v7865_v51 = vld [vmem:[#allocation10 + $0x168] sm:$0xff]  ;;  %v7867_v62 = vld [vmem:[#allocation10 + $0x178] sm:$0xff] }
 0x380   :  { %10788 = vst [vmem:[#allocation121_spill] sm:$0xff] %v7865_v51  ;;  %10789 = vst [vmem:[#allocation122_spill] sm:$0xff] %v7867_v62 }
 0x381   :  { %1575 = vst [vmem:[#allocation2 + $0x2] sm:$0x3] %v1574_v55  ;;  %1578 = vst [vmem:[#allocation13 + $0x2] sm:$0x3] %v1574_v55  ;;  %v7871_v55 = vld [vmem:[#allocation10 + $0x160] sm:$0xff] }
 0x382   :  { %10790 = vst [vmem:[#allocation123_spill] sm:$0xff] %v7871_v55 }
 0x383   :  { %v6172_v49 = vpop.eup %6171 }
 0x384   :  { %v1815_v48 = vadd.f32 1.0, %v6172_v49  ;;  %v7877_v49 = vld [vmem:[#allocation10 + $0x148] sm:$0xff] }
 0x385   :  { %v6174_v57 = vpop.eup %6173  ;;  %10792 = vst [vmem:[#allocation125_spill] sm:$0xff] %v7877_v49 }
 0x386   :  { %6177 = vrcp.f32 %v1815_v48  ;;  %v1824_v0 = vadd.f32 1.0, %v6174_v57  ;;  %v6176_v48 = vpop.eup %6175  ;;  %v7883_v57 = vld [vmem:[#allocation10 + $0x140] sm:$0xff] }
 0x387   :  { %6179 = vtanh.f32 %v1827_v50  ;;  %v7879_v50 = vld [vmem:[#allocation10 + $0x158] sm:$0xff]  ;;  %10794 = vst [vmem:[#allocation127_spill] sm:$0xff] %v7883_v57 }
 0x388   :  { %6181 = vrcp.f32 %v1824_v0  ;;  %v1845_v3 = vld [vmem:[#allocation2 + $0x2] sm:$0x3]  ;;  %10793 = vst [vmem:[#allocation126_spill] sm:$0xff] %v7879_v50  ;;  %v7885_v0 = vld [vmem:[#allocation10 + $0x150] sm:$0xff] }
 0x389   :  { %1976 = vmatmul.mubr.f32.vlgmr.msra.gmra.mxu0 %v1845_v3  ;;  %2047 = vmatmul.mubr.f32.vlgmr.msra.gmra.mxu1 %v1845_v3  ;;  %10795 = vst [vmem:[#allocation128_spill] sm:$0xff] %v7885_v0 }
 0x38a   :  { %2118 = vmatpush1.msra.mxu0 %v7827_v1  ;;  %2189 = vmatpush1.msra.mxu1 %v7829_v47 }
 0x38b   :  { %2119 = vmatprep.subr.mxu0 %v7831_v34  ;;  %2190 = vmatprep.subr.mxu1 %v7833_v46 }
 0x38c   :  { %2120 = vmatpush1.msra.mxu0 %v7835_v52  ;;  %2191 = vmatpush1.msra.mxu1 %v7837_v45 }
 0x38d   :  { %2121 = vmatprep.subr.mxu0 %v7841_v37  ;;  %2192 = vmatprep.subr.mxu1 %v7843_v24 }
 0x38e   :  { %2122 = vmatpush1.msra.mxu0 %v7847_v25  ;;  %2193 = vmatpush1.msra.mxu1 %v7849_v26  ;;  %v1835_v26 = vadd.f32 1.0, %v6176_v48  ;;  %v1582_v25 = vld [vmem:[#allocation3] sm:$0x3]  ;;  %v7913_v48 = vld [vmem:[#allocation10 + $0xe8] sm:$0xff] }
 0x38f   :  { %2123 = vmatprep.subr.mxu0 %v7853_v60  ;;  %2194 = vmatprep.subr.mxu1 %v7855_v27  ;;  %10798 = vst [vmem:[#allocation131_spill] sm:$0xff] %v7913_v48 }
 0x390   :  { %2124 = vmatpush1.msra.mxu0 %v7859_v59  ;;  %2195 = vmatpush1.msra.mxu1 %v7861_v53  ;;  %v7889_v59 = vld [vmem:[#allocation10 + $0x128] sm:$0xff]  ;;  %v7891_v53 = vld [vmem:[#allocation10 + $0x138] sm:$0xff]  ;;  %6183 = vrcp.f32 %v1835_v26  ;;  %v7943_v26 = vld [vmem:[#allocation10 + $0xa0] sm:$0xff] }
 0x391   :  { %2125 = vmatprep.subr.mxu0 %v7865_v51  ;;  %2196 = vmatprep.subr.mxu1 %v7867_v62  ;;  %10796 = vst [vmem:[#allocation129_spill] sm:$0xff] %v7889_v59  ;;  %10797 = vst [vmem:[#allocation130_spill] sm:$0xff] %v7891_v53  ;;  %v7895_v51 = vld [vmem:[#allocation10 + $0x120] sm:$0xff]  ;;  %v7897_v62 = vld [vmem:[#allocation10 + $0x130] sm:$0xff] }
 0x392   :  { %2126 = vmatpush1.msra.mxu0 %v7871_v55  ;;  %2197 = vmatpush1.msra.mxu1 %v7873_v54  ;;  %v7901_v54 = vld [vmem:[#allocation10 + $0x108] sm:$0xff]  ;;  %v7903_v55 = vld [vmem:[#allocation10 + $0x118] sm:$0xff]  ;;  %10808 = vst [vmem:[#allocation141_spill] sm:$0xff] %v7943_v26 }
 0x393   :  { %v6178_v3 = vpop.eup %6177  ;;  %2127 = vmatprep.subr.mxu0 %v7877_v49  ;;  %2198 = vmatprep.subr.mxu1 %v7879_v50  ;;  %v7907_v50 = vld [vmem:[#allocation10 + $0x100] sm:$0xff]  ;;  %v7909_v49 = vld [vmem:[#allocation10 + $0x110] sm:$0xff] }
 0x394   :  { %v6180_v27 = vpop.eup %6179  ;;  %2128 = vmatpush1.msra.mxu0 %v7883_v57  ;;  %2199 = vmatpush1.msra.mxu1 %v7885_v0  ;;  %v7915_v0 = vld [vmem:[#allocation10 + $0xf8] sm:$0xff] }
 0x395   :  { %v6182_v60 = vpop.eup %6181  ;;  %2129 = vmatprep.subr.mxu0 %v7889_v59  ;;  %2200 = vmatprep.subr.mxu1 %v7891_v53  ;;  %v1839_v37 = vmul.f32 %v6180_v27, %v6178_v3  ;;  %10799 = vst [vmem:[#allocation132_spill] sm:$0xff] %v7915_v0  ;;  %v7919_v59 = vld [vmem:[#allocation10 + $0xe0] sm:$0xff]  ;;  %v7921_v53 = vld [vmem:[#allocation10 + $0xf0] sm:$0xff] }
 0x396   :  { %v1838_v24 = vmul.f32 %v6182_v60, %v1582_v25  ;;  %2130 = vmatpush1.msra.mxu0 %v7895_v51  ;;  %2201 = vmatpush1.msra.mxu1 %v7897_v62  ;;  %10800 = vst [vmem:[#allocation133_spill] sm:$0xff] %v7919_v59  ;;  %10801 = vst [vmem:[#allocation134_spill] sm:$0xff] %v7921_v53  ;;  %v7925_v25 = vld [vmem:[#allocation10 + $0xc8] sm:$0xff]  ;;  %v7927_v60 = vld [vmem:[#allocation10 + $0xd8] sm:$0xff] }
 0x397   :  { %2131 = vmatprep.subr.mxu0 %v7901_v54  ;;  %2202 = vmatprep.subr.mxu1 %v7903_v55  ;;  %10802 = vst [vmem:[#allocation135_spill] sm:$0xff] %v7925_v25  ;;  %10803 = vst [vmem:[#allocation136_spill] sm:$0xff] %v7927_v60  ;;  %v7931_v27 = vld [vmem:[#allocation10 + $0xc0] sm:$0xff]  ;;  %v7933_v3 = vld [vmem:[#allocation10 + $0xd0] sm:$0xff] }
 0x398   :  { %v1840_v57 = vadd.f32 %v1839_v37, %v1838_v24  ;;  %2132 = vmatpush1.msra.mxu0 %v7907_v50  ;;  %2203 = vmatpush1.msra.mxu1 %v7909_v49  ;;  %10804 = vst [vmem:[#allocation137_spill] sm:$0xff] %v7931_v27  ;;  %10805 = vst [vmem:[#allocation138_spill] sm:$0xff] %v7933_v3  ;;  %v7937_v37 = vld [vmem:[#allocation10 + $0xa8] sm:$0xff]  ;;  %v7939_v24 = vld [vmem:[#allocation10 + $0xb8] sm:$0xff] }
 0x399   :  { %2133 = vmatprep.subr.mxu0 %v7913_v48  ;;  %2204 = vmatprep.subr.mxu1 %v7915_v0  ;;  %10806 = vst [vmem:[#allocation139_spill] sm:$0xff] %v7937_v37  ;;  %10807 = vst [vmem:[#allocation140_spill] sm:$0xff] %v7939_v24  ;;  %v7945_v0 = vld [vmem:[#allocation10 + $0xb0] sm:$0xff] }
 0x39a   :  { %6185 = vtanh.f32 %v1840_v57  ;;  %1844 = vst [vmem:[#allocation3] sm:$0x3] %v1840_v57  ;;  %2134 = vmatpush1.msra.mxu0 %v7919_v59  ;;  %2205 = vmatpush1.msra.mxu1 %v7921_v53  ;;  %10809 = vst [vmem:[#allocation142_spill] sm:$0xff] %v7945_v0  ;;  %v7949_v57 = vld [vmem:[#allocation10 + $0x88] sm:$0xff]  ;;  %v7951_v59 = vld [vmem:[#allocation10 + $0x98] sm:$0xff] }
 0x39b   :  { %2135 = vmatprep.subr.mxu0 %v7925_v25  ;;  %2206 = vmatprep.subr.mxu1 %v7927_v60  ;;  %10810 = vst [vmem:[#allocation143_spill] sm:$0xff] %v7949_v57  ;;  %10811 = vst [vmem:[#allocation144_spill] sm:$0xff] %v7951_v59  ;;  %v7955_v53 = vld [vmem:[#allocation10 + $0x80] sm:$0xff]  ;;  %v7957_v25 = vld [vmem:[#allocation10 + $0x90] sm:$0xff] }
 0x39c   :  { %2136 = vmatpush1.msra.mxu0 %v7931_v27  ;;  %2207 = vmatpush1.msra.mxu1 %v7933_v3  ;;  %10812 = vst [vmem:[#allocation145_spill] sm:$0xff] %v7955_v53  ;;  %10813 = vst [vmem:[#allocation146_spill] sm:$0xff] %v7957_v25  ;;  %v7961_v60 = vld [vmem:[#allocation10 + $0x68] sm:$0xff]  ;;  %v7963_v27 = vld [vmem:[#allocation10 + $0x78] sm:$0xff] }
 0x39d   :  { %2137 = vmatprep.subr.mxu0 %v7937_v37  ;;  %2208 = vmatprep.subr.mxu1 %v7939_v24  ;;  %10814 = vst [vmem:[#allocation147_spill] sm:$0xff] %v7961_v60  ;;  %10815 = vst [vmem:[#allocation148_spill] sm:$0xff] %v7963_v27  ;;  %v7967_v3 = vld [vmem:[#allocation10 + $0x60] sm:$0xff]  ;;  %v7969_v37 = vld [vmem:[#allocation10 + $0x70] sm:$0xff] }
 0x39e   :  { %2138 = vmatpush1.msra.mxu0 %v7943_v26  ;;  %2209 = vmatpush1.msra.mxu1 %v7945_v0  ;;  %10816 = vst [vmem:[#allocation149_spill] sm:$0xff] %v7967_v3  ;;  %10817 = vst [vmem:[#allocation150_spill] sm:$0xff] %v7969_v37  ;;  %v7973_v24 = vld [vmem:[#allocation10 + $0x48] sm:$0xff]  ;;  %v7975_v26 = vld [vmem:[#allocation10 + $0x58] sm:$0xff] }
 0x39f   :  { %2139 = vmatprep.subr.mxu0 %v7949_v57  ;;  %2210 = vmatprep.subr.mxu1 %v7951_v59  ;;  %10818 = vst [vmem:[#allocation151_spill] sm:$0xff] %v7973_v24  ;;  %10819 = vst [vmem:[#allocation152_spill] sm:$0xff] %v7975_v26  ;;  %v7979_v0 = vld [vmem:[#allocation10 + $0x40] sm:$0xff]  ;;  %v7981_v57 = vld [vmem:[#allocation10 + $0x50] sm:$0xff] }
 0x3a0   :  { %2140 = vmatpush1.msra.mxu0 %v7955_v53  ;;  %2211 = vmatpush1.msra.mxu1 %v7957_v25  ;;  %10820 = vst [vmem:[#allocation153_spill] sm:$0xff] %v7981_v57  ;;  %v7985_v59 = vld [vmem:[#allocation10 + $0x28] sm:$0xff]  ;;  %v7987_v53 = vld [vmem:[#allocation10 + $0x38] sm:$0xff]  ;;  %v7991_v25 = vld [vmem:[#allocation10 + $0x20] sm:$0xff] }
 0x3a1   :  { %2141 = vmatprep.subr.mxu0 %v7961_v60  ;;  %2212 = vmatprep.subr.mxu1 %v7963_v27  ;;  %v7993_v60 = vld [vmem:[#allocation10 + $0x30] sm:$0xff]  ;;  %v7997_v27 = vld [vmem:[#allocation10 + $0x8] sm:$0xff] }
 0x3a2   :  { %2142 = vmatpush1.msra.mxu0 %v7967_v3  ;;  %2213 = vmatpush1.msra.mxu1 %v7969_v37  ;;  %v7999_v3 = vld [vmem:[#allocation10 + $0x18] sm:$0xff]  ;;  %v6184_v37 = vpop.eup %6183  ;;  %v8007_v48 = vld [vmem:[#allocation10 + $0x10] sm:$0xff] }
 0x3a3   :  { %2143 = vmatprep.subr.mxu0 %v7973_v24  ;;  %2214 = vmatprep.subr.mxu1 %v7975_v26  ;;  %v8003_v24 = vld [vmem:[#allocation10] sm:$0xff] }
 0x3a4   :  { %2144 = vmatpush1.msra.mxu0 %v7979_v0  ;;  %2215 = vmatpush1.msra.mxu1 %v7981_v57 }
 0x3a5   :  { %2145 = vmatprep.subr.mxu0 %v7985_v59  ;;  %2216 = vmatprep.subr.mxu1 %v7987_v53 }
 0x3a6   :  { %2146 = vmatpush1.msra.mxu0 %v7991_v25  ;;  %2217 = vmatpush1.msra.mxu1 %v7993_v60 }
 0x3a7   :  { %v6186_v26 = vpop.eup %6185  ;;  %2147 = vmatprep.subr.mxu0 %v7997_v27  ;;  %2218 = vmatprep.subr.mxu1 %v7999_v3 }
 0x3a8   :  { %v1842_v57 = vmul.f32 %v6186_v26, %v6184_v37  ;;  %2148 = vmatpush1.msra.mxu0 %v8003_v24  ;;  %2181 = vmatprep.mubr.f32.mxu0 %v10561_v21  ;;  %v10852_v37 = vld [vmem:[#allocation55_spill] sm:$0xff]  ;;  %v10853_v26 = vld [vmem:[#allocation56_spill] sm:$0xff] }
 0x3a9   :  { %2219 = vmatpush1.msra.mxu1 %v8007_v48  ;;  %2252 = vmatprep.mubr.f32.mxu1 %v10561_v21 }
 0x3aa   :  { %1843 = vst [vmem:[#allocation2] sm:$0x3] %v1842_v57  ;;  %2182 = vmatmul.mubr.f32.vlgmr.msra.gmra.mxu0 %v1842_v57  ;;  %2253 = vmatmul.mubr.f32.vlgmr.msra.gmra.mxu1 %v1842_v57  ;;  %v10854_v57 = vld [vmem:[#allocation57_spill] sm:$0xff] }
 0x3ab   :  { %2381 = vmatprep.subr.mxu0 %v7430_v2  ;;  %2452 = vmatprep.subr.mxu1 %v7432_v61  ;;  %v10821_v2 = vld [vmem:[#allocation24_spill] sm:$0xff]  ;;  %v10822_v61 = vld [vmem:[#allocation25_spill] sm:$0xff] }
 0x3ac   :  { %2382 = vmatpush1.msra.mxu0 %v7436_v4  ;;  %2453 = vmatpush1.msra.mxu1 %v7438_v5  ;;  %v10823_v4 = vld [vmem:[#allocation26_spill] sm:$0xff]  ;;  %v10824_v5 = vld [vmem:[#allocation27_spill] sm:$0xff] }
 0x3ad   :  { %2383 = vmatprep.subr.mxu0 %v7440_v6  ;;  %2454 = vmatprep.subr.mxu1 %v7442_v7  ;;  %v10825_v6 = vld [vmem:[#allocation28_spill] sm:$0xff]  ;;  %v10826_v7 = vld [vmem:[#allocation29_spill] sm:$0xff] }
 0x3ae   :  { %2384 = vmatpush1.msra.mxu0 %v7446_v8  ;;  %2455 = vmatpush1.msra.mxu1 %v7448_v9  ;;  %v10827_v8 = vld [vmem:[#allocation30_spill] sm:$0xff]  ;;  %v10828_v9 = vld [vmem:[#allocation31_spill] sm:$0xff] }
 0x3af   :  { %2385 = vmatprep.subr.mxu0 %v7452_v10  ;;  %2456 = vmatprep.subr.mxu1 %v7454_v11  ;;  %v10829_v10 = vld [vmem:[#allocation32_spill] sm:$0xff]  ;;  %v10830_v11 = vld [vmem:[#allocation33_spill] sm:$0xff] }
 0x3b0   :  { %2386 = vmatpush1.msra.mxu0 %v7458_v12  ;;  %2457 = vmatpush1.msra.mxu1 %v7460_v13  ;;  %v10831_v12 = vld [vmem:[#allocation34_spill] sm:$0xff]  ;;  %v10832_v13 = vld [vmem:[#allocation35_spill] sm:$0xff] }
 0x3b1   :  { %2387 = vmatprep.subr.mxu0 %v7464_v14  ;;  %2458 = vmatprep.subr.mxu1 %v7466_v15  ;;  %v10833_v14 = vld [vmem:[#allocation36_spill] sm:$0xff]  ;;  %v10834_v15 = vld [vmem:[#allocation37_spill] sm:$0xff] }
 0x3b2   :  { %2388 = vmatpush1.msra.mxu0 %v7470_v16  ;;  %2459 = vmatpush1.msra.mxu1 %v7472_v17  ;;  %v10835_v16 = vld [vmem:[#allocation38_spill] sm:$0xff]  ;;  %v10836_v17 = vld [vmem:[#allocation39_spill] sm:$0xff] }
 0x3b3   :  { %2389 = vmatprep.subr.mxu0 %v7476_v18  ;;  %2460 = vmatprep.subr.mxu1 %v7478_v19  ;;  %v10837_v18 = vld [vmem:[#allocation40_spill] sm:$0xff]  ;;  %v10838_v19 = vld [vmem:[#allocation41_spill] sm:$0xff] }
 0x3b4   :  { %2390 = vmatpush1.msra.mxu0 %v7482_v20  ;;  %2461 = vmatpush1.msra.mxu1 %v7484_v22  ;;  %v10839_v20 = vld [vmem:[#allocation42_spill] sm:$0xff]  ;;  %v10840_v22 = vld [vmem:[#allocation43_spill] sm:$0xff] }
 0x3b5   :  { %2391 = vmatprep.subr.mxu0 %v7488_v23  ;;  %2462 = vmatprep.subr.mxu1 %v7490_v28  ;;  %v10841_v23 = vld [vmem:[#allocation44_spill] sm:$0xff]  ;;  %v10842_v28 = vld [vmem:[#allocation45_spill] sm:$0xff] }
 0x3b6   :  { %2392 = vmatpush1.msra.mxu0 %v7494_v29  ;;  %2463 = vmatpush1.msra.mxu1 %v7496_v30  ;;  %v10843_v29 = vld [vmem:[#allocation46_spill] sm:$0xff]  ;;  %v10844_v30 = vld [vmem:[#allocation47_spill] sm:$0xff] }
 0x3b7   :  { %2393 = vmatprep.subr.mxu0 %v7500_v31  ;;  %2464 = vmatprep.subr.mxu1 %v7502_v32  ;;  %v10845_v31 = vld [vmem:[#allocation48_spill] sm:$0xff]  ;;  %v10846_v32 = vld [vmem:[#allocation49_spill] sm:$0xff] }
 0x3b8   :  { %2394 = vmatpush1.msra.mxu0 %v7506_v33  ;;  %2465 = vmatpush1.msra.mxu1 %v7508_v35  ;;  %v10847_v33 = vld [vmem:[#allocation50_spill] sm:$0xff]  ;;  %v10848_v35 = vld [vmem:[#allocation51_spill] sm:$0xff] }
 0x3b9   :  { %2395 = vmatprep.subr.mxu0 %v7512_v36  ;;  %2466 = vmatprep.subr.mxu1 %v7514_v38  ;;  %v2315_v36 = vld [vmem:[#allocation2] sm:$0x3]  ;;  %v8083_v38 = vld [vmem:[#allocation9 + $0x1e8] sm:$0xff] }
 0x3ba   :  { %2396 = vmatpush1.msra.mxu0 %v7518_v39  ;;  %2467 = vmatpush1.msra.mxu1 %v7520_v40  ;;  %v8085_v39 = vld [vmem:[#allocation9 + $0x1f8] sm:$0xff]  ;;  %v8089_v40 = vld [vmem:[#allocation9 + $0x1e0] sm:$0xff] }
 0x3bb   :  { %2397 = vmatprep.subr.mxu0 %v7524_v41  ;;  %2468 = vmatprep.subr.mxu1 %v7526_v42  ;;  %v8091_v41 = vld [vmem:[#allocation9 + $0x1f0] sm:$0xff] }
 0x3bc   :  { %2398 = vmatpush1.msra.mxu0 %v7530_v43  ;;  %2469 = vmatpush1.msra.mxu1 %v7532_v44  ;;  %v10849_v42 = vld [vmem:[#allocation52_spill] sm:$0xff]  ;;  %v10850_v43 = vld [vmem:[#allocation53_spill] sm:$0xff]  ;;  %v10851_v44 = vld [vmem:[#allocation54_spill] sm:$0xff] }
 0x3bd   :  { %2399 = vmatprep.subr.mxu0 %v10821_v2  ;;  %2470 = vmatprep.subr.mxu1 %v10822_v61  ;;  %v10855_v2 = vld [vmem:[#allocation58_spill] sm:$0xff]  ;;  %v10856_v61 = vld [vmem:[#allocation59_spill] sm:$0xff] }
 0x3be   :  { %2400 = vmatpush1.msra.mxu0 %v10823_v4  ;;  %2471 = vmatpush1.msra.mxu1 %v10824_v5  ;;  %v10857_v4 = vld [vmem:[#allocation60_spill] sm:$0xff]  ;;  %v10858_v5 = vld [vmem:[#allocation61_spill] sm:$0xff] }
 0x3bf   :  { %2401 = vmatprep.subr.mxu0 %v10825_v6  ;;  %2472 = vmatprep.subr.mxu1 %v10826_v7  ;;  %v10859_v6 = vld [vmem:[#allocation62_spill] sm:$0xff]  ;;  %v10860_v7 = vld [vmem:[#allocation63_spill] sm:$0xff] }
 0x3c0   :  { %2402 = vmatpush1.msra.mxu0 %v10827_v8  ;;  %2473 = vmatpush1.msra.mxu1 %v10828_v9  ;;  %v10861_v8 = vld [vmem:[#allocation64_spill] sm:$0xff]  ;;  %v10862_v9 = vld [vmem:[#allocation65_spill] sm:$0xff] }
 0x3c1   :  { %2403 = vmatprep.subr.mxu0 %v10829_v10  ;;  %2474 = vmatprep.subr.mxu1 %v10830_v11  ;;  %v10863_v10 = vld [vmem:[#allocation66_spill] sm:$0xff]  ;;  %v10864_v11 = vld [vmem:[#allocation67_spill] sm:$0xff] }
 0x3c2   :  { %2404 = vmatpush1.msra.mxu0 %v10831_v12  ;;  %2475 = vmatpush1.msra.mxu1 %v10832_v13  ;;  %v10865_v12 = vld [vmem:[#allocation68_spill] sm:$0xff]  ;;  %v10866_v13 = vld [vmem:[#allocation69_spill] sm:$0xff] }
 0x3c3   :  { %2405 = vmatprep.subr.mxu0 %v10833_v14  ;;  %2476 = vmatprep.subr.mxu1 %v10834_v15  ;;  %v10867_v14 = vld [vmem:[#allocation70_spill] sm:$0xff]  ;;  %v10868_v15 = vld [vmem:[#allocation71_spill] sm:$0xff] }
 0x3c4   :  { %2406 = vmatpush1.msra.mxu0 %v10835_v16  ;;  %2477 = vmatpush1.msra.mxu1 %v10836_v17  ;;  %v10869_v16 = vld [vmem:[#allocation72_spill] sm:$0xff]  ;;  %v10870_v17 = vld [vmem:[#allocation73_spill] sm:$0xff] }
 0x3c5   :  { %2407 = vmatprep.subr.mxu0 %v10837_v18  ;;  %2478 = vmatprep.subr.mxu1 %v10838_v19  ;;  %v10871_v18 = vld [vmem:[#allocation74_spill] sm:$0xff]  ;;  %v10872_v19 = vld [vmem:[#allocation75_spill] sm:$0xff] }
 0x3c6   :  { %2408 = vmatpush1.msra.mxu0 %v10839_v20  ;;  %2479 = vmatpush1.msra.mxu1 %v10840_v22  ;;  %v10873_v20 = vld [vmem:[#allocation76_spill] sm:$0xff]  ;;  %v10874_v22 = vld [vmem:[#allocation77_spill] sm:$0xff] }
 0x3c7   :  { %2409 = vmatprep.subr.mxu0 %v10841_v23  ;;  %2480 = vmatprep.subr.mxu1 %v10842_v28  ;;  %v10875_v23 = vld [vmem:[#allocation78_spill] sm:$0xff]  ;;  %v10876_v28 = vld [vmem:[#allocation79_spill] sm:$0xff] }
 0x3c8   :  { %2410 = vmatpush1.msra.mxu0 %v10843_v29  ;;  %2481 = vmatpush1.msra.mxu1 %v10844_v30  ;;  %v10877_v29 = vld [vmem:[#allocation80_spill] sm:$0xff]  ;;  %v10878_v30 = vld [vmem:[#allocation81_spill] sm:$0xff] }
 0x3c9   :  { %2411 = vmatprep.subr.mxu0 %v10845_v31  ;;  %2482 = vmatprep.subr.mxu1 %v10846_v32  ;;  %v10879_v31 = vld [vmem:[#allocation82_spill] sm:$0xff]  ;;  %v10880_v32 = vld [vmem:[#allocation83_spill] sm:$0xff] }
 0x3ca   :  { %2412 = vmatpush1.msra.mxu0 %v10847_v33  ;;  %2445 = vmatprep.mubr.f32.mxu0 %v10561_v21  ;;  %v10881_v33 = vld [vmem:[#allocation84_spill] sm:$0xff] }
 0x3cb   :  { %2483 = vmatpush1.msra.mxu1 %v10848_v35  ;;  %2516 = vmatprep.mubr.f32.mxu1 %v10561_v21  ;;  %v10882_v35 = vld [vmem:[#allocation85_spill] sm:$0xff] }
 0x3cc   :  { %2446 = vmatmul.mubr.f32.vlgmr.msra.gmra.mxu0 %v2315_v36  ;;  %2517 = vmatmul.mubr.f32.vlgmr.msra.gmra.mxu1 %v2315_v36  ;;  %v10883_v36 = vld [vmem:[#allocation86_spill] sm:$0xff] }
 0x3cd   :  { %2709 = vmatprep.mubr.f32.mxu0 %v10561_v21  ;;  %2780 = vmatprep.mubr.f32.mxu1 %v10561_v21 }
 0x3ce   :  { %2645 = vmatprep.subr.mxu0 %v8083_v38  ;;  %2716 = vmatprep.subr.mxu1 %v8085_v39 }
 0x3cf   :  { %2646 = vmatpush1.msra.mxu0 %v8089_v40  ;;  %2717 = vmatpush1.msra.mxu1 %v8091_v41 }
 0x3d0   :  { %2647 = vmatprep.subr.mxu0 %v10849_v42  ;;  %2718 = vmatprep.subr.mxu1 %v10850_v43  ;;  %v10884_v42 = vld [vmem:[#allocation87_spill] sm:$0xff]  ;;  %v10885_v43 = vld [vmem:[#allocation88_spill] sm:$0xff] }
 0x3d1   :  { %2648 = vmatpush1.msra.mxu0 %v10851_v44  ;;  %2719 = vmatpush1.msra.mxu1 %v10852_v37  ;;  %v10886_v44 = vld [vmem:[#allocation89_spill] sm:$0xff]  ;;  %v10887_v37 = vld [vmem:[#allocation90_spill] sm:$0xff] }
 0x3d2   :  { %2649 = vmatprep.subr.mxu0 %v10853_v26  ;;  %2720 = vmatprep.subr.mxu1 %v10854_v57  ;;  %v10888_v26 = vld [vmem:[#allocation91_spill] sm:$0xff]  ;;  %v10889_v57 = vld [vmem:[#allocation92_spill] sm:$0xff] }
 0x3d3   :  { %2650 = vmatpush1.msra.mxu0 %v10855_v2  ;;  %2721 = vmatpush1.msra.mxu1 %v10856_v61  ;;  %v10890_v2 = vld [vmem:[#allocation93_spill] sm:$0xff]  ;;  %v10891_v61 = vld [vmem:[#allocation94_spill] sm:$0xff] }
 0x3d4   :  { %2651 = vmatprep.subr.mxu0 %v10857_v4  ;;  %2722 = vmatprep.subr.mxu1 %v10858_v5  ;;  %v10892_v4 = vld [vmem:[#allocation95_spill] sm:$0xff]  ;;  %v10893_v5 = vld [vmem:[#allocation96_spill] sm:$0xff] }
 0x3d5   :  { %2652 = vmatpush1.msra.mxu0 %v10859_v6  ;;  %2723 = vmatpush1.msra.mxu1 %v10860_v7  ;;  %v10894_v6 = vld [vmem:[#allocation97_spill] sm:$0xff]  ;;  %v10895_v7 = vld [vmem:[#allocation98_spill] sm:$0xff] }
 0x3d6   :  { %2653 = vmatprep.subr.mxu0 %v10861_v8  ;;  %2724 = vmatprep.subr.mxu1 %v10862_v9  ;;  %v10896_v8 = vld [vmem:[#allocation99_spill] sm:$0xff]  ;;  %v10897_v9 = vld [vmem:[#allocation100_spill] sm:$0xff] }
 0x3d7   :  { %2654 = vmatpush1.msra.mxu0 %v10863_v10  ;;  %2725 = vmatpush1.msra.mxu1 %v10864_v11  ;;  %v10898_v10 = vld [vmem:[#allocation101_spill] sm:$0xff]  ;;  %v10899_v11 = vld [vmem:[#allocation102_spill] sm:$0xff] }
 0x3d8   :  { %2655 = vmatprep.subr.mxu0 %v10865_v12  ;;  %2726 = vmatprep.subr.mxu1 %v10866_v13  ;;  %v10900_v12 = vld [vmem:[#allocation165_spill] sm:$0xff]  ;;  %v10901_v13 = vld [vmem:[#allocation103_spill] sm:$0xff] }
 0x3d9   :  { %2656 = vmatpush1.msra.mxu0 %v10867_v14  ;;  %2727 = vmatpush1.msra.mxu1 %v10868_v15  ;;  %v10902_v14 = vld [vmem:[#allocation104_spill] sm:$0xff]  ;;  %v10903_v15 = vld [vmem:[#allocation105_spill] sm:$0xff] }
 0x3da   :  { %2657 = vmatprep.subr.mxu0 %v10869_v16  ;;  %2728 = vmatprep.subr.mxu1 %v10870_v17  ;;  %v10904_v16 = vld [vmem:[#allocation106_spill] sm:$0xff]  ;;  %v10905_v17 = vld [vmem:[#allocation107_spill] sm:$0xff] }
 0x3db   :  { %2658 = vmatpush1.msra.mxu0 %v10871_v18  ;;  %2729 = vmatpush1.msra.mxu1 %v10872_v19  ;;  %v10906_v18 = vld [vmem:[#allocation108_spill] sm:$0xff]  ;;  %v10907_v19 = vld [vmem:[#allocation109_spill] sm:$0xff] }
 0x3dc   :  { %2659 = vmatprep.subr.mxu0 %v10873_v20  ;;  %2730 = vmatprep.subr.mxu1 %v10874_v22  ;;  %v10908_v20 = vld [vmem:[#allocation110_spill] sm:$0xff]  ;;  %v10909_v22 = vld [vmem:[#allocation111_spill] sm:$0xff] }
 0x3dd   :  { %2660 = vmatpush1.msra.mxu0 %v10875_v23  ;;  %2731 = vmatpush1.msra.mxu1 %v10876_v28  ;;  %v10910_v23 = vld [vmem:[#allocation112_spill] sm:$0xff] }
 0x3de   :  { %2661 = vmatprep.subr.mxu0 %v10877_v29  ;;  %2732 = vmatprep.subr.mxu1 %v10878_v30  ;;  %v2259_v29 = vld [vmem:[%s9843_s4] sm:$0xf] }
 0x3df   :  { %2662 = vmatpush1.msra.mxu0 %v10879_v31  ;;  %2733 = vmatpush1.msra.mxu1 %v10880_v32  ;;  %v10911_v32 = vld [vmem:[#allocation22_spill] sm:$0xff] }
 0x3e0   :  { %2663 = vmatprep.subr.mxu0 %v10881_v33  ;;  %2734 = vmatprep.subr.mxu1 %v10882_v35  ;;  %v2264_v33 = vrot.slane %v2259_v29, %v10911_v32 }
 0x3e1   :  { %2664 = vmatpush1.msra.mxu0 %v10883_v36  ;;  %2735 = vmatpush1.msra.mxu1 %v10884_v42 }
 0x3e2   :  { %2665 = vmatprep.subr.mxu0 %v10885_v43  ;;  %2736 = vmatprep.subr.mxu1 %v10886_v44  ;;  %v10912_v43 = vld [vmem:[#allocation23_spill] sm:$0xff] }
 0x3e3   :  { %2666 = vmatpush1.msra.mxu0 %v10887_v37  ;;  %2737 = vmatpush1.msra.mxu1 %v10888_v26  ;;  %v2268_v44 = vrot.slane %v2259_v29, %v10912_v43 }
 0x3e4   :  { %2667 = vmatprep.subr.mxu0 %v10889_v57  ;;  %2738 = vmatprep.subr.mxu1 %v10890_v2 }
 0x3e5   :  { %2668 = vmatpush1.msra.mxu0 %v10891_v61  ;;  %2739 = vmatpush1.msra.mxu1 %v10892_v4 }
 0x3e6   :  { %2669 = vmatprep.subr.mxu0 %v10893_v5  ;;  %2740 = vmatprep.subr.mxu1 %v10894_v6 }
 0x3e7   :  { %2670 = vmatpush1.msra.mxu0 %v10895_v7  ;;  %2741 = vmatpush1.msra.mxu1 %v10896_v8  ;;  %v2276_v8 = vrot.slane %v2259_v29, %v7359_v63 }
 0x3e8   :  { %2671 = vmatprep.subr.mxu0 %v10897_v9  ;;  %2742 = vmatprep.subr.mxu1 %v10898_v10 }
 0x3e9   :  { %2672 = vmatpush1.msra.mxu0 %v10899_v11  ;;  %2743 = vmatpush1.msra.mxu1 %v10900_v12  ;;  %v2272_v11 = vrot.slane %v2259_v29, %v7363_v56 }
 0x3ea   :  { %2673 = vmatprep.subr.mxu0 %v10901_v13  ;;  %2744 = vmatprep.subr.mxu1 %v10902_v14 }
 0x3eb   :  { %2674 = vmatpush1.msra.mxu0 %v10903_v15  ;;  %2745 = vmatpush1.msra.mxu1 %v10904_v16 }
 0x3ec   :  { %2675 = vmatprep.subr.mxu0 %v10905_v17  ;;  %2746 = vmatprep.subr.mxu1 %v10906_v18 }
 0x3ed   :  { %2676 = vmatpush1.msra.mxu0 %v10907_v19  ;;  %2747 = vmatpush1.msra.mxu1 %v10908_v20 }
 0x3ee   :  { %2851 = vmatprep.subr.mxu0 %v10909_v22  ;;  %2922 = vmatprep.subr.mxu1 %v10910_v23 }
 0x449   :  { %v1977_v28 = vpop.f32.mrf.mxu0  ;;  %v2048_v30 = vpop.f32.mrf.mxu1 }
 0x44b   :  { %v1979_v31 = vpop.f32.mrf.mxu0  ;;  %v2050_v36 = vpop.f32.mrf.mxu1 }
 0x46a   :  { %v2183_v35 = vpop.f32.mrf.mxu0  ;;  %v2254_v57 = vpop.f32.mrf.mxu1 }
 0x46b   :  { %v2184_v42 = vadd.f32 %v2183_v35, %v1977_v28  ;;  %v2255_v10 = vadd.f32 %v2254_v57, %v2048_v30  ;;  %v1846_v35 = vld [vmem:[#allocation3 + $0x2] sm:$0x3] }
 0x46c   :  { %v2185_v37 = vpop.f32.mrf.mxu0  ;;  %v2256_v6 = vpop.f32.mrf.mxu1  ;;  %v2314_v57 = vld [vmem:[#allocation4 + $0x18] sm:$0xff] }
 0x46d   :  { %v2281_v26 = vadd.f32 %v2264_v33, %v2184_v42  ;;  %v2186_v2 = vadd.f32 %v2185_v37, %v1979_v31  ;;  %v2257_v7 = vadd.f32 %v2256_v6, %v2050_v36  ;;  %v2283_v14 = vadd.f32 %v2272_v11, %v2255_v10 }
 0x46f   :  { %v6059_v61 = vmul.f32 -1.442695, %v2281_v26  ;;  %v2282_v4 = vadd.f32 %v2268_v44, %v2186_v2  ;;  %v2284_v9 = vadd.f32 %v2276_v8, %v2257_v7 }
 0x471   :  { %6187 = vpow2.f32 %v6059_v61  ;;  %v6060_v5 = vmul.f32 -1.442695, %v2282_v4  ;;  %v6061_v12 = vmul.f32 -1.442695, %v2284_v9 }
 0x473   :  { %6189 = vpow2.f32 %v6060_v5 }
 0x474   :  { %6191 = vpow2.f32 %v6061_v12 }
 0x47e   :  { %v6188_v13 = vpop.eup %6187 }
 0x47f   :  { %v2288_v15 = vadd.f32 1.0, %v6188_v13 }
 0x480   :  { %v6190_v16 = vpop.eup %6189 }
 0x481   :  { %6193 = vrcp.f32 %v2288_v15  ;;  %v2294_v17 = vadd.f32 1.0, %v6190_v16  ;;  %v6192_v20 = vpop.eup %6191 }
 0x482   :  { %6195 = vtanh.f32 %v2283_v14  ;;  %v2301_v36 = vadd.f32 1.0, %v6192_v20  ;;  %v10914_v20 = vld [vmem:[#allocation114_spill] sm:$0xff] }
 0x483   :  { %6197 = vrcp.f32 %v2294_v17 }
 0x484   :  { %6199 = vrcp.f32 %v2301_v36  ;;  %v10926_v36 = vld [vmem:[#allocation126_spill] sm:$0xff] }
 0x48c   :  { %v2447_v18 = vpop.f32.mrf.mxu0  ;;  %v2518_v19 = vpop.f32.mrf.mxu1 }
 0x48e   :  { %v6194_v22 = vpop.eup %6193  ;;  %v2449_v23 = vpop.f32.mrf.mxu0 }
 0x48f   :  { %v2520_v28 = vpop.f32.mrf.mxu1  ;;  %v6196_v31 = vpop.eup %6195  ;;  %v2527_v30 = vcombine.low %v2447_v18, %v2449_v23  ;;  %v10916_v23 = vld [vmem:[#allocation116_spill] sm:$0xff] }
 0x490   :  { %v2528_v33 = vcombine.low %v2518_v19, %v2520_v28  ;;  %v6198_v29 = vpop.eup %6197  ;;  %v2305_v42 = vmul.f32 %v6196_v31, %v6194_v22  ;;  %v10913_v19 = vld [vmem:[#allocation113_spill] sm:$0xff]  ;;  %v10915_v22 = vld [vmem:[#allocation115_spill] sm:$0xff] }
 0x491   :  { %v2304_v44 = vmul.f32 %v6198_v29, %v1846_v35  ;;  %v2535_v37 = vrot.slane %v2527_v30, %v7203_v58  ;;  %v6200_v9 = vpop.eup %6199  ;;  %v10917_v28 = vld [vmem:[#allocation117_spill] sm:$0xff]  ;;  %v10923_v30 = vld [vmem:[#allocation123_spill] sm:$0xff] }
 0x492   :  { %v2542_v26 = vrot.slane %v2528_v33, %v7203_v58  ;;  %v10924_v33 = vld [vmem:[#allocation124_spill] sm:$0xff]  ;;  %v10925_v35 = vld [vmem:[#allocation125_spill] sm:$0xff] }
 0x493   :  { %v2306_v2 = vadd.f32 %v2305_v42, %v2304_v44 }
 0x494   :  { %v2543_v61 = vcombine.low %v2535_v37, %v2542_v26  ;;  %v10927_v37 = vld [vmem:[#allocation127_spill] sm:$0xff]  ;;  %v10928_v26 = vld [vmem:[#allocation128_spill] sm:$0xff] }
 0x495   :  { %6201 = vtanh.f32 %v2306_v2  ;;  %2310 = vst [vmem:[#allocation3 + $0x2] sm:$0x3] %v2306_v2  ;;  %v10929_v2 = vld [vmem:[#allocation129_spill] sm:$0xff] }
 0x496   :  { %v2545_v4 = vadd.f32 %v2543_v61, %v2314_v57  ;;  %v2316_v57 = vld [vmem:[#allocation3] sm:$0x3] }
 0x497   :  { %v10930_v61 = vld [vmem:[#allocation130_spill] sm:$0xff] }
 0x498   :  { %v6062_v5 = vmul.f32 -1.442695, %v2545_v4  ;;  %v2553_v6 = vrot.slane %v2545_v4, 2  ;;  %v2564_v8 = vrot.slane %v2545_v4, 6  ;;  %v2561_v14 = vrot.slane %v2545_v4, 4 }
 0x49a   :  { %6203 = vpow2.f32 %v6062_v5  ;;  %v6063_v7 = vmul.f32 -1.442695, %v2553_v6  ;;  %v6064_v12 = vmul.f32 -1.442695, %v2564_v8  ;;  %v10932_v8 = vld [vmem:[#allocation132_spill] sm:$0xff] }
 0x49c   :  { %6205 = vpow2.f32 %v6063_v7  ;;  %v10931_v7 = vld [vmem:[#allocation131_spill] sm:$0xff] }
 0x49d   :  { %6207 = vpow2.f32 %v6064_v12  ;;  %v10942_v12 = vld [vmem:[#allocation142_spill] sm:$0xff] }
 0x4a2   :  { %v6202_v10 = vpop.eup %6201 }
 0x4a3   :  { %v2308_v11 = vmul.f32 %v6202_v10, %v6200_v9  ;;  %v10933_v9 = vld [vmem:[#allocation133_spill] sm:$0xff]  ;;  %v10938_v10 = vld [vmem:[#allocation138_spill] sm:$0xff] }
 0x4a5   :  { %2309 = vst [vmem:[#allocation2 + $0x2] sm:$0x3] %v2308_v11  ;;  %2312 = vst [vmem:[#allocation13 + $0x4] sm:$0x3] %v2308_v11  ;;  %v10941_v11 = vld [vmem:[#allocation141_spill] sm:$0xff] }
 0x4a7   :  { %v6204_v13 = vpop.eup %6203 }
 0x4a8   :  { %v2549_v15 = vadd.f32 1.0, %v6204_v13  ;;  %v10943_v13 = vld [vmem:[#allocation143_spill] sm:$0xff] }
 0x4a9   :  { %v6206_v16 = vpop.eup %6205 }
 0x4aa   :  { %6209 = vrcp.f32 %v2549_v15  ;;  %v2558_v17 = vadd.f32 1.0, %v6206_v16  ;;  %v10945_v15 = vld [vmem:[#allocation145_spill] sm:$0xff]  ;;  %v10946_v16 = vld [vmem:[#allocation146_spill] sm:$0xff] }
 0x4ab   :  { %6211 = vtanh.f32 %v2561_v14  ;;  %v10944_v14 = vld [vmem:[#allocation144_spill] sm:$0xff] }
 0x4ac   :  { %6213 = vrcp.f32 %v2558_v17  ;;  %v2579_v18 = vld [vmem:[#allocation2 + $0x2] sm:$0x3]  ;;  %v10947_v17 = vld [vmem:[#allocation147_spill] sm:$0xff] }
 0x4ad   :  { %2710 = vmatmul.mubr.f32.vlgmr.msra.gmra.mxu0 %v2579_v18  ;;  %2781 = vmatmul.mubr.f32.vlgmr.msra.gmra.mxu1 %v2579_v18  ;;  %v10948_v18 = vld [vmem:[#allocation148_spill] sm:$0xff] }
 0x4ae   :  { %2852 = vmatpush1.msra.mxu0 %v7827_v1  ;;  %2923 = vmatpush1.msra.mxu1 %v7829_v47  ;;  %v10918_v1 = vld [vmem:[#allocation118_spill] sm:$0xff]  ;;  %v10919_v47 = vld [vmem:[#allocation119_spill] sm:$0xff] }
 0x4af   :  { %2853 = vmatprep.subr.mxu0 %v7831_v34  ;;  %2924 = vmatprep.subr.mxu1 %v7833_v46  ;;  %v10920_v34 = vld [vmem:[#allocation120_spill] sm:$0xff]  ;;  %v6208_v46 = vpop.eup %6207 }
 0x4b0   :  { %2854 = vmatpush1.msra.mxu0 %v7835_v52  ;;  %2925 = vmatpush1.msra.mxu1 %v7837_v45  ;;  %v10921_v52 = vld [vmem:[#allocation121_spill] sm:$0xff]  ;;  %v10922_v45 = vld [vmem:[#allocation122_spill] sm:$0xff]  ;;  %v2569_v44 = vadd.f32 1.0, %v6208_v46 }
 0x4b1   :  { %2855 = vmatprep.subr.mxu0 %v10913_v19  ;;  %2926 = vmatprep.subr.mxu1 %v10914_v20  ;;  %v10949_v19 = vld [vmem:[#allocation149_spill] sm:$0xff]  ;;  %v10950_v20 = vld [vmem:[#allocation150_spill] sm:$0xff] }
 0x4b2   :  { %2856 = vmatpush1.msra.mxu0 %v10915_v22  ;;  %2927 = vmatpush1.msra.mxu1 %v10916_v23  ;;  %6215 = vrcp.f32 %v2569_v44  ;;  %v10951_v22 = vld [vmem:[#allocation151_spill] sm:$0xff]  ;;  %v10952_v23 = vld [vmem:[#allocation152_spill] sm:$0xff]  ;;  %v8230_v46 = vld [vmem:[#allocation7 + $0x1f8] sm:$0xff] }
 0x4b3   :  { %2857 = vmatprep.subr.mxu0 %v10917_v28  ;;  %2928 = vmatprep.subr.mxu1 %v10918_v1  ;;  %v10953_v28 = vld [vmem:[#allocation153_spill] sm:$0xff] }
 0x4b4   :  { %2858 = vmatpush1.msra.mxu0 %v10919_v47  ;;  %2929 = vmatpush1.msra.mxu1 %v10920_v34  ;;  %v8282_v44 = vld [vmem:[#allocation7 + $0x170] sm:$0xff] }
 0x4b5   :  { %2859 = vmatprep.subr.mxu0 %v10921_v52  ;;  %2930 = vmatprep.subr.mxu1 %v10922_v45  ;;  %v8256_v52 = vld [vmem:[#allocation7 + $0x1a0] sm:$0xff]  ;;  %v8258_v45 = vld [vmem:[#allocation7 + $0x1b0] sm:$0xff] }
 0x4b6   :  { %2860 = vmatpush1.msra.mxu0 %v10923_v30  ;;  %2931 = vmatpush1.msra.mxu1 %v10924_v33  ;;  %v8264_v30 = vld [vmem:[#allocation7 + $0x198] sm:$0xff]  ;;  %v8268_v33 = vld [vmem:[#allocation7 + $0x180] sm:$0xff] }
 0x4b7   :  { %v6210_v31 = vpop.eup %6209  ;;  %2861 = vmatprep.subr.mxu0 %v10925_v35  ;;  %2932 = vmatprep.subr.mxu1 %v10926_v36  ;;  %v8274_v35 = vld [vmem:[#allocation7 + $0x168] sm:$0xff]  ;;  %v8276_v36 = vld [vmem:[#allocation7 + $0x178] sm:$0xff] }
 0x4b8   :  { %v6212_v29 = vpop.eup %6211  ;;  %2862 = vmatpush1.msra.mxu0 %v10927_v37  ;;  %2933 = vmatpush1.msra.mxu1 %v10928_v26  ;;  %v8286_v37 = vld [vmem:[#allocation7 + $0x148] sm:$0xff]  ;;  %v8288_v26 = vld [vmem:[#allocation7 + $0x158] sm:$0xff] }
 0x4b9   :  { %v6214_v42 = vpop.eup %6213  ;;  %2863 = vmatprep.subr.mxu0 %v10929_v2  ;;  %2934 = vmatprep.subr.mxu1 %v10930_v61  ;;  %v2573_v5 = vmul.f32 %v6212_v29, %v6210_v31  ;;  %v8262_v31 = vld [vmem:[#allocation7 + $0x188] sm:$0xff]  ;;  %v8270_v29 = vld [vmem:[#allocation7 + $0x190] sm:$0xff] }
 0x4ba   :  { %v2572_v4 = vmul.f32 %v6214_v42, %v2316_v57  ;;  %2864 = vmatpush1.msra.mxu0 %v7895_v51  ;;  %2935 = vmatpush1.msra.mxu1 %v7897_v62  ;;  %v10934_v51 = vld [vmem:[#allocation134_spill] sm:$0xff]  ;;  %v10935_v62 = vld [vmem:[#allocation135_spill] sm:$0xff]  ;;  %v8294_v2 = vld [vmem:[#allocation7 + $0x150] sm:$0xff] }
 0x4bb   :  { %2865 = vmatprep.subr.mxu0 %v7901_v54  ;;  %2936 = vmatprep.subr.mxu1 %v7903_v55  ;;  %v10936_v54 = vld [vmem:[#allocation136_spill] sm:$0xff]  ;;  %v10937_v55 = vld [vmem:[#allocation137_spill] sm:$0xff]  ;;  %v8280_v42 = vld [vmem:[#allocation7 + $0x160] sm:$0xff] }
 0x4bc   :  { %v2574_v6 = vadd.f32 %v2573_v5, %v2572_v4  ;;  %2866 = vmatpush1.msra.mxu0 %v7907_v50  ;;  %2937 = vmatpush1.msra.mxu1 %v7909_v49  ;;  %v10939_v50 = vld [vmem:[#allocation139_spill] sm:$0xff]  ;;  %v10940_v49 = vld [vmem:[#allocation140_spill] sm:$0xff]  ;;  %v8300_v4 = vld [vmem:[#allocation7 + $0x138] sm:$0xff] }
 0x4bd   :  { %2867 = vmatprep.subr.mxu0 %v10931_v7  ;;  %2938 = vmatprep.subr.mxu1 %v10932_v8  ;;  %v8292_v57 = vld [vmem:[#allocation7 + $0x140] sm:$0xff]  ;;  %v8298_v61 = vld [vmem:[#allocation7 + $0x128] sm:$0xff]  ;;  %v8312_v8 = vld [vmem:[#allocation7 + $0x118] sm:$0xff] }
 0x4be   :  { %6217 = vtanh.f32 %v2574_v6  ;;  %2578 = vst [vmem:[#allocation3] sm:$0x3] %v2574_v6  ;;  %2868 = vmatpush1.msra.mxu0 %v10933_v9  ;;  %2939 = vmatpush1.msra.mxu1 %v10934_v51  ;;  %v8304_v5 = vld [vmem:[#allocation7 + $0x120] sm:$0xff]  ;;  %v8306_v6 = vld [vmem:[#allocation7 + $0x130] sm:$0xff]  ;;  %v8310_v7 = vld [vmem:[#allocation7 + $0x108] sm:$0xff] }
 0x4bf   :  { %2869 = vmatprep.subr.mxu0 %v10935_v62  ;;  %2940 = vmatprep.subr.mxu1 %v10936_v54  ;;  %v6216_v1 = vpop.eup %6215  ;;  %v8316_v9 = vld [vmem:[#allocation7 + $0x100] sm:$0xff]  ;;  %v8318_v51 = vld [vmem:[#allocation7 + $0x110] sm:$0xff]  ;;  %v8322_v62 = vld [vmem:[#allocation7 + $0xe8] sm:$0xff] }
 0x4c0   :  { %2870 = vmatpush1.msra.mxu0 %v10937_v55  ;;  %2941 = vmatpush1.msra.mxu1 %v10938_v10  ;;  %v8324_v54 = vld [vmem:[#allocation7 + $0xf8] sm:$0xff]  ;;  %v8328_v55 = vld [vmem:[#allocation7 + $0xe0] sm:$0xff]  ;;  %v8330_v10 = vld [vmem:[#allocation7 + $0xf0] sm:$0xff] }
 0x4c1   :  { %2871 = vmatprep.subr.mxu0 %v10939_v50  ;;  %2942 = vmatprep.subr.mxu1 %v10940_v49  ;;  %v8334_v50 = vld [vmem:[#allocation7 + $0xc8] sm:$0xff]  ;;  %v8336_v49 = vld [vmem:[#allocation7 + $0xd8] sm:$0xff] }
 0x4c2   :  { %2872 = vmatpush1.msra.mxu0 %v10941_v11  ;;  %2943 = vmatpush1.msra.mxu1 %v10942_v12  ;;  %10954 = vst [vmem:[#allocation154_spill] sm:$0xff] %v8334_v50  ;;  %10955 = vst [vmem:[#allocation155_spill] sm:$0xff] %v8336_v49  ;;  %v8340_v11 = vld [vmem:[#allocation7 + $0xc0] sm:$0xff]  ;;  %v8342_v12 = vld [vmem:[#allocation7 + $0xd0] sm:$0xff] }
 0x4c3   :  { %2873 = vmatprep.subr.mxu0 %v10943_v13  ;;  %2944 = vmatprep.subr.mxu1 %v10944_v14  ;;  %10956 = vst [vmem:[#allocation156_spill] sm:$0xff] %v8340_v11  ;;  %10957 = vst [vmem:[#allocation157_spill] sm:$0xff] %v8342_v12  ;;  %v8346_v13 = vld [vmem:[#allocation7 + $0xa8] sm:$0xff]  ;;  %v8348_v14 = vld [vmem:[#allocation7 + $0xb8] sm:$0xff] }
 0x4c4   :  { %2874 = vmatpush1.msra.mxu0 %v10945_v15  ;;  %2945 = vmatpush1.msra.mxu1 %v10946_v16  ;;  %10958 = vst [vmem:[#allocation158_spill] sm:$0xff] %v8346_v13  ;;  %10959 = vst [vmem:[#allocation159_spill] sm:$0xff] %v8348_v14  ;;  %v8352_v15 = vld [vmem:[#allocation7 + $0xa0] sm:$0xff]  ;;  %v8354_v16 = vld [vmem:[#allocation7 + $0xb0] sm:$0xff] }
 0x4c5   :  { %2875 = vmatprep.subr.mxu0 %v10947_v17  ;;  %2946 = vmatprep.subr.mxu1 %v10948_v18  ;;  %10960 = vst [vmem:[#allocation160_spill] sm:$0xff] %v8352_v15  ;;  %10961 = vst [vmem:[#allocation161_spill] sm:$0xff] %v8354_v16  ;;  %v8358_v17 = vld [vmem:[#allocation7 + $0x88] sm:$0xff]  ;;  %v8360_v18 = vld [vmem:[#allocation7 + $0x98] sm:$0xff] }
 0x4c6   :  { %2876 = vmatpush1.msra.mxu0 %v10949_v19  ;;  %2947 = vmatpush1.msra.mxu1 %v10950_v20  ;;  %10962 = vst [vmem:[#allocation162_spill] sm:$0xff] %v8358_v17  ;;  %10963 = vst [vmem:[#allocation163_spill] sm:$0xff] %v8360_v18  ;;  %v8364_v19 = vld [vmem:[#allocation7 + $0x80] sm:$0xff]  ;;  %v8366_v20 = vld [vmem:[#allocation7 + $0x90] sm:$0xff] }
 0x4c7   :  { %2877 = vmatprep.subr.mxu0 %v10951_v22  ;;  %2948 = vmatprep.subr.mxu1 %v10952_v23  ;;  %10964 = vst [vmem:[#allocation164_spill] sm:$0xff] %v8364_v19  ;;  %10965 = vst [vmem:[#allocation24_spill] sm:$0xff] %v8366_v20  ;;  %v8370_v22 = vld [vmem:[#allocation7 + $0x68] sm:$0xff]  ;;  %v8372_v23 = vld [vmem:[#allocation7 + $0x78] sm:$0xff] }
 0x4c8   :  { %2878 = vmatpush1.msra.mxu0 %v7979_v0  ;;  %2949 = vmatpush1.msra.mxu1 %v10953_v28  ;;  %v8228_v0 = vld [vmem:[#allocation7 + $0x1e8] sm:$0xff]  ;;  %10966 = vst [vmem:[#allocation25_spill] sm:$0xff] %v8370_v22  ;;  %10967 = vst [vmem:[#allocation26_spill] sm:$0xff] %v8372_v23  ;;  %v8376_v28 = vld [vmem:[#allocation7 + $0x60] sm:$0xff] }
 0x4c9   :  { %2879 = vmatprep.subr.mxu0 %v7985_v59  ;;  %2950 = vmatprep.subr.mxu1 %v7987_v53  ;;  %v8234_v59 = vld [vmem:[#allocation7 + $0x1e0] sm:$0xff]  ;;  %v8236_v53 = vld [vmem:[#allocation7 + $0x1f0] sm:$0xff]  ;;  %10968 = vst [vmem:[#allocation27_spill] sm:$0xff] %v8376_v28 }
 0x4ca   :  { %2880 = vmatpush1.msra.mxu0 %v7991_v25  ;;  %2951 = vmatpush1.msra.mxu1 %v7993_v60  ;;  %v8238_v25 = vld [vmem:[#allocation7 + $0x1c8] sm:$0xff]  ;;  %v8240_v60 = vld [vmem:[#allocation7 + $0x1d8] sm:$0xff] }
 0x4cb   :  { %v6218_v47 = vpop.eup %6217  ;;  %2881 = vmatprep.subr.mxu0 %v7997_v27  ;;  %2952 = vmatprep.subr.mxu1 %v7999_v3  ;;  %v8244_v27 = vld [vmem:[#allocation7 + $0x1c0] sm:$0xff]  ;;  %v8250_v3 = vld [vmem:[#allocation7 + $0x1a8] sm:$0xff] }
 0x4cc   :  { %v2576_v34 = vmul.f32 %v6218_v47, %v6216_v1  ;;  %2882 = vmatpush1.msra.mxu0 %v8003_v24  ;;  %2915 = vmatprep.mubr.f32.mxu0 %v10561_v21  ;;  %v8252_v24 = vld [vmem:[#allocation7 + $0x1b8] sm:$0xff]  ;;  %v8378_v1 = vld [vmem:[#allocation7 + $0x70] sm:$0xff]  ;;  %v8382_v47 = vld [vmem:[#allocation7 + $0x48] sm:$0xff] }
 0x4cd   :  { %2953 = vmatpush1.msra.mxu1 %v8007_v48  ;;  %2986 = vmatprep.mubr.f32.mxu1 %v10561_v21  ;;  %v8246_v48 = vld [vmem:[#allocation7 + $0x1d0] sm:$0xff]  ;;  %10969 = vst [vmem:[#allocation28_spill] sm:$0xff] %v8378_v1  ;;  %10970 = vst [vmem:[#allocation29_spill] sm:$0xff] %v8382_v47 }
 0x4ce   :  { %2577 = vst [vmem:[#allocation2] sm:$0x3] %v2576_v34  ;;  %2916 = vmatmul.mubr.f32.vlgmr.msra.gmra.mxu0 %v2576_v34  ;;  %2987 = vmatmul.mubr.f32.vlgmr.msra.gmra.mxu1 %v2576_v34  ;;  %v8384_v34 = vld [vmem:[#allocation7 + $0x58] sm:$0xff] }
 0x4cf   :  { %3115 = vmatprep.subr.mxu0 %v8228_v0  ;;  %3186 = vmatprep.subr.mxu1 %v8230_v46  ;;  %10971 = vst [vmem:[#allocation30_spill] sm:$0xff] %v8384_v34 }
 0x4d0   :  { %3116 = vmatpush1.msra.mxu0 %v8234_v59  ;;  %3187 = vmatpush1.msra.mxu1 %v8236_v53 }
 0x4d1   :  { %3117 = vmatprep.subr.mxu0 %v8238_v25  ;;  %3188 = vmatprep.subr.mxu1 %v8240_v60 }
 0x4d2   :  { %3118 = vmatpush1.msra.mxu0 %v8244_v27  ;;  %3189 = vmatpush1.msra.mxu1 %v8246_v48 }
 0x4d3   :  { %3119 = vmatprep.subr.mxu0 %v8250_v3  ;;  %3190 = vmatprep.subr.mxu1 %v8252_v24 }
 0x4d4   :  { %3120 = vmatpush1.msra.mxu0 %v8256_v52  ;;  %3191 = vmatpush1.msra.mxu1 %v8258_v45 }
 0x4d5   :  { %3121 = vmatprep.subr.mxu0 %v8262_v31  ;;  %3192 = vmatprep.subr.mxu1 %v8264_v30 }
 0x4d6   :  { %3122 = vmatpush1.msra.mxu0 %v8268_v33  ;;  %3193 = vmatpush1.msra.mxu1 %v8270_v29 }
 0x4d7   :  { %3123 = vmatprep.subr.mxu0 %v8274_v35  ;;  %3194 = vmatprep.subr.mxu1 %v8276_v36 }
 0x4d8   :  { %3124 = vmatpush1.msra.mxu0 %v8280_v42  ;;  %3195 = vmatpush1.msra.mxu1 %v8282_v44 }
 0x4d9   :  { %3125 = vmatprep.subr.mxu0 %v8286_v37  ;;  %3196 = vmatprep.subr.mxu1 %v8288_v26 }
 0x4da   :  { %3126 = vmatpush1.msra.mxu0 %v8292_v57  ;;  %3197 = vmatpush1.msra.mxu1 %v8294_v2 }
 0x4db   :  { %3127 = vmatprep.subr.mxu0 %v8298_v61  ;;  %3198 = vmatprep.subr.mxu1 %v8300_v4 }
 0x4dc   :  { %3128 = vmatpush1.msra.mxu0 %v8304_v5  ;;  %3199 = vmatpush1.msra.mxu1 %v8306_v6 }
 0x4dd   :  { %3129 = vmatprep.subr.mxu0 %v8310_v7  ;;  %3200 = vmatprep.subr.mxu1 %v8312_v8 }
 0x4de   :  { %3130 = vmatpush1.msra.mxu0 %v8316_v9  ;;  %3201 = vmatpush1.msra.mxu1 %v8318_v51 }
 0x4df   :  { %3131 = vmatprep.subr.mxu0 %v8322_v62  ;;  %3202 = vmatprep.subr.mxu1 %v8324_v54 }
 0x4e0   :  { %3132 = vmatpush1.msra.mxu0 %v8328_v55  ;;  %3203 = vmatpush1.msra.mxu1 %v8330_v10 }
 0x4e1   :  { %3133 = vmatprep.subr.mxu0 %v8334_v50  ;;  %3204 = vmatprep.subr.mxu1 %v8336_v49 }
 0x4e2   :  { %3134 = vmatpush1.msra.mxu0 %v8340_v11  ;;  %3205 = vmatpush1.msra.mxu1 %v8342_v12 }
 0x4e3   :  { %3135 = vmatprep.subr.mxu0 %v8346_v13  ;;  %3206 = vmatprep.subr.mxu1 %v8348_v14 }
 0x4e4   :  { %3136 = vmatpush1.msra.mxu0 %v8352_v15  ;;  %3207 = vmatpush1.msra.mxu1 %v8354_v16  ;;  %v8388_v16 = vld [vmem:[#allocation7 + $0x40] sm:$0xff] }
 0x4e5   :  { %3137 = vmatprep.subr.mxu0 %v8358_v17  ;;  %3208 = vmatprep.subr.mxu1 %v8360_v18  ;;  %10972 = vst [vmem:[#allocation31_spill] sm:$0xff] %v8388_v16  ;;  %v8390_v17 = vld [vmem:[#allocation7 + $0x50] sm:$0xff]  ;;  %v8394_v18 = vld [vmem:[#allocation7 + $0x28] sm:$0xff] }
 0x4e6   :  { %3138 = vmatpush1.msra.mxu0 %v8364_v19  ;;  %3209 = vmatpush1.msra.mxu1 %v8366_v20  ;;  %10973 = vst [vmem:[#allocation32_spill] sm:$0xff] %v8390_v17  ;;  %10974 = vst [vmem:[#allocation33_spill] sm:$0xff] %v8394_v18  ;;  %v8396_v19 = vld [vmem:[#allocation7 + $0x38] sm:$0xff]  ;;  %v8400_v20 = vld [vmem:[#allocation7 + $0x20] sm:$0xff] }
 0x4e7   :  { %3139 = vmatprep.subr.mxu0 %v8370_v22  ;;  %3210 = vmatprep.subr.mxu1 %v8372_v23  ;;  %10975 = vst [vmem:[#allocation34_spill] sm:$0xff] %v8396_v19  ;;  %10976 = vst [vmem:[#allocation35_spill] sm:$0xff] %v8400_v20  ;;  %v8402_v22 = vld [vmem:[#allocation7 + $0x30] sm:$0xff]  ;;  %v8406_v23 = vld [vmem:[#allocation7 + $0x8] sm:$0xff] }
 0x4e8   :  { %3140 = vmatpush1.msra.mxu0 %v8376_v28  ;;  %3211 = vmatpush1.msra.mxu1 %v8378_v1  ;;  %10977 = vst [vmem:[#allocation36_spill] sm:$0xff] %v8402_v22  ;;  %10978 = vst [vmem:[#allocation37_spill] sm:$0xff] %v8406_v23  ;;  %v8408_v28 = vld [vmem:[#allocation7 + $0x18] sm:$0xff]  ;;  %v8412_v1 = vld [vmem:[#allocation7] sm:$0xff] }
 0x4e9   :  { %3141 = vmatprep.subr.mxu0 %v8382_v47  ;;  %3212 = vmatprep.subr.mxu1 %v8384_v34  ;;  %10979 = vst [vmem:[#allocation38_spill] sm:$0xff] %v8408_v28  ;;  %10980 = vst [vmem:[#allocation39_spill] sm:$0xff] %v8412_v1  ;;  %v8416_v34 = vld [vmem:[#allocation7 + $0x10] sm:$0xff] }
 0x4ea   :  { %3142 = vmatpush1.msra.mxu0 %v8388_v16  ;;  %3213 = vmatpush1.msra.mxu1 %v8390_v17  ;;  %10981 = vst [vmem:[#allocation40_spill] sm:$0xff] %v8416_v34 }
 0x4eb   :  { %3143 = vmatprep.subr.mxu0 %v8394_v18  ;;  %3214 = vmatprep.subr.mxu1 %v8396_v19  ;;  %v3049_v19 = vld [vmem:[#allocation2] sm:$0x3] }
 0x4ec   :  { %3144 = vmatpush1.msra.mxu0 %v8400_v20  ;;  %3215 = vmatpush1.msra.mxu1 %v8402_v22 }
 0x4ed   :  { %3145 = vmatprep.subr.mxu0 %v8406_v23  ;;  %3216 = vmatprep.subr.mxu1 %v8408_v28  ;;  %v8610_v28 = vld [vmem:[#allocation10 + $0x1f8] sm:$0xff] }
 0x4ee   :  { %3146 = vmatpush1.msra.mxu0 %v8412_v1  ;;  %3179 = vmatprep.mubr.f32.mxu0 %v10561_v21  ;;  %v8430_v1 = vld [vmem:[#allocation9 + $0x1c8] sm:$0xff]  ;;  %11043 = vst [vmem:[#allocation102_spill] sm:$0xff] %v8610_v28 }
 0x4ef   :  { %3217 = vmatpush1.msra.mxu1 %v8416_v34  ;;  %3250 = vmatprep.mubr.f32.mxu1 %v10561_v21  ;;  %10982 = vst [vmem:[#allocation41_spill] sm:$0xff] %v8430_v1  ;;  %v8432_v34 = vld [vmem:[#allocation9 + $0x1d8] sm:$0xff] }
 0x4f0   :  { %3180 = vmatmul.mubr.f32.vlgmr.msra.gmra.mxu0 %v3049_v19  ;;  %3251 = vmatmul.mubr.f32.vlgmr.msra.gmra.mxu1 %v3049_v19  ;;  %10983 = vst [vmem:[#allocation42_spill] sm:$0xff] %v8432_v34  ;;  %v8436_v19 = vld [vmem:[#allocation9 + $0x1c0] sm:$0xff] }
 0x4f1   :  { %3379 = vmatprep.subr.mxu0 %v8083_v38  ;;  %3450 = vmatprep.subr.mxu1 %v8085_v39  ;;  %10984 = vst [vmem:[#allocation43_spill] sm:$0xff] %v8436_v19  ;;  %v8438_v38 = vld [vmem:[#allocation9 + $0x1d0] sm:$0xff]  ;;  %v8442_v39 = vld [vmem:[#allocation9 + $0x1a8] sm:$0xff] }
 0x4f2   :  { %3380 = vmatpush1.msra.mxu0 %v8089_v40  ;;  %3451 = vmatpush1.msra.mxu1 %v8091_v41  ;;  %10985 = vst [vmem:[#allocation44_spill] sm:$0xff] %v8438_v38  ;;  %10986 = vst [vmem:[#allocation45_spill] sm:$0xff] %v8442_v39  ;;  %v8444_v40 = vld [vmem:[#allocation9 + $0x1b8] sm:$0xff]  ;;  %v8448_v41 = vld [vmem:[#allocation9 + $0x1a0] sm:$0xff] }
 0x4f3   :  { %3443 = vmatprep.mubr.f32.mxu0 %v10561_v21  ;;  %3514 = vmatprep.mubr.f32.mxu1 %v10561_v21  ;;  %10987 = vst [vmem:[#allocation46_spill] sm:$0xff] %v8444_v40  ;;  %10988 = vst [vmem:[#allocation47_spill] sm:$0xff] %v8448_v41 }
 0x4f4   :  { %3381 = vmatprep.subr.mxu0 %v8430_v1  ;;  %3452 = vmatprep.subr.mxu1 %v8432_v34  ;;  %v8450_v1 = vld [vmem:[#allocation9 + $0x1b0] sm:$0xff]  ;;  %v8454_v34 = vld [vmem:[#allocation9 + $0x188] sm:$0xff] }
 0x4f5   :  { %3382 = vmatpush1.msra.mxu0 %v8436_v19  ;;  %3453 = vmatpush1.msra.mxu1 %v8438_v38  ;;  %10989 = vst [vmem:[#allocation48_spill] sm:$0xff] %v8450_v1  ;;  %10990 = vst [vmem:[#allocation49_spill] sm:$0xff] %v8454_v34  ;;  %v8456_v19 = vld [vmem:[#allocation9 + $0x198] sm:$0xff]  ;;  %v8460_v38 = vld [vmem:[#allocation9 + $0x180] sm:$0xff] }
 0x4f6   :  { %3383 = vmatprep.subr.mxu0 %v8442_v39  ;;  %3454 = vmatprep.subr.mxu1 %v8444_v40  ;;  %10991 = vst [vmem:[#allocation50_spill] sm:$0xff] %v8456_v19  ;;  %10992 = vst [vmem:[#allocation51_spill] sm:$0xff] %v8460_v38  ;;  %v8462_v39 = vld [vmem:[#allocation9 + $0x190] sm:$0xff]  ;;  %v8466_v40 = vld [vmem:[#allocation9 + $0x168] sm:$0xff] }
 0x4f7   :  { %3384 = vmatpush1.msra.mxu0 %v8448_v41  ;;  %3455 = vmatpush1.msra.mxu1 %v8450_v1  ;;  %10993 = vst [vmem:[#allocation52_spill] sm:$0xff] %v8462_v39  ;;  %10994 = vst [vmem:[#allocation53_spill] sm:$0xff] %v8466_v40  ;;  %v8468_v41 = vld [vmem:[#allocation9 + $0x178] sm:$0xff]  ;;  %v8472_v1 = vld [vmem:[#allocation9 + $0x160] sm:$0xff] }
 0x4f8   :  { %3385 = vmatprep.subr.mxu0 %v8454_v34  ;;  %3456 = vmatprep.subr.mxu1 %v8456_v19  ;;  %10995 = vst [vmem:[#allocation54_spill] sm:$0xff] %v8468_v41  ;;  %10996 = vst [vmem:[#allocation55_spill] sm:$0xff] %v8472_v1  ;;  %v8474_v34 = vld [vmem:[#allocation9 + $0x170] sm:$0xff]  ;;  %v8478_v19 = vld [vmem:[#allocation9 + $0x148] sm:$0xff] }
 0x4f9   :  { %3386 = vmatpush1.msra.mxu0 %v8460_v38  ;;  %3457 = vmatpush1.msra.mxu1 %v8462_v39  ;;  %10997 = vst [vmem:[#allocation56_spill] sm:$0xff] %v8474_v34  ;;  %10998 = vst [vmem:[#allocation57_spill] sm:$0xff] %v8478_v19  ;;  %v8480_v38 = vld [vmem:[#allocation9 + $0x158] sm:$0xff]  ;;  %v8484_v39 = vld [vmem:[#allocation9 + $0x140] sm:$0xff] }
 0x4fa   :  { %3387 = vmatprep.subr.mxu0 %v8466_v40  ;;  %3458 = vmatprep.subr.mxu1 %v8468_v41  ;;  %10999 = vst [vmem:[#allocation58_spill] sm:$0xff] %v8480_v38  ;;  %11000 = vst [vmem:[#allocation59_spill] sm:$0xff] %v8484_v39  ;;  %v8486_v40 = vld [vmem:[#allocation9 + $0x150] sm:$0xff]  ;;  %v8490_v41 = vld [vmem:[#allocation9 + $0x128] sm:$0xff] }
 0x4fb   :  { %3388 = vmatpush1.msra.mxu0 %v8472_v1  ;;  %3459 = vmatpush1.msra.mxu1 %v8474_v34  ;;  %11001 = vst [vmem:[#allocation60_spill] sm:$0xff] %v8486_v40  ;;  %11002 = vst [vmem:[#allocation61_spill] sm:$0xff] %v8490_v41  ;;  %v8492_v1 = vld [vmem:[#allocation9 + $0x138] sm:$0xff]  ;;  %v8496_v34 = vld [vmem:[#allocation9 + $0x120] sm:$0xff] }
 0x4fc   :  { %3389 = vmatprep.subr.mxu0 %v8478_v19  ;;  %3460 = vmatprep.subr.mxu1 %v8480_v38  ;;  %11003 = vst [vmem:[#allocation62_spill] sm:$0xff] %v8492_v1  ;;  %11004 = vst [vmem:[#allocation63_spill] sm:$0xff] %v8496_v34  ;;  %v8498_v19 = vld [vmem:[#allocation9 + $0x130] sm:$0xff]  ;;  %v8502_v38 = vld [vmem:[#allocation9 + $0x108] sm:$0xff] }
 0x4fd   :  { %3390 = vmatpush1.msra.mxu0 %v8484_v39  ;;  %3461 = vmatpush1.msra.mxu1 %v8486_v40  ;;  %11005 = vst [vmem:[#allocation64_spill] sm:$0xff] %v8498_v19  ;;  %11006 = vst [vmem:[#allocation65_spill] sm:$0xff] %v8502_v38  ;;  %v8504_v39 = vld [vmem:[#allocation9 + $0x118] sm:$0xff]  ;;  %v8508_v40 = vld [vmem:[#allocation9 + $0x100] sm:$0xff] }
 0x4fe   :  { %3391 = vmatprep.subr.mxu0 %v8490_v41  ;;  %3462 = vmatprep.subr.mxu1 %v8492_v1  ;;  %11007 = vst [vmem:[#allocation66_spill] sm:$0xff] %v8504_v39  ;;  %11008 = vst [vmem:[#allocation67_spill] sm:$0xff] %v8508_v40  ;;  %v8510_v41 = vld [vmem:[#allocation9 + $0x110] sm:$0xff]  ;;  %v8514_v1 = vld [vmem:[#allocation9 + $0xe8] sm:$0xff] }
 0x4ff   :  { %3392 = vmatpush1.msra.mxu0 %v8496_v34  ;;  %3463 = vmatpush1.msra.mxu1 %v8498_v19  ;;  %11009 = vst [vmem:[#allocation68_spill] sm:$0xff] %v8510_v41  ;;  %11010 = vst [vmem:[#allocation69_spill] sm:$0xff] %v8514_v1  ;;  %v8516_v34 = vld [vmem:[#allocation9 + $0xf8] sm:$0xff]  ;;  %v8520_v19 = vld [vmem:[#allocation9 + $0xe0] sm:$0xff] }
 0x500   :  { %3393 = vmatprep.subr.mxu0 %v8502_v38  ;;  %3464 = vmatprep.subr.mxu1 %v8504_v39  ;;  %11011 = vst [vmem:[#allocation70_spill] sm:$0xff] %v8516_v34  ;;  %11012 = vst [vmem:[#allocation71_spill] sm:$0xff] %v8520_v19  ;;  %v8522_v38 = vld [vmem:[#allocation9 + $0xf0] sm:$0xff]  ;;  %v8526_v39 = vld [vmem:[#allocation9 + $0xc8] sm:$0xff] }
 0x501   :  { %3394 = vmatpush1.msra.mxu0 %v8508_v40  ;;  %3465 = vmatpush1.msra.mxu1 %v8510_v41  ;;  %11013 = vst [vmem:[#allocation72_spill] sm:$0xff] %v8522_v38  ;;  %11014 = vst [vmem:[#allocation73_spill] sm:$0xff] %v8526_v39  ;;  %v8528_v40 = vld [vmem:[#allocation9 + $0xd8] sm:$0xff]  ;;  %v8532_v41 = vld [vmem:[#allocation9 + $0xc0] sm:$0xff] }
 0x502   :  { %3395 = vmatprep.subr.mxu0 %v8514_v1  ;;  %3466 = vmatprep.subr.mxu1 %v8516_v34  ;;  %11015 = vst [vmem:[#allocation74_spill] sm:$0xff] %v8528_v40  ;;  %11016 = vst [vmem:[#allocation75_spill] sm:$0xff] %v8532_v41  ;;  %v8534_v1 = vld [vmem:[#allocation9 + $0xd0] sm:$0xff]  ;;  %v8538_v34 = vld [vmem:[#allocation9 + $0xa8] sm:$0xff] }
 0x503   :  { %3396 = vmatpush1.msra.mxu0 %v8520_v19  ;;  %3467 = vmatpush1.msra.mxu1 %v8522_v38  ;;  %11017 = vst [vmem:[#allocation76_spill] sm:$0xff] %v8534_v1  ;;  %11018 = vst [vmem:[#allocation77_spill] sm:$0xff] %v8538_v34  ;;  %v8540_v19 = vld [vmem:[#allocation9 + $0xb8] sm:$0xff]  ;;  %v8544_v38 = vld [vmem:[#allocation9 + $0xa0] sm:$0xff] }
 0x504   :  { %3397 = vmatprep.subr.mxu0 %v8526_v39  ;;  %3468 = vmatprep.subr.mxu1 %v8528_v40  ;;  %11019 = vst [vmem:[#allocation78_spill] sm:$0xff] %v8540_v19  ;;  %11020 = vst [vmem:[#allocation79_spill] sm:$0xff] %v8544_v38  ;;  %v8546_v39 = vld [vmem:[#allocation9 + $0xb0] sm:$0xff]  ;;  %v8550_v40 = vld [vmem:[#allocation9 + $0x88] sm:$0xff] }
 0x505   :  { %3398 = vmatpush1.msra.mxu0 %v8532_v41  ;;  %3469 = vmatpush1.msra.mxu1 %v8534_v1  ;;  %11021 = vst [vmem:[#allocation80_spill] sm:$0xff] %v8546_v39  ;;  %11022 = vst [vmem:[#allocation81_spill] sm:$0xff] %v8550_v40  ;;  %v8552_v41 = vld [vmem:[#allocation9 + $0x98] sm:$0xff]  ;;  %v8556_v1 = vld [vmem:[#allocation9 + $0x80] sm:$0xff] }
 0x506   :  { %3399 = vmatprep.subr.mxu0 %v8538_v34  ;;  %3470 = vmatprep.subr.mxu1 %v8540_v19  ;;  %11023 = vst [vmem:[#allocation82_spill] sm:$0xff] %v8552_v41  ;;  %11024 = vst [vmem:[#allocation83_spill] sm:$0xff] %v8556_v1  ;;  %v8558_v34 = vld [vmem:[#allocation9 + $0x90] sm:$0xff]  ;;  %v8562_v19 = vld [vmem:[#allocation9 + $0x68] sm:$0xff] }
 0x507   :  { %3400 = vmatpush1.msra.mxu0 %v8544_v38  ;;  %3471 = vmatpush1.msra.mxu1 %v8546_v39  ;;  %11025 = vst [vmem:[#allocation84_spill] sm:$0xff] %v8558_v34  ;;  %11026 = vst [vmem:[#allocation85_spill] sm:$0xff] %v8562_v19  ;;  %v8564_v38 = vld [vmem:[#allocation9 + $0x78] sm:$0xff]  ;;  %v8568_v39 = vld [vmem:[#allocation9 + $0x60] sm:$0xff] }
 0x508   :  { %3401 = vmatprep.subr.mxu0 %v8550_v40  ;;  %3472 = vmatprep.subr.mxu1 %v8552_v41  ;;  %11027 = vst [vmem:[#allocation86_spill] sm:$0xff] %v8564_v38  ;;  %11028 = vst [vmem:[#allocation87_spill] sm:$0xff] %v8568_v39  ;;  %v8570_v40 = vld [vmem:[#allocation9 + $0x70] sm:$0xff]  ;;  %v8574_v41 = vld [vmem:[#allocation9 + $0x48] sm:$0xff] }
 0x509   :  { %3402 = vmatpush1.msra.mxu0 %v8556_v1  ;;  %3473 = vmatpush1.msra.mxu1 %v8558_v34  ;;  %11029 = vst [vmem:[#allocation88_spill] sm:$0xff] %v8570_v40  ;;  %11030 = vst [vmem:[#allocation89_spill] sm:$0xff] %v8574_v41  ;;  %v8576_v1 = vld [vmem:[#allocation9 + $0x58] sm:$0xff]  ;;  %v8580_v34 = vld [vmem:[#allocation9 + $0x40] sm:$0xff] }
 0x50a   :  { %3403 = vmatprep.subr.mxu0 %v8562_v19  ;;  %3474 = vmatprep.subr.mxu1 %v8564_v38  ;;  %11031 = vst [vmem:[#allocation90_spill] sm:$0xff] %v8576_v1  ;;  %11032 = vst [vmem:[#allocation91_spill] sm:$0xff] %v8580_v34  ;;  %v8582_v19 = vld [vmem:[#allocation9 + $0x50] sm:$0xff]  ;;  %v8586_v38 = vld [vmem:[#allocation9 + $0x28] sm:$0xff] }
 0x50b   :  { %3404 = vmatpush1.msra.mxu0 %v8568_v39  ;;  %3475 = vmatpush1.msra.mxu1 %v8570_v40  ;;  %11033 = vst [vmem:[#allocation92_spill] sm:$0xff] %v8582_v19  ;;  %11034 = vst [vmem:[#allocation93_spill] sm:$0xff] %v8586_v38  ;;  %v8588_v39 = vld [vmem:[#allocation9 + $0x38] sm:$0xff]  ;;  %v8592_v40 = vld [vmem:[#allocation9 + $0x20] sm:$0xff] }
 0x50c   :  { %3405 = vmatprep.subr.mxu0 %v8574_v41  ;;  %3476 = vmatprep.subr.mxu1 %v8576_v1  ;;  %11035 = vst [vmem:[#allocation94_spill] sm:$0xff] %v8588_v39  ;;  %11036 = vst [vmem:[#allocation95_spill] sm:$0xff] %v8592_v40  ;;  %v8594_v41 = vld [vmem:[#allocation9 + $0x30] sm:$0xff]  ;;  %v8598_v1 = vld [vmem:[#allocation9 + $0x8] sm:$0xff] }
 0x50d   :  { %3406 = vmatpush1.msra.mxu0 %v8580_v34  ;;  %3477 = vmatpush1.msra.mxu1 %v8582_v19  ;;  %11037 = vst [vmem:[#allocation96_spill] sm:$0xff] %v8594_v41  ;;  %11038 = vst [vmem:[#allocation97_spill] sm:$0xff] %v8598_v1  ;;  %v8600_v34 = vld [vmem:[#allocation9 + $0x18] sm:$0xff]  ;;  %v8602_v19 = vld [vmem:[#allocation9] sm:$0xff] }
 0x50e   :  { %3407 = vmatprep.subr.mxu0 %v8586_v38  ;;  %3478 = vmatprep.subr.mxu1 %v8588_v39  ;;  %11039 = vst [vmem:[#allocation98_spill] sm:$0xff] %v8600_v34  ;;  %11040 = vst [vmem:[#allocation99_spill] sm:$0xff] %v8602_v19  ;;  %v8606_v38 = vld [vmem:[#allocation9 + $0x10] sm:$0xff]  ;;  %v8608_v39 = vld [vmem:[#allocation10 + $0x1e8] sm:$0xff] }
 0x50f   :  { %3408 = vmatpush1.msra.mxu0 %v8592_v40  ;;  %3479 = vmatpush1.msra.mxu1 %v8594_v41  ;;  %11041 = vst [vmem:[#allocation100_spill] sm:$0xff] %v8606_v38  ;;  %11042 = vst [vmem:[#allocation101_spill] sm:$0xff] %v8608_v39 }
 0x510   :  { %3409 = vmatprep.subr.mxu0 %v8598_v1  ;;  %3480 = vmatprep.subr.mxu1 %v8600_v34  ;;  %v2993_v1 = vld [vmem:[%s9843_s4] sm:$0xf] }
 0x511   :  { %3410 = vmatpush1.msra.mxu0 %v8602_v19  ;;  %3481 = vmatpush1.msra.mxu1 %v8606_v38  ;;  %v2998_v23 = vrot.slane %v2993_v1, %v10911_v32  ;;  %v3002_v19 = vrot.slane %v2993_v1, %v10912_v43  ;;  %v3010_v12 = vrot.slane %v2993_v1, %v7359_v63 }
 0x512   :  { %3585 = vmatprep.subr.mxu0 %v8608_v39  ;;  %3656 = vmatprep.subr.mxu1 %v8610_v28  ;;  %v3006_v49 = vrot.slane %v2993_v1, %v7363_v56 }
 0x56d   :  { %v2711_v41 = vpop.f32.mrf.mxu0  ;;  %v2782_v34 = vpop.f32.mrf.mxu1 }
 0x56f   :  { %v2713_v40 = vpop.f32.mrf.mxu0  ;;  %v2784_v20 = vpop.f32.mrf.mxu1 }
 0x58e   :  { %v2917_v22 = vpop.f32.mrf.mxu0  ;;  %v2988_v16 = vpop.f32.mrf.mxu1 }
 0x58f   :  { %v2918_v18 = vadd.f32 %v2917_v22, %v2711_v41  ;;  %v2989_v32 = vadd.f32 %v2988_v16, %v2782_v34 }
 0x590   :  { %v2919_v17 = vpop.f32.mrf.mxu0  ;;  %v2990_v14 = vpop.f32.mrf.mxu1 }
 0x591   :  { %v3015_v38 = vadd.f32 %v2998_v23, %v2918_v18  ;;  %v2920_v39 = vadd.f32 %v2919_v17, %v2713_v40  ;;  %v2991_v13 = vadd.f32 %v2990_v14, %v2784_v20  ;;  %v3017_v43 = vadd.f32 %v3006_v49, %v2989_v32 }
 0x593   :  { %v6065_v47 = vmul.f32 -1.442695, %v3015_v38  ;;  %v3016_v28 = vadd.f32 %v3002_v19, %v2920_v39  ;;  %v3018_v11 = vadd.f32 %v3010_v12, %v2991_v13 }
 0x595   :  { %6219 = vpow2.f32 %v6065_v47  ;;  %v6066_v15 = vmul.f32 -1.442695, %v3016_v28  ;;  %v6067_v22 = vmul.f32 -1.442695, %v3018_v11  ;;  %v2580_v11 = vld [vmem:[#allocation3 + $0x2] sm:$0x3] }
 0x597   :  { %6221 = vpow2.f32 %v6066_v15 }
 0x598   :  { %6223 = vpow2.f32 %v6067_v22 }
 0x5a2   :  { %v6220_v41 = vpop.eup %6219 }
 0x5a3   :  { %v3022_v50 = vadd.f32 1.0, %v6220_v41 }
 0x5a4   :  { %v6222_v18 = vpop.eup %6221 }
 0x5a5   :  { %6225 = vrcp.f32 %v3022_v50  ;;  %v3028_v17 = vadd.f32 1.0, %v6222_v18  ;;  %v6224_v15 = vpop.eup %6223 }
 0x5a6   :  { %6227 = vtanh.f32 %v3017_v43  ;;  %v3035_v34 = vadd.f32 1.0, %v6224_v15  ;;  %v3048_v43 = vld [vmem:[#allocation4 + $0x20] sm:$0xff] }
 0x5a7   :  { %6229 = vrcp.f32 %v3028_v17 }
 0x5a8   :  { %6231 = vrcp.f32 %v3035_v34 }
 0x5b0   :  { %v3181_v23 = vpop.f32.mrf.mxu0  ;;  %v3252_v28 = vpop.f32.mrf.mxu1 }
 0x5b2   :  { %v6226_v14 = vpop.eup %6225  ;;  %v3183_v20 = vpop.f32.mrf.mxu0 }
 0x5b3   :  { %v3254_v47 = vpop.f32.mrf.mxu1  ;;  %v6228_v12 = vpop.eup %6227  ;;  %v3261_v13 = vcombine.low %v3181_v23, %v3183_v20 }
 0x5b4   :  { %v3262_v16 = vcombine.low %v3252_v28, %v3254_v47  ;;  %v6230_v1 = vpop.eup %6229  ;;  %v3039_v32 = vmul.f32 %v6228_v12, %v6226_v14 }
 0x5b5   :  { %v3038_v49 = vmul.f32 %v6230_v1, %v2580_v11  ;;  %v3269_v19 = vrot.slane %v3261_v13, %v7203_v58  ;;  %v6232_v23 = vpop.eup %6231  ;;  %v8625_v1 = vld [vmem:[#allocation10 + $0x1e0] sm:$0xff]  ;;  %v8627_v11 = vld [vmem:[#allocation10 + $0x1f0] sm:$0xff] }
 0x5b6   :  { %v3276_v50 = vrot.slane %v3262_v16, %v7203_v58 }
 0x5b7   :  { %v3040_v38 = vadd.f32 %v3039_v32, %v3038_v49  ;;  %v8629_v32 = vld [vmem:[#allocation10 + $0x1c8] sm:$0xff]  ;;  %v8631_v49 = vld [vmem:[#allocation10 + $0x1d8] sm:$0xff] }
 0x5b8   :  { %v3277_v39 = vcombine.low %v3269_v19, %v3276_v50  ;;  %v8633_v19 = vld [vmem:[#allocation10 + $0x1c0] sm:$0xff]  ;;  %v8635_v50 = vld [vmem:[#allocation10 + $0x1d0] sm:$0xff] }
 0x5b9   :  { %6233 = vtanh.f32 %v3040_v38  ;;  %3044 = vst [vmem:[#allocation3 + $0x2] sm:$0x3] %v3040_v38  ;;  %v8641_v38 = vld [vmem:[#allocation10 + $0x1b8] sm:$0xff] }
 0x5ba   :  { %v3279_v40 = vadd.f32 %v3277_v39, %v3048_v43  ;;  %v8639_v43 = vld [vmem:[#allocation10 + $0x1a8] sm:$0xff]  ;;  %11045 = vst [vmem:[#allocation103_spill] sm:$0xff] %v8641_v38  ;;  %v8645_v39 = vld [vmem:[#allocation10 + $0x1a0] sm:$0xff] }
 0x5bb   :  { %11044 = vst [vmem:[#allocation165_spill] sm:$0xff] %v8639_v43  ;;  %11046 = vst [vmem:[#allocation104_spill] sm:$0xff] %v8645_v39 }
 0x5bc   :  { %v6068_v22 = vmul.f32 -1.442695, %v3279_v40  ;;  %v3287_v41 = vrot.slane %v3279_v40, 2  ;;  %v3298_v17 = vrot.slane %v3279_v40, 6  ;;  %v3295_v47 = vrot.slane %v3279_v40, 4  ;;  %v8647_v40 = vld [vmem:[#allocation10 + $0x1b0] sm:$0xff] }
 0x5bd   :  { %11047 = vst [vmem:[#allocation105_spill] sm:$0xff] %v8647_v40 }
 0x5be   :  { %6235 = vpow2.f32 %v6068_v22  ;;  %v6069_v18 = vmul.f32 -1.442695, %v3287_v41  ;;  %v6070_v14 = vmul.f32 -1.442695, %v3298_v17  ;;  %v8651_v22 = vld [vmem:[#allocation10 + $0x188] sm:$0xff]  ;;  %v8653_v41 = vld [vmem:[#allocation10 + $0x198] sm:$0xff] }
 0x5bf   :  { %11048 = vst [vmem:[#allocation106_spill] sm:$0xff] %v8651_v22  ;;  %11049 = vst [vmem:[#allocation107_spill] sm:$0xff] %v8653_v41  ;;  %v8659_v17 = vld [vmem:[#allocation10 + $0x190] sm:$0xff] }
 0x5c0   :  { %6237 = vpow2.f32 %v6069_v18  ;;  %v8657_v18 = vld [vmem:[#allocation10 + $0x180] sm:$0xff]  ;;  %11051 = vst [vmem:[#allocation109_spill] sm:$0xff] %v8659_v17 }
 0x5c1   :  { %6239 = vpow2.f32 %v6070_v14  ;;  %11050 = vst [vmem:[#allocation108_spill] sm:$0xff] %v8657_v18  ;;  %v8671_v14 = vld [vmem:[#allocation10 + $0x170] sm:$0xff] }
 0x5c2   :  { %11055 = vst [vmem:[#allocation113_spill] sm:$0xff] %v8671_v14 }
 0x5c6   :  { %v6234_v28 = vpop.eup %6233 }
 0x5c7   :  { %v3042_v15 = vmul.f32 %v6234_v28, %v6232_v23  ;;  %v8663_v23 = vld [vmem:[#allocation10 + $0x168] sm:$0xff]  ;;  %v8665_v28 = vld [vmem:[#allocation10 + $0x178] sm:$0xff] }
 0x5c8   :  { %11052 = vst [vmem:[#allocation110_spill] sm:$0xff] %v8663_v23  ;;  %11053 = vst [vmem:[#allocation111_spill] sm:$0xff] %v8665_v28 }
 0x5c9   :  { %3046 = vst [vmem:[#allocation13 + $0x6] sm:$0x3] %v3042_v15  ;;  %3043 = vst [vmem:[#allocation2 + $0x2] sm:$0x3] %v3042_v15  ;;  %v8669_v15 = vld [vmem:[#allocation10 + $0x160] sm:$0xff] }
 0x5ca   :  { %11054 = vst [vmem:[#allocation112_spill] sm:$0xff] %v8669_v15 }
 0x5cb   :  { %v6236_v20 = vpop.eup %6235 }
 0x5cc   :  { %v3283_v12 = vadd.f32 1.0, %v6236_v20  ;;  %v8675_v20 = vld [vmem:[#allocation10 + $0x148] sm:$0xff] }
 0x5cd   :  { %v6238_v13 = vpop.eup %6237  ;;  %11056 = vst [vmem:[#allocation114_spill] sm:$0xff] %v8675_v20 }
 0x5ce   :  { %6241 = vrcp.f32 %v3283_v12  ;;  %v3292_v16 = vadd.f32 1.0, %v6238_v13  ;;  %v6240_v12 = vpop.eup %6239  ;;  %v8681_v13 = vld [vmem:[#allocation10 + $0x140] sm:$0xff] }
 0x5cf   :  { %6243 = vtanh.f32 %v3295_v47  ;;  %v8677_v47 = vld [vmem:[#allocation10 + $0x158] sm:$0xff]  ;;  %11058 = vst [vmem:[#allocation116_spill] sm:$0xff] %v8681_v13 }
 0x5d0   :  { %6245 = vrcp.f32 %v3292_v16  ;;  %v3313_v34 = vld [vmem:[#allocation2 + $0x2] sm:$0x3]  ;;  %11057 = vst [vmem:[#allocation115_spill] sm:$0xff] %v8677_v47  ;;  %v8683_v16 = vld [vmem:[#allocation10 + $0x150] sm:$0xff] }
 0x5d1   :  { %3444 = vmatmul.mubr.f32.vlgmr.msra.gmra.mxu0 %v3313_v34  ;;  %3515 = vmatmul.mubr.f32.vlgmr.msra.gmra.mxu1 %v3313_v34  ;;  %11059 = vst [vmem:[#allocation117_spill] sm:$0xff] %v8683_v16 }
 0x5d2   :  { %3586 = vmatpush1.msra.mxu0 %v8625_v1  ;;  %3657 = vmatpush1.msra.mxu1 %v8627_v11 }
 0x5d3   :  { %3587 = vmatprep.subr.mxu0 %v8629_v32  ;;  %3658 = vmatprep.subr.mxu1 %v8631_v49 }
 0x5d4   :  { %3588 = vmatpush1.msra.mxu0 %v8633_v19  ;;  %3659 = vmatpush1.msra.mxu1 %v8635_v50 }
 0x5d5   :  { %3589 = vmatprep.subr.mxu0 %v8639_v43  ;;  %3660 = vmatprep.subr.mxu1 %v8641_v38 }
 0x5d6   :  { %3590 = vmatpush1.msra.mxu0 %v8645_v39  ;;  %3661 = vmatpush1.msra.mxu1 %v8647_v40  ;;  %v3303_v40 = vadd.f32 1.0, %v6240_v12  ;;  %v3050_v39 = vld [vmem:[#allocation3] sm:$0x3]  ;;  %v8711_v12 = vld [vmem:[#allocation10 + $0xe8] sm:$0xff] }
 0x5d7   :  { %3591 = vmatprep.subr.mxu0 %v8651_v22  ;;  %3662 = vmatprep.subr.mxu1 %v8653_v41  ;;  %11062 = vst [vmem:[#allocation120_spill] sm:$0xff] %v8711_v12 }
 0x5d8   :  { %3592 = vmatpush1.msra.mxu0 %v8657_v18  ;;  %3663 = vmatpush1.msra.mxu1 %v8659_v17  ;;  %v8687_v18 = vld [vmem:[#allocation10 + $0x128] sm:$0xff]  ;;  %v8689_v17 = vld [vmem:[#allocation10 + $0x138] sm:$0xff]  ;;  %6247 = vrcp.f32 %v3303_v40  ;;  %v8741_v40 = vld [vmem:[#allocation10 + $0xa0] sm:$0xff] }
 0x5d9   :  { %3593 = vmatprep.subr.mxu0 %v8663_v23  ;;  %3664 = vmatprep.subr.mxu1 %v8665_v28  ;;  %11060 = vst [vmem:[#allocation118_spill] sm:$0xff] %v8687_v18  ;;  %11061 = vst [vmem:[#allocation119_spill] sm:$0xff] %v8689_v17  ;;  %v8693_v23 = vld [vmem:[#allocation10 + $0x120] sm:$0xff]  ;;  %v8695_v28 = vld [vmem:[#allocation10 + $0x130] sm:$0xff] }
 0x5da   :  { %3594 = vmatpush1.msra.mxu0 %v8669_v15  ;;  %3665 = vmatpush1.msra.mxu1 %v8671_v14  ;;  %v8699_v14 = vld [vmem:[#allocation10 + $0x108] sm:$0xff]  ;;  %v8701_v15 = vld [vmem:[#allocation10 + $0x118] sm:$0xff]  ;;  %11072 = vst [vmem:[#allocation130_spill] sm:$0xff] %v8741_v40 }
 0x5db   :  { %v6242_v34 = vpop.eup %6241  ;;  %3595 = vmatprep.subr.mxu0 %v8675_v20  ;;  %3666 = vmatprep.subr.mxu1 %v8677_v47  ;;  %v8705_v47 = vld [vmem:[#allocation10 + $0x100] sm:$0xff]  ;;  %v8707_v20 = vld [vmem:[#allocation10 + $0x110] sm:$0xff] }
 0x5dc   :  { %v6244_v41 = vpop.eup %6243  ;;  %3596 = vmatpush1.msra.mxu0 %v8681_v13  ;;  %3667 = vmatpush1.msra.mxu1 %v8683_v16  ;;  %v8713_v16 = vld [vmem:[#allocation10 + $0xf8] sm:$0xff] }
 0x5dd   :  { %v6246_v22 = vpop.eup %6245  ;;  %3597 = vmatprep.subr.mxu0 %v8687_v18  ;;  %3668 = vmatprep.subr.mxu1 %v8689_v17  ;;  %v3307_v43 = vmul.f32 %v6244_v41, %v6242_v34  ;;  %11063 = vst [vmem:[#allocation121_spill] sm:$0xff] %v8713_v16  ;;  %v8717_v18 = vld [vmem:[#allocation10 + $0xe0] sm:$0xff]  ;;  %v8719_v17 = vld [vmem:[#allocation10 + $0xf0] sm:$0xff] }
 0x5de   :  { %v3306_v38 = vmul.f32 %v6246_v22, %v3050_v39  ;;  %3598 = vmatpush1.msra.mxu0 %v8693_v23  ;;  %3669 = vmatpush1.msra.mxu1 %v8695_v28  ;;  %11064 = vst [vmem:[#allocation122_spill] sm:$0xff] %v8717_v18  ;;  %11065 = vst [vmem:[#allocation123_spill] sm:$0xff] %v8719_v17  ;;  %v8723_v39 = vld [vmem:[#allocation10 + $0xc8] sm:$0xff]  ;;  %v8725_v22 = vld [vmem:[#allocation10 + $0xd8] sm:$0xff] }
 0x5df   :  { %3599 = vmatprep.subr.mxu0 %v8699_v14  ;;  %3670 = vmatprep.subr.mxu1 %v8701_v15  ;;  %11066 = vst [vmem:[#allocation124_spill] sm:$0xff] %v8723_v39  ;;  %11067 = vst [vmem:[#allocation125_spill] sm:$0xff] %v8725_v22  ;;  %v8729_v41 = vld [vmem:[#allocation10 + $0xc0] sm:$0xff]  ;;  %v8731_v34 = vld [vmem:[#allocation10 + $0xd0] sm:$0xff] }
 0x5e0   :  { %v3308_v13 = vadd.f32 %v3307_v43, %v3306_v38  ;;  %3600 = vmatpush1.msra.mxu0 %v8705_v47  ;;  %3671 = vmatpush1.msra.mxu1 %v8707_v20  ;;  %11068 = vst [vmem:[#allocation126_spill] sm:$0xff] %v8729_v41  ;;  %11069 = vst [vmem:[#allocation127_spill] sm:$0xff] %v8731_v34  ;;  %v8735_v43 = vld [vmem:[#allocation10 + $0xa8] sm:$0xff]  ;;  %v8737_v38 = vld [vmem:[#allocation10 + $0xb8] sm:$0xff] }
 0x5e1   :  { %3601 = vmatprep.subr.mxu0 %v8711_v12  ;;  %3672 = vmatprep.subr.mxu1 %v8713_v16  ;;  %11070 = vst [vmem:[#allocation128_spill] sm:$0xff] %v8735_v43  ;;  %11071 = vst [vmem:[#allocation129_spill] sm:$0xff] %v8737_v38  ;;  %v8743_v16 = vld [vmem:[#allocation10 + $0xb0] sm:$0xff] }
 0x5e2   :  { %6249 = vtanh.f32 %v3308_v13  ;;  %3312 = vst [vmem:[#allocation3] sm:$0x3] %v3308_v13  ;;  %3602 = vmatpush1.msra.mxu0 %v8717_v18  ;;  %3673 = vmatpush1.msra.mxu1 %v8719_v17  ;;  %11073 = vst [vmem:[#allocation131_spill] sm:$0xff] %v8743_v16  ;;  %v8747_v13 = vld [vmem:[#allocation10 + $0x88] sm:$0xff]  ;;  %v8749_v18 = vld [vmem:[#allocation10 + $0x98] sm:$0xff] }
 0x5e3   :  { %3603 = vmatprep.subr.mxu0 %v8723_v39  ;;  %3674 = vmatprep.subr.mxu1 %v8725_v22  ;;  %11074 = vst [vmem:[#allocation132_spill] sm:$0xff] %v8747_v13  ;;  %11075 = vst [vmem:[#allocation133_spill] sm:$0xff] %v8749_v18  ;;  %v8753_v17 = vld [vmem:[#allocation10 + $0x80] sm:$0xff]  ;;  %v8755_v39 = vld [vmem:[#allocation10 + $0x90] sm:$0xff] }
 0x5e4   :  { %3604 = vmatpush1.msra.mxu0 %v8729_v41  ;;  %3675 = vmatpush1.msra.mxu1 %v8731_v34  ;;  %11076 = vst [vmem:[#allocation134_spill] sm:$0xff] %v8753_v17  ;;  %11077 = vst [vmem:[#allocation135_spill] sm:$0xff] %v8755_v39  ;;  %v8759_v22 = vld [vmem:[#allocation10 + $0x68] sm:$0xff]  ;;  %v8761_v41 = vld [vmem:[#allocation10 + $0x78] sm:$0xff] }
 0x5e5   :  { %3605 = vmatprep.subr.mxu0 %v8735_v43  ;;  %3676 = vmatprep.subr.mxu1 %v8737_v38  ;;  %11078 = vst [vmem:[#allocation136_spill] sm:$0xff] %v8759_v22  ;;  %11079 = vst [vmem:[#allocation137_spill] sm:$0xff] %v8761_v41  ;;  %v8765_v34 = vld [vmem:[#allocation10 + $0x60] sm:$0xff]  ;;  %v8767_v43 = vld [vmem:[#allocation10 + $0x70] sm:$0xff] }
 0x5e6   :  { %3606 = vmatpush1.msra.mxu0 %v8741_v40  ;;  %3677 = vmatpush1.msra.mxu1 %v8743_v16  ;;  %11080 = vst [vmem:[#allocation138_spill] sm:$0xff] %v8765_v34  ;;  %11081 = vst [vmem:[#allocation139_spill] sm:$0xff] %v8767_v43  ;;  %v8771_v38 = vld [vmem:[#allocation10 + $0x48] sm:$0xff]  ;;  %v8773_v40 = vld [vmem:[#allocation10 + $0x58] sm:$0xff] }
 0x5e7   :  { %3607 = vmatprep.subr.mxu0 %v8747_v13  ;;  %3678 = vmatprep.subr.mxu1 %v8749_v18  ;;  %11082 = vst [vmem:[#allocation140_spill] sm:$0xff] %v8771_v38  ;;  %11083 = vst [vmem:[#allocation141_spill] sm:$0xff] %v8773_v40  ;;  %v8777_v16 = vld [vmem:[#allocation10 + $0x40] sm:$0xff]  ;;  %v8779_v13 = vld [vmem:[#allocation10 + $0x50] sm:$0xff] }
 0x5e8   :  { %3608 = vmatpush1.msra.mxu0 %v8753_v17  ;;  %3679 = vmatpush1.msra.mxu1 %v8755_v39  ;;  %11084 = vst [vmem:[#allocation142_spill] sm:$0xff] %v8779_v13  ;;  %v8783_v18 = vld [vmem:[#allocation10 + $0x28] sm:$0xff]  ;;  %v8785_v17 = vld [vmem:[#allocation10 + $0x38] sm:$0xff]  ;;  %v8789_v39 = vld [vmem:[#allocation10 + $0x20] sm:$0xff] }
 0x5e9   :  { %3609 = vmatprep.subr.mxu0 %v8759_v22  ;;  %3680 = vmatprep.subr.mxu1 %v8761_v41  ;;  %v8791_v22 = vld [vmem:[#allocation10 + $0x30] sm:$0xff]  ;;  %v8795_v41 = vld [vmem:[#allocation10 + $0x8] sm:$0xff] }
 0x5ea   :  { %3610 = vmatpush1.msra.mxu0 %v8765_v34  ;;  %3681 = vmatpush1.msra.mxu1 %v8767_v43  ;;  %v8797_v34 = vld [vmem:[#allocation10 + $0x18] sm:$0xff]  ;;  %v6248_v43 = vpop.eup %6247  ;;  %v8805_v12 = vld [vmem:[#allocation10 + $0x10] sm:$0xff] }
 0x5eb   :  { %3611 = vmatprep.subr.mxu0 %v8771_v38  ;;  %3682 = vmatprep.subr.mxu1 %v8773_v40  ;;  %v8801_v38 = vld [vmem:[#allocation10] sm:$0xff] }
 0x5ec   :  { %3612 = vmatpush1.msra.mxu0 %v8777_v16  ;;  %3683 = vmatpush1.msra.mxu1 %v8779_v13 }
 0x5ed   :  { %3613 = vmatprep.subr.mxu0 %v8783_v18  ;;  %3684 = vmatprep.subr.mxu1 %v8785_v17 }
 0x5ee   :  { %3614 = vmatpush1.msra.mxu0 %v8789_v39  ;;  %3685 = vmatpush1.msra.mxu1 %v8791_v22 }
 0x5ef   :  { %v6250_v40 = vpop.eup %6249  ;;  %3615 = vmatprep.subr.mxu0 %v8795_v41  ;;  %3686 = vmatprep.subr.mxu1 %v8797_v34 }
 0x5f0   :  { %v3310_v13 = vmul.f32 %v6250_v40, %v6248_v43  ;;  %3616 = vmatpush1.msra.mxu0 %v8801_v38  ;;  %3649 = vmatprep.mubr.f32.mxu0 %v10561_v21  ;;  %v11116_v43 = vld [vmem:[#allocation44_spill] sm:$0xff]  ;;  %v11117_v40 = vld [vmem:[#allocation45_spill] sm:$0xff] }
 0x5f1   :  { %3687 = vmatpush1.msra.mxu1 %v8805_v12  ;;  %3720 = vmatprep.mubr.f32.mxu1 %v10561_v21 }
 0x5f2   :  { %3311 = vst [vmem:[#allocation2] sm:$0x3] %v3310_v13  ;;  %3650 = vmatmul.mubr.f32.vlgmr.msra.gmra.mxu0 %v3310_v13  ;;  %3721 = vmatmul.mubr.f32.vlgmr.msra.gmra.mxu1 %v3310_v13  ;;  %v11118_v13 = vld [vmem:[#allocation46_spill] sm:$0xff] }
 0x5f3   :  { %3849 = vmatprep.subr.mxu0 %v8228_v0  ;;  %3920 = vmatprep.subr.mxu1 %v8230_v46  ;;  %v11085_v0 = vld [vmem:[#allocation154_spill] sm:$0xff]  ;;  %v11086_v46 = vld [vmem:[#allocation155_spill] sm:$0xff] }
 0x5f4   :  { %3850 = vmatpush1.msra.mxu0 %v8234_v59  ;;  %3921 = vmatpush1.msra.mxu1 %v8236_v53  ;;  %v11087_v59 = vld [vmem:[#allocation156_spill] sm:$0xff]  ;;  %v11088_v53 = vld [vmem:[#allocation157_spill] sm:$0xff] }
 0x5f5   :  { %3851 = vmatprep.subr.mxu0 %v8238_v25  ;;  %3922 = vmatprep.subr.mxu1 %v8240_v60  ;;  %v11089_v25 = vld [vmem:[#allocation158_spill] sm:$0xff]  ;;  %v11090_v60 = vld [vmem:[#allocation159_spill] sm:$0xff] }
 0x5f6   :  { %3852 = vmatpush1.msra.mxu0 %v8244_v27  ;;  %3923 = vmatpush1.msra.mxu1 %v8246_v48  ;;  %v11091_v27 = vld [vmem:[#allocation160_spill] sm:$0xff]  ;;  %v11092_v48 = vld [vmem:[#allocation161_spill] sm:$0xff] }
 0x5f7   :  { %3853 = vmatprep.subr.mxu0 %v8250_v3  ;;  %3924 = vmatprep.subr.mxu1 %v8252_v24  ;;  %v11093_v3 = vld [vmem:[#allocation162_spill] sm:$0xff]  ;;  %v11094_v24 = vld [vmem:[#allocation163_spill] sm:$0xff] }
 0x5f8   :  { %3854 = vmatpush1.msra.mxu0 %v8256_v52  ;;  %3925 = vmatpush1.msra.mxu1 %v8258_v45  ;;  %v11095_v52 = vld [vmem:[#allocation164_spill] sm:$0xff] }
 0x5f9   :  { %3855 = vmatprep.subr.mxu0 %v8262_v31  ;;  %3926 = vmatprep.subr.mxu1 %v8264_v30  ;;  %v11096_v45 = vld [vmem:[#allocation24_spill] sm:$0xff]  ;;  %v11097_v31 = vld [vmem:[#allocation25_spill] sm:$0xff]  ;;  %v11098_v30 = vld [vmem:[#allocation26_spill] sm:$0xff] }
 0x5fa   :  { %3856 = vmatpush1.msra.mxu0 %v8268_v33  ;;  %3927 = vmatpush1.msra.mxu1 %v8270_v29  ;;  %v11099_v33 = vld [vmem:[#allocation27_spill] sm:$0xff]  ;;  %v11100_v29 = vld [vmem:[#allocation28_spill] sm:$0xff] }
 0x5fb   :  { %3857 = vmatprep.subr.mxu0 %v8274_v35  ;;  %3928 = vmatprep.subr.mxu1 %v8276_v36  ;;  %v11101_v35 = vld [vmem:[#allocation29_spill] sm:$0xff]  ;;  %v11102_v36 = vld [vmem:[#allocation30_spill] sm:$0xff] }
 0x5fc   :  { %3858 = vmatpush1.msra.mxu0 %v8280_v42  ;;  %3929 = vmatpush1.msra.mxu1 %v8282_v44  ;;  %v11103_v42 = vld [vmem:[#allocation31_spill] sm:$0xff]  ;;  %v11104_v44 = vld [vmem:[#allocation32_spill] sm:$0xff] }
 0x5fd   :  { %3859 = vmatprep.subr.mxu0 %v8286_v37  ;;  %3930 = vmatprep.subr.mxu1 %v8288_v26  ;;  %v11105_v37 = vld [vmem:[#allocation33_spill] sm:$0xff]  ;;  %v11106_v26 = vld [vmem:[#allocation34_spill] sm:$0xff] }
 0x5fe   :  { %3860 = vmatpush1.msra.mxu0 %v8292_v57  ;;  %3931 = vmatpush1.msra.mxu1 %v8294_v2  ;;  %v11107_v57 = vld [vmem:[#allocation35_spill] sm:$0xff]  ;;  %v11108_v2 = vld [vmem:[#allocation36_spill] sm:$0xff] }
 0x5ff   :  { %3861 = vmatprep.subr.mxu0 %v8298_v61  ;;  %3932 = vmatprep.subr.mxu1 %v8300_v4  ;;  %v11109_v61 = vld [vmem:[#allocation37_spill] sm:$0xff]  ;;  %v11110_v4 = vld [vmem:[#allocation38_spill] sm:$0xff] }
 0x600   :  { %3862 = vmatpush1.msra.mxu0 %v8304_v5  ;;  %3933 = vmatpush1.msra.mxu1 %v8306_v6  ;;  %v11111_v5 = vld [vmem:[#allocation39_spill] sm:$0xff]  ;;  %v11112_v6 = vld [vmem:[#allocation40_spill] sm:$0xff] }
 0x601   :  { %3863 = vmatprep.subr.mxu0 %v8310_v7  ;;  %3934 = vmatprep.subr.mxu1 %v8312_v8  ;;  %v3783_v7 = vld [vmem:[#allocation2] sm:$0x3]  ;;  %v8881_v8 = vld [vmem:[#allocation9 + $0x1e8] sm:$0xff] }
 0x602   :  { %3864 = vmatpush1.msra.mxu0 %v8316_v9  ;;  %3935 = vmatpush1.msra.mxu1 %v8318_v51  ;;  %v8883_v9 = vld [vmem:[#allocation9 + $0x1f8] sm:$0xff]  ;;  %v8887_v51 = vld [vmem:[#allocation9 + $0x1e0] sm:$0xff] }
 0x603   :  { %3865 = vmatprep.subr.mxu0 %v8322_v62  ;;  %3936 = vmatprep.subr.mxu1 %v8324_v54  ;;  %v8889_v62 = vld [vmem:[#allocation9 + $0x1f0] sm:$0xff] }
 0x604   :  { %3866 = vmatpush1.msra.mxu0 %v8328_v55  ;;  %3937 = vmatpush1.msra.mxu1 %v8330_v10  ;;  %v11113_v54 = vld [vmem:[#allocation41_spill] sm:$0xff]  ;;  %v11114_v55 = vld [vmem:[#allocation42_spill] sm:$0xff]  ;;  %v11115_v10 = vld [vmem:[#allocation43_spill] sm:$0xff] }
 0x605   :  { %3867 = vmatprep.subr.mxu0 %v11085_v0  ;;  %3938 = vmatprep.subr.mxu1 %v11086_v46  ;;  %v11119_v0 = vld [vmem:[#allocation47_spill] sm:$0xff]  ;;  %v11120_v46 = vld [vmem:[#allocation48_spill] sm:$0xff] }
 0x606   :  { %3868 = vmatpush1.msra.mxu0 %v11087_v59  ;;  %3939 = vmatpush1.msra.mxu1 %v11088_v53  ;;  %v11121_v59 = vld [vmem:[#allocation49_spill] sm:$0xff]  ;;  %v11122_v53 = vld [vmem:[#allocation50_spill] sm:$0xff] }
 0x607   :  { %3869 = vmatprep.subr.mxu0 %v11089_v25  ;;  %3940 = vmatprep.subr.mxu1 %v11090_v60  ;;  %v11123_v25 = vld [vmem:[#allocation51_spill] sm:$0xff]  ;;  %v11124_v60 = vld [vmem:[#allocation52_spill] sm:$0xff] }
 0x608   :  { %3870 = vmatpush1.msra.mxu0 %v11091_v27  ;;  %3941 = vmatpush1.msra.mxu1 %v11092_v48  ;;  %v11125_v27 = vld [vmem:[#allocation53_spill] sm:$0xff]  ;;  %v11126_v48 = vld [vmem:[#allocation54_spill] sm:$0xff] }
 0x609   :  { %3871 = vmatprep.subr.mxu0 %v11093_v3  ;;  %3942 = vmatprep.subr.mxu1 %v11094_v24  ;;  %v11127_v3 = vld [vmem:[#allocation55_spill] sm:$0xff]  ;;  %v11128_v24 = vld [vmem:[#allocation56_spill] sm:$0xff] }
 0x60a   :  { %3872 = vmatpush1.msra.mxu0 %v11095_v52  ;;  %3943 = vmatpush1.msra.mxu1 %v11096_v45  ;;  %v11129_v52 = vld [vmem:[#allocation57_spill] sm:$0xff]  ;;  %v11130_v45 = vld [vmem:[#allocation58_spill] sm:$0xff] }
 0x60b   :  { %3873 = vmatprep.subr.mxu0 %v11097_v31  ;;  %3944 = vmatprep.subr.mxu1 %v11098_v30  ;;  %v11131_v31 = vld [vmem:[#allocation59_spill] sm:$0xff]  ;;  %v11132_v30 = vld [vmem:[#allocation60_spill] sm:$0xff] }
 0x60c   :  { %3874 = vmatpush1.msra.mxu0 %v11099_v33  ;;  %3945 = vmatpush1.msra.mxu1 %v11100_v29  ;;  %v11133_v33 = vld [vmem:[#allocation61_spill] sm:$0xff]  ;;  %v11134_v29 = vld [vmem:[#allocation62_spill] sm:$0xff] }
 0x60d   :  { %3875 = vmatprep.subr.mxu0 %v11101_v35  ;;  %3946 = vmatprep.subr.mxu1 %v11102_v36  ;;  %v11135_v35 = vld [vmem:[#allocation63_spill] sm:$0xff]  ;;  %v11136_v36 = vld [vmem:[#allocation64_spill] sm:$0xff] }
 0x60e   :  { %3876 = vmatpush1.msra.mxu0 %v11103_v42  ;;  %3947 = vmatpush1.msra.mxu1 %v11104_v44  ;;  %v11137_v42 = vld [vmem:[#allocation65_spill] sm:$0xff]  ;;  %v11138_v44 = vld [vmem:[#allocation66_spill] sm:$0xff] }
 0x60f   :  { %3877 = vmatprep.subr.mxu0 %v11105_v37  ;;  %3948 = vmatprep.subr.mxu1 %v11106_v26  ;;  %v11139_v37 = vld [vmem:[#allocation67_spill] sm:$0xff]  ;;  %v11140_v26 = vld [vmem:[#allocation68_spill] sm:$0xff] }
 0x610   :  { %3878 = vmatpush1.msra.mxu0 %v11107_v57  ;;  %3949 = vmatpush1.msra.mxu1 %v11108_v2  ;;  %v11141_v57 = vld [vmem:[#allocation69_spill] sm:$0xff]  ;;  %v11142_v2 = vld [vmem:[#allocation70_spill] sm:$0xff] }
 0x611   :  { %3879 = vmatprep.subr.mxu0 %v11109_v61  ;;  %3950 = vmatprep.subr.mxu1 %v11110_v4  ;;  %v11143_v61 = vld [vmem:[#allocation71_spill] sm:$0xff]  ;;  %v11144_v4 = vld [vmem:[#allocation72_spill] sm:$0xff] }
 0x612   :  { %3880 = vmatpush1.msra.mxu0 %v11111_v5  ;;  %3913 = vmatprep.mubr.f32.mxu0 %v10561_v21  ;;  %v11145_v5 = vld [vmem:[#allocation73_spill] sm:$0xff] }
 0x613   :  { %3951 = vmatpush1.msra.mxu1 %v11112_v6  ;;  %3984 = vmatprep.mubr.f32.mxu1 %v10561_v21  ;;  %v11146_v6 = vld [vmem:[#allocation74_spill] sm:$0xff] }
 0x614   :  { %3914 = vmatmul.mubr.f32.vlgmr.msra.gmra.mxu0 %v3783_v7  ;;  %3985 = vmatmul.mubr.f32.vlgmr.msra.gmra.mxu1 %v3783_v7  ;;  %v11147_v7 = vld [vmem:[#allocation75_spill] sm:$0xff] }
 0x615   :  { %4177 = vmatprep.mubr.f32.mxu0 %v10561_v21  ;;  %4248 = vmatprep.mubr.f32.mxu1 %v10561_v21 }
 0x616   :  { %4113 = vmatprep.subr.mxu0 %v8881_v8  ;;  %4184 = vmatprep.subr.mxu1 %v8883_v9 }
 0x617   :  { %4114 = vmatpush1.msra.mxu0 %v8887_v51  ;;  %4185 = vmatpush1.msra.mxu1 %v8889_v62 }
 0x618   :  { %4115 = vmatprep.subr.mxu0 %v11113_v54  ;;  %4186 = vmatprep.subr.mxu1 %v11114_v55  ;;  %v11148_v54 = vld [vmem:[#allocation76_spill] sm:$0xff]  ;;  %v11149_v55 = vld [vmem:[#allocation77_spill] sm:$0xff] }
 0x619   :  { %4116 = vmatpush1.msra.mxu0 %v11115_v10  ;;  %4187 = vmatpush1.msra.mxu1 %v11116_v43  ;;  %v11150_v10 = vld [vmem:[#allocation78_spill] sm:$0xff]  ;;  %v11151_v43 = vld [vmem:[#allocation79_spill] sm:$0xff] }
 0x61a   :  { %4117 = vmatprep.subr.mxu0 %v11117_v40  ;;  %4188 = vmatprep.subr.mxu1 %v11118_v13  ;;  %v11152_v40 = vld [vmem:[#allocation80_spill] sm:$0xff]  ;;  %v11153_v13 = vld [vmem:[#allocation81_spill] sm:$0xff] }
 0x61b   :  { %4118 = vmatpush1.msra.mxu0 %v11119_v0  ;;  %4189 = vmatpush1.msra.mxu1 %v11120_v46  ;;  %v11154_v0 = vld [vmem:[#allocation82_spill] sm:$0xff]  ;;  %v11155_v46 = vld [vmem:[#allocation83_spill] sm:$0xff] }
 0x61c   :  { %4119 = vmatprep.subr.mxu0 %v11121_v59  ;;  %4190 = vmatprep.subr.mxu1 %v11122_v53  ;;  %v11156_v59 = vld [vmem:[#allocation84_spill] sm:$0xff]  ;;  %v11157_v53 = vld [vmem:[#allocation85_spill] sm:$0xff] }
 0x61d   :  { %4120 = vmatpush1.msra.mxu0 %v11123_v25  ;;  %4191 = vmatpush1.msra.mxu1 %v11124_v60  ;;  %v11158_v25 = vld [vmem:[#allocation86_spill] sm:$0xff]  ;;  %v11159_v60 = vld [vmem:[#allocation87_spill] sm:$0xff] }
 0x61e   :  { %4121 = vmatprep.subr.mxu0 %v11125_v27  ;;  %4192 = vmatprep.subr.mxu1 %v11126_v48  ;;  %v11160_v27 = vld [vmem:[#allocation88_spill] sm:$0xff]  ;;  %v11161_v48 = vld [vmem:[#allocation89_spill] sm:$0xff] }
 0x61f   :  { %4122 = vmatpush1.msra.mxu0 %v11127_v3  ;;  %4193 = vmatpush1.msra.mxu1 %v11128_v24  ;;  %v11162_v3 = vld [vmem:[#allocation90_spill] sm:$0xff]  ;;  %v11163_v24 = vld [vmem:[#allocation91_spill] sm:$0xff] }
 0x620   :  { %4123 = vmatprep.subr.mxu0 %v11129_v52  ;;  %4194 = vmatprep.subr.mxu1 %v11130_v45  ;;  %v11164_v52 = vld [vmem:[#allocation92_spill] sm:$0xff]  ;;  %v11165_v45 = vld [vmem:[#allocation93_spill] sm:$0xff] }
 0x621   :  { %4124 = vmatpush1.msra.mxu0 %v11131_v31  ;;  %4195 = vmatpush1.msra.mxu1 %v11132_v30  ;;  %v11166_v31 = vld [vmem:[#allocation94_spill] sm:$0xff]  ;;  %v11167_v30 = vld [vmem:[#allocation95_spill] sm:$0xff] }
 0x622   :  { %4125 = vmatprep.subr.mxu0 %v11133_v33  ;;  %4196 = vmatprep.subr.mxu1 %v11134_v29  ;;  %v11168_v33 = vld [vmem:[#allocation96_spill] sm:$0xff]  ;;  %v11169_v29 = vld [vmem:[#allocation97_spill] sm:$0xff] }
 0x623   :  { %4126 = vmatpush1.msra.mxu0 %v11135_v35  ;;  %4197 = vmatpush1.msra.mxu1 %v11136_v36  ;;  %v11170_v35 = vld [vmem:[#allocation98_spill] sm:$0xff]  ;;  %v11171_v36 = vld [vmem:[#allocation99_spill] sm:$0xff] }
 0x624   :  { %4127 = vmatprep.subr.mxu0 %v11137_v42  ;;  %4198 = vmatprep.subr.mxu1 %v11138_v44  ;;  %v11172_v42 = vld [vmem:[#allocation100_spill] sm:$0xff]  ;;  %v11173_v44 = vld [vmem:[#allocation101_spill] sm:$0xff] }
 0x625   :  { %4128 = vmatpush1.msra.mxu0 %v11139_v37  ;;  %4199 = vmatpush1.msra.mxu1 %v11140_v26  ;;  %v11174_v37 = vld [vmem:[#allocation102_spill] sm:$0xff] }
 0x626   :  { %4129 = vmatprep.subr.mxu0 %v11141_v57  ;;  %4200 = vmatprep.subr.mxu1 %v11142_v2  ;;  %v3727_v57 = vld [vmem:[%s9843_s4] sm:$0xf] }
 0x627   :  { %4130 = vmatpush1.msra.mxu0 %v11143_v61  ;;  %4201 = vmatpush1.msra.mxu1 %v11144_v4  ;;  %v11175_v4 = vld [vmem:[#allocation22_spill] sm:$0xff] }
 0x628   :  { %4131 = vmatprep.subr.mxu0 %v11145_v5  ;;  %4202 = vmatprep.subr.mxu1 %v11146_v6  ;;  %v3732_v5 = vrot.slane %v3727_v57, %v11175_v4 }
 0x629   :  { %4132 = vmatpush1.msra.mxu0 %v11147_v7  ;;  %4203 = vmatpush1.msra.mxu1 %v11148_v54 }
 0x62a   :  { %4133 = vmatprep.subr.mxu0 %v11149_v55  ;;  %4204 = vmatprep.subr.mxu1 %v11150_v10  ;;  %v11176_v55 = vld [vmem:[#allocation23_spill] sm:$0xff] }
 0x62b   :  { %4134 = vmatpush1.msra.mxu0 %v11151_v43  ;;  %4205 = vmatpush1.msra.mxu1 %v11152_v40  ;;  %v3736_v10 = vrot.slane %v3727_v57, %v11176_v55 }
 0x62c   :  { %4135 = vmatprep.subr.mxu0 %v11153_v13  ;;  %4206 = vmatprep.subr.mxu1 %v11154_v0 }
 0x62d   :  { %4136 = vmatpush1.msra.mxu0 %v11155_v46  ;;  %4207 = vmatpush1.msra.mxu1 %v11156_v59 }
 0x62e   :  { %4137 = vmatprep.subr.mxu0 %v11157_v53  ;;  %4208 = vmatprep.subr.mxu1 %v11158_v25 }
 0x62f   :  { %4138 = vmatpush1.msra.mxu0 %v11159_v60  ;;  %4209 = vmatpush1.msra.mxu1 %v11160_v27  ;;  %v3744_v27 = vrot.slane %v3727_v57, %v7359_v63 }
 0x630   :  { %4139 = vmatprep.subr.mxu0 %v11161_v48  ;;  %4210 = vmatprep.subr.mxu1 %v11162_v3 }
 0x631   :  { %4140 = vmatpush1.msra.mxu0 %v11163_v24  ;;  %4211 = vmatpush1.msra.mxu1 %v11164_v52  ;;  %v3740_v24 = vrot.slane %v3727_v57, %v7363_v56 }
 0x632   :  { %4141 = vmatprep.subr.mxu0 %v11165_v45  ;;  %4212 = vmatprep.subr.mxu1 %v11166_v31 }
 0x633   :  { %4142 = vmatpush1.msra.mxu0 %v11167_v30  ;;  %4213 = vmatpush1.msra.mxu1 %v11168_v33 }
 0x634   :  { %4143 = vmatprep.subr.mxu0 %v11169_v29  ;;  %4214 = vmatprep.subr.mxu1 %v11170_v35 }
 0x635   :  { %4144 = vmatpush1.msra.mxu0 %v11171_v36  ;;  %4215 = vmatpush1.msra.mxu1 %v11172_v42 }
 0x636   :  { %4319 = vmatprep.subr.mxu0 %v11173_v44  ;;  %4390 = vmatprep.subr.mxu1 %v11174_v37 }
 0x691   :  { %v3445_v26 = vpop.f32.mrf.mxu0  ;;  %v3516_v2 = vpop.f32.mrf.mxu1 }
 0x693   :  { %v3447_v61 = vpop.f32.mrf.mxu0  ;;  %v3518_v7 = vpop.f32.mrf.mxu1 }
 0x6b2   :  { %v3651_v6 = vpop.f32.mrf.mxu0  ;;  %v3722_v13 = vpop.f32.mrf.mxu1 }
 0x6b3   :  { %v3652_v54 = vadd.f32 %v3651_v6, %v3445_v26  ;;  %v3723_v3 = vadd.f32 %v3722_v13, %v3516_v2  ;;  %v3314_v6 = vld [vmem:[#allocation3 + $0x2] sm:$0x3]  ;;  %v3782_v13 = vld [vmem:[#allocation4 + $0x28] sm:$0xff] }
 0x6b4   :  { %v3653_v43 = vpop.f32.mrf.mxu0  ;;  %v3724_v25 = vpop.f32.mrf.mxu1 }
 0x6b5   :  { %v3749_v40 = vadd.f32 %v3732_v5, %v3652_v54  ;;  %v3654_v0 = vadd.f32 %v3653_v43, %v3447_v61  ;;  %v3725_v60 = vadd.f32 %v3724_v25, %v3518_v7  ;;  %v3751_v31 = vadd.f32 %v3740_v24, %v3723_v3 }
 0x6b7   :  { %v6071_v46 = vmul.f32 -1.442695, %v3749_v40  ;;  %v3750_v59 = vadd.f32 %v3736_v10, %v3654_v0  ;;  %v3752_v48 = vadd.f32 %v3744_v27, %v3725_v60 }
 0x6b9   :  { %6251 = vpow2.f32 %v6071_v46  ;;  %v6072_v53 = vmul.f32 -1.442695, %v3750_v59  ;;  %v6073_v52 = vmul.f32 -1.442695, %v3752_v48 }
 0x6bb   :  { %6253 = vpow2.f32 %v6072_v53 }
 0x6bc   :  { %6255 = vpow2.f32 %v6073_v52 }
 0x6c6   :  { %v6252_v45 = vpop.eup %6251 }
 0x6c7   :  { %v3756_v30 = vadd.f32 1.0, %v6252_v45 }
 0x6c8   :  { %v6254_v33 = vpop.eup %6253 }
 0x6c9   :  { %6257 = vrcp.f32 %v3756_v30  ;;  %v3762_v29 = vadd.f32 1.0, %v6254_v33  ;;  %v6256_v42 = vpop.eup %6255 }
 0x6ca   :  { %6259 = vtanh.f32 %v3751_v31  ;;  %v3769_v7 = vadd.f32 1.0, %v6256_v42  ;;  %v11178_v42 = vld [vmem:[#allocation103_spill] sm:$0xff] }
 0x6cb   :  { %6261 = vrcp.f32 %v3762_v29 }
 0x6cc   :  { %6263 = vrcp.f32 %v3769_v7  ;;  %v11190_v7 = vld [vmem:[#allocation115_spill] sm:$0xff] }
 0x6d4   :  { %v3915_v35 = vpop.f32.mrf.mxu0  ;;  %v3986_v36 = vpop.f32.mrf.mxu1 }
 0x6d6   :  { %v6258_v44 = vpop.eup %6257  ;;  %v3917_v37 = vpop.f32.mrf.mxu0 }
 0x6d7   :  { %v3988_v26 = vpop.f32.mrf.mxu1  ;;  %v6260_v61 = vpop.eup %6259  ;;  %v3995_v2 = vcombine.low %v3915_v35, %v3917_v37  ;;  %v11180_v37 = vld [vmem:[#allocation105_spill] sm:$0xff] }
 0x6d8   :  { %v3996_v5 = vcombine.low %v3986_v36, %v3988_v26  ;;  %v6262_v57 = vpop.eup %6261  ;;  %v3773_v54 = vmul.f32 %v6260_v61, %v6258_v44  ;;  %v11177_v36 = vld [vmem:[#allocation165_spill] sm:$0xff]  ;;  %v11179_v44 = vld [vmem:[#allocation104_spill] sm:$0xff]  ;;  %v11181_v26 = vld [vmem:[#allocation106_spill] sm:$0xff] }
 0x6d9   :  { %v3772_v10 = vmul.f32 %v6262_v57, %v3314_v6  ;;  %v4003_v43 = vrot.slane %v3995_v2, %v7203_v58  ;;  %v6264_v48 = vpop.eup %6263  ;;  %v11187_v2 = vld [vmem:[#allocation112_spill] sm:$0xff]  ;;  %v11189_v6 = vld [vmem:[#allocation114_spill] sm:$0xff] }
 0x6da   :  { %v4010_v40 = vrot.slane %v3996_v5, %v7203_v58  ;;  %v11188_v5 = vld [vmem:[#allocation113_spill] sm:$0xff] }
 0x6db   :  { %v3774_v0 = vadd.f32 %v3773_v54, %v3772_v10 }
 0x6dc   :  { %v4011_v46 = vcombine.low %v4003_v43, %v4010_v40  ;;  %v11191_v43 = vld [vmem:[#allocation116_spill] sm:$0xff]  ;;  %v11192_v40 = vld [vmem:[#allocation117_spill] sm:$0xff] }
 0x6dd   :  { %6265 = vtanh.f32 %v3774_v0  ;;  %3778 = vst [vmem:[#allocation3 + $0x2] sm:$0x3] %v3774_v0  ;;  %v11193_v0 = vld [vmem:[#allocation118_spill] sm:$0xff] }
 0x6de   :  { %v4013_v59 = vadd.f32 %v4011_v46, %v3782_v13  ;;  %v3784_v13 = vld [vmem:[#allocation3] sm:$0x3]  ;;  %v11194_v46 = vld [vmem:[#allocation119_spill] sm:$0xff] }
 0x6e0   :  { %v6074_v53 = vmul.f32 -1.442695, %v4013_v59  ;;  %v4021_v25 = vrot.slane %v4013_v59, 2  ;;  %v4032_v27 = vrot.slane %v4013_v59, 6  ;;  %v4029_v31 = vrot.slane %v4013_v59, 4 }
 0x6e2   :  { %6267 = vpow2.f32 %v6074_v53  ;;  %v6075_v60 = vmul.f32 -1.442695, %v4021_v25  ;;  %v6076_v52 = vmul.f32 -1.442695, %v4032_v27  ;;  %v11196_v27 = vld [vmem:[#allocation121_spill] sm:$0xff] }
 0x6e4   :  { %6269 = vpow2.f32 %v6075_v60  ;;  %v11195_v60 = vld [vmem:[#allocation120_spill] sm:$0xff] }
 0x6e5   :  { %6271 = vpow2.f32 %v6076_v52  ;;  %v11206_v52 = vld [vmem:[#allocation131_spill] sm:$0xff] }
 0x6ea   :  { %v6266_v3 = vpop.eup %6265 }
 0x6eb   :  { %v3776_v24 = vmul.f32 %v6266_v3, %v6264_v48  ;;  %v11197_v48 = vld [vmem:[#allocation122_spill] sm:$0xff]  ;;  %v11202_v3 = vld [vmem:[#allocation127_spill] sm:$0xff] }
 0x6ed   :  { %3780 = vst [vmem:[#allocation13 + $0x8] sm:$0x3] %v3776_v24  ;;  %3777 = vst [vmem:[#allocation2 + $0x2] sm:$0x3] %v3776_v24  ;;  %v11205_v24 = vld [vmem:[#allocation130_spill] sm:$0xff] }
 0x6ef   :  { %v6268_v45 = vpop.eup %6267 }
 0x6f0   :  { %v4017_v30 = vadd.f32 1.0, %v6268_v45  ;;  %v11207_v45 = vld [vmem:[#allocation132_spill] sm:$0xff] }
 0x6f1   :  { %v6270_v33 = vpop.eup %6269 }
 0x6f2   :  { %6273 = vrcp.f32 %v4017_v30  ;;  %v4026_v29 = vadd.f32 1.0, %v6270_v33  ;;  %v11209_v30 = vld [vmem:[#allocation134_spill] sm:$0xff]  ;;  %v11210_v33 = vld [vmem:[#allocation135_spill] sm:$0xff] }
 0x6f3   :  { %6275 = vtanh.f32 %v4029_v31  ;;  %v11208_v31 = vld [vmem:[#allocation133_spill] sm:$0xff] }
 0x6f4   :  { %6277 = vrcp.f32 %v4026_v29  ;;  %v4047_v35 = vld [vmem:[#allocation2 + $0x2] sm:$0x3]  ;;  %v11211_v29 = vld [vmem:[#allocation136_spill] sm:$0xff] }
 0x6f5   :  { %4178 = vmatmul.mubr.f32.vlgmr.msra.gmra.mxu0 %v4047_v35  ;;  %4249 = vmatmul.mubr.f32.vlgmr.msra.gmra.mxu1 %v4047_v35  ;;  %v11212_v35 = vld [vmem:[#allocation137_spill] sm:$0xff] }
 0x6f6   :  { %4320 = vmatpush1.msra.mxu0 %v8625_v1  ;;  %4391 = vmatpush1.msra.mxu1 %v8627_v11  ;;  %v11182_v1 = vld [vmem:[#allocation107_spill] sm:$0xff]  ;;  %v11183_v11 = vld [vmem:[#allocation108_spill] sm:$0xff] }
 0x6f7   :  { %4321 = vmatprep.subr.mxu0 %v8629_v32  ;;  %4392 = vmatprep.subr.mxu1 %v8631_v49  ;;  %v11184_v32 = vld [vmem:[#allocation109_spill] sm:$0xff]  ;;  %v6272_v49 = vpop.eup %6271 }
 0x6f8   :  { %4322 = vmatpush1.msra.mxu0 %v8633_v19  ;;  %4393 = vmatpush1.msra.mxu1 %v8635_v50  ;;  %v11185_v19 = vld [vmem:[#allocation110_spill] sm:$0xff]  ;;  %v11186_v50 = vld [vmem:[#allocation111_spill] sm:$0xff]  ;;  %v4037_v10 = vadd.f32 1.0, %v6272_v49 }
 0x6f9   :  { %4323 = vmatprep.subr.mxu0 %v11177_v36  ;;  %4394 = vmatprep.subr.mxu1 %v11178_v42  ;;  %v11213_v36 = vld [vmem:[#allocation138_spill] sm:$0xff]  ;;  %v11214_v42 = vld [vmem:[#allocation139_spill] sm:$0xff] }
 0x6fa   :  { %4324 = vmatpush1.msra.mxu0 %v11179_v44  ;;  %4395 = vmatpush1.msra.mxu1 %v11180_v37  ;;  %6279 = vrcp.f32 %v4037_v10  ;;  %v11215_v44 = vld [vmem:[#allocation140_spill] sm:$0xff]  ;;  %v11216_v37 = vld [vmem:[#allocation141_spill] sm:$0xff] }
 0x6fb   :  { %4325 = vmatprep.subr.mxu0 %v11181_v26  ;;  %4396 = vmatprep.subr.mxu1 %v11182_v1  ;;  %v11217_v26 = vld [vmem:[#allocation142_spill] sm:$0xff]  ;;  %v9080_v10 = vld [vmem:[#allocation7 + $0x170] sm:$0xff] }
 0x6fc   :  { %4326 = vmatpush1.msra.mxu0 %v11183_v11  ;;  %4397 = vmatpush1.msra.mxu1 %v11184_v32  ;;  %v9028_v49 = vld [vmem:[#allocation7 + $0x1f8] sm:$0xff] }
 0x6fd   :  { %4327 = vmatprep.subr.mxu0 %v11185_v19  ;;  %4398 = vmatprep.subr.mxu1 %v11186_v50  ;;  %v9054_v19 = vld [vmem:[#allocation7 + $0x1a0] sm:$0xff]  ;;  %v9056_v50 = vld [vmem:[#allocation7 + $0x1b0] sm:$0xff] }
 0x6fe   :  { %4328 = vmatpush1.msra.mxu0 %v11187_v2  ;;  %4399 = vmatpush1.msra.mxu1 %v11188_v5  ;;  %v9062_v2 = vld [vmem:[#allocation7 + $0x198] sm:$0xff]  ;;  %v9066_v5 = vld [vmem:[#allocation7 + $0x180] sm:$0xff] }
 0x6ff   :  { %v6274_v61 = vpop.eup %6273  ;;  %4329 = vmatprep.subr.mxu0 %v11189_v6  ;;  %4400 = vmatprep.subr.mxu1 %v11190_v7  ;;  %v9072_v6 = vld [vmem:[#allocation7 + $0x168] sm:$0xff]  ;;  %v9074_v7 = vld [vmem:[#allocation7 + $0x178] sm:$0xff] }
 0x700   :  { %v6276_v57 = vpop.eup %6275  ;;  %4330 = vmatpush1.msra.mxu0 %v11191_v43  ;;  %4401 = vmatpush1.msra.mxu1 %v11192_v40  ;;  %v9084_v43 = vld [vmem:[#allocation7 + $0x148] sm:$0xff]  ;;  %v9086_v40 = vld [vmem:[#allocation7 + $0x158] sm:$0xff] }
 0x701   :  { %v6278_v54 = vpop.eup %6277  ;;  %4331 = vmatprep.subr.mxu0 %v11193_v0  ;;  %4402 = vmatprep.subr.mxu1 %v11194_v46  ;;  %v4041_v53 = vmul.f32 %v6276_v57, %v6274_v61  ;;  %v9060_v61 = vld [vmem:[#allocation7 + $0x188] sm:$0xff]  ;;  %v9068_v57 = vld [vmem:[#allocation7 + $0x190] sm:$0xff] }
 0x702   :  { %v4040_v59 = vmul.f32 %v6278_v54, %v3784_v13  ;;  %4332 = vmatpush1.msra.mxu0 %v8693_v23  ;;  %4403 = vmatpush1.msra.mxu1 %v8695_v28  ;;  %v11198_v23 = vld [vmem:[#allocation123_spill] sm:$0xff]  ;;  %v11199_v28 = vld [vmem:[#allocation124_spill] sm:$0xff] }
 0x703   :  { %4333 = vmatprep.subr.mxu0 %v8699_v14  ;;  %4404 = vmatprep.subr.mxu1 %v8701_v15  ;;  %v11200_v14 = vld [vmem:[#allocation125_spill] sm:$0xff]  ;;  %v11201_v15 = vld [vmem:[#allocation126_spill] sm:$0xff]  ;;  %v9096_v46 = vld [vmem:[#allocation7 + $0x128] sm:$0xff] }
 0x704   :  { %v4042_v25 = vadd.f32 %v4041_v53, %v4040_v59  ;;  %4334 = vmatpush1.msra.mxu0 %v8705_v47  ;;  %4405 = vmatpush1.msra.mxu1 %v8707_v20  ;;  %v11203_v47 = vld [vmem:[#allocation128_spill] sm:$0xff]  ;;  %v11204_v20 = vld [vmem:[#allocation129_spill] sm:$0xff]  ;;  %v9078_v54 = vld [vmem:[#allocation7 + $0x160] sm:$0xff] }
 0x705   :  { %4335 = vmatprep.subr.mxu0 %v11195_v60  ;;  %4406 = vmatprep.subr.mxu1 %v11196_v27  ;;  %v9090_v13 = vld [vmem:[#allocation7 + $0x140] sm:$0xff]  ;;  %v9092_v0 = vld [vmem:[#allocation7 + $0x150] sm:$0xff]  ;;  %v9098_v59 = vld [vmem:[#allocation7 + $0x138] sm:$0xff] }
 0x706   :  { %6281 = vtanh.f32 %v4042_v25  ;;  %4046 = vst [vmem:[#allocation3] sm:$0x3] %v4042_v25  ;;  %4336 = vmatpush1.msra.mxu0 %v11197_v48  ;;  %4407 = vmatpush1.msra.mxu1 %v11198_v23  ;;  %v9102_v53 = vld [vmem:[#allocation7 + $0x120] sm:$0xff]  ;;  %v9104_v25 = vld [vmem:[#allocation7 + $0x130] sm:$0xff]  ;;  %v9108_v60 = vld [vmem:[#allocation7 + $0x108] sm:$0xff] }
 0x707   :  { %4337 = vmatprep.subr.mxu0 %v11199_v28  ;;  %4408 = vmatprep.subr.mxu1 %v11200_v14  ;;  %v6280_v1 = vpop.eup %6279  ;;  %v9110_v27 = vld [vmem:[#allocation7 + $0x118] sm:$0xff]  ;;  %v9114_v48 = vld [vmem:[#allocation7 + $0x100] sm:$0xff]  ;;  %v9116_v23 = vld [vmem:[#allocation7 + $0x110] sm:$0xff] }
 0x708   :  { %4338 = vmatpush1.msra.mxu0 %v11201_v15  ;;  %4409 = vmatpush1.msra.mxu1 %v11202_v3  ;;  %v9120_v28 = vld [vmem:[#allocation7 + $0xe8] sm:$0xff]  ;;  %v9122_v14 = vld [vmem:[#allocation7 + $0xf8] sm:$0xff]  ;;  %v9126_v15 = vld [vmem:[#allocation7 + $0xe0] sm:$0xff] }
 0x709   :  { %4339 = vmatprep.subr.mxu0 %v11203_v47  ;;  %4410 = vmatprep.subr.mxu1 %v11204_v20  ;;  %v9128_v3 = vld [vmem:[#allocation7 + $0xf0] sm:$0xff]  ;;  %v9132_v47 = vld [vmem:[#allocation7 + $0xc8] sm:$0xff]  ;;  %v9134_v20 = vld [vmem:[#allocation7 + $0xd8] sm:$0xff] }
 0x70a   :  { %4340 = vmatpush1.msra.mxu0 %v11205_v24  ;;  %4411 = vmatpush1.msra.mxu1 %v11206_v52  ;;  %11218 = vst [vmem:[#allocation143_spill] sm:$0xff] %v9132_v47  ;;  %11219 = vst [vmem:[#allocation144_spill] sm:$0xff] %v9134_v20  ;;  %v9138_v24 = vld [vmem:[#allocation7 + $0xc0] sm:$0xff]  ;;  %v9140_v52 = vld [vmem:[#allocation7 + $0xd0] sm:$0xff] }
 0x70b   :  { %4341 = vmatprep.subr.mxu0 %v11207_v45  ;;  %4412 = vmatprep.subr.mxu1 %v11208_v31  ;;  %11220 = vst [vmem:[#allocation145_spill] sm:$0xff] %v9138_v24  ;;  %11221 = vst [vmem:[#allocation146_spill] sm:$0xff] %v9140_v52  ;;  %v9144_v45 = vld [vmem:[#allocation7 + $0xa8] sm:$0xff]  ;;  %v9146_v31 = vld [vmem:[#allocation7 + $0xb8] sm:$0xff] }
 0x70c   :  { %4342 = vmatpush1.msra.mxu0 %v11209_v30  ;;  %4413 = vmatpush1.msra.mxu1 %v11210_v33  ;;  %11222 = vst [vmem:[#allocation147_spill] sm:$0xff] %v9144_v45  ;;  %11223 = vst [vmem:[#allocation148_spill] sm:$0xff] %v9146_v31  ;;  %v9150_v30 = vld [vmem:[#allocation7 + $0xa0] sm:$0xff]  ;;  %v9152_v33 = vld [vmem:[#allocation7 + $0xb0] sm:$0xff] }
 0x70d   :  { %4343 = vmatprep.subr.mxu0 %v11211_v29  ;;  %4414 = vmatprep.subr.mxu1 %v11212_v35  ;;  %11224 = vst [vmem:[#allocation149_spill] sm:$0xff] %v9150_v30  ;;  %11225 = vst [vmem:[#allocation150_spill] sm:$0xff] %v9152_v33  ;;  %v9156_v29 = vld [vmem:[#allocation7 + $0x88] sm:$0xff]  ;;  %v9158_v35 = vld [vmem:[#allocation7 + $0x98] sm:$0xff] }
 0x70e   :  { %4344 = vmatpush1.msra.mxu0 %v11213_v36  ;;  %4415 = vmatpush1.msra.mxu1 %v11214_v42  ;;  %11226 = vst [vmem:[#allocation151_spill] sm:$0xff] %v9156_v29  ;;  %11227 = vst [vmem:[#allocation152_spill] sm:$0xff] %v9158_v35  ;;  %v9162_v36 = vld [vmem:[#allocation7 + $0x80] sm:$0xff]  ;;  %v9164_v42 = vld [vmem:[#allocation7 + $0x90] sm:$0xff] }
 0x70f   :  { %4345 = vmatprep.subr.mxu0 %v11215_v44  ;;  %4416 = vmatprep.subr.mxu1 %v11216_v37  ;;  %11228 = vst [vmem:[#allocation153_spill] sm:$0xff] %v9162_v36  ;;  %11229 = vst [vmem:[#allocation154_spill] sm:$0xff] %v9164_v42  ;;  %v9168_v44 = vld [vmem:[#allocation7 + $0x68] sm:$0xff]  ;;  %v9170_v37 = vld [vmem:[#allocation7 + $0x78] sm:$0xff] }
 0x710   :  { %4346 = vmatpush1.msra.mxu0 %v8777_v16  ;;  %4417 = vmatpush1.msra.mxu1 %v11217_v26  ;;  %v9026_v16 = vld [vmem:[#allocation7 + $0x1e8] sm:$0xff]  ;;  %11230 = vst [vmem:[#allocation155_spill] sm:$0xff] %v9168_v44  ;;  %11231 = vst [vmem:[#allocation156_spill] sm:$0xff] %v9170_v37  ;;  %v9174_v26 = vld [vmem:[#allocation7 + $0x60] sm:$0xff] }
 0x711   :  { %4347 = vmatprep.subr.mxu0 %v8783_v18  ;;  %4418 = vmatprep.subr.mxu1 %v8785_v17  ;;  %v9032_v18 = vld [vmem:[#allocation7 + $0x1e0] sm:$0xff]  ;;  %v9034_v17 = vld [vmem:[#allocation7 + $0x1f0] sm:$0xff]  ;;  %11232 = vst [vmem:[#allocation157_spill] sm:$0xff] %v9174_v26 }
 0x712   :  { %4348 = vmatpush1.msra.mxu0 %v8789_v39  ;;  %4419 = vmatpush1.msra.mxu1 %v8791_v22  ;;  %v9036_v39 = vld [vmem:[#allocation7 + $0x1c8] sm:$0xff]  ;;  %v9038_v22 = vld [vmem:[#allocation7 + $0x1d8] sm:$0xff] }
 0x713   :  { %v6282_v11 = vpop.eup %6281  ;;  %4349 = vmatprep.subr.mxu0 %v8795_v41  ;;  %4420 = vmatprep.subr.mxu1 %v8797_v34  ;;  %v9042_v41 = vld [vmem:[#allocation7 + $0x1c0] sm:$0xff]  ;;  %v9048_v34 = vld [vmem:[#allocation7 + $0x1a8] sm:$0xff] }
 0x714   :  { %v4044_v32 = vmul.f32 %v6282_v11, %v6280_v1  ;;  %4350 = vmatpush1.msra.mxu0 %v8801_v38  ;;  %4383 = vmatprep.mubr.f32.mxu0 %v10561_v21  ;;  %v9050_v38 = vld [vmem:[#allocation7 + $0x1b8] sm:$0xff]  ;;  %v9176_v1 = vld [vmem:[#allocation7 + $0x70] sm:$0xff]  ;;  %v9180_v11 = vld [vmem:[#allocation7 + $0x48] sm:$0xff] }
 0x715   :  { %4421 = vmatpush1.msra.mxu1 %v8805_v12  ;;  %4454 = vmatprep.mubr.f32.mxu1 %v10561_v21  ;;  %v9044_v12 = vld [vmem:[#allocation7 + $0x1d0] sm:$0xff]  ;;  %11233 = vst [vmem:[#allocation158_spill] sm:$0xff] %v9176_v1  ;;  %11234 = vst [vmem:[#allocation159_spill] sm:$0xff] %v9180_v11 }
 0x716   :  { %4045 = vst [vmem:[#allocation2] sm:$0x3] %v4044_v32  ;;  %4384 = vmatmul.mubr.f32.vlgmr.msra.gmra.mxu0 %v4044_v32  ;;  %4455 = vmatmul.mubr.f32.vlgmr.msra.gmra.mxu1 %v4044_v32  ;;  %v9182_v32 = vld [vmem:[#allocation7 + $0x58] sm:$0xff] }
 0x717   :  { %4583 = vmatprep.subr.mxu0 %v9026_v16  ;;  %4654 = vmatprep.subr.mxu1 %v9028_v49  ;;  %11235 = vst [vmem:[#allocation160_spill] sm:$0xff] %v9182_v32 }
 0x718   :  { %4584 = vmatpush1.msra.mxu0 %v9032_v18  ;;  %4655 = vmatpush1.msra.mxu1 %v9034_v17 }
 0x719   :  { %4585 = vmatprep.subr.mxu0 %v9036_v39  ;;  %4656 = vmatprep.subr.mxu1 %v9038_v22 }
 0x71a   :  { %4586 = vmatpush1.msra.mxu0 %v9042_v41  ;;  %4657 = vmatpush1.msra.mxu1 %v9044_v12 }
 0x71b   :  { %4587 = vmatprep.subr.mxu0 %v9048_v34  ;;  %4658 = vmatprep.subr.mxu1 %v9050_v38 }
 0x71c   :  { %4588 = vmatpush1.msra.mxu0 %v9054_v19  ;;  %4659 = vmatpush1.msra.mxu1 %v9056_v50 }
 0x71d   :  { %4589 = vmatprep.subr.mxu0 %v9060_v61  ;;  %4660 = vmatprep.subr.mxu1 %v9062_v2 }
 0x71e   :  { %4590 = vmatpush1.msra.mxu0 %v9066_v5  ;;  %4661 = vmatpush1.msra.mxu1 %v9068_v57 }
 0x71f   :  { %4591 = vmatprep.subr.mxu0 %v9072_v6  ;;  %4662 = vmatprep.subr.mxu1 %v9074_v7 }
 0x720   :  { %4592 = vmatpush1.msra.mxu0 %v9078_v54  ;;  %4663 = vmatpush1.msra.mxu1 %v9080_v10 }
 0x721   :  { %4593 = vmatprep.subr.mxu0 %v9084_v43  ;;  %4664 = vmatprep.subr.mxu1 %v9086_v40 }
 0x722   :  { %4594 = vmatpush1.msra.mxu0 %v9090_v13  ;;  %4665 = vmatpush1.msra.mxu1 %v9092_v0 }
 0x723   :  { %4595 = vmatprep.subr.mxu0 %v9096_v46  ;;  %4666 = vmatprep.subr.mxu1 %v9098_v59 }
 0x724   :  { %4596 = vmatpush1.msra.mxu0 %v9102_v53  ;;  %4667 = vmatpush1.msra.mxu1 %v9104_v25 }
 0x725   :  { %4597 = vmatprep.subr.mxu0 %v9108_v60  ;;  %4668 = vmatprep.subr.mxu1 %v9110_v27 }
 0x726   :  { %4598 = vmatpush1.msra.mxu0 %v9114_v48  ;;  %4669 = vmatpush1.msra.mxu1 %v9116_v23 }
 0x727   :  { %4599 = vmatprep.subr.mxu0 %v9120_v28  ;;  %4670 = vmatprep.subr.mxu1 %v9122_v14 }
 0x728   :  { %4600 = vmatpush1.msra.mxu0 %v9126_v15  ;;  %4671 = vmatpush1.msra.mxu1 %v9128_v3 }
 0x729   :  { %4601 = vmatprep.subr.mxu0 %v9132_v47  ;;  %4672 = vmatprep.subr.mxu1 %v9134_v20 }
 0x72a   :  { %4602 = vmatpush1.msra.mxu0 %v9138_v24  ;;  %4673 = vmatpush1.msra.mxu1 %v9140_v52 }
 0x72b   :  { %4603 = vmatprep.subr.mxu0 %v9144_v45  ;;  %4674 = vmatprep.subr.mxu1 %v9146_v31 }
 0x72c   :  { %4604 = vmatpush1.msra.mxu0 %v9150_v30  ;;  %4675 = vmatpush1.msra.mxu1 %v9152_v33  ;;  %v9186_v33 = vld [vmem:[#allocation7 + $0x40] sm:$0xff] }
 0x72d   :  { %4605 = vmatprep.subr.mxu0 %v9156_v29  ;;  %4676 = vmatprep.subr.mxu1 %v9158_v35  ;;  %11236 = vst [vmem:[#allocation161_spill] sm:$0xff] %v9186_v33  ;;  %v9188_v29 = vld [vmem:[#allocation7 + $0x50] sm:$0xff]  ;;  %v9192_v35 = vld [vmem:[#allocation7 + $0x28] sm:$0xff] }
 0x72e   :  { %4606 = vmatpush1.msra.mxu0 %v9162_v36  ;;  %4677 = vmatpush1.msra.mxu1 %v9164_v42  ;;  %11237 = vst [vmem:[#allocation162_spill] sm:$0xff] %v9188_v29  ;;  %11238 = vst [vmem:[#allocation163_spill] sm:$0xff] %v9192_v35  ;;  %v9194_v36 = vld [vmem:[#allocation7 + $0x38] sm:$0xff]  ;;  %v9198_v42 = vld [vmem:[#allocation7 + $0x20] sm:$0xff] }
 0x72f   :  { %4607 = vmatprep.subr.mxu0 %v9168_v44  ;;  %4678 = vmatprep.subr.mxu1 %v9170_v37  ;;  %11239 = vst [vmem:[#allocation164_spill] sm:$0xff] %v9194_v36  ;;  %11240 = vst [vmem:[#allocation24_spill] sm:$0xff] %v9198_v42  ;;  %v9200_v44 = vld [vmem:[#allocation7 + $0x30] sm:$0xff]  ;;  %v9204_v37 = vld [vmem:[#allocation7 + $0x8] sm:$0xff] }
 0x730   :  { %4608 = vmatpush1.msra.mxu0 %v9174_v26  ;;  %4679 = vmatpush1.msra.mxu1 %v9176_v1  ;;  %11241 = vst [vmem:[#allocation25_spill] sm:$0xff] %v9200_v44  ;;  %11242 = vst [vmem:[#allocation26_spill] sm:$0xff] %v9204_v37  ;;  %v9206_v26 = vld [vmem:[#allocation7 + $0x18] sm:$0xff]  ;;  %v9210_v1 = vld [vmem:[#allocation7] sm:$0xff] }
 0x731   :  { %4609 = vmatprep.subr.mxu0 %v9180_v11  ;;  %4680 = vmatprep.subr.mxu1 %v9182_v32  ;;  %11243 = vst [vmem:[#allocation27_spill] sm:$0xff] %v9206_v26  ;;  %11244 = vst [vmem:[#allocation28_spill] sm:$0xff] %v9210_v1  ;;  %v9214_v32 = vld [vmem:[#allocation7 + $0x10] sm:$0xff] }
 0x732   :  { %4610 = vmatpush1.msra.mxu0 %v9186_v33  ;;  %4681 = vmatpush1.msra.mxu1 %v9188_v29  ;;  %11245 = vst [vmem:[#allocation29_spill] sm:$0xff] %v9214_v32 }
 0x733   :  { %4611 = vmatprep.subr.mxu0 %v9192_v35  ;;  %4682 = vmatprep.subr.mxu1 %v9194_v36  ;;  %v4517_v36 = vld [vmem:[#allocation2] sm:$0x3] }
 0x734   :  { %4612 = vmatpush1.msra.mxu0 %v9198_v42  ;;  %4683 = vmatpush1.msra.mxu1 %v9200_v44 }
 0x735   :  { %4613 = vmatprep.subr.mxu0 %v9204_v37  ;;  %4684 = vmatprep.subr.mxu1 %v9206_v26  ;;  %v9408_v26 = vld [vmem:[#allocation10 + $0x1f8] sm:$0xff] }
 0x736   :  { %4614 = vmatpush1.msra.mxu0 %v9210_v1  ;;  %4647 = vmatprep.mubr.f32.mxu0 %v10561_v21  ;;  %v9228_v1 = vld [vmem:[#allocation9 + $0x1c8] sm:$0xff]  ;;  %11307 = vst [vmem:[#allocation91_spill] sm:$0xff] %v9408_v26 }
 0x737   :  { %4685 = vmatpush1.msra.mxu1 %v9214_v32  ;;  %4718 = vmatprep.mubr.f32.mxu1 %v10561_v21  ;;  %11246 = vst [vmem:[#allocation30_spill] sm:$0xff] %v9228_v1  ;;  %v9230_v32 = vld [vmem:[#allocation9 + $0x1d8] sm:$0xff] }
 0x738   :  { %4648 = vmatmul.mubr.f32.vlgmr.msra.gmra.mxu0 %v4517_v36  ;;  %4719 = vmatmul.mubr.f32.vlgmr.msra.gmra.mxu1 %v4517_v36  ;;  %11247 = vst [vmem:[#allocation31_spill] sm:$0xff] %v9230_v32  ;;  %v9234_v36 = vld [vmem:[#allocation9 + $0x1c0] sm:$0xff] }
 0x739   :  { %4847 = vmatprep.subr.mxu0 %v8881_v8  ;;  %4918 = vmatprep.subr.mxu1 %v8883_v9  ;;  %11248 = vst [vmem:[#allocation32_spill] sm:$0xff] %v9234_v36  ;;  %v9236_v8 = vld [vmem:[#allocation9 + $0x1d0] sm:$0xff]  ;;  %v9240_v9 = vld [vmem:[#allocation9 + $0x1a8] sm:$0xff] }
 0x73a   :  { %4848 = vmatpush1.msra.mxu0 %v8887_v51  ;;  %4919 = vmatpush1.msra.mxu1 %v8889_v62  ;;  %11249 = vst [vmem:[#allocation33_spill] sm:$0xff] %v9236_v8  ;;  %11250 = vst [vmem:[#allocation34_spill] sm:$0xff] %v9240_v9  ;;  %v9242_v51 = vld [vmem:[#allocation9 + $0x1b8] sm:$0xff]  ;;  %v9246_v62 = vld [vmem:[#allocation9 + $0x1a0] sm:$0xff] }
 0x73b   :  { %4911 = vmatprep.mubr.f32.mxu0 %v10561_v21  ;;  %4982 = vmatprep.mubr.f32.mxu1 %v10561_v21  ;;  %11251 = vst [vmem:[#allocation35_spill] sm:$0xff] %v9242_v51  ;;  %11252 = vst [vmem:[#allocation36_spill] sm:$0xff] %v9246_v62 }
 0x73c   :  { %4849 = vmatprep.subr.mxu0 %v9228_v1  ;;  %4920 = vmatprep.subr.mxu1 %v9230_v32  ;;  %v9248_v1 = vld [vmem:[#allocation9 + $0x1b0] sm:$0xff]  ;;  %v9252_v32 = vld [vmem:[#allocation9 + $0x188] sm:$0xff] }
 0x73d   :  { %4850 = vmatpush1.msra.mxu0 %v9234_v36  ;;  %4921 = vmatpush1.msra.mxu1 %v9236_v8  ;;  %11253 = vst [vmem:[#allocation37_spill] sm:$0xff] %v9248_v1  ;;  %11254 = vst [vmem:[#allocation38_spill] sm:$0xff] %v9252_v32  ;;  %v9254_v36 = vld [vmem:[#allocation9 + $0x198] sm:$0xff]  ;;  %v9258_v8 = vld [vmem:[#allocation9 + $0x180] sm:$0xff] }
 0x73e   :  { %4851 = vmatprep.subr.mxu0 %v9240_v9  ;;  %4922 = vmatprep.subr.mxu1 %v9242_v51  ;;  %11255 = vst [vmem:[#allocation39_spill] sm:$0xff] %v9254_v36  ;;  %11256 = vst [vmem:[#allocation40_spill] sm:$0xff] %v9258_v8  ;;  %v9260_v9 = vld [vmem:[#allocation9 + $0x190] sm:$0xff]  ;;  %v9264_v51 = vld [vmem:[#allocation9 + $0x168] sm:$0xff] }
 0x73f   :  { %4852 = vmatpush1.msra.mxu0 %v9246_v62  ;;  %4923 = vmatpush1.msra.mxu1 %v9248_v1  ;;  %11257 = vst [vmem:[#allocation41_spill] sm:$0xff] %v9260_v9  ;;  %11258 = vst [vmem:[#allocation42_spill] sm:$0xff] %v9264_v51  ;;  %v9266_v62 = vld [vmem:[#allocation9 + $0x178] sm:$0xff]  ;;  %v9270_v1 = vld [vmem:[#allocation9 + $0x160] sm:$0xff] }
 0x740   :  { %4853 = vmatprep.subr.mxu0 %v9252_v32  ;;  %4924 = vmatprep.subr.mxu1 %v9254_v36  ;;  %11259 = vst [vmem:[#allocation43_spill] sm:$0xff] %v9266_v62  ;;  %11260 = vst [vmem:[#allocation44_spill] sm:$0xff] %v9270_v1  ;;  %v9272_v32 = vld [vmem:[#allocation9 + $0x170] sm:$0xff]  ;;  %v9276_v36 = vld [vmem:[#allocation9 + $0x148] sm:$0xff] }
 0x741   :  { %4854 = vmatpush1.msra.mxu0 %v9258_v8  ;;  %4925 = vmatpush1.msra.mxu1 %v9260_v9  ;;  %11261 = vst [vmem:[#allocation45_spill] sm:$0xff] %v9272_v32  ;;  %11262 = vst [vmem:[#allocation46_spill] sm:$0xff] %v9276_v36  ;;  %v9278_v8 = vld [vmem:[#allocation9 + $0x158] sm:$0xff]  ;;  %v9282_v9 = vld [vmem:[#allocation9 + $0x140] sm:$0xff] }
 0x742   :  { %4855 = vmatprep.subr.mxu0 %v9264_v51  ;;  %4926 = vmatprep.subr.mxu1 %v9266_v62  ;;  %11263 = vst [vmem:[#allocation47_spill] sm:$0xff] %v9278_v8  ;;  %11264 = vst [vmem:[#allocation48_spill] sm:$0xff] %v9282_v9  ;;  %v9284_v51 = vld [vmem:[#allocation9 + $0x150] sm:$0xff]  ;;  %v9288_v62 = vld [vmem:[#allocation9 + $0x128] sm:$0xff] }
 0x743   :  { %4856 = vmatpush1.msra.mxu0 %v9270_v1  ;;  %4927 = vmatpush1.msra.mxu1 %v9272_v32  ;;  %11265 = vst [vmem:[#allocation49_spill] sm:$0xff] %v9284_v51  ;;  %11266 = vst [vmem:[#allocation50_spill] sm:$0xff] %v9288_v62  ;;  %v9290_v1 = vld [vmem:[#allocation9 + $0x138] sm:$0xff]  ;;  %v9294_v32 = vld [vmem:[#allocation9 + $0x120] sm:$0xff] }
 0x744   :  { %4857 = vmatprep.subr.mxu0 %v9276_v36  ;;  %4928 = vmatprep.subr.mxu1 %v9278_v8  ;;  %11267 = vst [vmem:[#allocation51_spill] sm:$0xff] %v9290_v1  ;;  %11268 = vst [vmem:[#allocation52_spill] sm:$0xff] %v9294_v32  ;;  %v9296_v36 = vld [vmem:[#allocation9 + $0x130] sm:$0xff]  ;;  %v9300_v8 = vld [vmem:[#allocation9 + $0x108] sm:$0xff] }
 0x745   :  { %4858 = vmatpush1.msra.mxu0 %v9282_v9  ;;  %4929 = vmatpush1.msra.mxu1 %v9284_v51  ;;  %11269 = vst [vmem:[#allocation53_spill] sm:$0xff] %v9296_v36  ;;  %11270 = vst [vmem:[#allocation54_spill] sm:$0xff] %v9300_v8  ;;  %v9302_v9 = vld [vmem:[#allocation9 + $0x118] sm:$0xff]  ;;  %v9306_v51 = vld [vmem:[#allocation9 + $0x100] sm:$0xff] }
 0x746   :  { %4859 = vmatprep.subr.mxu0 %v9288_v62  ;;  %4930 = vmatprep.subr.mxu1 %v9290_v1  ;;  %11271 = vst [vmem:[#allocation55_spill] sm:$0xff] %v9302_v9  ;;  %11272 = vst [vmem:[#allocation56_spill] sm:$0xff] %v9306_v51  ;;  %v9308_v62 = vld [vmem:[#allocation9 + $0x110] sm:$0xff]  ;;  %v9312_v1 = vld [vmem:[#allocation9 + $0xe8] sm:$0xff] }
 0x747   :  { %4860 = vmatpush1.msra.mxu0 %v9294_v32  ;;  %4931 = vmatpush1.msra.mxu1 %v9296_v36  ;;  %11273 = vst [vmem:[#allocation57_spill] sm:$0xff] %v9308_v62  ;;  %11274 = vst [vmem:[#allocation58_spill] sm:$0xff] %v9312_v1  ;;  %v9314_v32 = vld [vmem:[#allocation9 + $0xf8] sm:$0xff]  ;;  %v9318_v36 = vld [vmem:[#allocation9 + $0xe0] sm:$0xff] }
 0x748   :  { %4861 = vmatprep.subr.mxu0 %v9300_v8  ;;  %4932 = vmatprep.subr.mxu1 %v9302_v9  ;;  %11275 = vst [vmem:[#allocation59_spill] sm:$0xff] %v9314_v32  ;;  %11276 = vst [vmem:[#allocation60_spill] sm:$0xff] %v9318_v36  ;;  %v9320_v8 = vld [vmem:[#allocation9 + $0xf0] sm:$0xff]  ;;  %v9324_v9 = vld [vmem:[#allocation9 + $0xc8] sm:$0xff] }
 0x749   :  { %4862 = vmatpush1.msra.mxu0 %v9306_v51  ;;  %4933 = vmatpush1.msra.mxu1 %v9308_v62  ;;  %11277 = vst [vmem:[#allocation61_spill] sm:$0xff] %v9320_v8  ;;  %11278 = vst [vmem:[#allocation62_spill] sm:$0xff] %v9324_v9  ;;  %v9326_v51 = vld [vmem:[#allocation9 + $0xd8] sm:$0xff]  ;;  %v9330_v62 = vld [vmem:[#allocation9 + $0xc0] sm:$0xff] }
 0x74a   :  { %4863 = vmatprep.subr.mxu0 %v9312_v1  ;;  %4934 = vmatprep.subr.mxu1 %v9314_v32  ;;  %11279 = vst [vmem:[#allocation63_spill] sm:$0xff] %v9326_v51  ;;  %11280 = vst [vmem:[#allocation64_spill] sm:$0xff] %v9330_v62  ;;  %v9332_v1 = vld [vmem:[#allocation9 + $0xd0] sm:$0xff]  ;;  %v9336_v32 = vld [vmem:[#allocation9 + $0xa8] sm:$0xff] }
 0x74b   :  { %4864 = vmatpush1.msra.mxu0 %v9318_v36  ;;  %4935 = vmatpush1.msra.mxu1 %v9320_v8  ;;  %11281 = vst [vmem:[#allocation65_spill] sm:$0xff] %v9332_v1  ;;  %11282 = vst [vmem:[#allocation66_spill] sm:$0xff] %v9336_v32  ;;  %v9338_v36 = vld [vmem:[#allocation9 + $0xb8] sm:$0xff]  ;;  %v9342_v8 = vld [vmem:[#allocation9 + $0xa0] sm:$0xff] }
 0x74c   :  { %4865 = vmatprep.subr.mxu0 %v9324_v9  ;;  %4936 = vmatprep.subr.mxu1 %v9326_v51  ;;  %11283 = vst [vmem:[#allocation67_spill] sm:$0xff] %v9338_v36  ;;  %11284 = vst [vmem:[#allocation68_spill] sm:$0xff] %v9342_v8  ;;  %v9344_v9 = vld [vmem:[#allocation9 + $0xb0] sm:$0xff]  ;;  %v9348_v51 = vld [vmem:[#allocation9 + $0x88] sm:$0xff] }
 0x74d   :  { %4866 = vmatpush1.msra.mxu0 %v9330_v62  ;;  %4937 = vmatpush1.msra.mxu1 %v9332_v1  ;;  %11285 = vst [vmem:[#allocation69_spill] sm:$0xff] %v9344_v9  ;;  %11286 = vst [vmem:[#allocation70_spill] sm:$0xff] %v9348_v51  ;;  %v9350_v62 = vld [vmem:[#allocation9 + $0x98] sm:$0xff]  ;;  %v9354_v1 = vld [vmem:[#allocation9 + $0x80] sm:$0xff] }
 0x74e   :  { %4867 = vmatprep.subr.mxu0 %v9336_v32  ;;  %4938 = vmatprep.subr.mxu1 %v9338_v36  ;;  %11287 = vst [vmem:[#allocation71_spill] sm:$0xff] %v9350_v62  ;;  %11288 = vst [vmem:[#allocation72_spill] sm:$0xff] %v9354_v1  ;;  %v9356_v32 = vld [vmem:[#allocation9 + $0x90] sm:$0xff]  ;;  %v9360_v36 = vld [vmem:[#allocation9 + $0x68] sm:$0xff] }
 0x74f   :  { %4868 = vmatpush1.msra.mxu0 %v9342_v8  ;;  %4939 = vmatpush1.msra.mxu1 %v9344_v9  ;;  %11289 = vst [vmem:[#allocation73_spill] sm:$0xff] %v9356_v32  ;;  %11290 = vst [vmem:[#allocation74_spill] sm:$0xff] %v9360_v36  ;;  %v9362_v8 = vld [vmem:[#allocation9 + $0x78] sm:$0xff]  ;;  %v9366_v9 = vld [vmem:[#allocation9 + $0x60] sm:$0xff] }
 0x750   :  { %4869 = vmatprep.subr.mxu0 %v9348_v51  ;;  %4940 = vmatprep.subr.mxu1 %v9350_v62  ;;  %11291 = vst [vmem:[#allocation75_spill] sm:$0xff] %v9362_v8  ;;  %11292 = vst [vmem:[#allocation76_spill] sm:$0xff] %v9366_v9  ;;  %v9368_v51 = vld [vmem:[#allocation9 + $0x70] sm:$0xff]  ;;  %v9372_v62 = vld [vmem:[#allocation9 + $0x48] sm:$0xff] }
 0x751   :  { %4870 = vmatpush1.msra.mxu0 %v9354_v1  ;;  %4941 = vmatpush1.msra.mxu1 %v9356_v32  ;;  %11293 = vst [vmem:[#allocation77_spill] sm:$0xff] %v9368_v51  ;;  %11294 = vst [vmem:[#allocation78_spill] sm:$0xff] %v9372_v62  ;;  %v9374_v1 = vld [vmem:[#allocation9 + $0x58] sm:$0xff]  ;;  %v9378_v32 = vld [vmem:[#allocation9 + $0x40] sm:$0xff] }
 0x752   :  { %4871 = vmatprep.subr.mxu0 %v9360_v36  ;;  %4942 = vmatprep.subr.mxu1 %v9362_v8  ;;  %11295 = vst [vmem:[#allocation79_spill] sm:$0xff] %v9374_v1  ;;  %11296 = vst [vmem:[#allocation80_spill] sm:$0xff] %v9378_v32  ;;  %v9380_v36 = vld [vmem:[#allocation9 + $0x50] sm:$0xff]  ;;  %v9384_v8 = vld [vmem:[#allocation9 + $0x28] sm:$0xff] }
 0x753   :  { %4872 = vmatpush1.msra.mxu0 %v9366_v9  ;;  %4943 = vmatpush1.msra.mxu1 %v9368_v51  ;;  %11297 = vst [vmem:[#allocation81_spill] sm:$0xff] %v9380_v36  ;;  %11298 = vst [vmem:[#allocation82_spill] sm:$0xff] %v9384_v8  ;;  %v9386_v9 = vld [vmem:[#allocation9 + $0x38] sm:$0xff]  ;;  %v9390_v51 = vld [vmem:[#allocation9 + $0x20] sm:$0xff] }
 0x754   :  { %4873 = vmatprep.subr.mxu0 %v9372_v62  ;;  %4944 = vmatprep.subr.mxu1 %v9374_v1  ;;  %11299 = vst [vmem:[#allocation83_spill] sm:$0xff] %v9386_v9  ;;  %11300 = vst [vmem:[#allocation84_spill] sm:$0xff] %v9390_v51  ;;  %v9392_v62 = vld [vmem:[#allocation9 + $0x30] sm:$0xff]  ;;  %v9396_v1 = vld [vmem:[#allocation9 + $0x8] sm:$0xff] }
 0x755   :  { %4874 = vmatpush1.msra.mxu0 %v9378_v32  ;;  %4945 = vmatpush1.msra.mxu1 %v9380_v36  ;;  %11301 = vst [vmem:[#allocation85_spill] sm:$0xff] %v9392_v62  ;;  %11302 = vst [vmem:[#allocation86_spill] sm:$0xff] %v9396_v1  ;;  %v9398_v32 = vld [vmem:[#allocation9 + $0x18] sm:$0xff]  ;;  %v9400_v36 = vld [vmem:[#allocation9] sm:$0xff] }
 0x756   :  { %4875 = vmatprep.subr.mxu0 %v9384_v8  ;;  %4946 = vmatprep.subr.mxu1 %v9386_v9  ;;  %11303 = vst [vmem:[#allocation87_spill] sm:$0xff] %v9398_v32  ;;  %11304 = vst [vmem:[#allocation88_spill] sm:$0xff] %v9400_v36  ;;  %v9404_v8 = vld [vmem:[#allocation9 + $0x10] sm:$0xff]  ;;  %v9406_v9 = vld [vmem:[#allocation10 + $0x1e8] sm:$0xff] }
 0x757   :  { %4876 = vmatpush1.msra.mxu0 %v9390_v51  ;;  %4947 = vmatpush1.msra.mxu1 %v9392_v62  ;;  %11305 = vst [vmem:[#allocation89_spill] sm:$0xff] %v9404_v8  ;;  %11306 = vst [vmem:[#allocation90_spill] sm:$0xff] %v9406_v9 }
 0x758   :  { %4877 = vmatprep.subr.mxu0 %v9396_v1  ;;  %4948 = vmatprep.subr.mxu1 %v9398_v32  ;;  %v4461_v1 = vld [vmem:[%s9843_s4] sm:$0xf] }
 0x759   :  { %4878 = vmatpush1.msra.mxu0 %v9400_v36  ;;  %4949 = vmatpush1.msra.mxu1 %v9404_v8  ;;  %v4466_v37 = vrot.slane %v4461_v1, %v11175_v4  ;;  %v4470_v36 = vrot.slane %v4461_v1, %v11176_v55  ;;  %v4478_v52 = vrot.slane %v4461_v1, %v7359_v63 }
 0x75a   :  { %5053 = vmatprep.subr.mxu0 %v9406_v9  ;;  %5124 = vmatprep.subr.mxu1 %v9408_v26  ;;  %v4474_v20 = vrot.slane %v4461_v1, %v7363_v56 }
 0x7b5   :  { %v4179_v62 = vpop.f32.mrf.mxu0  ;;  %v4250_v32 = vpop.f32.mrf.mxu1 }
 0x7b7   :  { %v4181_v51 = vpop.f32.mrf.mxu0  ;;  %v4252_v42 = vpop.f32.mrf.mxu1 }
 0x7d6   :  { %v4385_v44 = vpop.f32.mrf.mxu0  ;;  %v4456_v33 = vpop.f32.mrf.mxu1 }
 0x7d7   :  { %v4386_v35 = vadd.f32 %v4385_v44, %v4179_v62  ;;  %v4457_v4 = vadd.f32 %v4456_v33, %v4250_v32 }
 0x7d8   :  { %v4387_v29 = vpop.f32.mrf.mxu0  ;;  %v4458_v31 = vpop.f32.mrf.mxu1 }
 0x7d9   :  { %v4483_v8 = vadd.f32 %v4466_v37, %v4386_v35  ;;  %v4388_v9 = vadd.f32 %v4387_v29, %v4181_v51  ;;  %v4459_v45 = vadd.f32 %v4458_v31, %v4252_v42  ;;  %v4485_v55 = vadd.f32 %v4474_v20, %v4457_v4 }
 0x7db   :  { %v6077_v11 = vmul.f32 -1.442695, %v4483_v8  ;;  %v4484_v26 = vadd.f32 %v4470_v36, %v4388_v9  ;;  %v4486_v24 = vadd.f32 %v4478_v52, %v4459_v45 }
 0x7dd   :  { %6283 = vpow2.f32 %v6077_v11  ;;  %v6078_v30 = vmul.f32 -1.442695, %v4484_v26  ;;  %v6079_v44 = vmul.f32 -1.442695, %v4486_v24  ;;  %v4048_v24 = vld [vmem:[#allocation3 + $0x2] sm:$0x3] }
 0x7df   :  { %6285 = vpow2.f32 %v6078_v30 }
 0x7e0   :  { %6287 = vpow2.f32 %v6079_v44 }
 0x7ea   :  { %v6284_v62 = vpop.eup %6283 }
 0x7eb   :  { %v4490_v47 = vadd.f32 1.0, %v6284_v62 }
 0x7ec   :  { %v6286_v35 = vpop.eup %6285 }
 0x7ed   :  { %6289 = vrcp.f32 %v4490_v47  ;;  %v4496_v29 = vadd.f32 1.0, %v6286_v35  ;;  %v6288_v30 = vpop.eup %6287 }
 0x7ee   :  { %6291 = vtanh.f32 %v4485_v55  ;;  %v4503_v32 = vadd.f32 1.0, %v6288_v30  ;;  %v4516_v55 = vld [vmem:[#allocation4 + $0x30] sm:$0xff] }
 0x7ef   :  { %6293 = vrcp.f32 %v4496_v29 }
 0x7f0   :  { %6295 = vrcp.f32 %v4503_v32 }
 0x7f8   :  { %v4649_v37 = vpop.f32.mrf.mxu0  ;;  %v4720_v26 = vpop.f32.mrf.mxu1 }
 0x7fa   :  { %v6290_v31 = vpop.eup %6289  ;;  %v4651_v42 = vpop.f32.mrf.mxu0 }
 0x7fb   :  { %v4722_v11 = vpop.f32.mrf.mxu1  ;;  %v6292_v52 = vpop.eup %6291  ;;  %v4729_v45 = vcombine.low %v4649_v37, %v4651_v42 }
 0x7fc   :  { %v4730_v33 = vcombine.low %v4720_v26, %v4722_v11  ;;  %v6294_v1 = vpop.eup %6293  ;;  %v4507_v4 = vmul.f32 %v6292_v52, %v6290_v31 }
 0x7fd   :  { %v4506_v20 = vmul.f32 %v6294_v1, %v4048_v24  ;;  %v4737_v36 = vrot.slane %v4729_v45, %v7203_v58  ;;  %v6296_v37 = vpop.eup %6295  ;;  %v9423_v1 = vld [vmem:[#allocation10 + $0x1e0] sm:$0xff]  ;;  %v9425_v24 = vld [vmem:[#allocation10 + $0x1f0] sm:$0xff] }
 0x7fe   :  { %v4744_v47 = vrot.slane %v4730_v33, %v7203_v58 }
 0x7ff   :  { %v4508_v8 = vadd.f32 %v4507_v4, %v4506_v20  ;;  %v9427_v4 = vld [vmem:[#allocation10 + $0x1c8] sm:$0xff]  ;;  %v9429_v20 = vld [vmem:[#allocation10 + $0x1d8] sm:$0xff] }
 0x800   :  { %v4745_v9 = vcombine.low %v4737_v36, %v4744_v47  ;;  %v9431_v36 = vld [vmem:[#allocation10 + $0x1c0] sm:$0xff]  ;;  %v9433_v47 = vld [vmem:[#allocation10 + $0x1d0] sm:$0xff] }
 0x801   :  { %6297 = vtanh.f32 %v4508_v8  ;;  %4512 = vst [vmem:[#allocation3 + $0x2] sm:$0x3] %v4508_v8  ;;  %v9439_v8 = vld [vmem:[#allocation10 + $0x1b8] sm:$0xff] }
 0x802   :  { %v4747_v51 = vadd.f32 %v4745_v9, %v4516_v55  ;;  %v9437_v55 = vld [vmem:[#allocation10 + $0x1a8] sm:$0xff]  ;;  %11309 = vst [vmem:[#allocation93_spill] sm:$0xff] %v9439_v8  ;;  %v9443_v9 = vld [vmem:[#allocation10 + $0x1a0] sm:$0xff] }
 0x803   :  { %11308 = vst [vmem:[#allocation92_spill] sm:$0xff] %v9437_v55  ;;  %11310 = vst [vmem:[#allocation94_spill] sm:$0xff] %v9443_v9 }
 0x804   :  { %v6080_v44 = vmul.f32 -1.442695, %v4747_v51  ;;  %v4755_v62 = vrot.slane %v4747_v51, 2  ;;  %v4766_v29 = vrot.slane %v4747_v51, 6  ;;  %v4763_v11 = vrot.slane %v4747_v51, 4  ;;  %v9445_v51 = vld [vmem:[#allocation10 + $0x1b0] sm:$0xff] }
 0x805   :  { %11311 = vst [vmem:[#allocation95_spill] sm:$0xff] %v9445_v51 }
 0x806   :  { %6299 = vpow2.f32 %v6080_v44  ;;  %v6081_v35 = vmul.f32 -1.442695, %v4755_v62  ;;  %v6082_v31 = vmul.f32 -1.442695, %v4766_v29  ;;  %v9449_v44 = vld [vmem:[#allocation10 + $0x188] sm:$0xff]  ;;  %v9451_v62 = vld [vmem:[#allocation10 + $0x198] sm:$0xff] }
 0x807   :  { %11312 = vst [vmem:[#allocation96_spill] sm:$0xff] %v9449_v44  ;;  %11313 = vst [vmem:[#allocation97_spill] sm:$0xff] %v9451_v62  ;;  %v9457_v29 = vld [vmem:[#allocation10 + $0x190] sm:$0xff] }
 0x808   :  { %6301 = vpow2.f32 %v6081_v35  ;;  %v9455_v35 = vld [vmem:[#allocation10 + $0x180] sm:$0xff]  ;;  %11315 = vst [vmem:[#allocation99_spill] sm:$0xff] %v9457_v29 }
 0x809   :  { %6303 = vpow2.f32 %v6082_v31  ;;  %11314 = vst [vmem:[#allocation98_spill] sm:$0xff] %v9455_v35  ;;  %v9469_v31 = vld [vmem:[#allocation10 + $0x170] sm:$0xff] }
 0x80a   :  { %11319 = vst [vmem:[#allocation165_spill] sm:$0xff] %v9469_v31 }
 0x80e   :  { %v6298_v26 = vpop.eup %6297 }
 0x80f   :  { %v4510_v30 = vmul.f32 %v6298_v26, %v6296_v37  ;;  %v9461_v37 = vld [vmem:[#allocation10 + $0x168] sm:$0xff]  ;;  %v9463_v26 = vld [vmem:[#allocation10 + $0x178] sm:$0xff] }
 0x810   :  { %11316 = vst [vmem:[#allocation100_spill] sm:$0xff] %v9461_v37  ;;  %11317 = vst [vmem:[#allocation101_spill] sm:$0xff] %v9463_v26 }
 0x811   :  { %4514 = vst [vmem:[#allocation13 + $0xa] sm:$0x3] %v4510_v30  ;;  %4511 = vst [vmem:[#allocation2 + $0x2] sm:$0x3] %v4510_v30  ;;  %v9467_v30 = vld [vmem:[#allocation10 + $0x160] sm:$0xff] }
 0x812   :  { %11318 = vst [vmem:[#allocation102_spill] sm:$0xff] %v9467_v30 }
 0x813   :  { %v6300_v42 = vpop.eup %6299 }
 0x814   :  { %v4751_v52 = vadd.f32 1.0, %v6300_v42  ;;  %v9473_v42 = vld [vmem:[#allocation10 + $0x148] sm:$0xff] }
 0x815   :  { %v6302_v45 = vpop.eup %6301  ;;  %11320 = vst [vmem:[#allocation103_spill] sm:$0xff] %v9473_v42 }
 0x816   :  { %6305 = vrcp.f32 %v4751_v52  ;;  %v4760_v33 = vadd.f32 1.0, %v6302_v45  ;;  %v6304_v52 = vpop.eup %6303  ;;  %v9479_v45 = vld [vmem:[#allocation10 + $0x140] sm:$0xff] }
 0x817   :  { %6307 = vtanh.f32 %v4763_v11  ;;  %v9475_v11 = vld [vmem:[#allocation10 + $0x158] sm:$0xff]  ;;  %11322 = vst [vmem:[#allocation105_spill] sm:$0xff] %v9479_v45 }
 0x818   :  { %6309 = vrcp.f32 %v4760_v33  ;;  %v4781_v32 = vld [vmem:[#allocation2 + $0x2] sm:$0x3]  ;;  %11321 = vst [vmem:[#allocation104_spill] sm:$0xff] %v9475_v11  ;;  %v9481_v33 = vld [vmem:[#allocation10 + $0x150] sm:$0xff] }
 0x819   :  { %4912 = vmatmul.mubr.f32.vlgmr.msra.gmra.mxu0 %v4781_v32  ;;  %4983 = vmatmul.mubr.f32.vlgmr.msra.gmra.mxu1 %v4781_v32  ;;  %11323 = vst [vmem:[#allocation106_spill] sm:$0xff] %v9481_v33 }
 0x81a   :  { %5054 = vmatpush1.msra.mxu0 %v9423_v1  ;;  %5125 = vmatpush1.msra.mxu1 %v9425_v24 }
 0x81b   :  { %5055 = vmatprep.subr.mxu0 %v9427_v4  ;;  %5126 = vmatprep.subr.mxu1 %v9429_v20 }
 0x81c   :  { %5056 = vmatpush1.msra.mxu0 %v9431_v36  ;;  %5127 = vmatpush1.msra.mxu1 %v9433_v47 }
 0x81d   :  { %5057 = vmatprep.subr.mxu0 %v9437_v55  ;;  %5128 = vmatprep.subr.mxu1 %v9439_v8 }
 0x81e   :  { %5058 = vmatpush1.msra.mxu0 %v9443_v9  ;;  %5129 = vmatpush1.msra.mxu1 %v9445_v51  ;;  %v4771_v51 = vadd.f32 1.0, %v6304_v52  ;;  %v4518_v9 = vld [vmem:[#allocation3] sm:$0x3]  ;;  %v9509_v52 = vld [vmem:[#allocation10 + $0xe8] sm:$0xff] }
 0x81f   :  { %5059 = vmatprep.subr.mxu0 %v9449_v44  ;;  %5130 = vmatprep.subr.mxu1 %v9451_v62  ;;  %11326 = vst [vmem:[#allocation109_spill] sm:$0xff] %v9509_v52 }
 0x820   :  { %5060 = vmatpush1.msra.mxu0 %v9455_v35  ;;  %5131 = vmatpush1.msra.mxu1 %v9457_v29  ;;  %v9485_v35 = vld [vmem:[#allocation10 + $0x128] sm:$0xff]  ;;  %v9487_v29 = vld [vmem:[#allocation10 + $0x138] sm:$0xff]  ;;  %6311 = vrcp.f32 %v4771_v51  ;;  %v9539_v51 = vld [vmem:[#allocation10 + $0xa0] sm:$0xff] }
 0x821   :  { %5061 = vmatprep.subr.mxu0 %v9461_v37  ;;  %5132 = vmatprep.subr.mxu1 %v9463_v26  ;;  %11324 = vst [vmem:[#allocation107_spill] sm:$0xff] %v9485_v35  ;;  %11325 = vst [vmem:[#allocation108_spill] sm:$0xff] %v9487_v29  ;;  %v9491_v37 = vld [vmem:[#allocation10 + $0x120] sm:$0xff]  ;;  %v9493_v26 = vld [vmem:[#allocation10 + $0x130] sm:$0xff] }
 0x822   :  { %5062 = vmatpush1.msra.mxu0 %v9467_v30  ;;  %5133 = vmatpush1.msra.mxu1 %v9469_v31  ;;  %v9497_v31 = vld [vmem:[#allocation10 + $0x108] sm:$0xff]  ;;  %v9499_v30 = vld [vmem:[#allocation10 + $0x118] sm:$0xff]  ;;  %11336 = vst [vmem:[#allocation119_spill] sm:$0xff] %v9539_v51 }
 0x823   :  { %v6306_v32 = vpop.eup %6305  ;;  %5063 = vmatprep.subr.mxu0 %v9473_v42  ;;  %5134 = vmatprep.subr.mxu1 %v9475_v11  ;;  %v9503_v11 = vld [vmem:[#allocation10 + $0x100] sm:$0xff]  ;;  %v9505_v42 = vld [vmem:[#allocation10 + $0x110] sm:$0xff] }
 0x824   :  { %v6308_v62 = vpop.eup %6307  ;;  %5064 = vmatpush1.msra.mxu0 %v9479_v45  ;;  %5135 = vmatpush1.msra.mxu1 %v9481_v33  ;;  %v9511_v33 = vld [vmem:[#allocation10 + $0xf8] sm:$0xff] }
 0x825   :  { %v6310_v44 = vpop.eup %6309  ;;  %5065 = vmatprep.subr.mxu0 %v9485_v35  ;;  %5136 = vmatprep.subr.mxu1 %v9487_v29  ;;  %v4775_v55 = vmul.f32 %v6308_v62, %v6306_v32  ;;  %11327 = vst [vmem:[#allocation110_spill] sm:$0xff] %v9511_v33  ;;  %v9515_v35 = vld [vmem:[#allocation10 + $0xe0] sm:$0xff]  ;;  %v9517_v29 = vld [vmem:[#allocation10 + $0xf0] sm:$0xff] }
 0x826   :  { %v4774_v8 = vmul.f32 %v6310_v44, %v4518_v9  ;;  %5066 = vmatpush1.msra.mxu0 %v9491_v37  ;;  %5137 = vmatpush1.msra.mxu1 %v9493_v26  ;;  %11328 = vst [vmem:[#allocation111_spill] sm:$0xff] %v9515_v35  ;;  %11329 = vst [vmem:[#allocation112_spill] sm:$0xff] %v9517_v29  ;;  %v9521_v9 = vld [vmem:[#allocation10 + $0xc8] sm:$0xff]  ;;  %v9523_v44 = vld [vmem:[#allocation10 + $0xd8] sm:$0xff] }
 0x827   :  { %5067 = vmatprep.subr.mxu0 %v9497_v31  ;;  %5138 = vmatprep.subr.mxu1 %v9499_v30  ;;  %11330 = vst [vmem:[#allocation113_spill] sm:$0xff] %v9521_v9  ;;  %11331 = vst [vmem:[#allocation114_spill] sm:$0xff] %v9523_v44  ;;  %v9527_v62 = vld [vmem:[#allocation10 + $0xc0] sm:$0xff]  ;;  %v9529_v32 = vld [vmem:[#allocation10 + $0xd0] sm:$0xff] }
 0x828   :  { %v4776_v45 = vadd.f32 %v4775_v55, %v4774_v8  ;;  %5068 = vmatpush1.msra.mxu0 %v9503_v11  ;;  %5139 = vmatpush1.msra.mxu1 %v9505_v42  ;;  %11332 = vst [vmem:[#allocation115_spill] sm:$0xff] %v9527_v62  ;;  %11333 = vst [vmem:[#allocation116_spill] sm:$0xff] %v9529_v32  ;;  %v9533_v55 = vld [vmem:[#allocation10 + $0xa8] sm:$0xff]  ;;  %v9535_v8 = vld [vmem:[#allocation10 + $0xb8] sm:$0xff] }
 0x829   :  { %5069 = vmatprep.subr.mxu0 %v9509_v52  ;;  %5140 = vmatprep.subr.mxu1 %v9511_v33  ;;  %11334 = vst [vmem:[#allocation117_spill] sm:$0xff] %v9533_v55  ;;  %11335 = vst [vmem:[#allocation118_spill] sm:$0xff] %v9535_v8  ;;  %v9541_v33 = vld [vmem:[#allocation10 + $0xb0] sm:$0xff] }
 0x82a   :  { %6313 = vtanh.f32 %v4776_v45  ;;  %4780 = vst [vmem:[#allocation3] sm:$0x3] %v4776_v45  ;;  %5070 = vmatpush1.msra.mxu0 %v9515_v35  ;;  %5141 = vmatpush1.msra.mxu1 %v9517_v29  ;;  %11337 = vst [vmem:[#allocation120_spill] sm:$0xff] %v9541_v33  ;;  %v9545_v45 = vld [vmem:[#allocation10 + $0x88] sm:$0xff]  ;;  %v9547_v35 = vld [vmem:[#allocation10 + $0x98] sm:$0xff] }
 0x82b   :  { %5071 = vmatprep.subr.mxu0 %v9521_v9  ;;  %5142 = vmatprep.subr.mxu1 %v9523_v44  ;;  %11338 = vst [vmem:[#allocation121_spill] sm:$0xff] %v9545_v45  ;;  %11339 = vst [vmem:[#allocation122_spill] sm:$0xff] %v9547_v35  ;;  %v9551_v29 = vld [vmem:[#allocation10 + $0x80] sm:$0xff]  ;;  %v9553_v9 = vld [vmem:[#allocation10 + $0x90] sm:$0xff] }
 0x82c   :  { %5072 = vmatpush1.msra.mxu0 %v9527_v62  ;;  %5143 = vmatpush1.msra.mxu1 %v9529_v32  ;;  %11340 = vst [vmem:[#allocation123_spill] sm:$0xff] %v9551_v29  ;;  %11341 = vst [vmem:[#allocation124_spill] sm:$0xff] %v9553_v9  ;;  %v9557_v44 = vld [vmem:[#allocation10 + $0x68] sm:$0xff]  ;;  %v9559_v62 = vld [vmem:[#allocation10 + $0x78] sm:$0xff] }
 0x82d   :  { %5073 = vmatprep.subr.mxu0 %v9533_v55  ;;  %5144 = vmatprep.subr.mxu1 %v9535_v8  ;;  %11342 = vst [vmem:[#allocation125_spill] sm:$0xff] %v9557_v44  ;;  %11343 = vst [vmem:[#allocation126_spill] sm:$0xff] %v9559_v62  ;;  %v9563_v32 = vld [vmem:[#allocation10 + $0x60] sm:$0xff]  ;;  %v9565_v55 = vld [vmem:[#allocation10 + $0x70] sm:$0xff] }
 0x82e   :  { %5074 = vmatpush1.msra.mxu0 %v9539_v51  ;;  %5145 = vmatpush1.msra.mxu1 %v9541_v33  ;;  %11344 = vst [vmem:[#allocation127_spill] sm:$0xff] %v9563_v32  ;;  %11345 = vst [vmem:[#allocation128_spill] sm:$0xff] %v9565_v55  ;;  %v9569_v8 = vld [vmem:[#allocation10 + $0x48] sm:$0xff]  ;;  %v9571_v51 = vld [vmem:[#allocation10 + $0x58] sm:$0xff] }
 0x82f   :  { %5075 = vmatprep.subr.mxu0 %v9545_v45  ;;  %5146 = vmatprep.subr.mxu1 %v9547_v35  ;;  %11346 = vst [vmem:[#allocation129_spill] sm:$0xff] %v9569_v8  ;;  %11347 = vst [vmem:[#allocation130_spill] sm:$0xff] %v9571_v51  ;;  %v9575_v33 = vld [vmem:[#allocation10 + $0x40] sm:$0xff]  ;;  %v9577_v45 = vld [vmem:[#allocation10 + $0x50] sm:$0xff] }
 0x830   :  { %5076 = vmatpush1.msra.mxu0 %v9551_v29  ;;  %5147 = vmatpush1.msra.mxu1 %v9553_v9  ;;  %11348 = vst [vmem:[#allocation131_spill] sm:$0xff] %v9577_v45  ;;  %v9581_v35 = vld [vmem:[#allocation10 + $0x28] sm:$0xff]  ;;  %v9583_v29 = vld [vmem:[#allocation10 + $0x38] sm:$0xff]  ;;  %v9587_v9 = vld [vmem:[#allocation10 + $0x20] sm:$0xff] }
 0x831   :  { %5077 = vmatprep.subr.mxu0 %v9557_v44  ;;  %5148 = vmatprep.subr.mxu1 %v9559_v62  ;;  %v9589_v44 = vld [vmem:[#allocation10 + $0x30] sm:$0xff]  ;;  %v9593_v62 = vld [vmem:[#allocation10 + $0x8] sm:$0xff] }
 0x832   :  { %5078 = vmatpush1.msra.mxu0 %v9563_v32  ;;  %5149 = vmatpush1.msra.mxu1 %v9565_v55  ;;  %v9595_v32 = vld [vmem:[#allocation10 + $0x18] sm:$0xff]  ;;  %v6312_v55 = vpop.eup %6311  ;;  %v9603_v52 = vld [vmem:[#allocation10 + $0x10] sm:$0xff] }
 0x833   :  { %5079 = vmatprep.subr.mxu0 %v9569_v8  ;;  %5150 = vmatprep.subr.mxu1 %v9571_v51  ;;  %v9599_v8 = vld [vmem:[#allocation10] sm:$0xff] }
 0x834   :  { %5080 = vmatpush1.msra.mxu0 %v9575_v33  ;;  %5151 = vmatpush1.msra.mxu1 %v9577_v45 }
 0x835   :  { %5081 = vmatprep.subr.mxu0 %v9581_v35  ;;  %5152 = vmatprep.subr.mxu1 %v9583_v29 }
 0x836   :  { %5082 = vmatpush1.msra.mxu0 %v9587_v9  ;;  %5153 = vmatpush1.msra.mxu1 %v9589_v44 }
 0x837   :  { %v6314_v51 = vpop.eup %6313  ;;  %5083 = vmatprep.subr.mxu0 %v9593_v62  ;;  %5154 = vmatprep.subr.mxu1 %v9595_v32 }
 0x838   :  { %v4778_v45 = vmul.f32 %v6314_v51, %v6312_v55  ;;  %5084 = vmatpush1.msra.mxu0 %v9599_v8  ;;  %5117 = vmatprep.mubr.f32.mxu0 %v10561_v21  ;;  %v11380_v55 = vld [vmem:[#allocation33_spill] sm:$0xff]  ;;  %v11381_v51 = vld [vmem:[#allocation34_spill] sm:$0xff] }
 0x839   :  { %5155 = vmatpush1.msra.mxu1 %v9603_v52  ;;  %5188 = vmatprep.mubr.f32.mxu1 %v10561_v21 }
 0x83a   :  { %4779 = vst [vmem:[#allocation2] sm:$0x3] %v4778_v45  ;;  %5118 = vmatmul.mubr.f32.vlgmr.msra.gmra.mxu0 %v4778_v45  ;;  %5189 = vmatmul.mubr.f32.vlgmr.msra.gmra.mxu1 %v4778_v45  ;;  %v11382_v45 = vld [vmem:[#allocation35_spill] sm:$0xff] }
 0x83b   :  { %5317 = vmatprep.subr.mxu0 %v9026_v16  ;;  %5388 = vmatprep.subr.mxu1 %v9028_v49  ;;  %v11349_v16 = vld [vmem:[#allocation143_spill] sm:$0xff]  ;;  %v11350_v49 = vld [vmem:[#allocation144_spill] sm:$0xff] }
 0x83c   :  { %5318 = vmatpush1.msra.mxu0 %v9032_v18  ;;  %5389 = vmatpush1.msra.mxu1 %v9034_v17  ;;  %v11351_v18 = vld [vmem:[#allocation145_spill] sm:$0xff]  ;;  %v11352_v17 = vld [vmem:[#allocation146_spill] sm:$0xff] }
 0x83d   :  { %5319 = vmatprep.subr.mxu0 %v9036_v39  ;;  %5390 = vmatprep.subr.mxu1 %v9038_v22  ;;  %v11353_v39 = vld [vmem:[#allocation147_spill] sm:$0xff]  ;;  %v11354_v22 = vld [vmem:[#allocation148_spill] sm:$0xff] }
 0x83e   :  { %5320 = vmatpush1.msra.mxu0 %v9042_v41  ;;  %5391 = vmatpush1.msra.mxu1 %v9044_v12  ;;  %v11355_v41 = vld [vmem:[#allocation149_spill] sm:$0xff]  ;;  %v11356_v12 = vld [vmem:[#allocation150_spill] sm:$0xff] }
 0x83f   :  { %5321 = vmatprep.subr.mxu0 %v9048_v34  ;;  %5392 = vmatprep.subr.mxu1 %v9050_v38  ;;  %v11357_v34 = vld [vmem:[#allocation151_spill] sm:$0xff]  ;;  %v11358_v38 = vld [vmem:[#allocation152_spill] sm:$0xff] }
 0x840   :  { %5322 = vmatpush1.msra.mxu0 %v9054_v19  ;;  %5393 = vmatpush1.msra.mxu1 %v9056_v50  ;;  %v11359_v19 = vld [vmem:[#allocation153_spill] sm:$0xff]  ;;  %v11360_v50 = vld [vmem:[#allocation154_spill] sm:$0xff] }
 0x841   :  { %5323 = vmatprep.subr.mxu0 %v9060_v61  ;;  %5394 = vmatprep.subr.mxu1 %v9062_v2  ;;  %v11361_v61 = vld [vmem:[#allocation155_spill] sm:$0xff]  ;;  %v11362_v2 = vld [vmem:[#allocation156_spill] sm:$0xff] }
 0x842   :  { %5324 = vmatpush1.msra.mxu0 %v9066_v5  ;;  %5395 = vmatpush1.msra.mxu1 %v9068_v57  ;;  %v11363_v5 = vld [vmem:[#allocation157_spill] sm:$0xff]  ;;  %v11364_v57 = vld [vmem:[#allocation158_spill] sm:$0xff] }
 0x843   :  { %5325 = vmatprep.subr.mxu0 %v9072_v6  ;;  %5396 = vmatprep.subr.mxu1 %v9074_v7  ;;  %v11365_v6 = vld [vmem:[#allocation159_spill] sm:$0xff]  ;;  %v11366_v7 = vld [vmem:[#allocation160_spill] sm:$0xff] }
 0x844   :  { %5326 = vmatpush1.msra.mxu0 %v9078_v54  ;;  %5397 = vmatpush1.msra.mxu1 %v9080_v10  ;;  %v11367_v54 = vld [vmem:[#allocation161_spill] sm:$0xff]  ;;  %v11368_v10 = vld [vmem:[#allocation162_spill] sm:$0xff] }
 0x845   :  { %5327 = vmatprep.subr.mxu0 %v9084_v43  ;;  %5398 = vmatprep.subr.mxu1 %v9086_v40  ;;  %v11369_v43 = vld [vmem:[#allocation163_spill] sm:$0xff]  ;;  %v11370_v40 = vld [vmem:[#allocation164_spill] sm:$0xff] }
 0x846   :  { %5328 = vmatpush1.msra.mxu0 %v9090_v13  ;;  %5399 = vmatpush1.msra.mxu1 %v9092_v0  ;;  %v11371_v13 = vld [vmem:[#allocation24_spill] sm:$0xff]  ;;  %v11372_v0 = vld [vmem:[#allocation25_spill] sm:$0xff] }
 0x847   :  { %5329 = vmatprep.subr.mxu0 %v9096_v46  ;;  %5400 = vmatprep.subr.mxu1 %v9098_v59  ;;  %v11373_v46 = vld [vmem:[#allocation26_spill] sm:$0xff]  ;;  %v11374_v59 = vld [vmem:[#allocation27_spill] sm:$0xff] }
 0x848   :  { %5330 = vmatpush1.msra.mxu0 %v9102_v53  ;;  %5401 = vmatpush1.msra.mxu1 %v9104_v25  ;;  %v11375_v53 = vld [vmem:[#allocation28_spill] sm:$0xff]  ;;  %v11376_v25 = vld [vmem:[#allocation29_spill] sm:$0xff] }
 0x849   :  { %5331 = vmatprep.subr.mxu0 %v9108_v60  ;;  %5402 = vmatprep.subr.mxu1 %v9110_v27  ;;  %v5251_v60 = vld [vmem:[#allocation2] sm:$0x3]  ;;  %v5578_v27 = vld [vmem:[#allocation9 + $0x1e8] sm:$0xff] }
 0x84a   :  { %5332 = vmatpush1.msra.mxu0 %v9114_v48  ;;  %5403 = vmatpush1.msra.mxu1 %v9116_v23  ;;  %v5580_v48 = vld [vmem:[#allocation9 + $0x1f8] sm:$0xff]  ;;  %v5577_v23 = vld [vmem:[#allocation9 + $0x1e0] sm:$0xff] }
 0x84b   :  { %5333 = vmatprep.subr.mxu0 %v9120_v28  ;;  %5404 = vmatprep.subr.mxu1 %v9122_v14  ;;  %v5579_v28 = vld [vmem:[#allocation9 + $0x1f0] sm:$0xff]  ;;  %v11377_v14 = vld [vmem:[#allocation30_spill] sm:$0xff] }
 0x84c   :  { %5334 = vmatpush1.msra.mxu0 %v9126_v15  ;;  %5405 = vmatpush1.msra.mxu1 %v9128_v3  ;;  %v11378_v15 = vld [vmem:[#allocation31_spill] sm:$0xff]  ;;  %v11379_v3 = vld [vmem:[#allocation32_spill] sm:$0xff] }
 0x84d   :  { %5335 = vmatprep.subr.mxu0 %v11349_v16  ;;  %5406 = vmatprep.subr.mxu1 %v11350_v49  ;;  %v11383_v16 = vld [vmem:[#allocation36_spill] sm:$0xff]  ;;  %v11384_v49 = vld [vmem:[#allocation37_spill] sm:$0xff] }
 0x84e   :  { %5336 = vmatpush1.msra.mxu0 %v11351_v18  ;;  %5407 = vmatpush1.msra.mxu1 %v11352_v17  ;;  %v11385_v18 = vld [vmem:[#allocation38_spill] sm:$0xff]  ;;  %v11386_v17 = vld [vmem:[#allocation39_spill] sm:$0xff] }
 0x84f   :  { %5337 = vmatprep.subr.mxu0 %v11353_v39  ;;  %5408 = vmatprep.subr.mxu1 %v11354_v22  ;;  %v11387_v39 = vld [vmem:[#allocation40_spill] sm:$0xff]  ;;  %v11388_v22 = vld [vmem:[#allocation41_spill] sm:$0xff] }
 0x850   :  { %5338 = vmatpush1.msra.mxu0 %v11355_v41  ;;  %5409 = vmatpush1.msra.mxu1 %v11356_v12  ;;  %v11389_v41 = vld [vmem:[#allocation42_spill] sm:$0xff]  ;;  %v11390_v12 = vld [vmem:[#allocation43_spill] sm:$0xff] }
 0x851   :  { %5339 = vmatprep.subr.mxu0 %v11357_v34  ;;  %5410 = vmatprep.subr.mxu1 %v11358_v38  ;;  %v11391_v34 = vld [vmem:[#allocation44_spill] sm:$0xff]  ;;  %v11392_v38 = vld [vmem:[#allocation45_spill] sm:$0xff] }
 0x852   :  { %5340 = vmatpush1.msra.mxu0 %v11359_v19  ;;  %5411 = vmatpush1.msra.mxu1 %v11360_v50  ;;  %v11393_v19 = vld [vmem:[#allocation46_spill] sm:$0xff]  ;;  %v11394_v50 = vld [vmem:[#allocation47_spill] sm:$0xff] }
 0x853   :  { %5341 = vmatprep.subr.mxu0 %v11361_v61  ;;  %5412 = vmatprep.subr.mxu1 %v11362_v2  ;;  %v11395_v61 = vld [vmem:[#allocation48_spill] sm:$0xff]  ;;  %v11396_v2 = vld [vmem:[#allocation49_spill] sm:$0xff] }
 0x854   :  { %5342 = vmatpush1.msra.mxu0 %v11363_v5  ;;  %5413 = vmatpush1.msra.mxu1 %v11364_v57  ;;  %v11397_v5 = vld [vmem:[#allocation50_spill] sm:$0xff]  ;;  %v11398_v57 = vld [vmem:[#allocation51_spill] sm:$0xff] }
 0x855   :  { %5343 = vmatprep.subr.mxu0 %v11365_v6  ;;  %5414 = vmatprep.subr.mxu1 %v11366_v7  ;;  %v11399_v6 = vld [vmem:[#allocation52_spill] sm:$0xff]  ;;  %v11400_v7 = vld [vmem:[#allocation53_spill] sm:$0xff] }
 0x856   :  { %5344 = vmatpush1.msra.mxu0 %v11367_v54  ;;  %5415 = vmatpush1.msra.mxu1 %v11368_v10  ;;  %v11401_v54 = vld [vmem:[#allocation54_spill] sm:$0xff]  ;;  %v11402_v10 = vld [vmem:[#allocation55_spill] sm:$0xff] }
 0x857   :  { %5345 = vmatprep.subr.mxu0 %v11369_v43  ;;  %5416 = vmatprep.subr.mxu1 %v11370_v40  ;;  %v11403_v43 = vld [vmem:[#allocation56_spill] sm:$0xff]  ;;  %v11404_v40 = vld [vmem:[#allocation57_spill] sm:$0xff] }
 0x858   :  { %5346 = vmatpush1.msra.mxu0 %v11371_v13  ;;  %5417 = vmatpush1.msra.mxu1 %v11372_v0  ;;  %v11405_v13 = vld [vmem:[#allocation58_spill] sm:$0xff]  ;;  %v11406_v0 = vld [vmem:[#allocation59_spill] sm:$0xff] }
 0x859   :  { %5347 = vmatprep.subr.mxu0 %v11373_v46  ;;  %5418 = vmatprep.subr.mxu1 %v11374_v59  ;;  %v11407_v46 = vld [vmem:[#allocation60_spill] sm:$0xff]  ;;  %v11408_v59 = vld [vmem:[#allocation61_spill] sm:$0xff] }
 0x85a   :  { %5348 = vmatpush1.msra.mxu0 %v11375_v53  ;;  %5381 = vmatprep.mubr.f32.mxu0 %v10561_v21  ;;  %v11409_v53 = vld [vmem:[#allocation62_spill] sm:$0xff] }
 0x85b   :  { %5419 = vmatpush1.msra.mxu1 %v11376_v25  ;;  %5452 = vmatprep.mubr.f32.mxu1 %v10561_v21  ;;  %v11410_v25 = vld [vmem:[#allocation63_spill] sm:$0xff] }
 0x85c   :  { %5382 = vmatmul.mubr.f32.vlgmr.msra.gmra.mxu0 %v5251_v60  ;;  %5453 = vmatmul.mubr.f32.vlgmr.msra.gmra.mxu1 %v5251_v60  ;;  %v11411_v60 = vld [vmem:[#allocation64_spill] sm:$0xff] }
 0x85d   :  { %5645 = vmatprep.mubr.f32.mxu0 %v10561_v21  ;;  %5716 = vmatprep.mubr.f32.mxu1 %v10561_v21 }
 0x85e   :  { %5581 = vmatprep.subr.mxu0 %v5578_v27  ;;  %5652 = vmatprep.subr.mxu1 %v5580_v48  ;;  %v11412_v27 = vld [vmem:[#allocation65_spill] sm:$0xff]  ;;  %v11413_v48 = vld [vmem:[#allocation66_spill] sm:$0xff] }
 0x85f   :  { %5582 = vmatpush1.msra.mxu0 %v5577_v23  ;;  %5653 = vmatpush1.msra.mxu1 %v5579_v28  ;;  %v11414_v23 = vld [vmem:[#allocation67_spill] sm:$0xff]  ;;  %v11415_v28 = vld [vmem:[#allocation68_spill] sm:$0xff] }
 0x860   :  { %5583 = vmatprep.subr.mxu0 %v11377_v14  ;;  %5654 = vmatprep.subr.mxu1 %v11378_v15  ;;  %v11416_v14 = vld [vmem:[#allocation69_spill] sm:$0xff]  ;;  %v11417_v15 = vld [vmem:[#allocation70_spill] sm:$0xff] }
 0x861   :  { %5584 = vmatpush1.msra.mxu0 %v11379_v3  ;;  %5655 = vmatpush1.msra.mxu1 %v11380_v55  ;;  %v11418_v3 = vld [vmem:[#allocation71_spill] sm:$0xff]  ;;  %v11419_v55 = vld [vmem:[#allocation72_spill] sm:$0xff] }
 0x862   :  { %5585 = vmatprep.subr.mxu0 %v11381_v51  ;;  %5656 = vmatprep.subr.mxu1 %v11382_v45  ;;  %v11420_v51 = vld [vmem:[#allocation73_spill] sm:$0xff]  ;;  %v11421_v45 = vld [vmem:[#allocation74_spill] sm:$0xff] }
 0x863   :  { %5586 = vmatpush1.msra.mxu0 %v11383_v16  ;;  %5657 = vmatpush1.msra.mxu1 %v11384_v49  ;;  %v11422_v16 = vld [vmem:[#allocation75_spill] sm:$0xff]  ;;  %v11423_v49 = vld [vmem:[#allocation76_spill] sm:$0xff] }
 0x864   :  { %5587 = vmatprep.subr.mxu0 %v11385_v18  ;;  %5658 = vmatprep.subr.mxu1 %v11386_v17  ;;  %v11424_v18 = vld [vmem:[#allocation77_spill] sm:$0xff]  ;;  %v11425_v17 = vld [vmem:[#allocation78_spill] sm:$0xff] }
 0x865   :  { %5588 = vmatpush1.msra.mxu0 %v11387_v39  ;;  %5659 = vmatpush1.msra.mxu1 %v11388_v22  ;;  %v11426_v39 = vld [vmem:[#allocation79_spill] sm:$0xff]  ;;  %v11427_v22 = vld [vmem:[#allocation80_spill] sm:$0xff] }
 0x866   :  { %5589 = vmatprep.subr.mxu0 %v11389_v41  ;;  %5660 = vmatprep.subr.mxu1 %v11390_v12  ;;  %v11428_v41 = vld [vmem:[#allocation81_spill] sm:$0xff]  ;;  %v11429_v12 = vld [vmem:[#allocation82_spill] sm:$0xff] }
 0x867   :  { %5590 = vmatpush1.msra.mxu0 %v11391_v34  ;;  %5661 = vmatpush1.msra.mxu1 %v11392_v38  ;;  %v11430_v34 = vld [vmem:[#allocation83_spill] sm:$0xff]  ;;  %v11431_v38 = vld [vmem:[#allocation84_spill] sm:$0xff] }
 0x868   :  { %5591 = vmatprep.subr.mxu0 %v11393_v19  ;;  %5662 = vmatprep.subr.mxu1 %v11394_v50  ;;  %v11432_v19 = vld [vmem:[#allocation85_spill] sm:$0xff]  ;;  %v11433_v50 = vld [vmem:[#allocation86_spill] sm:$0xff] }
 0x869   :  { %5592 = vmatpush1.msra.mxu0 %v11395_v61  ;;  %5663 = vmatpush1.msra.mxu1 %v11396_v2  ;;  %v11434_v61 = vld [vmem:[#allocation87_spill] sm:$0xff]  ;;  %v11435_v2 = vld [vmem:[#allocation88_spill] sm:$0xff] }
 0x86a   :  { %5593 = vmatprep.subr.mxu0 %v11397_v5  ;;  %5664 = vmatprep.subr.mxu1 %v11398_v57  ;;  %v11436_v5 = vld [vmem:[#allocation89_spill] sm:$0xff]  ;;  %v11437_v57 = vld [vmem:[#allocation90_spill] sm:$0xff] }
 0x86b   :  { %5594 = vmatpush1.msra.mxu0 %v11399_v6  ;;  %5665 = vmatpush1.msra.mxu1 %v11400_v7  ;;  %v11438_v6 = vld [vmem:[#allocation91_spill] sm:$0xff] }
 0x86c   :  { %5595 = vmatprep.subr.mxu0 %v11401_v54  ;;  %5666 = vmatprep.subr.mxu1 %v11402_v10  ;;  %v5195_v54 = vld [vmem:[%s9843_s4] sm:$0xf] }
 0x86d   :  { %5596 = vmatpush1.msra.mxu0 %v11403_v43  ;;  %5667 = vmatpush1.msra.mxu1 %v11404_v40  ;;  %v11439_v40 = vld [vmem:[#allocation22_spill] sm:$0xff] }
 0x86e   :  { %5597 = vmatprep.subr.mxu0 %v11405_v13  ;;  %5668 = vmatprep.subr.mxu1 %v11406_v0  ;;  %v5200_v13 = vrot.slane %v5195_v54, %v11439_v40 }
 0x86f   :  { %5598 = vmatpush1.msra.mxu0 %v11407_v46  ;;  %5669 = vmatpush1.msra.mxu1 %v11408_v59 }
 0x870   :  { %5599 = vmatprep.subr.mxu0 %v11409_v53  ;;  %5670 = vmatprep.subr.mxu1 %v11410_v25  ;;  %v11440_v53 = vld [vmem:[#allocation23_spill] sm:$0xff] }
 0x871   :  { %5600 = vmatpush1.msra.mxu0 %v11411_v60  ;;  %5671 = vmatpush1.msra.mxu1 %v11412_v27  ;;  %v5204_v25 = vrot.slane %v5195_v54, %v11440_v53 }
 0x872   :  { %5601 = vmatprep.subr.mxu0 %v11413_v48  ;;  %5672 = vmatprep.subr.mxu1 %v11414_v23 }
 0x873   :  { %5602 = vmatpush1.msra.mxu0 %v11415_v28  ;;  %5673 = vmatpush1.msra.mxu1 %v11416_v14 }
 0x874   :  { %5603 = vmatprep.subr.mxu0 %v11417_v15  ;;  %5674 = vmatprep.subr.mxu1 %v11418_v3 }
 0x875   :  { %5604 = vmatpush1.msra.mxu0 %v11419_v55  ;;  %5675 = vmatpush1.msra.mxu1 %v11420_v51  ;;  %v5212_v51 = vrot.slane %v5195_v54, %v7359_v63 }
 0x876   :  { %5605 = vmatprep.subr.mxu0 %v11421_v45  ;;  %5676 = vmatprep.subr.mxu1 %v11422_v16 }
 0x877   :  { %5606 = vmatpush1.msra.mxu0 %v11423_v49  ;;  %5677 = vmatpush1.msra.mxu1 %v11424_v18  ;;  %v5208_v49 = vrot.slane %v5195_v54, %v7363_v56  ;;  %v4782_v54 = vld [vmem:[#allocation3 + $0x2] sm:$0x3] }
 0x878   :  { %5607 = vmatprep.subr.mxu0 %v11425_v17  ;;  %5678 = vmatprep.subr.mxu1 %v11426_v39 }
 0x879   :  { %5608 = vmatpush1.msra.mxu0 %v11427_v22  ;;  %5679 = vmatpush1.msra.mxu1 %v11428_v41 }
 0x87a   :  { %5609 = vmatprep.subr.mxu0 %v11429_v12  ;;  %5680 = vmatprep.subr.mxu1 %v11430_v34 }
 0x87b   :  { %5610 = vmatpush1.msra.mxu0 %v11431_v38  ;;  %5681 = vmatpush1.msra.mxu1 %v11432_v19 }
 0x87c   :  { %5611 = vmatprep.subr.mxu0 %v11433_v50  ;;  %5682 = vmatprep.subr.mxu1 %v11434_v61 }
 0x87d   :  { %5612 = vmatpush1.msra.mxu0 %v11435_v2  ;;  %5683 = vmatpush1.msra.mxu1 %v11436_v5 }
 0x87e   :  { %5787 = vmatprep.subr.mxu0 %v11437_v57  ;;  %5858 = vmatprep.subr.mxu1 %v11438_v6 }
 0x8d9   :  { %v4913_v7 = vpop.f32.mrf.mxu0  ;;  %v4984_v10 = vpop.f32.mrf.mxu1 }
 0x8db   :  { %v4915_v43 = vpop.f32.mrf.mxu0  ;;  %v4986_v46 = vpop.f32.mrf.mxu1 }
 0x8fa   :  { %v5119_v0 = vpop.f32.mrf.mxu0  ;;  %v5190_v48 = vpop.f32.mrf.mxu1 }
 0x8fb   :  { %v5120_v59 = vadd.f32 %v5119_v0, %v4913_v7  ;;  %v5191_v16 = vadd.f32 %v5190_v48, %v4984_v10 }
 0x8fc   :  { %v5121_v60 = vpop.f32.mrf.mxu0  ;;  %v5192_v3 = vpop.f32.mrf.mxu1 }
 0x8fd   :  { %v5217_v27 = vadd.f32 %v5200_v13, %v5120_v59  ;;  %v5122_v23 = vadd.f32 %v5121_v60, %v4915_v43  ;;  %v5193_v55 = vadd.f32 %v5192_v3, %v4986_v46  ;;  %v5219_v39 = vadd.f32 %v5208_v49, %v5191_v16  ;;  %v5250_v59 = vld [vmem:[#allocation4 + $0x38] sm:$0xff] }
 0x8ff   :  { %v6083_v28 = vmul.f32 -1.442695, %v5217_v27  ;;  %v5218_v14 = vadd.f32 %v5204_v25, %v5122_v23  ;;  %v5220_v45 = vadd.f32 %v5212_v51, %v5193_v55 }
 0x901   :  { %6315 = vpow2.f32 %v6083_v28  ;;  %v6084_v15 = vmul.f32 -1.442695, %v5218_v14  ;;  %v6085_v18 = vmul.f32 -1.442695, %v5220_v45 }
 0x903   :  { %6317 = vpow2.f32 %v6084_v15 }
 0x904   :  { %6319 = vpow2.f32 %v6085_v18 }
 0x90e   :  { %v6316_v17 = vpop.eup %6315 }
 0x90f   :  { %v5224_v22 = vadd.f32 1.0, %v6316_v17 }
 0x910   :  { %v6318_v41 = vpop.eup %6317 }
 0x911   :  { %6321 = vrcp.f32 %v5224_v22  ;;  %v5230_v12 = vadd.f32 1.0, %v6318_v41  ;;  %v6320_v19 = vpop.eup %6319  ;;  %v11442_v22 = vld [vmem:[#allocation93_spill] sm:$0xff]  ;;  %v11443_v41 = vld [vmem:[#allocation94_spill] sm:$0xff] }
 0x912   :  { %6323 = vtanh.f32 %v5219_v39  ;;  %v5237_v10 = vadd.f32 1.0, %v6320_v19  ;;  %v11441_v39 = vld [vmem:[#allocation92_spill] sm:$0xff]  ;;  %v11451_v19 = vld [vmem:[#allocation102_spill] sm:$0xff] }
 0x913   :  { %6325 = vrcp.f32 %v5230_v12  ;;  %v11444_v12 = vld [vmem:[#allocation95_spill] sm:$0xff] }
 0x914   :  { %6327 = vrcp.f32 %v5237_v10  ;;  %v5252_v10 = vld [vmem:[#allocation3] sm:$0x3] }
 0x91c   :  { %v5383_v34 = vpop.f32.mrf.mxu0  ;;  %v5454_v38 = vpop.f32.mrf.mxu1 }
 0x91e   :  { %v6322_v50 = vpop.eup %6321  ;;  %v5385_v61 = vpop.f32.mrf.mxu0 }
 0x91f   :  { %v5456_v2 = vpop.f32.mrf.mxu1  ;;  %v6324_v5 = vpop.eup %6323  ;;  %v5463_v57 = vcombine.low %v5383_v34, %v5385_v61  ;;  %v11445_v34 = vld [vmem:[#allocation96_spill] sm:$0xff] }
 0x920   :  { %v5464_v6 = vcombine.low %v5454_v38, %v5456_v2  ;;  %v6326_v7 = vpop.eup %6325  ;;  %v5241_v43 = vmul.f32 %v6324_v5, %v6322_v50  ;;  %v11452_v50 = vld [vmem:[#allocation165_spill] sm:$0xff]  ;;  %v11453_v2 = vld [vmem:[#allocation103_spill] sm:$0xff]  ;;  %v11454_v5 = vld [vmem:[#allocation104_spill] sm:$0xff] }
 0x921   :  { %v5240_v13 = vmul.f32 %v6326_v7, %v4782_v54  ;;  %v5471_v0 = vrot.slane %v5463_v57, %v7203_v58  ;;  %v6328_v15 = vpop.eup %6327  ;;  %v11455_v7 = vld [vmem:[#allocation105_spill] sm:$0xff]  ;;  %v11456_v54 = vld [vmem:[#allocation106_spill] sm:$0xff] }
 0x922   :  { %v5478_v46 = vrot.slane %v5464_v6, %v7203_v58 }
 0x923   :  { %v5242_v25 = vadd.f32 %v5241_v43, %v5240_v13  ;;  %v11457_v43 = vld [vmem:[#allocation107_spill] sm:$0xff]  ;;  %v11458_v13 = vld [vmem:[#allocation108_spill] sm:$0xff] }
 0x924   :  { %v5479_v60 = vcombine.low %v5471_v0, %v5478_v46 }
 0x925   :  { %6329 = vtanh.f32 %v5242_v25  ;;  %5246 = vst [vmem:[#allocation3 + $0x2] sm:$0x3] %v5242_v25  ;;  %v11459_v25 = vld [vmem:[#allocation109_spill] sm:$0xff] }
 0x926   :  { %v5481_v27 = vadd.f32 %v5479_v60, %v5250_v59  ;;  %v11460_v60 = vld [vmem:[#allocation110_spill] sm:$0xff] }
 0x928   :  { %v6086_v48 = vmul.f32 -1.442695, %v5481_v27  ;;  %v5489_v23 = vrot.slane %v5481_v27, 2  ;;  %v5500_v14 = vrot.slane %v5481_v27, 6  ;;  %v5497_v45 = vrot.slane %v5481_v27, 4  ;;  %v11461_v27 = vld [vmem:[#allocation111_spill] sm:$0xff] }
 0x92a   :  { %6331 = vpow2.f32 %v6086_v48  ;;  %v6087_v28 = vmul.f32 -1.442695, %v5489_v23  ;;  %v6088_v51 = vmul.f32 -1.442695, %v5500_v14  ;;  %v11466_v48 = vld [vmem:[#allocation116_spill] sm:$0xff]  ;;  %v11469_v23 = vld [vmem:[#allocation119_spill] sm:$0xff] }
 0x92b   :  { %v11471_v14 = vld [vmem:[#allocation121_spill] sm:$0xff] }
 0x92c   :  { %6333 = vpow2.f32 %v6087_v28  ;;  %v11470_v28 = vld [vmem:[#allocation120_spill] sm:$0xff] }
 0x92d   :  { %6335 = vpow2.f32 %v6088_v51  ;;  %v11475_v51 = vld [vmem:[#allocation125_spill] sm:$0xff] }
 0x932   :  { %v6330_v3 = vpop.eup %6329 }
 0x933   :  { %v5244_v55 = vmul.f32 %v6330_v3, %v6328_v15  ;;  %v11472_v15 = vld [vmem:[#allocation122_spill] sm:$0xff]  ;;  %v11473_v3 = vld [vmem:[#allocation123_spill] sm:$0xff] }
 0x935   :  { %5248 = vst [vmem:[#allocation13 + $0xc] sm:$0x3] %v5244_v55  ;;  %5245 = vst [vmem:[#allocation2 + $0x2] sm:$0x3] %v5244_v55  ;;  %v11474_v55 = vld [vmem:[#allocation124_spill] sm:$0xff] }
 0x937   :  { %v6332_v58 = vpop.eup %6331 }
 0x938   :  { %v5485_v16 = vadd.f32 1.0, %v6332_v58  ;;  %v11476_v58 = vld [vmem:[#allocation126_spill] sm:$0xff] }
 0x939   :  { %v6334_v49 = vpop.eup %6333 }
 0x93a   :  { %6337 = vrcp.f32 %v5485_v16  ;;  %v5494_v18 = vadd.f32 1.0, %v6334_v49  ;;  %v11478_v16 = vld [vmem:[#allocation128_spill] sm:$0xff]  ;;  %v11479_v49 = vld [vmem:[#allocation129_spill] sm:$0xff] }
 0x93b   :  { %6339 = vtanh.f32 %v5497_v45  ;;  %v11477_v45 = vld [vmem:[#allocation127_spill] sm:$0xff] }
 0x93c   :  { %6341 = vrcp.f32 %v5494_v18  ;;  %v5515_v17 = vld [vmem:[#allocation2 + $0x2] sm:$0x3]  ;;  %v11480_v18 = vld [vmem:[#allocation130_spill] sm:$0xff] }
 0x93d   :  { %5646 = vmatmul.mubr.f32.vlgmr.msra.gmra.mxu0 %v5515_v17  ;;  %5717 = vmatmul.mubr.f32.vlgmr.msra.gmra.mxu1 %v5515_v17  ;;  %v11481_v17 = vld [vmem:[#allocation131_spill] sm:$0xff] }
 0x93e   :  { %5788 = vmatpush1.msra.mxu0 %v9423_v1  ;;  %5859 = vmatpush1.msra.mxu1 %v9425_v24  ;;  %v11446_v1 = vld [vmem:[#allocation97_spill] sm:$0xff]  ;;  %v11447_v24 = vld [vmem:[#allocation98_spill] sm:$0xff] }
 0x93f   :  { %5789 = vmatprep.subr.mxu0 %v9427_v4  ;;  %5860 = vmatprep.subr.mxu1 %v9429_v20  ;;  %v11448_v4 = vld [vmem:[#allocation99_spill] sm:$0xff]  ;;  %v6336_v20 = vpop.eup %6335 }
 0x940   :  { %5790 = vmatpush1.msra.mxu0 %v9431_v36  ;;  %5861 = vmatpush1.msra.mxu1 %v9433_v47  ;;  %v11449_v36 = vld [vmem:[#allocation100_spill] sm:$0xff]  ;;  %v11450_v47 = vld [vmem:[#allocation101_spill] sm:$0xff]  ;;  %v5505_v6 = vadd.f32 1.0, %v6336_v20 }
 0x941   :  { %5791 = vmatprep.subr.mxu0 %v11441_v39  ;;  %5862 = vmatprep.subr.mxu1 %v11442_v22 }
 0x942   :  { %5792 = vmatpush1.msra.mxu0 %v11443_v41  ;;  %5863 = vmatpush1.msra.mxu1 %v11444_v12  ;;  %6343 = vrcp.f32 %v5505_v6 }
 0x943   :  { %5793 = vmatprep.subr.mxu0 %v11445_v34  ;;  %5864 = vmatprep.subr.mxu1 %v11446_v1 }
 0x944   :  { %5794 = vmatpush1.msra.mxu0 %v11447_v24  ;;  %5865 = vmatpush1.msra.mxu1 %v11448_v4 }
 0x945   :  { %5795 = vmatprep.subr.mxu0 %v11449_v36  ;;  %5866 = vmatprep.subr.mxu1 %v11450_v47 }
 0x946   :  { %5796 = vmatpush1.msra.mxu0 %v11451_v19  ;;  %5867 = vmatpush1.msra.mxu1 %v11452_v50 }
 0x947   :  { %v6338_v38 = vpop.eup %6337  ;;  %5797 = vmatprep.subr.mxu0 %v11453_v2  ;;  %5868 = vmatprep.subr.mxu1 %v11454_v5 }
 0x948   :  { %v6340_v61 = vpop.eup %6339  ;;  %5798 = vmatpush1.msra.mxu0 %v11455_v7  ;;  %5869 = vmatpush1.msra.mxu1 %v11456_v54 }
 0x949   :  { %v6342_v57 = vpop.eup %6341  ;;  %5799 = vmatprep.subr.mxu0 %v11457_v43  ;;  %5870 = vmatprep.subr.mxu1 %v11458_v13  ;;  %v5509_v46 = vmul.f32 %v6340_v61, %v6338_v38  ;;  %v5516_v13 = vld [vmem:[#allocation3 + $0x2] sm:$0x3] }
 0x94a   :  { %v5508_v0 = vmul.f32 %v6342_v57, %v5252_v10  ;;  %5800 = vmatpush1.msra.mxu0 %v9491_v37  ;;  %5871 = vmatpush1.msra.mxu1 %v9493_v26  ;;  %v11462_v37 = vld [vmem:[#allocation112_spill] sm:$0xff]  ;;  %v11463_v26 = vld [vmem:[#allocation113_spill] sm:$0xff] }
 0x94b   :  { %5801 = vmatprep.subr.mxu0 %v9497_v31  ;;  %5872 = vmatprep.subr.mxu1 %v9499_v30  ;;  %v11464_v31 = vld [vmem:[#allocation114_spill] sm:$0xff]  ;;  %v11465_v30 = vld [vmem:[#allocation115_spill] sm:$0xff] }
 0x94c   :  { %v5510_v59 = vadd.f32 %v5509_v46, %v5508_v0  ;;  %5802 = vmatpush1.msra.mxu0 %v9503_v11  ;;  %5873 = vmatpush1.msra.mxu1 %v9505_v42  ;;  %v11467_v11 = vld [vmem:[#allocation117_spill] sm:$0xff]  ;;  %v11468_v42 = vld [vmem:[#allocation118_spill] sm:$0xff] }
 0x94d   :  { %5803 = vmatprep.subr.mxu0 %v11459_v25  ;;  %5874 = vmatprep.subr.mxu1 %v11460_v60 }
 0x94e   :  { %6345 = vtanh.f32 %v5510_v59  ;;  %5514 = vst [vmem:[#allocation3] sm:$0x3] %v5510_v59  ;;  %5804 = vmatpush1.msra.mxu0 %v11461_v27  ;;  %5875 = vmatpush1.msra.mxu1 %v11462_v37 }
 0x94f   :  { %5805 = vmatprep.subr.mxu0 %v11463_v26  ;;  %5876 = vmatprep.subr.mxu1 %v11464_v31  ;;  %v6344_v39 = vpop.eup %6343 }
 0x950   :  { %5806 = vmatpush1.msra.mxu0 %v11465_v30  ;;  %5877 = vmatpush1.msra.mxu1 %v11466_v48 }
 0x951   :  { %5807 = vmatprep.subr.mxu0 %v11467_v11  ;;  %5878 = vmatprep.subr.mxu1 %v11468_v42 }
 0x952   :  { %5808 = vmatpush1.msra.mxu0 %v11469_v23  ;;  %5879 = vmatpush1.msra.mxu1 %v11470_v28 }
 0x953   :  { %5809 = vmatprep.subr.mxu0 %v11471_v14  ;;  %5880 = vmatprep.subr.mxu1 %v11472_v15 }
 0x954   :  { %5810 = vmatpush1.msra.mxu0 %v11473_v3  ;;  %5881 = vmatpush1.msra.mxu1 %v11474_v55 }
 0x955   :  { %5811 = vmatprep.subr.mxu0 %v11475_v51  ;;  %5882 = vmatprep.subr.mxu1 %v11476_v58 }
 0x956   :  { %5812 = vmatpush1.msra.mxu0 %v11477_v45  ;;  %5883 = vmatpush1.msra.mxu1 %v11478_v16 }
 0x957   :  { %5813 = vmatprep.subr.mxu0 %v11479_v49  ;;  %5884 = vmatprep.subr.mxu1 %v11480_v18 }
 0x958   :  { %5814 = vmatpush1.msra.mxu0 %v9575_v33  ;;  %5885 = vmatpush1.msra.mxu1 %v11481_v17 }
 0x959   :  { %5815 = vmatprep.subr.mxu0 %v9581_v35  ;;  %5886 = vmatprep.subr.mxu1 %v9583_v29  ;;  %v5929_v29 = vld [vmem:[%s9843_s4] sm:$0xf]  ;;  %s6545_s4 = smov [#allocation13]  }
 0x95a   :  { %5816 = vmatpush1.msra.mxu0 %v9587_v9  ;;  %5887 = vmatpush1.msra.mxu1 %v9589_v44  ;;  %v5934_v44 = vrot.slane %v5929_v29, %v11439_v40  ;;  %v5938_v12 = vrot.slane %v5929_v29, %v11440_v53  ;;  %v5946_v38 = vrot.slane %v5929_v29, %v7359_v63  ;;  %s5999_s30 = sshll.u32 %s6545_s4, 4  ;;  %s6000_s30 = int_to_ptr.vmem [resolvable:$true] %s5999_s30 }
 0x95b   :  { %v6346_v22 = vpop.eup %6345  ;;  %5817 = vmatprep.subr.mxu0 %v9593_v62  ;;  %5888 = vmatprep.subr.mxu1 %v9595_v32  ;;  %v5942_v50 = vrot.slane %v5929_v29, %v7363_v56  ;;  %s6463_s3 = scalar_lea.vmem %s6000_s30, 256  ;;  %p6468_p12 = scmp.lt.s32.totalorder %s6000_s30, %s6000_s30 }
 0x95c   :  { %v5512_v41 = vmul.f32 %v6346_v22, %v6344_v39  ;;  %5818 = vmatpush1.msra.mxu0 %v9599_v8  ;;  %5851 = vmatprep.mubr.f32.mxu0 %v10561_v21  ;;  %p6464_p11 = scmp.ne.s32.totalorder %s6000_s30, %s6463_s3  ;;  %p6469_p13 = scmp.lt.s32.totalorder %s6463_s3, %s6463_s3 }
 0x95d   :  { %5889 = vmatpush1.msra.mxu1 %v9603_v52  ;;  %5922 = vmatprep.mubr.f32.mxu1 %v10561_v21 }
 0x95e   :  { %5513 = vst [vmem:[#allocation2] sm:$0x3] %v5512_v41  ;;  %5852 = vmatmul.mubr.f32.vlgmr.msra.gmra.mxu0 %v5512_v41  ;;  %5923 = vmatmul.mubr.f32.vlgmr.msra.gmra.mxu1 %v5512_v41  ;;  %p6470_p0 = por %p6469_p13, %p6468_p12 }
 0x960   :  { %p6471_p1 = pnand %p6470_p0, %p6464_p11 }
 0x9fd   :  { %v5647_v35 = vpop.f32.mrf.mxu0  ;;  %v5718_v33 = vpop.f32.mrf.mxu1 }
 0x9ff   :  { %v5649_v9 = vpop.f32.mrf.mxu0  ;;  %v5720_v32 = vpop.f32.mrf.mxu1 }
 0xa1e   :  { %v5853_v62 = vpop.f32.mrf.mxu0  ;;  %v5924_v21 = vpop.f32.mrf.mxu1 }
 0xa1f   :  { %v5854_v8 = vadd.f32 %v5853_v62, %v5647_v35  ;;  %v5925_v40 = vadd.f32 %v5924_v21, %v5718_v33 }
 0xa20   :  { %v5855_v52 = vpop.f32.mrf.mxu0  ;;  %v5926_v36 = vpop.f32.mrf.mxu1 }
 0xa21   :  { %v5951_v34 = vadd.f32 %v5934_v44, %v5854_v8  ;;  %v5856_v1 = vadd.f32 %v5855_v52, %v5649_v9  ;;  %v5927_v47 = vadd.f32 %v5926_v36, %v5720_v32  ;;  %v5953_v53 = vadd.f32 %v5942_v50, %v5925_v40 }
 0xa23   :  { %v6089_v24 = vmul.f32 -1.442695, %v5951_v34  ;;  %v5952_v4 = vadd.f32 %v5938_v12, %v5856_v1  ;;  %v5954_v19 = vadd.f32 %v5946_v38, %v5927_v47 }
 0xa25   :  { %6347 = vpow2.f32 %v6089_v24  ;;  %v6090_v20 = vmul.f32 -1.442695, %v5952_v4  ;;  %v6091_v61 = vmul.f32 -1.442695, %v5954_v19 }
 0xa27   :  { %6349 = vpow2.f32 %v6090_v20 }
 0xa28   :  { %6351 = vpow2.f32 %v6091_v61 }
 0xa32   :  { %v6348_v2 = vpop.eup %6347 }
 0xa33   :  { %v5958_v5 = vadd.f32 1.0, %v6348_v2 }
 0xa34   :  { %v6350_v57 = vpop.eup %6349 }
 0xa35   :  { %6353 = vrcp.f32 %v5958_v5  ;;  %v5964_v6 = vadd.f32 1.0, %v6350_v57  ;;  %v6352_v7 = vpop.eup %6351 }
 0xa36   :  { %6355 = vtanh.f32 %v5953_v53  ;;  %v5971_v63 = vadd.f32 1.0, %v6352_v7 }
 0xa37   :  { %6357 = vrcp.f32 %v5964_v6 }
 0xa38   :  { %6359 = vrcp.f32 %v5971_v63 }
 0xa42   :  { %v6354_v54 = vpop.eup %6353 }
 0xa43   :  { %v6356_v10 = vpop.eup %6355 }
 0xa44   :  { %v6358_v43 = vpop.eup %6357  ;;  %v5975_v0 = vmul.f32 %v6356_v10, %v6354_v54 }
 0xa45   :  { %v5974_v46 = vmul.f32 %v6358_v43, %v5516_v13  ;;  %v6360_v25 = vpop.eup %6359 }
 0xa47   :  { %v5976_v59 = vadd.f32 %v5975_v0, %v5974_v46 }
 0xa49   :  { %6361 = vtanh.f32 %v5976_v59  ;;  %5980 = vst [vmem:[#allocation3 + $0x2] sm:$0x3] %v5976_v59 }
 0xa50   :  { %v5990_v56 = vld [vmem:[#allocation3] sm:$0xf]  }
 0xa51   :  { %5992 = vst [vmem:[#allocation16] sm:$0xf] %v5990_v56  }
 0xa56   :  { %v6362_v60 = vpop.eup %6361 }
 0xa57   :  { %v5978_v27 = vmul.f32 %v6362_v60, %v6360_v25 }
 0xa59   :  { %5982 = vst [vmem:[#allocation13 + $0xe] sm:$0x3] %v5978_v27  ;;  %5979 = vst [vmem:[#allocation2 + $0x2] sm:$0x3] %v5978_v27 }
 0xa5a   :  { %6474 = shalt.err (!%p6471_p1)
}
 0xa5b   :  { %6005 = dma.vmem_to_hbm [thread:$0]  %s6000_s30, 256, %s9846_s7, [#allocation6], %s6535_s13, %s6535_s13, %s6542_s14  }
 0xa5c   :  { %s6546_s0 = smov [#allocation14]   ;;  %s6547_s16 = smov [#allocation16]  }
 0xa5d   :  { %s6011_s15 = sshll.u32 %s6546_s0, 4  ;;  %s6023_s2 = sshll.u32 %s6547_s16, 4  ;;  %s6012_s15 = int_to_ptr.vmem [resolvable:$true] %s6011_s15  ;;  %s6024_s2 = int_to_ptr.vmem [resolvable:$true] %s6023_s2 }
 0xa5e   :  { %s6483_s6 = scalar_lea.vmem %s6012_s15, 64  ;;  %p6488_p3 = scmp.lt.s32.totalorder %s6012_s15, %s6012_s15 }
 0xa5f   :  { %p6484_p2 = scmp.ne.s32.totalorder %s6012_s15, %s6483_s6  ;;  %p6489_p4 = scmp.lt.s32.totalorder %s6483_s6, %s6483_s6 }
 0xa60   :  { %v5986_v37 = vld [vmem:[#allocation2] sm:$0xf]  }
 0xa61   :  { %5988 = vst [vmem:[#allocation14] sm:$0xf] %v5986_v37   ;;  %p6490_p5 = por %p6489_p4, %p6488_p3 }
 0xa63   :  { %p6491_p6 = pnand %p6490_p5, %p6484_p2 }
 0xa65   :  { %6494 = shalt.err (!%p6491_p6)
}
 0xa66   :  { %6017 = dma.vmem_to_hbm [thread:$0]  %s6012_s15, 64, %s9847_s8, [#allocation15], %s6535_s13, %s6535_s13, %s6542_s14  }
 0xa67   :  { %s6503_s12 = scalar_lea.vmem %s6024_s2, 64  ;;  %p6508_p8 = scmp.lt.s32.totalorder %s6024_s2, %s6024_s2 }
 0xa68   :  { %p6504_p7 = scmp.ne.s32.totalorder %s6024_s2, %s6503_s12  ;;  %p6509_p9 = scmp.lt.s32.totalorder %s6503_s12, %s6503_s12 }
 0xa6a   :  { %p6510_p10 = por %p6509_p9, %p6508_p8 }
 0xa6c   :  { %p6511_p11 = pnand %p6510_p10, %p6504_p7 }
 0xa6e   :  { %6514 = shalt.err (!%p6511_p11)
}
 0xa6f   :  { %6029 = dma.vmem_to_hbm [thread:$0]  %s6024_s2, 64, %s9848_s9, [#allocation15], %s6535_s13, %s6535_s13, %s6542_s14  }
 0xa70   :  { %6529 = dma.done.wait [#allocation6], 256  }
 0xa71   :  { %6530 = vsyncadd [#allocation6], 4294967040 }
 0xa72   :  { %6531 = dma.done.wait [#allocation15], 128  }
 0xa73   :  { %6532 = vsyncadd [#allocation15], 4294967168 }
 0xa74   :  { %6039 = vsyncpa [#allocation5], 1 }
 0xa75   :  { %6040 = vsyncpa [#allocation8], 1 }
 0xa76   :  { %6041 = vsyncpa [#allocation11], 1 }
 0xa77   :  { %6042 = vsyncpa [#allocation6], 1 }
 0xa78   :  { %6043 = vsyncpa [#allocation15], 1 }

</bundles_post_ra>
